<compile_context>
chip_gen: v7x
topology: tpu7x:2x2x1
jax: 0.10.0
libtpu: 0.0.40
codegen_flags: <defaults>
</compile_context>

<pallas_src>
import math

import jax
import jax.numpy as jnp
from jax import lax
from jax.experimental import pallas as pl
from jax.experimental.pallas import tpu as pltpu

# ---------------- model config (small, consistent with __C) ----------------
HIDDEN = 32           # __C.HIDDEN_SIZE
N_HEAD = 4            # __C.MULTI_HEAD
HEAD_DIM = HIDDEN // N_HEAD
FF_SIZE = HIDDEN * 4  # __C.FF_SIZE
LAYER = 2             # __C.LAYER
LN_EPS = 1e-6
NEG_INF = -1e9


# ================================ fused kernel ================================

def _dcan_kernel(
    # activations / masks
    x_ref, y_ref, xsb_ref, ysb_ref, cb_ref,
    # SA stacks (enc_list_0 layers then enc_list_1 layers): leading dim = 2*LAYER
    sa_wqkv, sa_bqkv, sa_wm, sa_bm,
    sa_w1, sa_b1, sa_w2, sa_b2,
    sa_ln1g, sa_ln1b, sa_ln2g, sa_ln2b,
    # SGA stacks (dec_list): leading dim = LAYER
    g_wqkv1, g_bqkv1, g_wm1, g_bm1,
    g_wqkv2, g_bqkv2, g_wm2, g_bm2,
    g_w1, g_b1, g_w2, g_b2,
    g_ln1g, g_ln1b, g_ln2g, g_ln2b, g_ln3g, g_ln3b,
    # outputs
    ox_ref, oy_ref,
):
    x = x_ref[...]        # (B*Lx, H) f32
    y = y_ref[...]        # (B*Ly, H) f32
    xs_bias = xsb_ref[...]  # (B*Lx, B*Lx) additive bias (0 / -1e9), block-diag + key pad
    ys_bias = ysb_ref[...]  # (B*Ly, B*Ly)
    c_bias = cb_ref[...]    # (B*Ly, B*Lx)

    scale = 1.0 / math.sqrt(HEAD_DIM)

    def layer_norm(h, g, b):
        mean = jnp.mean(h, axis=-1, keepdims=True)
        c = h - mean
        var = jnp.sum(c * c, axis=-1, keepdims=True) / float(HIDDEN - 1)
        return g * c / (jnp.sqrt(var) + LN_EPS) + b

    def mh_att(q_all, k_all, v_all, bias, wm, bm):
        # q_all: (Mq, H), k_all/v_all: (Mk, H), bias: (Mq, Mk)
        acc = None
        for h in range(N_HEAD):
            sl = slice(h * HEAD_DIM, (h + 1) * HEAD_DIM)
            s = lax.dot_general(q_all[:, sl], k_all[:, sl],
                                (((1,), (1,)), ((), ())),
                                preferred_element_type=jnp.float32)
            s = s * scale + bias                       # masked_fill -> additive bias
            m = jnp.max(s, axis=-1, keepdims=True)
            e = jnp.exp(s - m)
            p = e / jnp.sum(e, axis=-1, keepdims=True)  # softmax(dim=-1)
            ctx = jnp.dot(p, v_all[:, sl], preferred_element_type=jnp.float32)
            # output projection folded per head (== concat-heads @ wm)
            part = jnp.dot(ctx, wm[sl, :], preferred_element_type=jnp.float32)
            acc = part if acc is None else acc + part
        return acc + bm

    def mhatt_self(xin, wqkv, bqkv, wm, bm, bias):
        qkv = jnp.dot(xin, wqkv, preferred_element_type=jnp.float32) + bqkv
        return mh_att(qkv[:, 0:HIDDEN],
                      qkv[:, HIDDEN:2 * HIDDEN],
                      qkv[:, 2 * HIDDEN:3 * HIDDEN],
                      bias, wm, bm)

    def mhatt_cross(q_in, kv_in, wqkv, bqkv, wm, bm, bias):
        q = jnp.dot(q_in, wqkv[:, 0:HIDDEN],
                    preferred_element_type=jnp.float32) + bqkv[:, 0:HIDDEN]
        kv = jnp.dot(kv_in, wqkv[:, HIDDEN:],
                     preferred_element_type=jnp.float32) + bqkv[:, HIDDEN:]
        return mh_att(q, kv[:, 0:HIDDEN], kv[:, HIDDEN:2 * HIDDEN], bias, wm, bm)

    def ffn(xin, w1, b1, w2, b2):
        h = jnp.maximum(jnp.dot(xin, w1, preferred_element_type=jnp.float32) + b1, 0.0)
        return jnp.dot(h, w2, preferred_element_type=jnp.float32) + b2

    def sa_layer(xin, bias, li):
        att = mhatt_self(xin, sa_wqkv[li], sa_bqkv[li], sa_wm[li], sa_bm[li], bias)
        xin = layer_norm(xin + att, sa_ln1g[li], sa_ln1b[li])
        f = ffn(xin, sa_w1[li], sa_b1[li], sa_w2[li], sa_b2[li])
        xin = layer_norm(xin + f, sa_ln2g[li], sa_ln2b[li])
        return xin

    def sga_layer(xd, enc, bias_self, bias_cross, li):
        a1 = mhatt_self(xd, g_wqkv1[li], g_bqkv1[li], g_wm1[li], g_bm1[li], bias_self)
        xd = layer_norm(xd + a1, g_ln1g[li], g_ln1b[li])
        a2 = mhatt_cross(xd, enc, g_wqkv2[li], g_bqkv2[li], g_wm2[li], g_bm2[li],
                         bias_cross)
        xd = layer_norm(xd + a2, g_ln2g[li], g_ln2b[li])
        f = ffn(xd, g_w1[li], g_b1[li], g_w2[li], g_b2[li])
        xd = layer_norm(xd + f, g_ln3g[li], g_ln3b[li])
        return xd

    # ---------------- DCAN forward (activations stay in VMEM) ----------------
    x0 = x
    x1 = x
    for l in range(LAYER):                 # enc_list_0
        x0 = sa_layer(x0, xs_bias, l)
    for l in range(LAYER):                 # enc_list_1
        x1 = sa_layer(x1, xs_bias, LAYER + l)
    xe = x0 + x1
    yd = y
    for l in range(LAYER):                 # dec_list
        yd = sga_layer(yd, xe, ys_bias, c_bias, l)

    ox_ref[...] = xe.astype(ox_ref.dtype)
    oy_ref[...] = yd.astype(oy_ref.dtype)


# ============================ parameter packing ============================

def _pack_mhatt(p):
    wqkv = jnp.concatenate([p['wq'], p['wk'], p['wv']], axis=1)            # (H, 3H)
    bqkv = jnp.concatenate([p['bq'], p['bk'], p['bv']], axis=0)[None, :]   # (1, 3H)
    return wqkv, bqkv, p['wm'], p['bm'][None, :]


def _pack_params(params):
    sa_layers = list(params['enc0']) + list(params['enc1'])
    dec_layers = list(params['dec'])
    st = lambda items: jnp.stack(items, axis=0)

    sa_m = [_pack_mhatt(p['mhatt']) for p in sa_layers]
    packed = [
        st([m[0] for m in sa_m]), st([m[1] for m in sa_m]),
        st([m[2] for m in sa_m]), st([m[3] for m in sa_m]),
        st([p['ffn']['w1'] for p in sa_layers]),
        st([p['ffn']['b1'][None, :] for p in sa_layers]),
        st([p['ffn']['w2'] for p in sa_layers]),
        st([p['ffn']['b2'][None, :] for p in sa_layers]),
        st([p['ln1']['g'][None, :] for p in sa_layers]),
        st([p['ln1']['b'][None, :] for p in sa_layers]),
        st([p['ln2']['g'][None, :] for p in sa_layers]),
        st([p['ln2']['b'][None, :] for p in sa_layers]),
    ]
    m1 = [_pack_mhatt(p['m1']) for p in dec_layers]
    m2 = [_pack_mhatt(p['m2']) for p in dec_layers]
    packed += [
        st([m[0] for m in m1]), st([m[1] for m in m1]),
        st([m[2] for m in m1]), st([m[3] for m in m1]),
        st([m[0] for m in m2]), st([m[1] for m in m2]),
        st([m[2] for m in m2]), st([m[3] for m in m2]),
        st([p['ffn']['w1'] for p in dec_layers]),
        st([p['ffn']['b1'][None, :] for p in dec_layers]),
        st([p['ffn']['w2'] for p in dec_layers]),
        st([p['ffn']['b2'][None, :] for p in dec_layers]),
        st([p['ln1']['g'][None, :] for p in dec_layers]),
        st([p['ln1']['b'][None, :] for p in dec_layers]),
        st([p['ln2']['g'][None, :] for p in dec_layers]),
        st([p['ln2']['b'][None, :] for p in dec_layers]),
        st([p['ln3']['g'][None, :] for p in dec_layers]),
        st([p['ln3']['b'][None, :] for p in dec_layers]),
    ]
    return packed


# ================================ wrapper ================================

def dcan_forward(params, x, y, x_mask, y_mask):
    """x: (B,Lx,H), y: (B,Ly,H), masks: (B,1,1,L) with 1.0 == padded key."""
    B, Lx, H = x.shape
    Ly = y.shape[1]
    xm = x_mask.reshape(B, Lx)
    ym = y_mask.reshape(B, Ly)

    def block_bias(q_bid, k_mask):
        # additive bias: -1e9 for cross-batch pairs or padded keys, else 0
        Bk, Lk = k_mask.shape
        k_bid = jnp.repeat(jnp.arange(Bk), Lk)
        cross = q_bid[:, None] != k_bid[None, :]
        pad = (k_mask.reshape(Bk * Lk) > 0.5)[None, :]
        return jnp.where(cross | pad, NEG_INF, 0.0).astype(jnp.float32)

    xq = jnp.repeat(jnp.arange(B), Lx)
    yq = jnp.repeat(jnp.arange(B), Ly)
    xs_bias = block_bias(xq, xm)    # (B*Lx, B*Lx)  encoder self-attn
    ys_bias = block_bias(yq, ym)    # (B*Ly, B*Ly)  decoder self-attn
    c_bias = block_bias(yq, xm)     # (B*Ly, B*Lx)  decoder->encoder cross-attn

    args = (x.reshape(B * Lx, H), y.reshape(B * Ly, H),
            xs_bias, ys_bias, c_bias, *_pack_params(params))

    vspec = pl.BlockSpec(memory_space=pltpu.MemorySpace.VMEM)
    ox, oy = pl.pallas_call(
        _dcan_kernel,
        out_shape=(jax.ShapeDtypeStruct((B * Lx, H), x.dtype),
                   jax.ShapeDtypeStruct((B * Ly, H), y.dtype)),
        in_specs=[vspec] * len(args),
        out_specs=(vspec, vspec),
    )(*args)
    return ox.reshape(B, Lx, H), oy.reshape(B, Ly, H)


# ============================ parameter init ============================

def _init_mhatt(key):
    ks = jax.random.split(key, 4)
    p = {}
    for name, kk in zip(('v', 'k', 'q', 'm'), ks):
        p['w' + name] = 0.02 * jax.random.normal(kk, (HIDDEN, HIDDEN), jnp.float32)
        p['b' + name] = jnp.zeros((HIDDEN,), jnp.float32)
    return p


def _init_ffn(key):
    k1, k2 = jax.random.split(key)
    return {'w1': 0.02 * jax.random.normal(k1, (HIDDEN, FF_SIZE), jnp.float32),
            'b1': jnp.zeros((FF_SIZE,), jnp.float32),
            'w2': 0.02 * jax.random.normal(k2, (FF_SIZE, HIDDEN), jnp.float32),
            'b2': jnp.zeros((HIDDEN,), jnp.float32)}


def _init_ln():
    return {'g': jnp.ones((HIDDEN,), jnp.float32),
            'b': jnp.zeros((HIDDEN,), jnp.float32)}


def _init_sa(key):
    k1, k2 = jax.random.split(key)
    return {'mhatt': _init_mhatt(k1), 'ffn': _init_ffn(k2),
            'ln1': _init_ln(), 'ln2': _init_ln()}


def _init_sga(key):
    k1, k2, k3 = jax.random.split(key, 3)
    return {'m1': _init_mhatt(k1), 'm2': _init_mhatt(k2), 'ffn': _init_ffn(k3),
            'ln1': _init_ln(), 'ln2': _init_ln(), 'ln3': _init_ln()}


def init_dcan(key):
    k0, k1, k2 = jax.random.split(key, 3)
    return {'enc0': [_init_sa(k) for k in jax.random.split(k0, LAYER)],
            'enc1': [_init_sa(k) for k in jax.random.split(k1, LAYER)],
            'dec': [_init_sga(k) for k in jax.random.split(k2, LAYER)]}


# ============================ pure-JAX reference ============================

def _ref_ln(h, g, b):
    mean = jnp.mean(h, axis=-1, keepdims=True)
    c = h - mean
    std = jnp.sqrt(jnp.sum(c * c, axis=-1, keepdims=True) / (h.shape[-1] - 1))
    return g * c / (std + LN_EPS) + b


def _ref_mhatt(p, v_in, k_in, q_in, mask):
    B, Lq, H = q_in.shape
    Lk = k_in.shape[1]
    v = (v_in @ p['wv'] + p['bv']).reshape(B, Lk, N_HEAD, HEAD_DIM).transpose(0, 2, 1, 3)
    k = (k_in @ p['wk'] + p['bk']).reshape(B, Lk, N_HEAD, HEAD_DIM).transpose(0, 2, 1, 3)
    q = (q_in @ p['wq'] + p['bq']).reshape(B, Lq, N_HEAD, HEAD_DIM).transpose(0, 2, 1, 3)
    s = jnp.einsum('bhqd,bhkd->bhqk', q, k) / math.sqrt(HEAD_DIM)
    s = jnp.where(mask > 0.5, NEG_INF, s)
    a = jax.nn.softmax(s, axis=-1)
    o = jnp.einsum('bhqk,bhkd->bhqd', a, v).transpose(0, 2, 1, 3).reshape(B, Lq, H)
    return o @ p['wm'] + p['bm']


def _ref_ffn(p, x):
    return jnp.maximum(x @ p['w1'] + p['b1'], 0.0) @ p['w2'] + p['b2']


def _ref_sa(p, x, m):
    x = _ref_ln(x + _ref_mhatt(p['mhatt'], x, x, x, m), p['ln1']['g'], p['ln1']['b'])
    x = _ref_ln(x + _ref_ffn(p['ffn'], x), p['ln2']['g'], p['ln2']['b'])
    return x


def _ref_sga(p, x, y, xm, ym):
    x = _ref_ln(x + _ref_mhatt(p['m1'], x, x, x, xm), p['ln1']['g'], p['ln1']['b'])
    x = _ref_ln(x + _ref_mhatt(p['m2'], y, y, x, ym), p['ln2']['g'], p['ln2']['b'])
    x = _ref_ln(x + _ref_ffn(p['ffn'], x), p['ln3']['g'], p['ln3']['b'])
    return x


def ref_dcan(params, x, y, x_mask, y_mask):
    x1 = x
    for p in params['enc0']:
        x = _ref_sa(p, x, x_mask)
    for p in params['enc1']:
        x1 = _ref_sa(p, x1, x_mask)
    x = x + x1
    for p in params['dec']:
        y = _ref_sga(p, y, x, y_mask, x_mask)
    return x, y


# ================================= main =================================

if __name__ == "__main__":
    key = jax.random.PRNGKey(0)
    kx, ky, kp = jax.random.split(key, 3)

    B, Lx, Ly = 2, 16, 8
    x = jax.random.normal(kx, (B, Lx, HIDDEN), jnp.float32)
    y = jax.random.normal(ky, (B, Ly, HIDDEN), jnp.float32)

    # masks: 1.0 == padded key position (torch bool mask with True == pad)
    x_valid = jnp.array([Lx, Lx - 4])
    y_valid = jnp.array([Ly, Ly - 3])
    x_mask = (jnp.arange(Lx)[None, :] >= x_valid[:, None]) \
        .astype(jnp.float32).reshape(B, 1, 1, Lx)
    y_mask = (jnp.arange(Ly)[None, :] >= y_valid[:, None]) \
        .astype(jnp.float32).reshape(B, 1, 1, Ly)

    params = init_dcan(kp)

    fwd = jax.jit(dcan_forward)
    out_x, out_y = fwd(params, x, y, x_mask, y_mask)
    jax.block_until_ready((out_x, out_y))

    # correctness check vs. plain-JAX reference
    ref_x, ref_y = ref_dcan(params, x, y, x_mask, y_mask)
    assert jnp.allclose(out_x, ref_x, atol=1e-3, rtol=1e-3), "x mismatch"
    assert jnp.allclose(out_y, ref_y, atol=1e-3, rtol=1e-3), "y mismatch"
    assert out_x.shape == (B, Lx, HIDDEN) and out_y.shape == (B, Ly, HIDDEN)

    print("KERNEL_OK")
</pallas_src>

<mosaic_0001>
module attributes {stable_mosaic.version = 11 : i64} {
  func.func @_dcan_kernel(%arg0: memref<32x32xf32, #tpu.memory_space<vmem>>, %arg1: memref<16x32xf32, #tpu.memory_space<vmem>>, %arg2: memref<32x32xf32, #tpu.memory_space<vmem>>, %arg3: memref<16x16xf32, #tpu.memory_space<vmem>>, %arg4: memref<16x32xf32, #tpu.memory_space<vmem>>, %arg5: memref<4x32x96xf32, #tpu.memory_space<vmem>>, %arg6: memref<4x1x96xf32, #tpu.memory_space<vmem>>, %arg7: memref<4x32x32xf32, #tpu.memory_space<vmem>>, %arg8: memref<4x1x32xf32, #tpu.memory_space<vmem>>, %arg9: memref<4x32x128xf32, #tpu.memory_space<vmem>>, %arg10: memref<4x1x128xf32, #tpu.memory_space<vmem>>, %arg11: memref<4x128x32xf32, #tpu.memory_space<vmem>>, %arg12: memref<4x1x32xf32, #tpu.memory_space<vmem>>, %arg13: memref<4x1x32xf32, #tpu.memory_space<vmem>>, %arg14: memref<4x1x32xf32, #tpu.memory_space<vmem>>, %arg15: memref<4x1x32xf32, #tpu.memory_space<vmem>>, %arg16: memref<4x1x32xf32, #tpu.memory_space<vmem>>, %arg17: memref<2x32x96xf32, #tpu.memory_space<vmem>>, %arg18: memref<2x1x96xf32, #tpu.memory_space<vmem>>, %arg19: memref<2x32x32xf32, #tpu.memory_space<vmem>>, %arg20: memref<2x1x32xf32, #tpu.memory_space<vmem>>, %arg21: memref<2x32x96xf32, #tpu.memory_space<vmem>>, %arg22: memref<2x1x96xf32, #tpu.memory_space<vmem>>, %arg23: memref<2x32x32xf32, #tpu.memory_space<vmem>>, %arg24: memref<2x1x32xf32, #tpu.memory_space<vmem>>, %arg25: memref<2x32x128xf32, #tpu.memory_space<vmem>>, %arg26: memref<2x1x128xf32, #tpu.memory_space<vmem>>, %arg27: memref<2x128x32xf32, #tpu.memory_space<vmem>>, %arg28: memref<2x1x32xf32, #tpu.memory_space<vmem>>, %arg29: memref<2x1x32xf32, #tpu.memory_space<vmem>>, %arg30: memref<2x1x32xf32, #tpu.memory_space<vmem>>, %arg31: memref<2x1x32xf32, #tpu.memory_space<vmem>>, %arg32: memref<2x1x32xf32, #tpu.memory_space<vmem>>, %arg33: memref<2x1x32xf32, #tpu.memory_space<vmem>>, %arg34: memref<2x1x32xf32, #tpu.memory_space<vmem>>, %arg35: memref<32x32xf32, #tpu.memory_space<vmem>>, %arg36: memref<16x32xf32, #tpu.memory_space<vmem>>) attributes {dimension_semantics = [], scalar_prefetch = 0 : i64, scratch_operands = 0 : i64, tpu.core_type = #tpu.core_type<tc>} {
    %c0 = arith.constant 0 : index
    %c0_0 = arith.constant 0 : index
    %0 = vector.load %arg0[%c0, %c0_0] : memref<32x32xf32, #tpu.memory_space<vmem>>, vector<32x32xf32>
    %c0_1 = arith.constant 0 : index
    %c0_2 = arith.constant 0 : index
    %1 = vector.load %arg1[%c0_1, %c0_2] : memref<16x32xf32, #tpu.memory_space<vmem>>, vector<16x32xf32>
    %c0_3 = arith.constant 0 : index
    %c0_4 = arith.constant 0 : index
    %2 = vector.load %arg2[%c0_3, %c0_4] : memref<32x32xf32, #tpu.memory_space<vmem>>, vector<32x32xf32>
    %c0_5 = arith.constant 0 : index
    %c0_6 = arith.constant 0 : index
    %3 = vector.load %arg3[%c0_5, %c0_6] : memref<16x16xf32, #tpu.memory_space<vmem>>, vector<16x16xf32>
    %c0_7 = arith.constant 0 : index
    %c0_8 = arith.constant 0 : index
    %4 = vector.load %arg4[%c0_7, %c0_8] : memref<16x32xf32, #tpu.memory_space<vmem>>, vector<16x32xf32>
    %c0_9 = arith.constant 0 : index
    %c0_10 = arith.constant 0 : index
    %c0_11 = arith.constant 0 : index
    %5 = vector.load %arg5[%c0_9, %c0_10, %c0_11] : memref<4x32x96xf32, #tpu.memory_space<vmem>>, vector<1x32x96xf32>
    %6 = vector.shape_cast %5 : vector<1x32x96xf32> to vector<32x96xf32>
    %c0_12 = arith.constant 0 : index
    %c0_13 = arith.constant 0 : index
    %c0_14 = arith.constant 0 : index
    %7 = vector.load %arg6[%c0_12, %c0_13, %c0_14] : memref<4x1x96xf32, #tpu.memory_space<vmem>>, vector<1x1x96xf32>
    %8 = vector.shape_cast %7 : vector<1x1x96xf32> to vector<1x96xf32>
    %c0_15 = arith.constant 0 : index
    %c0_16 = arith.constant 0 : index
    %c0_17 = arith.constant 0 : index
    %9 = vector.load %arg7[%c0_15, %c0_16, %c0_17] : memref<4x32x32xf32, #tpu.memory_space<vmem>>, vector<1x32x32xf32>
    %10 = vector.shape_cast %9 : vector<1x32x32xf32> to vector<32x32xf32>
    %c0_18 = arith.constant 0 : index
    %c0_19 = arith.constant 0 : index
    %c0_20 = arith.constant 0 : index
    %11 = vector.load %arg8[%c0_18, %c0_19, %c0_20] : memref<4x1x32xf32, #tpu.memory_space<vmem>>, vector<1x1x32xf32>
    %12 = vector.shape_cast %11 : vector<1x1x32xf32> to vector<1x32xf32>
    %cst = arith.constant dense<0.000000e+00> : vector<32x96xf32>
    %13 = tpu.matmul %0, %6, %cst {dimension_numbers = #tpu.dot_dimension_numbers<[1], [0], [0], [1], [0, 0, 1, 1], [], []>} : vector<32x32xf32>, vector<32x96xf32>, vector<32x96xf32> -> vector<32x96xf32>
    %14 = vector.broadcast %8 : vector<1x96xf32> to vector<32x96xf32>
    %15 = arith.addf %13, %14 : vector<32x96xf32>
    %16 = vector.extract_strided_slice %15 {offsets = [0, 0], sizes = [32, 32], strides = [1, 1]} : vector<32x96xf32> to vector<32x32xf32>
    %17 = vector.extract_strided_slice %15 {offsets = [0, 32], sizes = [32, 32], strides = [1, 1]} : vector<32x96xf32> to vector<32x32xf32>
    %18 = vector.extract_strided_slice %15 {offsets = [0, 64], sizes = [32, 32], strides = [1, 1]} : vector<32x96xf32> to vector<32x32xf32>
    %19 = vector.extract_strided_slice %16 {offsets = [0, 0], sizes = [32, 8], strides = [1, 1]} : vector<32x32xf32> to vector<32x8xf32>
    %20 = vector.extract_strided_slice %17 {offsets = [0, 0], sizes = [32, 8], strides = [1, 1]} : vector<32x32xf32> to vector<32x8xf32>
    %cst_21 = arith.constant dense<0.000000e+00> : vector<32x32xf32>
    %21 = tpu.matmul %19, %20, %cst_21 {dimension_numbers = #tpu.dot_dimension_numbers<[1], [1], [0], [0], [0, 0, 1, 0], [], []>} : vector<32x8xf32>, vector<32x8xf32>, vector<32x32xf32> -> vector<32x32xf32>
    %cst_22 = arith.constant 0.353553385 : f32
    %22 = vector.broadcast %cst_22 : f32 to vector<32x32xf32>
    %23 = arith.mulf %21, %22 : vector<32x32xf32>
    %24 = arith.addf %23, %2 : vector<32x32xf32>
    %cst_23 = arith.constant dense<0xFF800000> : vector<32xf32>
    %25 = vector.multi_reduction <maximumf>, %24, %cst_23 [1] : vector<32x32xf32> to vector<32xf32>
    %26 = vector.shape_cast %25 : vector<32xf32> to vector<32x1xf32>
    %27 = vector.broadcast %26 : vector<32x1xf32> to vector<32x32xf32>
    %28 = arith.subf %24, %27 : vector<32x32xf32>
    %29 = math.exp %28 : vector<32x32xf32>
    %cst_24 = arith.constant dense<0.000000e+00> : vector<32xf32>
    %30 = vector.multi_reduction <add>, %29, %cst_24 [1] : vector<32x32xf32> to vector<32xf32>
    %31 = vector.shape_cast %30 : vector<32xf32> to vector<32x1xf32>
    %32 = vector.broadcast %31 : vector<32x1xf32> to vector<32x32xf32>
    %33 = arith.divf %29, %32 : vector<32x32xf32>
    %34 = vector.extract_strided_slice %18 {offsets = [0, 0], sizes = [32, 8], strides = [1, 1]} : vector<32x32xf32> to vector<32x8xf32>
    %cst_25 = arith.constant dense<0.000000e+00> : vector<32x8xf32>
    %35 = tpu.matmul %33, %34, %cst_25 {dimension_numbers = #tpu.dot_dimension_numbers<[1], [0], [0], [1], [0, 0, 1, 1], [], []>} : vector<32x32xf32>, vector<32x8xf32>, vector<32x8xf32> -> vector<32x8xf32>
    %36 = vector.extract_strided_slice %10 {offsets = [0, 0], sizes = [8, 32], strides = [1, 1]} : vector<32x32xf32> to vector<8x32xf32>
    %cst_26 = arith.constant dense<0.000000e+00> : vector<32x32xf32>
    %37 = tpu.matmul %35, %36, %cst_26 {dimension_numbers = #tpu.dot_dimension_numbers<[1], [0], [0], [1], [0, 0, 1, 1], [], []>} : vector<32x8xf32>, vector<8x32xf32>, vector<32x32xf32> -> vector<32x32xf32>
    %38 = vector.extract_strided_slice %16 {offsets = [0, 8], sizes = [32, 8], strides = [1, 1]} : vector<32x32xf32> to vector<32x8xf32>
    %39 = vector.extract_strided_slice %17 {offsets = [0, 8], sizes = [32, 8], strides = [1, 1]} : vector<32x32xf32> to vector<32x8xf32>
    %cst_27 = arith.constant dense<0.000000e+00> : vector<32x32xf32>
    %40 = tpu.matmul %38, %39, %cst_27 {dimension_numbers = #tpu.dot_dimension_numbers<[1], [1], [0], [0], [0, 0, 1, 0], [], []>} : vector<32x8xf32>, vector<32x8xf32>, vector<32x32xf32> -> vector<32x32xf32>
    %cst_28 = arith.constant 0.353553385 : f32
    %41 = vector.broadcast %cst_28 : f32 to vector<32x32xf32>
    %42 = arith.mulf %40, %41 : vector<32x32xf32>
    %43 = arith.addf %42, %2 : vector<32x32xf32>
    %cst_29 = arith.constant dense<0xFF800000> : vector<32xf32>
    %44 = vector.multi_reduction <maximumf>, %43, %cst_29 [1] : vector<32x32xf32> to vector<32xf32>
    %45 = vector.shape_cast %44 : vector<32xf32> to vector<32x1xf32>
    %46 = vector.broadcast %45 : vector<32x1xf32> to vector<32x32xf32>
    %47 = arith.subf %43, %46 : vector<32x32xf32>
    %48 = math.exp %47 : vector<32x32xf32>
    %cst_30 = arith.constant dense<0.000000e+00> : vector<32xf32>
    %49 = vector.multi_reduction <add>, %48, %cst_30 [1] : vector<32x32xf32> to vector<32xf32>
    %50 = vector.shape_cast %49 : vector<32xf32> to vector<32x1xf32>
    %51 = vector.broadcast %50 : vector<32x1xf32> to vector<32x32xf32>
    %52 = arith.divf %48, %51 : vector<32x32xf32>
    %53 = vector.extract_strided_slice %18 {offsets = [0, 8], sizes = [32, 8], strides = [1, 1]} : vector<32x32xf32> to vector<32x8xf32>
    %cst_31 = arith.constant dense<0.000000e+00> : vector<32x8xf32>
    %54 = tpu.matmul %52, %53, %cst_31 {dimension_numbers = #tpu.dot_dimension_numbers<[1], [0], [0], [1], [0, 0, 1, 1], [], []>} : vector<32x32xf32>, vector<32x8xf32>, vector<32x8xf32> -> vector<32x8xf32>
    %55 = vector.extract_strided_slice %10 {offsets = [8, 0], sizes = [8, 32], strides = [1, 1]} : vector<32x32xf32> to vector<8x32xf32>
    %cst_32 = arith.constant dense<0.000000e+00> : vector<32x32xf32>
    %56 = tpu.matmul %54, %55, %cst_32 {dimension_numbers = #tpu.dot_dimension_numbers<[1], [0], [0], [1], [0, 0, 1, 1], [], []>} : vector<32x8xf32>, vector<8x32xf32>, vector<32x32xf32> -> vector<32x32xf32>
    %57 = arith.addf %37, %56 : vector<32x32xf32>
    %58 = vector.extract_strided_slice %16 {offsets = [0, 16], sizes = [32, 8], strides = [1, 1]} : vector<32x32xf32> to vector<32x8xf32>
    %59 = vector.extract_strided_slice %17 {offsets = [0, 16], sizes = [32, 8], strides = [1, 1]} : vector<32x32xf32> to vector<32x8xf32>
    %cst_33 = arith.constant dense<0.000000e+00> : vector<32x32xf32>
    %60 = tpu.matmul %58, %59, %cst_33 {dimension_numbers = #tpu.dot_dimension_numbers<[1], [1], [0], [0], [0, 0, 1, 0], [], []>} : vector<32x8xf32>, vector<32x8xf32>, vector<32x32xf32> -> vector<32x32xf32>
    %cst_34 = arith.constant 0.353553385 : f32
    %61 = vector.broadcast %cst_34 : f32 to vector<32x32xf32>
    %62 = arith.mulf %60, %61 : vector<32x32xf32>
    %63 = arith.addf %62, %2 : vector<32x32xf32>
    %cst_35 = arith.constant dense<0xFF800000> : vector<32xf32>
    %64 = vector.multi_reduction <maximumf>, %63, %cst_35 [1] : vector<32x32xf32> to vector<32xf32>
    %65 = vector.shape_cast %64 : vector<32xf32> to vector<32x1xf32>
    %66 = vector.broadcast %65 : vector<32x1xf32> to vector<32x32xf32>
    %67 = arith.subf %63, %66 : vector<32x32xf32>
    %68 = math.exp %67 : vector<32x32xf32>
    %cst_36 = arith.constant dense<0.000000e+00> : vector<32xf32>
    %69 = vector.multi_reduction <add>, %68, %cst_36 [1] : vector<32x32xf32> to vector<32xf32>
    %70 = vector.shape_cast %69 : vector<32xf32> to vector<32x1xf32>
    %71 = vector.broadcast %70 : vector<32x1xf32> to vector<32x32xf32>
    %72 = arith.divf %68, %71 : vector<32x32xf32>
    %73 = vector.extract_strided_slice %18 {offsets = [0, 16], sizes = [32, 8], strides = [1, 1]} : vector<32x32xf32> to vector<32x8xf32>
    %cst_37 = arith.constant dense<0.000000e+00> : vector<32x8xf32>
    %74 = tpu.matmul %72, %73, %cst_37 {dimension_numbers = #tpu.dot_dimension_numbers<[1], [0], [0], [1], [0, 0, 1, 1], [], []>} : vector<32x32xf32>, vector<32x8xf32>, vector<32x8xf32> -> vector<32x8xf32>
    %75 = vector.extract_strided_slice %10 {offsets = [16, 0], sizes = [8, 32], strides = [1, 1]} : vector<32x32xf32> to vector<8x32xf32>
    %cst_38 = arith.constant dense<0.000000e+00> : vector<32x32xf32>
    %76 = tpu.matmul %74, %75, %cst_38 {dimension_numbers = #tpu.dot_dimension_numbers<[1], [0], [0], [1], [0, 0, 1, 1], [], []>} : vector<32x8xf32>, vector<8x32xf32>, vector<32x32xf32> -> vector<32x32xf32>
    %77 = arith.addf %57, %76 : vector<32x32xf32>
    %78 = vector.extract_strided_slice %16 {offsets = [0, 24], sizes = [32, 8], strides = [1, 1]} : vector<32x32xf32> to vector<32x8xf32>
    %79 = vector.extract_strided_slice %17 {offsets = [0, 24], sizes = [32, 8], strides = [1, 1]} : vector<32x32xf32> to vector<32x8xf32>
    %cst_39 = arith.constant dense<0.000000e+00> : vector<32x32xf32>
    %80 = tpu.matmul %78, %79, %cst_39 {dimension_numbers = #tpu.dot_dimension_numbers<[1], [1], [0], [0], [0, 0, 1, 0], [], []>} : vector<32x8xf32>, vector<32x8xf32>, vector<32x32xf32> -> vector<32x32xf32>
    %cst_40 = arith.constant 0.353553385 : f32
    %81 = vector.broadcast %cst_40 : f32 to vector<32x32xf32>
    %82 = arith.mulf %80, %81 : vector<32x32xf32>
    %83 = arith.addf %82, %2 : vector<32x32xf32>
    %cst_41 = arith.constant dense<0xFF800000> : vector<32xf32>
    %84 = vector.multi_reduction <maximumf>, %83, %cst_41 [1] : vector<32x32xf32> to vector<32xf32>
    %85 = vector.shape_cast %84 : vector<32xf32> to vector<32x1xf32>
    %86 = vector.broadcast %85 : vector<32x1xf32> to vector<32x32xf32>
    %87 = arith.subf %83, %86 : vector<32x32xf32>
    %88 = math.exp %87 : vector<32x32xf32>
    %cst_42 = arith.constant dense<0.000000e+00> : vector<32xf32>
    %89 = vector.multi_reduction <add>, %88, %cst_42 [1] : vector<32x32xf32> to vector<32xf32>
    %90 = vector.shape_cast %89 : vector<32xf32> to vector<32x1xf32>
    %91 = vector.broadcast %90 : vector<32x1xf32> to vector<32x32xf32>
    %92 = arith.divf %88, %91 : vector<32x32xf32>
    %93 = vector.extract_strided_slice %18 {offsets = [0, 24], sizes = [32, 8], strides = [1, 1]} : vector<32x32xf32> to vector<32x8xf32>
    %cst_43 = arith.constant dense<0.000000e+00> : vector<32x8xf32>
    %94 = tpu.matmul %92, %93, %cst_43 {dimension_numbers = #tpu.dot_dimension_numbers<[1], [0], [0], [1], [0, 0, 1, 1], [], []>} : vector<32x32xf32>, vector<32x8xf32>, vector<32x8xf32> -> vector<32x8xf32>
    %95 = vector.extract_strided_slice %10 {offsets = [24, 0], sizes = [8, 32], strides = [1, 1]} : vector<32x32xf32> to vector<8x32xf32>
    %cst_44 = arith.constant dense<0.000000e+00> : vector<32x32xf32>
    %96 = tpu.matmul %94, %95, %cst_44 {dimension_numbers = #tpu.dot_dimension_numbers<[1], [0], [0], [1], [0, 0, 1, 1], [], []>} : vector<32x8xf32>, vector<8x32xf32>, vector<32x32xf32> -> vector<32x32xf32>
    %97 = arith.addf %77, %96 : vector<32x32xf32>
    %98 = vector.broadcast %12 : vector<1x32xf32> to vector<32x32xf32>
    %99 = arith.addf %97, %98 : vector<32x32xf32>
    %100 = arith.addf %0, %99 : vector<32x32xf32>
    %c0_45 = arith.constant 0 : index
    %c0_46 = arith.constant 0 : index
    %c0_47 = arith.constant 0 : index
    %101 = vector.load %arg13[%c0_45, %c0_46, %c0_47] : memref<4x1x32xf32, #tpu.memory_space<vmem>>, vector<1x1x32xf32>
    %102 = vector.shape_cast %101 : vector<1x1x32xf32> to vector<1x32xf32>
    %c0_48 = arith.constant 0 : index
    %c0_49 = arith.constant 0 : index
    %c0_50 = arith.constant 0 : index
    %103 = vector.load %arg14[%c0_48, %c0_49, %c0_50] : memref<4x1x32xf32, #tpu.memory_space<vmem>>, vector<1x1x32xf32>
    %104 = vector.shape_cast %103 : vector<1x1x32xf32> to vector<1x32xf32>
    %cst_51 = arith.constant dense<0.000000e+00> : vector<32xf32>
    %105 = vector.multi_reduction <add>, %100, %cst_51 [1] : vector<32x32xf32> to vector<32xf32>
    %106 = vector.shape_cast %105 : vector<32xf32> to vector<32x1xf32>
    %cst_52 = arith.constant 3.200000e+01 : f32
    %107 = vector.broadcast %cst_52 : f32 to vector<32x1xf32>
    %108 = arith.divf %106, %107 : vector<32x1xf32>
    %109 = vector.broadcast %108 : vector<32x1xf32> to vector<32x32xf32>
    %110 = arith.subf %100, %109 : vector<32x32xf32>
    %111 = arith.mulf %110, %110 : vector<32x32xf32>
    %cst_53 = arith.constant dense<0.000000e+00> : vector<32xf32>
    %112 = vector.multi_reduction <add>, %111, %cst_53 [1] : vector<32x32xf32> to vector<32xf32>
    %113 = vector.shape_cast %112 : vector<32xf32> to vector<32x1xf32>
    %cst_54 = arith.constant 3.100000e+01 : f32
    %114 = vector.broadcast %cst_54 : f32 to vector<32x1xf32>
    %115 = arith.divf %113, %114 : vector<32x1xf32>
    %116 = vector.broadcast %102 : vector<1x32xf32> to vector<32x32xf32>
    %117 = arith.mulf %116, %110 : vector<32x32xf32>
    %118 = math.sqrt %115 : vector<32x1xf32>
    %cst_55 = arith.constant 9.99999997E-7 : f32
    %119 = vector.broadcast %cst_55 : f32 to vector<32x1xf32>
    %120 = arith.addf %118, %119 : vector<32x1xf32>
    %121 = vector.broadcast %120 : vector<32x1xf32> to vector<32x32xf32>
    %122 = arith.divf %117, %121 : vector<32x32xf32>
    %123 = vector.broadcast %104 : vector<1x32xf32> to vector<32x32xf32>
    %124 = arith.addf %122, %123 : vector<32x32xf32>
    %c0_56 = arith.constant 0 : index
    %c0_57 = arith.constant 0 : index
    %c0_58 = arith.constant 0 : index
    %125 = vector.load %arg9[%c0_56, %c0_57, %c0_58] : memref<4x32x128xf32, #tpu.memory_space<vmem>>, vector<1x32x128xf32>
    %126 = vector.shape_cast %125 : vector<1x32x128xf32> to vector<32x128xf32>
    %c0_59 = arith.constant 0 : index
    %c0_60 = arith.constant 0 : index
    %c0_61 = arith.constant 0 : index
    %127 = vector.load %arg10[%c0_59, %c0_60, %c0_61] : memref<4x1x128xf32, #tpu.memory_space<vmem>>, vector<1x1x128xf32>
    %128 = vector.shape_cast %127 : vector<1x1x128xf32> to vector<1x128xf32>
    %c0_62 = arith.constant 0 : index
    %c0_63 = arith.constant 0 : index
    %c0_64 = arith.constant 0 : index
    %129 = vector.load %arg11[%c0_62, %c0_63, %c0_64] : memref<4x128x32xf32, #tpu.memory_space<vmem>>, vector<1x128x32xf32>
    %130 = vector.shape_cast %129 : vector<1x128x32xf32> to vector<128x32xf32>
    %c0_65 = arith.constant 0 : index
    %c0_66 = arith.constant 0 : index
    %c0_67 = arith.constant 0 : index
    %131 = vector.load %arg12[%c0_65, %c0_66, %c0_67] : memref<4x1x32xf32, #tpu.memory_space<vmem>>, vector<1x1x32xf32>
    %132 = vector.shape_cast %131 : vector<1x1x32xf32> to vector<1x32xf32>
    %cst_68 = arith.constant dense<0.000000e+00> : vector<32x128xf32>
    %133 = tpu.matmul %124, %126, %cst_68 {dimension_numbers = #tpu.dot_dimension_numbers<[1], [0], [0], [1], [0, 0, 1, 1], [], []>} : vector<32x32xf32>, vector<32x128xf32>, vector<32x128xf32> -> vector<32x128xf32>
    %134 = vector.broadcast %128 : vector<1x128xf32> to vector<32x128xf32>
    %135 = arith.addf %133, %134 : vector<32x128xf32>
    %cst_69 = arith.constant 0.000000e+00 : f32
    %136 = vector.broadcast %cst_69 : f32 to vector<32x128xf32>
    %137 = arith.maximumf %135, %136 : vector<32x128xf32>
    %cst_70 = arith.constant dense<0.000000e+00> : vector<32x32xf32>
    %138 = tpu.matmul %137, %130, %cst_70 {dimension_numbers = #tpu.dot_dimension_numbers<[1], [0], [0], [1], [0, 0, 1, 1], [], []>} : vector<32x128xf32>, vector<128x32xf32>, vector<32x32xf32> -> vector<32x32xf32>
    %139 = vector.broadcast %132 : vector<1x32xf32> to vector<32x32xf32>
    %140 = arith.addf %138, %139 : vector<32x32xf32>
    %141 = arith.addf %124, %140 : vector<32x32xf32>
    %c0_71 = arith.constant 0 : index
    %c0_72 = arith.constant 0 : index
    %c0_73 = arith.constant 0 : index
    %142 = vector.load %arg15[%c0_71, %c0_72, %c0_73] : memref<4x1x32xf32, #tpu.memory_space<vmem>>, vector<1x1x32xf32>
    %143 = vector.shape_cast %142 : vector<1x1x32xf32> to vector<1x32xf32>
    %c0_74 = arith.constant 0 : index
    %c0_75 = arith.constant 0 : index
    %c0_76 = arith.constant 0 : index
    %144 = vector.load %arg16[%c0_74, %c0_75, %c0_76] : memref<4x1x32xf32, #tpu.memory_space<vmem>>, vector<1x1x32xf32>
    %145 = vector.shape_cast %144 : vector<1x1x32xf32> to vector<1x32xf32>
    %cst_77 = arith.constant dense<0.000000e+00> : vector<32xf32>
    %146 = vector.multi_reduction <add>, %141, %cst_77 [1] : vector<32x32xf32> to vector<32xf32>
    %147 = vector.shape_cast %146 : vector<32xf32> to vector<32x1xf32>
    %cst_78 = arith.constant 3.200000e+01 : f32
    %148 = vector.broadcast %cst_78 : f32 to vector<32x1xf32>
    %149 = arith.divf %147, %148 : vector<32x1xf32>
    %150 = vector.broadcast %149 : vector<32x1xf32> to vector<32x32xf32>
    %151 = arith.subf %141, %150 : vector<32x32xf32>
    %152 = arith.mulf %151, %151 : vector<32x32xf32>
    %cst_79 = arith.constant dense<0.000000e+00> : vector<32xf32>
    %153 = vector.multi_reduction <add>, %152, %cst_79 [1] : vector<32x32xf32> to vector<32xf32>
    %154 = vector.shape_cast %153 : vector<32xf32> to vector<32x1xf32>
    %cst_80 = arith.constant 3.100000e+01 : f32
    %155 = vector.broadcast %cst_80 : f32 to vector<32x1xf32>
    %156 = arith.divf %154, %155 : vector<32x1xf32>
    %157 = vector.broadcast %143 : vector<1x32xf32> to vector<32x32xf32>
    %158 = arith.mulf %157, %151 : vector<32x32xf32>
    %159 = math.sqrt %156 : vector<32x1xf32>
    %cst_81 = arith.constant 9.99999997E-7 : f32
    %160 = vector.broadcast %cst_81 : f32 to vector<32x1xf32>
    %161 = arith.addf %159, %160 : vector<32x1xf32>
    %162 = vector.broadcast %161 : vector<32x1xf32> to vector<32x32xf32>
    %163 = arith.divf %158, %162 : vector<32x32xf32>
    %164 = vector.broadcast %145 : vector<1x32xf32> to vector<32x32xf32>
    %165 = arith.addf %163, %164 : vector<32x32xf32>
    %c1 = arith.constant 1 : index
    %c0_82 = arith.constant 0 : index
    %c0_83 = arith.constant 0 : index
    %166 = vector.load %arg5[%c1, %c0_82, %c0_83] : memref<4x32x96xf32, #tpu.memory_space<vmem>>, vector<1x32x96xf32>
    %167 = vector.shape_cast %166 : vector<1x32x96xf32> to vector<32x96xf32>
    %c1_84 = arith.constant 1 : index
    %c0_85 = arith.constant 0 : index
    %c0_86 = arith.constant 0 : index
    %168 = vector.load %arg6[%c1_84, %c0_85, %c0_86] : memref<4x1x96xf32, #tpu.memory_space<vmem>>, vector<1x1x96xf32>
    %169 = vector.shape_cast %168 : vector<1x1x96xf32> to vector<1x96xf32>
    %c1_87 = arith.constant 1 : index
    %c0_88 = arith.constant 0 : index
    %c0_89 = arith.constant 0 : index
    %170 = vector.load %arg7[%c1_87, %c0_88, %c0_89] : memref<4x32x32xf32, #tpu.memory_space<vmem>>, vector<1x32x32xf32>
    %171 = vector.shape_cast %170 : vector<1x32x32xf32> to vector<32x32xf32>
    %c1_90 = arith.constant 1 : index
    %c0_91 = arith.constant 0 : index
    %c0_92 = arith.constant 0 : index
    %172 = vector.load %arg8[%c1_90, %c0_91, %c0_92] : memref<4x1x32xf32, #tpu.memory_space<vmem>>, vector<1x1x32xf32>
    %173 = vector.shape_cast %172 : vector<1x1x32xf32> to vector<1x32xf32>
    %cst_93 = arith.constant dense<0.000000e+00> : vector<32x96xf32>
    %174 = tpu.matmul %165, %167, %cst_93 {dimension_numbers = #tpu.dot_dimension_numbers<[1], [0], [0], [1], [0, 0, 1, 1], [], []>} : vector<32x32xf32>, vector<32x96xf32>, vector<32x96xf32> -> vector<32x96xf32>
    %175 = vector.broadcast %169 : vector<1x96xf32> to vector<32x96xf32>
    %176 = arith.addf %174, %175 : vector<32x96xf32>
    %177 = vector.extract_strided_slice %176 {offsets = [0, 0], sizes = [32, 32], strides = [1, 1]} : vector<32x96xf32> to vector<32x32xf32>
    %178 = vector.extract_strided_slice %176 {offsets = [0, 32], sizes = [32, 32], strides = [1, 1]} : vector<32x96xf32> to vector<32x32xf32>
    %179 = vector.extract_strided_slice %176 {offsets = [0, 64], sizes = [32, 32], strides = [1, 1]} : vector<32x96xf32> to vector<32x32xf32>
    %180 = vector.extract_strided_slice %177 {offsets = [0, 0], sizes = [32, 8], strides = [1, 1]} : vector<32x32xf32> to vector<32x8xf32>
    %181 = vector.extract_strided_slice %178 {offsets = [0, 0], sizes = [32, 8], strides = [1, 1]} : vector<32x32xf32> to vector<32x8xf32>
    %cst_94 = arith.constant dense<0.000000e+00> : vector<32x32xf32>
    %182 = tpu.matmul %180, %181, %cst_94 {dimension_numbers = #tpu.dot_dimension_numbers<[1], [1], [0], [0], [0, 0, 1, 0], [], []>} : vector<32x8xf32>, vector<32x8xf32>, vector<32x32xf32> -> vector<32x32xf32>
    %cst_95 = arith.constant 0.353553385 : f32
    %183 = vector.broadcast %cst_95 : f32 to vector<32x32xf32>
    %184 = arith.mulf %182, %183 : vector<32x32xf32>
    %185 = arith.addf %184, %2 : vector<32x32xf32>
    %cst_96 = arith.constant dense<0xFF800000> : vector<32xf32>
    %186 = vector.multi_reduction <maximumf>, %185, %cst_96 [1] : vector<32x32xf32> to vector<32xf32>
    %187 = vector.shape_cast %186 : vector<32xf32> to vector<32x1xf32>
    %188 = vector.broadcast %187 : vector<32x1xf32> to vector<32x32xf32>
    %189 = arith.subf %185, %188 : vector<32x32xf32>
    %190 = math.exp %189 : vector<32x32xf32>
    %cst_97 = arith.constant dense<0.000000e+00> : vector<32xf32>
    %191 = vector.multi_reduction <add>, %190, %cst_97 [1] : vector<32x32xf32> to vector<32xf32>
    %192 = vector.shape_cast %191 : vector<32xf32> to vector<32x1xf32>
    %193 = vector.broadcast %192 : vector<32x1xf32> to vector<32x32xf32>
    %194 = arith.divf %190, %193 : vector<32x32xf32>
    %195 = vector.extract_strided_slice %179 {offsets = [0, 0], sizes = [32, 8], strides = [1, 1]} : vector<32x32xf32> to vector<32x8xf32>
    %cst_98 = arith.constant dense<0.000000e+00> : vector<32x8xf32>
    %196 = tpu.matmul %194, %195, %cst_98 {dimension_numbers = #tpu.dot_dimension_numbers<[1], [0], [0], [1], [0, 0, 1, 1], [], []>} : vector<32x32xf32>, vector<32x8xf32>, vector<32x8xf32> -> vector<32x8xf32>
    %197 = vector.extract_strided_slice %171 {offsets = [0, 0], sizes = [8, 32], strides = [1, 1]} : vector<32x32xf32> to vector<8x32xf32>
    %cst_99 = arith.constant dense<0.000000e+00> : vector<32x32xf32>
    %198 = tpu.matmul %196, %197, %cst_99 {dimension_numbers = #tpu.dot_dimension_numbers<[1], [0], [0], [1], [0, 0, 1, 1], [], []>} : vector<32x8xf32>, vector<8x32xf32>, vector<32x32xf32> -> vector<32x32xf32>
    %199 = vector.extract_strided_slice %177 {offsets = [0, 8], sizes = [32, 8], strides = [1, 1]} : vector<32x32xf32> to vector<32x8xf32>
    %200 = vector.extract_strided_slice %178 {offsets = [0, 8], sizes = [32, 8], strides = [1, 1]} : vector<32x32xf32> to vector<32x8xf32>
    %cst_100 = arith.constant dense<0.000000e+00> : vector<32x32xf32>
    %201 = tpu.matmul %199, %200, %cst_100 {dimension_numbers = #tpu.dot_dimension_numbers<[1], [1], [0], [0], [0, 0, 1, 0], [], []>} : vector<32x8xf32>, vector<32x8xf32>, vector<32x32xf32> -> vector<32x32xf32>
    %cst_101 = arith.constant 0.353553385 : f32
    %202 = vector.broadcast %cst_101 : f32 to vector<32x32xf32>
    %203 = arith.mulf %201, %202 : vector<32x32xf32>
    %204 = arith.addf %203, %2 : vector<32x32xf32>
    %cst_102 = arith.constant dense<0xFF800000> : vector<32xf32>
    %205 = vector.multi_reduction <maximumf>, %204, %cst_102 [1] : vector<32x32xf32> to vector<32xf32>
    %206 = vector.shape_cast %205 : vector<32xf32> to vector<32x1xf32>
    %207 = vector.broadcast %206 : vector<32x1xf32> to vector<32x32xf32>
    %208 = arith.subf %204, %207 : vector<32x32xf32>
    %209 = math.exp %208 : vector<32x32xf32>
    %cst_103 = arith.constant dense<0.000000e+00> : vector<32xf32>
    %210 = vector.multi_reduction <add>, %209, %cst_103 [1] : vector<32x32xf32> to vector<32xf32>
    %211 = vector.shape_cast %210 : vector<32xf32> to vector<32x1xf32>
    %212 = vector.broadcast %211 : vector<32x1xf32> to vector<32x32xf32>
    %213 = arith.divf %209, %212 : vector<32x32xf32>
    %214 = vector.extract_strided_slice %179 {offsets = [0, 8], sizes = [32, 8], strides = [1, 1]} : vector<32x32xf32> to vector<32x8xf32>
    %cst_104 = arith.constant dense<0.000000e+00> : vector<32x8xf32>
    %215 = tpu.matmul %213, %214, %cst_104 {dimension_numbers = #tpu.dot_dimension_numbers<[1], [0], [0], [1], [0, 0, 1, 1], [], []>} : vector<32x32xf32>, vector<32x8xf32>, vector<32x8xf32> -> vector<32x8xf32>
    %216 = vector.extract_strided_slice %171 {offsets = [8, 0], sizes = [8, 32], strides = [1, 1]} : vector<32x32xf32> to vector<8x32xf32>
    %cst_105 = arith.constant dense<0.000000e+00> : vector<32x32xf32>
    %217 = tpu.matmul %215, %216, %cst_105 {dimension_numbers = #tpu.dot_dimension_numbers<[1], [0], [0], [1], [0, 0, 1, 1], [], []>} : vector<32x8xf32>, vector<8x32xf32>, vector<32x32xf32> -> vector<32x32xf32>
    %218 = arith.addf %198, %217 : vector<32x32xf32>
    %219 = vector.extract_strided_slice %177 {offsets = [0, 16], sizes = [32, 8], strides = [1, 1]} : vector<32x32xf32> to vector<32x8xf32>
    %220 = vector.extract_strided_slice %178 {offsets = [0, 16], sizes = [32, 8], strides = [1, 1]} : vector<32x32xf32> to vector<32x8xf32>
    %cst_106 = arith.constant dense<0.000000e+00> : vector<32x32xf32>
    %221 = tpu.matmul %219, %220, %cst_106 {dimension_numbers = #tpu.dot_dimension_numbers<[1], [1], [0], [0], [0, 0, 1, 0], [], []>} : vector<32x8xf32>, vector<32x8xf32>, vector<32x32xf32> -> vector<32x32xf32>
    %cst_107 = arith.constant 0.353553385 : f32
    %222 = vector.broadcast %cst_107 : f32 to vector<32x32xf32>
    %223 = arith.mulf %221, %222 : vector<32x32xf32>
    %224 = arith.addf %223, %2 : vector<32x32xf32>
    %cst_108 = arith.constant dense<0xFF800000> : vector<32xf32>
    %225 = vector.multi_reduction <maximumf>, %224, %cst_108 [1] : vector<32x32xf32> to vector<32xf32>
    %226 = vector.shape_cast %225 : vector<32xf32> to vector<32x1xf32>
    %227 = vector.broadcast %226 : vector<32x1xf32> to vector<32x32xf32>
    %228 = arith.subf %224, %227 : vector<32x32xf32>
    %229 = math.exp %228 : vector<32x32xf32>
    %cst_109 = arith.constant dense<0.000000e+00> : vector<32xf32>
    %230 = vector.multi_reduction <add>, %229, %cst_109 [1] : vector<32x32xf32> to vector<32xf32>
    %231 = vector.shape_cast %230 : vector<32xf32> to vector<32x1xf32>
    %232 = vector.broadcast %231 : vector<32x1xf32> to vector<32x32xf32>
    %233 = arith.divf %229, %232 : vector<32x32xf32>
    %234 = vector.extract_strided_slice %179 {offsets = [0, 16], sizes = [32, 8], strides = [1, 1]} : vector<32x32xf32> to vector<32x8xf32>
    %cst_110 = arith.constant dense<0.000000e+00> : vector<32x8xf32>
    %235 = tpu.matmul %233, %234, %cst_110 {dimension_numbers = #tpu.dot_dimension_numbers<[1], [0], [0], [1], [0, 0, 1, 1], [], []>} : vector<32x32xf32>, vector<32x8xf32>, vector<32x8xf32> -> vector<32x8xf32>
    %236 = vector.extract_strided_slice %171 {offsets = [16, 0], sizes = [8, 32], strides = [1, 1]} : vector<32x32xf32> to vector<8x32xf32>
    %cst_111 = arith.constant dense<0.000000e+00> : vector<32x32xf32>
    %237 = tpu.matmul %235, %236, %cst_111 {dimension_numbers = #tpu.dot_dimension_numbers<[1], [0], [0], [1], [0, 0, 1, 1], [], []>} : vector<32x8xf32>, vector<8x32xf32>, vector<32x32xf32> -> vector<32x32xf32>
    %238 = arith.addf %218, %237 : vector<32x32xf32>
    %239 = vector.extract_strided_slice %177 {offsets = [0, 24], sizes = [32, 8], strides = [1, 1]} : vector<32x32xf32> to vector<32x8xf32>
    %240 = vector.extract_strided_slice %178 {offsets = [0, 24], sizes = [32, 8], strides = [1, 1]} : vector<32x32xf32> to vector<32x8xf32>
    %cst_112 = arith.constant dense<0.000000e+00> : vector<32x32xf32>
    %241 = tpu.matmul %239, %240, %cst_112 {dimension_numbers = #tpu.dot_dimension_numbers<[1], [1], [0], [0], [0, 0, 1, 0], [], []>} : vector<32x8xf32>, vector<32x8xf32>, vector<32x32xf32> -> vector<32x32xf32>
    %cst_113 = arith.constant 0.353553385 : f32
    %242 = vector.broadcast %cst_113 : f32 to vector<32x32xf32>
    %243 = arith.mulf %241, %242 : vector<32x32xf32>
    %244 = arith.addf %243, %2 : vector<32x32xf32>
    %cst_114 = arith.constant dense<0xFF800000> : vector<32xf32>
    %245 = vector.multi_reduction <maximumf>, %244, %cst_114 [1] : vector<32x32xf32> to vector<32xf32>
    %246 = vector.shape_cast %245 : vector<32xf32> to vector<32x1xf32>
    %247 = vector.broadcast %246 : vector<32x1xf32> to vector<32x32xf32>
    %248 = arith.subf %244, %247 : vector<32x32xf32>
    %249 = math.exp %248 : vector<32x32xf32>
    %cst_115 = arith.constant dense<0.000000e+00> : vector<32xf32>
    %250 = vector.multi_reduction <add>, %249, %cst_115 [1] : vector<32x32xf32> to vector<32xf32>
    %251 = vector.shape_cast %250 : vector<32xf32> to vector<32x1xf32>
    %252 = vector.broadcast %251 : vector<32x1xf32> to vector<32x32xf32>
    %253 = arith.divf %249, %252 : vector<32x32xf32>
    %254 = vector.extract_strided_slice %179 {offsets = [0, 24], sizes = [32, 8], strides = [1, 1]} : vector<32x32xf32> to vector<32x8xf32>
    %cst_116 = arith.constant dense<0.000000e+00> : vector<32x8xf32>
    %255 = tpu.matmul %253, %254, %cst_116 {dimension_numbers = #tpu.dot_dimension_numbers<[1], [0], [0], [1], [0, 0, 1, 1], [], []>} : vector<32x32xf32>, vector<32x8xf32>, vector<32x8xf32> -> vector<32x8xf32>
    %256 = vector.extract_strided_slice %171 {offsets = [24, 0], sizes = [8, 32], strides = [1, 1]} : vector<32x32xf32> to vector<8x32xf32>
    %cst_117 = arith.constant dense<0.000000e+00> : vector<32x32xf32>
    %257 = tpu.matmul %255, %256, %cst_117 {dimension_numbers = #tpu.dot_dimension_numbers<[1], [0], [0], [1], [0, 0, 1, 1], [], []>} : vector<32x8xf32>, vector<8x32xf32>, vector<32x32xf32> -> vector<32x32xf32>
    %258 = arith.addf %238, %257 : vector<32x32xf32>
    %259 = vector.broadcast %173 : vector<1x32xf32> to vector<32x32xf32>
    %260 = arith.addf %258, %259 : vector<32x32xf32>
    %261 = arith.addf %165, %260 : vector<32x32xf32>
    %c1_118 = arith.constant 1 : index
    %c0_119 = arith.constant 0 : index
    %c0_120 = arith.constant 0 : index
    %262 = vector.load %arg13[%c1_118, %c0_119, %c0_120] : memref<4x1x32xf32, #tpu.memory_space<vmem>>, vector<1x1x32xf32>
    %263 = vector.shape_cast %262 : vector<1x1x32xf32> to vector<1x32xf32>
    %c1_121 = arith.constant 1 : index
    %c0_122 = arith.constant 0 : index
    %c0_123 = arith.constant 0 : index
    %264 = vector.load %arg14[%c1_121, %c0_122, %c0_123] : memref<4x1x32xf32, #tpu.memory_space<vmem>>, vector<1x1x32xf32>
    %265 = vector.shape_cast %264 : vector<1x1x32xf32> to vector<1x32xf32>
    %cst_124 = arith.constant dense<0.000000e+00> : vector<32xf32>
    %266 = vector.multi_reduction <add>, %261, %cst_124 [1] : vector<32x32xf32> to vector<32xf32>
    %267 = vector.shape_cast %266 : vector<32xf32> to vector<32x1xf32>
    %cst_125 = arith.constant 3.200000e+01 : f32
    %268 = vector.broadcast %cst_125 : f32 to vector<32x1xf32>
    %269 = arith.divf %267, %268 : vector<32x1xf32>
    %270 = vector.broadcast %269 : vector<32x1xf32> to vector<32x32xf32>
    %271 = arith.subf %261, %270 : vector<32x32xf32>
    %272 = arith.mulf %271, %271 : vector<32x32xf32>
    %cst_126 = arith.constant dense<0.000000e+00> : vector<32xf32>
    %273 = vector.multi_reduction <add>, %272, %cst_126 [1] : vector<32x32xf32> to vector<32xf32>
    %274 = vector.shape_cast %273 : vector<32xf32> to vector<32x1xf32>
    %cst_127 = arith.constant 3.100000e+01 : f32
    %275 = vector.broadcast %cst_127 : f32 to vector<32x1xf32>
    %276 = arith.divf %274, %275 : vector<32x1xf32>
    %277 = vector.broadcast %263 : vector<1x32xf32> to vector<32x32xf32>
    %278 = arith.mulf %277, %271 : vector<32x32xf32>
    %279 = math.sqrt %276 : vector<32x1xf32>
    %cst_128 = arith.constant 9.99999997E-7 : f32
    %280 = vector.broadcast %cst_128 : f32 to vector<32x1xf32>
    %281 = arith.addf %279, %280 : vector<32x1xf32>
    %282 = vector.broadcast %281 : vector<32x1xf32> to vector<32x32xf32>
    %283 = arith.divf %278, %282 : vector<32x32xf32>
    %284 = vector.broadcast %265 : vector<1x32xf32> to vector<32x32xf32>
    %285 = arith.addf %283, %284 : vector<32x32xf32>
    %c1_129 = arith.constant 1 : index
    %c0_130 = arith.constant 0 : index
    %c0_131 = arith.constant 0 : index
    %286 = vector.load %arg9[%c1_129, %c0_130, %c0_131] : memref<4x32x128xf32, #tpu.memory_space<vmem>>, vector<1x32x128xf32>
    %287 = vector.shape_cast %286 : vector<1x32x128xf32> to vector<32x128xf32>
    %c1_132 = arith.constant 1 : index
    %c0_133 = arith.constant 0 : index
    %c0_134 = arith.constant 0 : index
    %288 = vector.load %arg10[%c1_132, %c0_133, %c0_134] : memref<4x1x128xf32, #tpu.memory_space<vmem>>, vector<1x1x128xf32>
    %289 = vector.shape_cast %288 : vector<1x1x128xf32> to vector<1x128xf32>
    %c1_135 = arith.constant 1 : index
    %c0_136 = arith.constant 0 : index
    %c0_137 = arith.constant 0 : index
    %290 = vector.load %arg11[%c1_135, %c0_136, %c0_137] : memref<4x128x32xf32, #tpu.memory_space<vmem>>, vector<1x128x32xf32>
    %291 = vector.shape_cast %290 : vector<1x128x32xf32> to vector<128x32xf32>
    %c1_138 = arith.constant 1 : index
    %c0_139 = arith.constant 0 : index
    %c0_140 = arith.constant 0 : index
    %292 = vector.load %arg12[%c1_138, %c0_139, %c0_140] : memref<4x1x32xf32, #tpu.memory_space<vmem>>, vector<1x1x32xf32>
    %293 = vector.shape_cast %292 : vector<1x1x32xf32> to vector<1x32xf32>
    %cst_141 = arith.constant dense<0.000000e+00> : vector<32x128xf32>
    %294 = tpu.matmul %285, %287, %cst_141 {dimension_numbers = #tpu.dot_dimension_numbers<[1], [0], [0], [1], [0, 0, 1, 1], [], []>} : vector<32x32xf32>, vector<32x128xf32>, vector<32x128xf32> -> vector<32x128xf32>
    %295 = vector.broadcast %289 : vector<1x128xf32> to vector<32x128xf32>
    %296 = arith.addf %294, %295 : vector<32x128xf32>
    %cst_142 = arith.constant 0.000000e+00 : f32
    %297 = vector.broadcast %cst_142 : f32 to vector<32x128xf32>
    %298 = arith.maximumf %296, %297 : vector<32x128xf32>
    %cst_143 = arith.constant dense<0.000000e+00> : vector<32x32xf32>
    %299 = tpu.matmul %298, %291, %cst_143 {dimension_numbers = #tpu.dot_dimension_numbers<[1], [0], [0], [1], [0, 0, 1, 1], [], []>} : vector<32x128xf32>, vector<128x32xf32>, vector<32x32xf32> -> vector<32x32xf32>
    %300 = vector.broadcast %293 : vector<1x32xf32> to vector<32x32xf32>
    %301 = arith.addf %299, %300 : vector<32x32xf32>
    %302 = arith.addf %285, %301 : vector<32x32xf32>
    %c1_144 = arith.constant 1 : index
    %c0_145 = arith.constant 0 : index
    %c0_146 = arith.constant 0 : index
    %303 = vector.load %arg15[%c1_144, %c0_145, %c0_146] : memref<4x1x32xf32, #tpu.memory_space<vmem>>, vector<1x1x32xf32>
    %304 = vector.shape_cast %303 : vector<1x1x32xf32> to vector<1x32xf32>
    %c1_147 = arith.constant 1 : index
    %c0_148 = arith.constant 0 : index
    %c0_149 = arith.constant 0 : index
    %305 = vector.load %arg16[%c1_147, %c0_148, %c0_149] : memref<4x1x32xf32, #tpu.memory_space<vmem>>, vector<1x1x32xf32>
    %306 = vector.shape_cast %305 : vector<1x1x32xf32> to vector<1x32xf32>
    %cst_150 = arith.constant dense<0.000000e+00> : vector<32xf32>
    %307 = vector.multi_reduction <add>, %302, %cst_150 [1] : vector<32x32xf32> to vector<32xf32>
    %308 = vector.shape_cast %307 : vector<32xf32> to vector<32x1xf32>
    %cst_151 = arith.constant 3.200000e+01 : f32
    %309 = vector.broadcast %cst_151 : f32 to vector<32x1xf32>
    %310 = arith.divf %308, %309 : vector<32x1xf32>
    %311 = vector.broadcast %310 : vector<32x1xf32> to vector<32x32xf32>
    %312 = arith.subf %302, %311 : vector<32x32xf32>
    %313 = arith.mulf %312, %312 : vector<32x32xf32>
    %cst_152 = arith.constant dense<0.000000e+00> : vector<32xf32>
    %314 = vector.multi_reduction <add>, %313, %cst_152 [1] : vector<32x32xf32> to vector<32xf32>
    %315 = vector.shape_cast %314 : vector<32xf32> to vector<32x1xf32>
    %cst_153 = arith.constant 3.100000e+01 : f32
    %316 = vector.broadcast %cst_153 : f32 to vector<32x1xf32>
    %317 = arith.divf %315, %316 : vector<32x1xf32>
    %318 = vector.broadcast %304 : vector<1x32xf32> to vector<32x32xf32>
    %319 = arith.mulf %318, %312 : vector<32x32xf32>
    %320 = math.sqrt %317 : vector<32x1xf32>
    %cst_154 = arith.constant 9.99999997E-7 : f32
    %321 = vector.broadcast %cst_154 : f32 to vector<32x1xf32>
    %322 = arith.addf %320, %321 : vector<32x1xf32>
    %323 = vector.broadcast %322 : vector<32x1xf32> to vector<32x32xf32>
    %324 = arith.divf %319, %323 : vector<32x32xf32>
    %325 = vector.broadcast %306 : vector<1x32xf32> to vector<32x32xf32>
    %326 = arith.addf %324, %325 : vector<32x32xf32>
    %c2 = arith.constant 2 : index
    %c0_155 = arith.constant 0 : index
    %c0_156 = arith.constant 0 : index
    %327 = vector.load %arg5[%c2, %c0_155, %c0_156] : memref<4x32x96xf32, #tpu.memory_space<vmem>>, vector<1x32x96xf32>
    %328 = vector.shape_cast %327 : vector<1x32x96xf32> to vector<32x96xf32>
    %c2_157 = arith.constant 2 : index
    %c0_158 = arith.constant 0 : index
    %c0_159 = arith.constant 0 : index
    %329 = vector.load %arg6[%c2_157, %c0_158, %c0_159] : memref<4x1x96xf32, #tpu.memory_space<vmem>>, vector<1x1x96xf32>
    %330 = vector.shape_cast %329 : vector<1x1x96xf32> to vector<1x96xf32>
    %c2_160 = arith.constant 2 : index
    %c0_161 = arith.constant 0 : index
    %c0_162 = arith.constant 0 : index
    %331 = vector.load %arg7[%c2_160, %c0_161, %c0_162] : memref<4x32x32xf32, #tpu.memory_space<vmem>>, vector<1x32x32xf32>
    %332 = vector.shape_cast %331 : vector<1x32x32xf32> to vector<32x32xf32>
    %c2_163 = arith.constant 2 : index
    %c0_164 = arith.constant 0 : index
    %c0_165 = arith.constant 0 : index
    %333 = vector.load %arg8[%c2_163, %c0_164, %c0_165] : memref<4x1x32xf32, #tpu.memory_space<vmem>>, vector<1x1x32xf32>
    %334 = vector.shape_cast %333 : vector<1x1x32xf32> to vector<1x32xf32>
    %cst_166 = arith.constant dense<0.000000e+00> : vector<32x96xf32>
    %335 = tpu.matmul %0, %328, %cst_166 {dimension_numbers = #tpu.dot_dimension_numbers<[1], [0], [0], [1], [0, 0, 1, 1], [], []>} : vector<32x32xf32>, vector<32x96xf32>, vector<32x96xf32> -> vector<32x96xf32>
    %336 = vector.broadcast %330 : vector<1x96xf32> to vector<32x96xf32>
    %337 = arith.addf %335, %336 : vector<32x96xf32>
    %338 = vector.extract_strided_slice %337 {offsets = [0, 0], sizes = [32, 32], strides = [1, 1]} : vector<32x96xf32> to vector<32x32xf32>
    %339 = vector.extract_strided_slice %337 {offsets = [0, 32], sizes = [32, 32], strides = [1, 1]} : vector<32x96xf32> to vector<32x32xf32>
    %340 = vector.extract_strided_slice %337 {offsets = [0, 64], sizes = [32, 32], strides = [1, 1]} : vector<32x96xf32> to vector<32x32xf32>
    %341 = vector.extract_strided_slice %338 {offsets = [0, 0], sizes = [32, 8], strides = [1, 1]} : vector<32x32xf32> to vector<32x8xf32>
    %342 = vector.extract_strided_slice %339 {offsets = [0, 0], sizes = [32, 8], strides = [1, 1]} : vector<32x32xf32> to vector<32x8xf32>
    %cst_167 = arith.constant dense<0.000000e+00> : vector<32x32xf32>
    %343 = tpu.matmul %341, %342, %cst_167 {dimension_numbers = #tpu.dot_dimension_numbers<[1], [1], [0], [0], [0, 0, 1, 0], [], []>} : vector<32x8xf32>, vector<32x8xf32>, vector<32x32xf32> -> vector<32x32xf32>
    %cst_168 = arith.constant 0.353553385 : f32
    %344 = vector.broadcast %cst_168 : f32 to vector<32x32xf32>
    %345 = arith.mulf %343, %344 : vector<32x32xf32>
    %346 = arith.addf %345, %2 : vector<32x32xf32>
    %cst_169 = arith.constant dense<0xFF800000> : vector<32xf32>
    %347 = vector.multi_reduction <maximumf>, %346, %cst_169 [1] : vector<32x32xf32> to vector<32xf32>
    %348 = vector.shape_cast %347 : vector<32xf32> to vector<32x1xf32>
    %349 = vector.broadcast %348 : vector<32x1xf32> to vector<32x32xf32>
    %350 = arith.subf %346, %349 : vector<32x32xf32>
    %351 = math.exp %350 : vector<32x32xf32>
    %cst_170 = arith.constant dense<0.000000e+00> : vector<32xf32>
    %352 = vector.multi_reduction <add>, %351, %cst_170 [1] : vector<32x32xf32> to vector<32xf32>
    %353 = vector.shape_cast %352 : vector<32xf32> to vector<32x1xf32>
    %354 = vector.broadcast %353 : vector<32x1xf32> to vector<32x32xf32>
    %355 = arith.divf %351, %354 : vector<32x32xf32>
    %356 = vector.extract_strided_slice %340 {offsets = [0, 0], sizes = [32, 8], strides = [1, 1]} : vector<32x32xf32> to vector<32x8xf32>
    %cst_171 = arith.constant dense<0.000000e+00> : vector<32x8xf32>
    %357 = tpu.matmul %355, %356, %cst_171 {dimension_numbers = #tpu.dot_dimension_numbers<[1], [0], [0], [1], [0, 0, 1, 1], [], []>} : vector<32x32xf32>, vector<32x8xf32>, vector<32x8xf32> -> vector<32x8xf32>
    %358 = vector.extract_strided_slice %332 {offsets = [0, 0], sizes = [8, 32], strides = [1, 1]} : vector<32x32xf32> to vector<8x32xf32>
    %cst_172 = arith.constant dense<0.000000e+00> : vector<32x32xf32>
    %359 = tpu.matmul %357, %358, %cst_172 {dimension_numbers = #tpu.dot_dimension_numbers<[1], [0], [0], [1], [0, 0, 1, 1], [], []>} : vector<32x8xf32>, vector<8x32xf32>, vector<32x32xf32> -> vector<32x32xf32>
    %360 = vector.extract_strided_slice %338 {offsets = [0, 8], sizes = [32, 8], strides = [1, 1]} : vector<32x32xf32> to vector<32x8xf32>
    %361 = vector.extract_strided_slice %339 {offsets = [0, 8], sizes = [32, 8], strides = [1, 1]} : vector<32x32xf32> to vector<32x8xf32>
    %cst_173 = arith.constant dense<0.000000e+00> : vector<32x32xf32>
    %362 = tpu.matmul %360, %361, %cst_173 {dimension_numbers = #tpu.dot_dimension_numbers<[1], [1], [0], [0], [0, 0, 1, 0], [], []>} : vector<32x8xf32>, vector<32x8xf32>, vector<32x32xf32> -> vector<32x32xf32>
    %cst_174 = arith.constant 0.353553385 : f32
    %363 = vector.broadcast %cst_174 : f32 to vector<32x32xf32>
    %364 = arith.mulf %362, %363 : vector<32x32xf32>
    %365 = arith.addf %364, %2 : vector<32x32xf32>
    %cst_175 = arith.constant dense<0xFF800000> : vector<32xf32>
    %366 = vector.multi_reduction <maximumf>, %365, %cst_175 [1] : vector<32x32xf32> to vector<32xf32>
    %367 = vector.shape_cast %366 : vector<32xf32> to vector<32x1xf32>
    %368 = vector.broadcast %367 : vector<32x1xf32> to vector<32x32xf32>
    %369 = arith.subf %365, %368 : vector<32x32xf32>
    %370 = math.exp %369 : vector<32x32xf32>
    %cst_176 = arith.constant dense<0.000000e+00> : vector<32xf32>
    %371 = vector.multi_reduction <add>, %370, %cst_176 [1] : vector<32x32xf32> to vector<32xf32>
    %372 = vector.shape_cast %371 : vector<32xf32> to vector<32x1xf32>
    %373 = vector.broadcast %372 : vector<32x1xf32> to vector<32x32xf32>
    %374 = arith.divf %370, %373 : vector<32x32xf32>
    %375 = vector.extract_strided_slice %340 {offsets = [0, 8], sizes = [32, 8], strides = [1, 1]} : vector<32x32xf32> to vector<32x8xf32>
    %cst_177 = arith.constant dense<0.000000e+00> : vector<32x8xf32>
    %376 = tpu.matmul %374, %375, %cst_177 {dimension_numbers = #tpu.dot_dimension_numbers<[1], [0], [0], [1], [0, 0, 1, 1], [], []>} : vector<32x32xf32>, vector<32x8xf32>, vector<32x8xf32> -> vector<32x8xf32>
    %377 = vector.extract_strided_slice %332 {offsets = [8, 0], sizes = [8, 32], strides = [1, 1]} : vector<32x32xf32> to vector<8x32xf32>
    %cst_178 = arith.constant dense<0.000000e+00> : vector<32x32xf32>
    %378 = tpu.matmul %376, %377, %cst_178 {dimension_numbers = #tpu.dot_dimension_numbers<[1], [0], [0], [1], [0, 0, 1, 1], [], []>} : vector<32x8xf32>, vector<8x32xf32>, vector<32x32xf32> -> vector<32x32xf32>
    %379 = arith.addf %359, %378 : vector<32x32xf32>
    %380 = vector.extract_strided_slice %338 {offsets = [0, 16], sizes = [32, 8], strides = [1, 1]} : vector<32x32xf32> to vector<32x8xf32>
    %381 = vector.extract_strided_slice %339 {offsets = [0, 16], sizes = [32, 8], strides = [1, 1]} : vector<32x32xf32> to vector<32x8xf32>
    %cst_179 = arith.constant dense<0.000000e+00> : vector<32x32xf32>
    %382 = tpu.matmul %380, %381, %cst_179 {dimension_numbers = #tpu.dot_dimension_numbers<[1], [1], [0], [0], [0, 0, 1, 0], [], []>} : vector<32x8xf32>, vector<32x8xf32>, vector<32x32xf32> -> vector<32x32xf32>
    %cst_180 = arith.constant 0.353553385 : f32
    %383 = vector.broadcast %cst_180 : f32 to vector<32x32xf32>
    %384 = arith.mulf %382, %383 : vector<32x32xf32>
    %385 = arith.addf %384, %2 : vector<32x32xf32>
    %cst_181 = arith.constant dense<0xFF800000> : vector<32xf32>
    %386 = vector.multi_reduction <maximumf>, %385, %cst_181 [1] : vector<32x32xf32> to vector<32xf32>
    %387 = vector.shape_cast %386 : vector<32xf32> to vector<32x1xf32>
    %388 = vector.broadcast %387 : vector<32x1xf32> to vector<32x32xf32>
    %389 = arith.subf %385, %388 : vector<32x32xf32>
    %390 = math.exp %389 : vector<32x32xf32>
    %cst_182 = arith.constant dense<0.000000e+00> : vector<32xf32>
    %391 = vector.multi_reduction <add>, %390, %cst_182 [1] : vector<32x32xf32> to vector<32xf32>
    %392 = vector.shape_cast %391 : vector<32xf32> to vector<32x1xf32>
    %393 = vector.broadcast %392 : vector<32x1xf32> to vector<32x32xf32>
    %394 = arith.divf %390, %393 : vector<32x32xf32>
    %395 = vector.extract_strided_slice %340 {offsets = [0, 16], sizes = [32, 8], strides = [1, 1]} : vector<32x32xf32> to vector<32x8xf32>
    %cst_183 = arith.constant dense<0.000000e+00> : vector<32x8xf32>
    %396 = tpu.matmul %394, %395, %cst_183 {dimension_numbers = #tpu.dot_dimension_numbers<[1], [0], [0], [1], [0, 0, 1, 1], [], []>} : vector<32x32xf32>, vector<32x8xf32>, vector<32x8xf32> -> vector<32x8xf32>
    %397 = vector.extract_strided_slice %332 {offsets = [16, 0], sizes = [8, 32], strides = [1, 1]} : vector<32x32xf32> to vector<8x32xf32>
    %cst_184 = arith.constant dense<0.000000e+00> : vector<32x32xf32>
    %398 = tpu.matmul %396, %397, %cst_184 {dimension_numbers = #tpu.dot_dimension_numbers<[1], [0], [0], [1], [0, 0, 1, 1], [], []>} : vector<32x8xf32>, vector<8x32xf32>, vector<32x32xf32> -> vector<32x32xf32>
    %399 = arith.addf %379, %398 : vector<32x32xf32>
    %400 = vector.extract_strided_slice %338 {offsets = [0, 24], sizes = [32, 8], strides = [1, 1]} : vector<32x32xf32> to vector<32x8xf32>
    %401 = vector.extract_strided_slice %339 {offsets = [0, 24], sizes = [32, 8], strides = [1, 1]} : vector<32x32xf32> to vector<32x8xf32>
    %cst_185 = arith.constant dense<0.000000e+00> : vector<32x32xf32>
    %402 = tpu.matmul %400, %401, %cst_185 {dimension_numbers = #tpu.dot_dimension_numbers<[1], [1], [0], [0], [0, 0, 1, 0], [], []>} : vector<32x8xf32>, vector<32x8xf32>, vector<32x32xf32> -> vector<32x32xf32>
    %cst_186 = arith.constant 0.353553385 : f32
    %403 = vector.broadcast %cst_186 : f32 to vector<32x32xf32>
    %404 = arith.mulf %402, %403 : vector<32x32xf32>
    %405 = arith.addf %404, %2 : vector<32x32xf32>
    %cst_187 = arith.constant dense<0xFF800000> : vector<32xf32>
    %406 = vector.multi_reduction <maximumf>, %405, %cst_187 [1] : vector<32x32xf32> to vector<32xf32>
    %407 = vector.shape_cast %406 : vector<32xf32> to vector<32x1xf32>
    %408 = vector.broadcast %407 : vector<32x1xf32> to vector<32x32xf32>
    %409 = arith.subf %405, %408 : vector<32x32xf32>
    %410 = math.exp %409 : vector<32x32xf32>
    %cst_188 = arith.constant dense<0.000000e+00> : vector<32xf32>
    %411 = vector.multi_reduction <add>, %410, %cst_188 [1] : vector<32x32xf32> to vector<32xf32>
    %412 = vector.shape_cast %411 : vector<32xf32> to vector<32x1xf32>
    %413 = vector.broadcast %412 : vector<32x1xf32> to vector<32x32xf32>
    %414 = arith.divf %410, %413 : vector<32x32xf32>
    %415 = vector.extract_strided_slice %340 {offsets = [0, 24], sizes = [32, 8], strides = [1, 1]} : vector<32x32xf32> to vector<32x8xf32>
    %cst_189 = arith.constant dense<0.000000e+00> : vector<32x8xf32>
    %416 = tpu.matmul %414, %415, %cst_189 {dimension_numbers = #tpu.dot_dimension_numbers<[1], [0], [0], [1], [0, 0, 1, 1], [], []>} : vector<32x32xf32>, vector<32x8xf32>, vector<32x8xf32> -> vector<32x8xf32>
    %417 = vector.extract_strided_slice %332 {offsets = [24, 0], sizes = [8, 32], strides = [1, 1]} : vector<32x32xf32> to vector<8x32xf32>
    %cst_190 = arith.constant dense<0.000000e+00> : vector<32x32xf32>
    %418 = tpu.matmul %416, %417, %cst_190 {dimension_numbers = #tpu.dot_dimension_numbers<[1], [0], [0], [1], [0, 0, 1, 1], [], []>} : vector<32x8xf32>, vector<8x32xf32>, vector<32x32xf32> -> vector<32x32xf32>
    %419 = arith.addf %399, %418 : vector<32x32xf32>
    %420 = vector.broadcast %334 : vector<1x32xf32> to vector<32x32xf32>
    %421 = arith.addf %419, %420 : vector<32x32xf32>
    %422 = arith.addf %0, %421 : vector<32x32xf32>
    %c2_191 = arith.constant 2 : index
    %c0_192 = arith.constant 0 : index
    %c0_193 = arith.constant 0 : index
    %423 = vector.load %arg13[%c2_191, %c0_192, %c0_193] : memref<4x1x32xf32, #tpu.memory_space<vmem>>, vector<1x1x32xf32>
    %424 = vector.shape_cast %423 : vector<1x1x32xf32> to vector<1x32xf32>
    %c2_194 = arith.constant 2 : index
    %c0_195 = arith.constant 0 : index
    %c0_196 = arith.constant 0 : index
    %425 = vector.load %arg14[%c2_194, %c0_195, %c0_196] : memref<4x1x32xf32, #tpu.memory_space<vmem>>, vector<1x1x32xf32>
    %426 = vector.shape_cast %425 : vector<1x1x32xf32> to vector<1x32xf32>
    %cst_197 = arith.constant dense<0.000000e+00> : vector<32xf32>
    %427 = vector.multi_reduction <add>, %422, %cst_197 [1] : vector<32x32xf32> to vector<32xf32>
    %428 = vector.shape_cast %427 : vector<32xf32> to vector<32x1xf32>
    %cst_198 = arith.constant 3.200000e+01 : f32
    %429 = vector.broadcast %cst_198 : f32 to vector<32x1xf32>
    %430 = arith.divf %428, %429 : vector<32x1xf32>
    %431 = vector.broadcast %430 : vector<32x1xf32> to vector<32x32xf32>
    %432 = arith.subf %422, %431 : vector<32x32xf32>
    %433 = arith.mulf %432, %432 : vector<32x32xf32>
    %cst_199 = arith.constant dense<0.000000e+00> : vector<32xf32>
    %434 = vector.multi_reduction <add>, %433, %cst_199 [1] : vector<32x32xf32> to vector<32xf32>
    %435 = vector.shape_cast %434 : vector<32xf32> to vector<32x1xf32>
    %cst_200 = arith.constant 3.100000e+01 : f32
    %436 = vector.broadcast %cst_200 : f32 to vector<32x1xf32>
    %437 = arith.divf %435, %436 : vector<32x1xf32>
    %438 = vector.broadcast %424 : vector<1x32xf32> to vector<32x32xf32>
    %439 = arith.mulf %438, %432 : vector<32x32xf32>
    %440 = math.sqrt %437 : vector<32x1xf32>
    %cst_201 = arith.constant 9.99999997E-7 : f32
    %441 = vector.broadcast %cst_201 : f32 to vector<32x1xf32>
    %442 = arith.addf %440, %441 : vector<32x1xf32>
    %443 = vector.broadcast %442 : vector<32x1xf32> to vector<32x32xf32>
    %444 = arith.divf %439, %443 : vector<32x32xf32>
    %445 = vector.broadcast %426 : vector<1x32xf32> to vector<32x32xf32>
    %446 = arith.addf %444, %445 : vector<32x32xf32>
    %c2_202 = arith.constant 2 : index
    %c0_203 = arith.constant 0 : index
    %c0_204 = arith.constant 0 : index
    %447 = vector.load %arg9[%c2_202, %c0_203, %c0_204] : memref<4x32x128xf32, #tpu.memory_space<vmem>>, vector<1x32x128xf32>
    %448 = vector.shape_cast %447 : vector<1x32x128xf32> to vector<32x128xf32>
    %c2_205 = arith.constant 2 : index
    %c0_206 = arith.constant 0 : index
    %c0_207 = arith.constant 0 : index
    %449 = vector.load %arg10[%c2_205, %c0_206, %c0_207] : memref<4x1x128xf32, #tpu.memory_space<vmem>>, vector<1x1x128xf32>
    %450 = vector.shape_cast %449 : vector<1x1x128xf32> to vector<1x128xf32>
    %c2_208 = arith.constant 2 : index
    %c0_209 = arith.constant 0 : index
    %c0_210 = arith.constant 0 : index
    %451 = vector.load %arg11[%c2_208, %c0_209, %c0_210] : memref<4x128x32xf32, #tpu.memory_space<vmem>>, vector<1x128x32xf32>
    %452 = vector.shape_cast %451 : vector<1x128x32xf32> to vector<128x32xf32>
    %c2_211 = arith.constant 2 : index
    %c0_212 = arith.constant 0 : index
    %c0_213 = arith.constant 0 : index
    %453 = vector.load %arg12[%c2_211, %c0_212, %c0_213] : memref<4x1x32xf32, #tpu.memory_space<vmem>>, vector<1x1x32xf32>
    %454 = vector.shape_cast %453 : vector<1x1x32xf32> to vector<1x32xf32>
    %cst_214 = arith.constant dense<0.000000e+00> : vector<32x128xf32>
    %455 = tpu.matmul %446, %448, %cst_214 {dimension_numbers = #tpu.dot_dimension_numbers<[1], [0], [0], [1], [0, 0, 1, 1], [], []>} : vector<32x32xf32>, vector<32x128xf32>, vector<32x128xf32> -> vector<32x128xf32>
    %456 = vector.broadcast %450 : vector<1x128xf32> to vector<32x128xf32>
    %457 = arith.addf %455, %456 : vector<32x128xf32>
    %cst_215 = arith.constant 0.000000e+00 : f32
    %458 = vector.broadcast %cst_215 : f32 to vector<32x128xf32>
    %459 = arith.maximumf %457, %458 : vector<32x128xf32>
    %cst_216 = arith.constant dense<0.000000e+00> : vector<32x32xf32>
    %460 = tpu.matmul %459, %452, %cst_216 {dimension_numbers = #tpu.dot_dimension_numbers<[1], [0], [0], [1], [0, 0, 1, 1], [], []>} : vector<32x128xf32>, vector<128x32xf32>, vector<32x32xf32> -> vector<32x32xf32>
    %461 = vector.broadcast %454 : vector<1x32xf32> to vector<32x32xf32>
    %462 = arith.addf %460, %461 : vector<32x32xf32>
    %463 = arith.addf %446, %462 : vector<32x32xf32>
    %c2_217 = arith.constant 2 : index
    %c0_218 = arith.constant 0 : index
    %c0_219 = arith.constant 0 : index
    %464 = vector.load %arg15[%c2_217, %c0_218, %c0_219] : memref<4x1x32xf32, #tpu.memory_space<vmem>>, vector<1x1x32xf32>
    %465 = vector.shape_cast %464 : vector<1x1x32xf32> to vector<1x32xf32>
    %c2_220 = arith.constant 2 : index
    %c0_221 = arith.constant 0 : index
    %c0_222 = arith.constant 0 : index
    %466 = vector.load %arg16[%c2_220, %c0_221, %c0_222] : memref<4x1x32xf32, #tpu.memory_space<vmem>>, vector<1x1x32xf32>
    %467 = vector.shape_cast %466 : vector<1x1x32xf32> to vector<1x32xf32>
    %cst_223 = arith.constant dense<0.000000e+00> : vector<32xf32>
    %468 = vector.multi_reduction <add>, %463, %cst_223 [1] : vector<32x32xf32> to vector<32xf32>
    %469 = vector.shape_cast %468 : vector<32xf32> to vector<32x1xf32>
    %cst_224 = arith.constant 3.200000e+01 : f32
    %470 = vector.broadcast %cst_224 : f32 to vector<32x1xf32>
    %471 = arith.divf %469, %470 : vector<32x1xf32>
    %472 = vector.broadcast %471 : vector<32x1xf32> to vector<32x32xf32>
    %473 = arith.subf %463, %472 : vector<32x32xf32>
    %474 = arith.mulf %473, %473 : vector<32x32xf32>
    %cst_225 = arith.constant dense<0.000000e+00> : vector<32xf32>
    %475 = vector.multi_reduction <add>, %474, %cst_225 [1] : vector<32x32xf32> to vector<32xf32>
    %476 = vector.shape_cast %475 : vector<32xf32> to vector<32x1xf32>
    %cst_226 = arith.constant 3.100000e+01 : f32
    %477 = vector.broadcast %cst_226 : f32 to vector<32x1xf32>
    %478 = arith.divf %476, %477 : vector<32x1xf32>
    %479 = vector.broadcast %465 : vector<1x32xf32> to vector<32x32xf32>
    %480 = arith.mulf %479, %473 : vector<32x32xf32>
    %481 = math.sqrt %478 : vector<32x1xf32>
    %cst_227 = arith.constant 9.99999997E-7 : f32
    %482 = vector.broadcast %cst_227 : f32 to vector<32x1xf32>
    %483 = arith.addf %481, %482 : vector<32x1xf32>
    %484 = vector.broadcast %483 : vector<32x1xf32> to vector<32x32xf32>
    %485 = arith.divf %480, %484 : vector<32x32xf32>
    %486 = vector.broadcast %467 : vector<1x32xf32> to vector<32x32xf32>
    %487 = arith.addf %485, %486 : vector<32x32xf32>
    %c3 = arith.constant 3 : index
    %c0_228 = arith.constant 0 : index
    %c0_229 = arith.constant 0 : index
    %488 = vector.load %arg5[%c3, %c0_228, %c0_229] : memref<4x32x96xf32, #tpu.memory_space<vmem>>, vector<1x32x96xf32>
    %489 = vector.shape_cast %488 : vector<1x32x96xf32> to vector<32x96xf32>
    %c3_230 = arith.constant 3 : index
    %c0_231 = arith.constant 0 : index
    %c0_232 = arith.constant 0 : index
    %490 = vector.load %arg6[%c3_230, %c0_231, %c0_232] : memref<4x1x96xf32, #tpu.memory_space<vmem>>, vector<1x1x96xf32>
    %491 = vector.shape_cast %490 : vector<1x1x96xf32> to vector<1x96xf32>
    %c3_233 = arith.constant 3 : index
    %c0_234 = arith.constant 0 : index
    %c0_235 = arith.constant 0 : index
    %492 = vector.load %arg7[%c3_233, %c0_234, %c0_235] : memref<4x32x32xf32, #tpu.memory_space<vmem>>, vector<1x32x32xf32>
    %493 = vector.shape_cast %492 : vector<1x32x32xf32> to vector<32x32xf32>
    %c3_236 = arith.constant 3 : index
    %c0_237 = arith.constant 0 : index
    %c0_238 = arith.constant 0 : index
    %494 = vector.load %arg8[%c3_236, %c0_237, %c0_238] : memref<4x1x32xf32, #tpu.memory_space<vmem>>, vector<1x1x32xf32>
    %495 = vector.shape_cast %494 : vector<1x1x32xf32> to vector<1x32xf32>
    %cst_239 = arith.constant dense<0.000000e+00> : vector<32x96xf32>
    %496 = tpu.matmul %487, %489, %cst_239 {dimension_numbers = #tpu.dot_dimension_numbers<[1], [0], [0], [1], [0, 0, 1, 1], [], []>} : vector<32x32xf32>, vector<32x96xf32>, vector<32x96xf32> -> vector<32x96xf32>
    %497 = vector.broadcast %491 : vector<1x96xf32> to vector<32x96xf32>
    %498 = arith.addf %496, %497 : vector<32x96xf32>
    %499 = vector.extract_strided_slice %498 {offsets = [0, 0], sizes = [32, 32], strides = [1, 1]} : vector<32x96xf32> to vector<32x32xf32>
    %500 = vector.extract_strided_slice %498 {offsets = [0, 32], sizes = [32, 32], strides = [1, 1]} : vector<32x96xf32> to vector<32x32xf32>
    %501 = vector.extract_strided_slice %498 {offsets = [0, 64], sizes = [32, 32], strides = [1, 1]} : vector<32x96xf32> to vector<32x32xf32>
    %502 = vector.extract_strided_slice %499 {offsets = [0, 0], sizes = [32, 8], strides = [1, 1]} : vector<32x32xf32> to vector<32x8xf32>
    %503 = vector.extract_strided_slice %500 {offsets = [0, 0], sizes = [32, 8], strides = [1, 1]} : vector<32x32xf32> to vector<32x8xf32>
    %cst_240 = arith.constant dense<0.000000e+00> : vector<32x32xf32>
    %504 = tpu.matmul %502, %503, %cst_240 {dimension_numbers = #tpu.dot_dimension_numbers<[1], [1], [0], [0], [0, 0, 1, 0], [], []>} : vector<32x8xf32>, vector<32x8xf32>, vector<32x32xf32> -> vector<32x32xf32>
    %cst_241 = arith.constant 0.353553385 : f32
    %505 = vector.broadcast %cst_241 : f32 to vector<32x32xf32>
    %506 = arith.mulf %504, %505 : vector<32x32xf32>
    %507 = arith.addf %506, %2 : vector<32x32xf32>
    %cst_242 = arith.constant dense<0xFF800000> : vector<32xf32>
    %508 = vector.multi_reduction <maximumf>, %507, %cst_242 [1] : vector<32x32xf32> to vector<32xf32>
    %509 = vector.shape_cast %508 : vector<32xf32> to vector<32x1xf32>
    %510 = vector.broadcast %509 : vector<32x1xf32> to vector<32x32xf32>
    %511 = arith.subf %507, %510 : vector<32x32xf32>
    %512 = math.exp %511 : vector<32x32xf32>
    %cst_243 = arith.constant dense<0.000000e+00> : vector<32xf32>
    %513 = vector.multi_reduction <add>, %512, %cst_243 [1] : vector<32x32xf32> to vector<32xf32>
    %514 = vector.shape_cast %513 : vector<32xf32> to vector<32x1xf32>
    %515 = vector.broadcast %514 : vector<32x1xf32> to vector<32x32xf32>
    %516 = arith.divf %512, %515 : vector<32x32xf32>
    %517 = vector.extract_strided_slice %501 {offsets = [0, 0], sizes = [32, 8], strides = [1, 1]} : vector<32x32xf32> to vector<32x8xf32>
    %cst_244 = arith.constant dense<0.000000e+00> : vector<32x8xf32>
    %518 = tpu.matmul %516, %517, %cst_244 {dimension_numbers = #tpu.dot_dimension_numbers<[1], [0], [0], [1], [0, 0, 1, 1], [], []>} : vector<32x32xf32>, vector<32x8xf32>, vector<32x8xf32> -> vector<32x8xf32>
    %519 = vector.extract_strided_slice %493 {offsets = [0, 0], sizes = [8, 32], strides = [1, 1]} : vector<32x32xf32> to vector<8x32xf32>
    %cst_245 = arith.constant dense<0.000000e+00> : vector<32x32xf32>
    %520 = tpu.matmul %518, %519, %cst_245 {dimension_numbers = #tpu.dot_dimension_numbers<[1], [0], [0], [1], [0, 0, 1, 1], [], []>} : vector<32x8xf32>, vector<8x32xf32>, vector<32x32xf32> -> vector<32x32xf32>
    %521 = vector.extract_strided_slice %499 {offsets = [0, 8], sizes = [32, 8], strides = [1, 1]} : vector<32x32xf32> to vector<32x8xf32>
    %522 = vector.extract_strided_slice %500 {offsets = [0, 8], sizes = [32, 8], strides = [1, 1]} : vector<32x32xf32> to vector<32x8xf32>
    %cst_246 = arith.constant dense<0.000000e+00> : vector<32x32xf32>
    %523 = tpu.matmul %521, %522, %cst_246 {dimension_numbers = #tpu.dot_dimension_numbers<[1], [1], [0], [0], [0, 0, 1, 0], [], []>} : vector<32x8xf32>, vector<32x8xf32>, vector<32x32xf32> -> vector<32x32xf32>
    %cst_247 = arith.constant 0.353553385 : f32
    %524 = vector.broadcast %cst_247 : f32 to vector<32x32xf32>
    %525 = arith.mulf %523, %524 : vector<32x32xf32>
    %526 = arith.addf %525, %2 : vector<32x32xf32>
    %cst_248 = arith.constant dense<0xFF800000> : vector<32xf32>
    %527 = vector.multi_reduction <maximumf>, %526, %cst_248 [1] : vector<32x32xf32> to vector<32xf32>
    %528 = vector.shape_cast %527 : vector<32xf32> to vector<32x1xf32>
    %529 = vector.broadcast %528 : vector<32x1xf32> to vector<32x32xf32>
    %530 = arith.subf %526, %529 : vector<32x32xf32>
    %531 = math.exp %530 : vector<32x32xf32>
    %cst_249 = arith.constant dense<0.000000e+00> : vector<32xf32>
    %532 = vector.multi_reduction <add>, %531, %cst_249 [1] : vector<32x32xf32> to vector<32xf32>
    %533 = vector.shape_cast %532 : vector<32xf32> to vector<32x1xf32>
    %534 = vector.broadcast %533 : vector<32x1xf32> to vector<32x32xf32>
    %535 = arith.divf %531, %534 : vector<32x32xf32>
    %536 = vector.extract_strided_slice %501 {offsets = [0, 8], sizes = [32, 8], strides = [1, 1]} : vector<32x32xf32> to vector<32x8xf32>
    %cst_250 = arith.constant dense<0.000000e+00> : vector<32x8xf32>
    %537 = tpu.matmul %535, %536, %cst_250 {dimension_numbers = #tpu.dot_dimension_numbers<[1], [0], [0], [1], [0, 0, 1, 1], [], []>} : vector<32x32xf32>, vector<32x8xf32>, vector<32x8xf32> -> vector<32x8xf32>
    %538 = vector.extract_strided_slice %493 {offsets = [8, 0], sizes = [8, 32], strides = [1, 1]} : vector<32x32xf32> to vector<8x32xf32>
    %cst_251 = arith.constant dense<0.000000e+00> : vector<32x32xf32>
    %539 = tpu.matmul %537, %538, %cst_251 {dimension_numbers = #tpu.dot_dimension_numbers<[1], [0], [0], [1], [0, 0, 1, 1], [], []>} : vector<32x8xf32>, vector<8x32xf32>, vector<32x32xf32> -> vector<32x32xf32>
    %540 = arith.addf %520, %539 : vector<32x32xf32>
    %541 = vector.extract_strided_slice %499 {offsets = [0, 16], sizes = [32, 8], strides = [1, 1]} : vector<32x32xf32> to vector<32x8xf32>
    %542 = vector.extract_strided_slice %500 {offsets = [0, 16], sizes = [32, 8], strides = [1, 1]} : vector<32x32xf32> to vector<32x8xf32>
    %cst_252 = arith.constant dense<0.000000e+00> : vector<32x32xf32>
    %543 = tpu.matmul %541, %542, %cst_252 {dimension_numbers = #tpu.dot_dimension_numbers<[1], [1], [0], [0], [0, 0, 1, 0], [], []>} : vector<32x8xf32>, vector<32x8xf32>, vector<32x32xf32> -> vector<32x32xf32>
    %cst_253 = arith.constant 0.353553385 : f32
    %544 = vector.broadcast %cst_253 : f32 to vector<32x32xf32>
    %545 = arith.mulf %543, %544 : vector<32x32xf32>
    %546 = arith.addf %545, %2 : vector<32x32xf32>
    %cst_254 = arith.constant dense<0xFF800000> : vector<32xf32>
    %547 = vector.multi_reduction <maximumf>, %546, %cst_254 [1] : vector<32x32xf32> to vector<32xf32>
    %548 = vector.shape_cast %547 : vector<32xf32> to vector<32x1xf32>
    %549 = vector.broadcast %548 : vector<32x1xf32> to vector<32x32xf32>
    %550 = arith.subf %546, %549 : vector<32x32xf32>
    %551 = math.exp %550 : vector<32x32xf32>
    %cst_255 = arith.constant dense<0.000000e+00> : vector<32xf32>
    %552 = vector.multi_reduction <add>, %551, %cst_255 [1] : vector<32x32xf32> to vector<32xf32>
    %553 = vector.shape_cast %552 : vector<32xf32> to vector<32x1xf32>
    %554 = vector.broadcast %553 : vector<32x1xf32> to vector<32x32xf32>
    %555 = arith.divf %551, %554 : vector<32x32xf32>
    %556 = vector.extract_strided_slice %501 {offsets = [0, 16], sizes = [32, 8], strides = [1, 1]} : vector<32x32xf32> to vector<32x8xf32>
    %cst_256 = arith.constant dense<0.000000e+00> : vector<32x8xf32>
    %557 = tpu.matmul %555, %556, %cst_256 {dimension_numbers = #tpu.dot_dimension_numbers<[1], [0], [0], [1], [0, 0, 1, 1], [], []>} : vector<32x32xf32>, vector<32x8xf32>, vector<32x8xf32> -> vector<32x8xf32>
    %558 = vector.extract_strided_slice %493 {offsets = [16, 0], sizes = [8, 32], strides = [1, 1]} : vector<32x32xf32> to vector<8x32xf32>
    %cst_257 = arith.constant dense<0.000000e+00> : vector<32x32xf32>
    %559 = tpu.matmul %557, %558, %cst_257 {dimension_numbers = #tpu.dot_dimension_numbers<[1], [0], [0], [1], [0, 0, 1, 1], [], []>} : vector<32x8xf32>, vector<8x32xf32>, vector<32x32xf32> -> vector<32x32xf32>
    %560 = arith.addf %540, %559 : vector<32x32xf32>
    %561 = vector.extract_strided_slice %499 {offsets = [0, 24], sizes = [32, 8], strides = [1, 1]} : vector<32x32xf32> to vector<32x8xf32>
    %562 = vector.extract_strided_slice %500 {offsets = [0, 24], sizes = [32, 8], strides = [1, 1]} : vector<32x32xf32> to vector<32x8xf32>
    %cst_258 = arith.constant dense<0.000000e+00> : vector<32x32xf32>
    %563 = tpu.matmul %561, %562, %cst_258 {dimension_numbers = #tpu.dot_dimension_numbers<[1], [1], [0], [0], [0, 0, 1, 0], [], []>} : vector<32x8xf32>, vector<32x8xf32>, vector<32x32xf32> -> vector<32x32xf32>
    %cst_259 = arith.constant 0.353553385 : f32
    %564 = vector.broadcast %cst_259 : f32 to vector<32x32xf32>
    %565 = arith.mulf %563, %564 : vector<32x32xf32>
    %566 = arith.addf %565, %2 : vector<32x32xf32>
    %cst_260 = arith.constant dense<0xFF800000> : vector<32xf32>
    %567 = vector.multi_reduction <maximumf>, %566, %cst_260 [1] : vector<32x32xf32> to vector<32xf32>
    %568 = vector.shape_cast %567 : vector<32xf32> to vector<32x1xf32>
    %569 = vector.broadcast %568 : vector<32x1xf32> to vector<32x32xf32>
    %570 = arith.subf %566, %569 : vector<32x32xf32>
    %571 = math.exp %570 : vector<32x32xf32>
    %cst_261 = arith.constant dense<0.000000e+00> : vector<32xf32>
    %572 = vector.multi_reduction <add>, %571, %cst_261 [1] : vector<32x32xf32> to vector<32xf32>
    %573 = vector.shape_cast %572 : vector<32xf32> to vector<32x1xf32>
    %574 = vector.broadcast %573 : vector<32x1xf32> to vector<32x32xf32>
    %575 = arith.divf %571, %574 : vector<32x32xf32>
    %576 = vector.extract_strided_slice %501 {offsets = [0, 24], sizes = [32, 8], strides = [1, 1]} : vector<32x32xf32> to vector<32x8xf32>
    %cst_262 = arith.constant dense<0.000000e+00> : vector<32x8xf32>
    %577 = tpu.matmul %575, %576, %cst_262 {dimension_numbers = #tpu.dot_dimension_numbers<[1], [0], [0], [1], [0, 0, 1, 1], [], []>} : vector<32x32xf32>, vector<32x8xf32>, vector<32x8xf32> -> vector<32x8xf32>
    %578 = vector.extract_strided_slice %493 {offsets = [24, 0], sizes = [8, 32], strides = [1, 1]} : vector<32x32xf32> to vector<8x32xf32>
    %cst_263 = arith.constant dense<0.000000e+00> : vector<32x32xf32>
    %579 = tpu.matmul %577, %578, %cst_263 {dimension_numbers = #tpu.dot_dimension_numbers<[1], [0], [0], [1], [0, 0, 1, 1], [], []>} : vector<32x8xf32>, vector<8x32xf32>, vector<32x32xf32> -> vector<32x32xf32>
    %580 = arith.addf %560, %579 : vector<32x32xf32>
    %581 = vector.broadcast %495 : vector<1x32xf32> to vector<32x32xf32>
    %582 = arith.addf %580, %581 : vector<32x32xf32>
    %583 = arith.addf %487, %582 : vector<32x32xf32>
    %c3_264 = arith.constant 3 : index
    %c0_265 = arith.constant 0 : index
    %c0_266 = arith.constant 0 : index
    %584 = vector.load %arg13[%c3_264, %c0_265, %c0_266] : memref<4x1x32xf32, #tpu.memory_space<vmem>>, vector<1x1x32xf32>
    %585 = vector.shape_cast %584 : vector<1x1x32xf32> to vector<1x32xf32>
    %c3_267 = arith.constant 3 : index
    %c0_268 = arith.constant 0 : index
    %c0_269 = arith.constant 0 : index
    %586 = vector.load %arg14[%c3_267, %c0_268, %c0_269] : memref<4x1x32xf32, #tpu.memory_space<vmem>>, vector<1x1x32xf32>
    %587 = vector.shape_cast %586 : vector<1x1x32xf32> to vector<1x32xf32>
    %cst_270 = arith.constant dense<0.000000e+00> : vector<32xf32>
    %588 = vector.multi_reduction <add>, %583, %cst_270 [1] : vector<32x32xf32> to vector<32xf32>
    %589 = vector.shape_cast %588 : vector<32xf32> to vector<32x1xf32>
    %cst_271 = arith.constant 3.200000e+01 : f32
    %590 = vector.broadcast %cst_271 : f32 to vector<32x1xf32>
    %591 = arith.divf %589, %590 : vector<32x1xf32>
    %592 = vector.broadcast %591 : vector<32x1xf32> to vector<32x32xf32>
    %593 = arith.subf %583, %592 : vector<32x32xf32>
    %594 = arith.mulf %593, %593 : vector<32x32xf32>
    %cst_272 = arith.constant dense<0.000000e+00> : vector<32xf32>
    %595 = vector.multi_reduction <add>, %594, %cst_272 [1] : vector<32x32xf32> to vector<32xf32>
    %596 = vector.shape_cast %595 : vector<32xf32> to vector<32x1xf32>
    %cst_273 = arith.constant 3.100000e+01 : f32
    %597 = vector.broadcast %cst_273 : f32 to vector<32x1xf32>
    %598 = arith.divf %596, %597 : vector<32x1xf32>
    %599 = vector.broadcast %585 : vector<1x32xf32> to vector<32x32xf32>
    %600 = arith.mulf %599, %593 : vector<32x32xf32>
    %601 = math.sqrt %598 : vector<32x1xf32>
    %cst_274 = arith.constant 9.99999997E-7 : f32
    %602 = vector.broadcast %cst_274 : f32 to vector<32x1xf32>
    %603 = arith.addf %601, %602 : vector<32x1xf32>
    %604 = vector.broadcast %603 : vector<32x1xf32> to vector<32x32xf32>
    %605 = arith.divf %600, %604 : vector<32x32xf32>
    %606 = vector.broadcast %587 : vector<1x32xf32> to vector<32x32xf32>
    %607 = arith.addf %605, %606 : vector<32x32xf32>
    %c3_275 = arith.constant 3 : index
    %c0_276 = arith.constant 0 : index
    %c0_277 = arith.constant 0 : index
    %608 = vector.load %arg9[%c3_275, %c0_276, %c0_277] : memref<4x32x128xf32, #tpu.memory_space<vmem>>, vector<1x32x128xf32>
    %609 = vector.shape_cast %608 : vector<1x32x128xf32> to vector<32x128xf32>
    %c3_278 = arith.constant 3 : index
    %c0_279 = arith.constant 0 : index
    %c0_280 = arith.constant 0 : index
    %610 = vector.load %arg10[%c3_278, %c0_279, %c0_280] : memref<4x1x128xf32, #tpu.memory_space<vmem>>, vector<1x1x128xf32>
    %611 = vector.shape_cast %610 : vector<1x1x128xf32> to vector<1x128xf32>
    %c3_281 = arith.constant 3 : index
    %c0_282 = arith.constant 0 : index
    %c0_283 = arith.constant 0 : index
    %612 = vector.load %arg11[%c3_281, %c0_282, %c0_283] : memref<4x128x32xf32, #tpu.memory_space<vmem>>, vector<1x128x32xf32>
    %613 = vector.shape_cast %612 : vector<1x128x32xf32> to vector<128x32xf32>
    %c3_284 = arith.constant 3 : index
    %c0_285 = arith.constant 0 : index
    %c0_286 = arith.constant 0 : index
    %614 = vector.load %arg12[%c3_284, %c0_285, %c0_286] : memref<4x1x32xf32, #tpu.memory_space<vmem>>, vector<1x1x32xf32>
    %615 = vector.shape_cast %614 : vector<1x1x32xf32> to vector<1x32xf32>
    %cst_287 = arith.constant dense<0.000000e+00> : vector<32x128xf32>
    %616 = tpu.matmul %607, %609, %cst_287 {dimension_numbers = #tpu.dot_dimension_numbers<[1], [0], [0], [1], [0, 0, 1, 1], [], []>} : vector<32x32xf32>, vector<32x128xf32>, vector<32x128xf32> -> vector<32x128xf32>
    %617 = vector.broadcast %611 : vector<1x128xf32> to vector<32x128xf32>
    %618 = arith.addf %616, %617 : vector<32x128xf32>
    %cst_288 = arith.constant 0.000000e+00 : f32
    %619 = vector.broadcast %cst_288 : f32 to vector<32x128xf32>
    %620 = arith.maximumf %618, %619 : vector<32x128xf32>
    %cst_289 = arith.constant dense<0.000000e+00> : vector<32x32xf32>
    %621 = tpu.matmul %620, %613, %cst_289 {dimension_numbers = #tpu.dot_dimension_numbers<[1], [0], [0], [1], [0, 0, 1, 1], [], []>} : vector<32x128xf32>, vector<128x32xf32>, vector<32x32xf32> -> vector<32x32xf32>
    %622 = vector.broadcast %615 : vector<1x32xf32> to vector<32x32xf32>
    %623 = arith.addf %621, %622 : vector<32x32xf32>
    %624 = arith.addf %607, %623 : vector<32x32xf32>
    %c3_290 = arith.constant 3 : index
    %c0_291 = arith.constant 0 : index
    %c0_292 = arith.constant 0 : index
    %625 = vector.load %arg15[%c3_290, %c0_291, %c0_292] : memref<4x1x32xf32, #tpu.memory_space<vmem>>, vector<1x1x32xf32>
    %626 = vector.shape_cast %625 : vector<1x1x32xf32> to vector<1x32xf32>
    %c3_293 = arith.constant 3 : index
    %c0_294 = arith.constant 0 : index
    %c0_295 = arith.constant 0 : index
    %627 = vector.load %arg16[%c3_293, %c0_294, %c0_295] : memref<4x1x32xf32, #tpu.memory_space<vmem>>, vector<1x1x32xf32>
    %628 = vector.shape_cast %627 : vector<1x1x32xf32> to vector<1x32xf32>
    %cst_296 = arith.constant dense<0.000000e+00> : vector<32xf32>
    %629 = vector.multi_reduction <add>, %624, %cst_296 [1] : vector<32x32xf32> to vector<32xf32>
    %630 = vector.shape_cast %629 : vector<32xf32> to vector<32x1xf32>
    %cst_297 = arith.constant 3.200000e+01 : f32
    %631 = vector.broadcast %cst_297 : f32 to vector<32x1xf32>
    %632 = arith.divf %630, %631 : vector<32x1xf32>
    %633 = vector.broadcast %632 : vector<32x1xf32> to vector<32x32xf32>
    %634 = arith.subf %624, %633 : vector<32x32xf32>
    %635 = arith.mulf %634, %634 : vector<32x32xf32>
    %cst_298 = arith.constant dense<0.000000e+00> : vector<32xf32>
    %636 = vector.multi_reduction <add>, %635, %cst_298 [1] : vector<32x32xf32> to vector<32xf32>
    %637 = vector.shape_cast %636 : vector<32xf32> to vector<32x1xf32>
    %cst_299 = arith.constant 3.100000e+01 : f32
    %638 = vector.broadcast %cst_299 : f32 to vector<32x1xf32>
    %639 = arith.divf %637, %638 : vector<32x1xf32>
    %640 = vector.broadcast %626 : vector<1x32xf32> to vector<32x32xf32>
    %641 = arith.mulf %640, %634 : vector<32x32xf32>
    %642 = math.sqrt %639 : vector<32x1xf32>
    %cst_300 = arith.constant 9.99999997E-7 : f32
    %643 = vector.broadcast %cst_300 : f32 to vector<32x1xf32>
    %644 = arith.addf %642, %643 : vector<32x1xf32>
    %645 = vector.broadcast %644 : vector<32x1xf32> to vector<32x32xf32>
    %646 = arith.divf %641, %645 : vector<32x32xf32>
    %647 = vector.broadcast %628 : vector<1x32xf32> to vector<32x32xf32>
    %648 = arith.addf %646, %647 : vector<32x32xf32>
    %649 = arith.addf %326, %648 : vector<32x32xf32>
    %c0_301 = arith.constant 0 : index
    %c0_302 = arith.constant 0 : index
    %c0_303 = arith.constant 0 : index
    %650 = vector.load %arg17[%c0_301, %c0_302, %c0_303] : memref<2x32x96xf32, #tpu.memory_space<vmem>>, vector<1x32x96xf32>
    %651 = vector.shape_cast %650 : vector<1x32x96xf32> to vector<32x96xf32>
    %c0_304 = arith.constant 0 : index
    %c0_305 = arith.constant 0 : index
    %c0_306 = arith.constant 0 : index
    %652 = vector.load %arg18[%c0_304, %c0_305, %c0_306] : memref<2x1x96xf32, #tpu.memory_space<vmem>>, vector<1x1x96xf32>
    %653 = vector.shape_cast %652 : vector<1x1x96xf32> to vector<1x96xf32>
    %c0_307 = arith.constant 0 : index
    %c0_308 = arith.constant 0 : index
    %c0_309 = arith.constant 0 : index
    %654 = vector.load %arg19[%c0_307, %c0_308, %c0_309] : memref<2x32x32xf32, #tpu.memory_space<vmem>>, vector<1x32x32xf32>
    %655 = vector.shape_cast %654 : vector<1x32x32xf32> to vector<32x32xf32>
    %c0_310 = arith.constant 0 : index
    %c0_311 = arith.constant 0 : index
    %c0_312 = arith.constant 0 : index
    %656 = vector.load %arg20[%c0_310, %c0_311, %c0_312] : memref<2x1x32xf32, #tpu.memory_space<vmem>>, vector<1x1x32xf32>
    %657 = vector.shape_cast %656 : vector<1x1x32xf32> to vector<1x32xf32>
    %cst_313 = arith.constant dense<0.000000e+00> : vector<16x96xf32>
    %658 = tpu.matmul %1, %651, %cst_313 {dimension_numbers = #tpu.dot_dimension_numbers<[1], [0], [0], [1], [0, 0, 1, 1], [], []>} : vector<16x32xf32>, vector<32x96xf32>, vector<16x96xf32> -> vector<16x96xf32>
    %659 = vector.broadcast %653 : vector<1x96xf32> to vector<16x96xf32>
    %660 = arith.addf %658, %659 : vector<16x96xf32>
    %661 = vector.extract_strided_slice %660 {offsets = [0, 0], sizes = [16, 32], strides = [1, 1]} : vector<16x96xf32> to vector<16x32xf32>
    %662 = vector.extract_strided_slice %660 {offsets = [0, 32], sizes = [16, 32], strides = [1, 1]} : vector<16x96xf32> to vector<16x32xf32>
    %663 = vector.extract_strided_slice %660 {offsets = [0, 64], sizes = [16, 32], strides = [1, 1]} : vector<16x96xf32> to vector<16x32xf32>
    %664 = vector.extract_strided_slice %661 {offsets = [0, 0], sizes = [16, 8], strides = [1, 1]} : vector<16x32xf32> to vector<16x8xf32>
    %665 = vector.extract_strided_slice %662 {offsets = [0, 0], sizes = [16, 8], strides = [1, 1]} : vector<16x32xf32> to vector<16x8xf32>
    %cst_314 = arith.constant dense<0.000000e+00> : vector<16x16xf32>
    %666 = tpu.matmul %664, %665, %cst_314 {dimension_numbers = #tpu.dot_dimension_numbers<[1], [1], [0], [0], [0, 0, 1, 0], [], []>} : vector<16x8xf32>, vector<16x8xf32>, vector<16x16xf32> -> vector<16x16xf32>
    %cst_315 = arith.constant 0.353553385 : f32
    %667 = vector.broadcast %cst_315 : f32 to vector<16x16xf32>
    %668 = arith.mulf %666, %667 : vector<16x16xf32>
    %669 = arith.addf %668, %3 : vector<16x16xf32>
    %cst_316 = arith.constant dense<0xFF800000> : vector<16xf32>
    %670 = vector.multi_reduction <maximumf>, %669, %cst_316 [1] : vector<16x16xf32> to vector<16xf32>
    %671 = vector.shape_cast %670 : vector<16xf32> to vector<16x1xf32>
    %672 = vector.broadcast %671 : vector<16x1xf32> to vector<16x16xf32>
    %673 = arith.subf %669, %672 : vector<16x16xf32>
    %674 = math.exp %673 : vector<16x16xf32>
    %cst_317 = arith.constant dense<0.000000e+00> : vector<16xf32>
    %675 = vector.multi_reduction <add>, %674, %cst_317 [1] : vector<16x16xf32> to vector<16xf32>
    %676 = vector.shape_cast %675 : vector<16xf32> to vector<16x1xf32>
    %677 = vector.broadcast %676 : vector<16x1xf32> to vector<16x16xf32>
    %678 = arith.divf %674, %677 : vector<16x16xf32>
    %679 = vector.extract_strided_slice %663 {offsets = [0, 0], sizes = [16, 8], strides = [1, 1]} : vector<16x32xf32> to vector<16x8xf32>
    %cst_318 = arith.constant dense<0.000000e+00> : vector<16x8xf32>
    %680 = tpu.matmul %678, %679, %cst_318 {dimension_numbers = #tpu.dot_dimension_numbers<[1], [0], [0], [1], [0, 0, 1, 1], [], []>} : vector<16x16xf32>, vector<16x8xf32>, vector<16x8xf32> -> vector<16x8xf32>
    %681 = vector.extract_strided_slice %655 {offsets = [0, 0], sizes = [8, 32], strides = [1, 1]} : vector<32x32xf32> to vector<8x32xf32>
    %cst_319 = arith.constant dense<0.000000e+00> : vector<16x32xf32>
    %682 = tpu.matmul %680, %681, %cst_319 {dimension_numbers = #tpu.dot_dimension_numbers<[1], [0], [0], [1], [0, 0, 1, 1], [], []>} : vector<16x8xf32>, vector<8x32xf32>, vector<16x32xf32> -> vector<16x32xf32>
    %683 = vector.extract_strided_slice %661 {offsets = [0, 8], sizes = [16, 8], strides = [1, 1]} : vector<16x32xf32> to vector<16x8xf32>
    %684 = vector.extract_strided_slice %662 {offsets = [0, 8], sizes = [16, 8], strides = [1, 1]} : vector<16x32xf32> to vector<16x8xf32>
    %cst_320 = arith.constant dense<0.000000e+00> : vector<16x16xf32>
    %685 = tpu.matmul %683, %684, %cst_320 {dimension_numbers = #tpu.dot_dimension_numbers<[1], [1], [0], [0], [0, 0, 1, 0], [], []>} : vector<16x8xf32>, vector<16x8xf32>, vector<16x16xf32> -> vector<16x16xf32>
    %cst_321 = arith.constant 0.353553385 : f32
    %686 = vector.broadcast %cst_321 : f32 to vector<16x16xf32>
    %687 = arith.mulf %685, %686 : vector<16x16xf32>
    %688 = arith.addf %687, %3 : vector<16x16xf32>
    %cst_322 = arith.constant dense<0xFF800000> : vector<16xf32>
    %689 = vector.multi_reduction <maximumf>, %688, %cst_322 [1] : vector<16x16xf32> to vector<16xf32>
    %690 = vector.shape_cast %689 : vector<16xf32> to vector<16x1xf32>
    %691 = vector.broadcast %690 : vector<16x1xf32> to vector<16x16xf32>
    %692 = arith.subf %688, %691 : vector<16x16xf32>
    %693 = math.exp %692 : vector<16x16xf32>
    %cst_323 = arith.constant dense<0.000000e+00> : vector<16xf32>
    %694 = vector.multi_reduction <add>, %693, %cst_323 [1] : vector<16x16xf32> to vector<16xf32>
    %695 = vector.shape_cast %694 : vector<16xf32> to vector<16x1xf32>
    %696 = vector.broadcast %695 : vector<16x1xf32> to vector<16x16xf32>
    %697 = arith.divf %693, %696 : vector<16x16xf32>
    %698 = vector.extract_strided_slice %663 {offsets = [0, 8], sizes = [16, 8], strides = [1, 1]} : vector<16x32xf32> to vector<16x8xf32>
    %cst_324 = arith.constant dense<0.000000e+00> : vector<16x8xf32>
    %699 = tpu.matmul %697, %698, %cst_324 {dimension_numbers = #tpu.dot_dimension_numbers<[1], [0], [0], [1], [0, 0, 1, 1], [], []>} : vector<16x16xf32>, vector<16x8xf32>, vector<16x8xf32> -> vector<16x8xf32>
    %700 = vector.extract_strided_slice %655 {offsets = [8, 0], sizes = [8, 32], strides = [1, 1]} : vector<32x32xf32> to vector<8x32xf32>
    %cst_325 = arith.constant dense<0.000000e+00> : vector<16x32xf32>
    %701 = tpu.matmul %699, %700, %cst_325 {dimension_numbers = #tpu.dot_dimension_numbers<[1], [0], [0], [1], [0, 0, 1, 1], [], []>} : vector<16x8xf32>, vector<8x32xf32>, vector<16x32xf32> -> vector<16x32xf32>
    %702 = arith.addf %682, %701 : vector<16x32xf32>
    %703 = vector.extract_strided_slice %661 {offsets = [0, 16], sizes = [16, 8], strides = [1, 1]} : vector<16x32xf32> to vector<16x8xf32>
    %704 = vector.extract_strided_slice %662 {offsets = [0, 16], sizes = [16, 8], strides = [1, 1]} : vector<16x32xf32> to vector<16x8xf32>
    %cst_326 = arith.constant dense<0.000000e+00> : vector<16x16xf32>
    %705 = tpu.matmul %703, %704, %cst_326 {dimension_numbers = #tpu.dot_dimension_numbers<[1], [1], [0], [0], [0, 0, 1, 0], [], []>} : vector<16x8xf32>, vector<16x8xf32>, vector<16x16xf32> -> vector<16x16xf32>
    %cst_327 = arith.constant 0.353553385 : f32
    %706 = vector.broadcast %cst_327 : f32 to vector<16x16xf32>
    %707 = arith.mulf %705, %706 : vector<16x16xf32>
    %708 = arith.addf %707, %3 : vector<16x16xf32>
    %cst_328 = arith.constant dense<0xFF800000> : vector<16xf32>
    %709 = vector.multi_reduction <maximumf>, %708, %cst_328 [1] : vector<16x16xf32> to vector<16xf32>
    %710 = vector.shape_cast %709 : vector<16xf32> to vector<16x1xf32>
    %711 = vector.broadcast %710 : vector<16x1xf32> to vector<16x16xf32>
    %712 = arith.subf %708, %711 : vector<16x16xf32>
    %713 = math.exp %712 : vector<16x16xf32>
    %cst_329 = arith.constant dense<0.000000e+00> : vector<16xf32>
    %714 = vector.multi_reduction <add>, %713, %cst_329 [1] : vector<16x16xf32> to vector<16xf32>
    %715 = vector.shape_cast %714 : vector<16xf32> to vector<16x1xf32>
    %716 = vector.broadcast %715 : vector<16x1xf32> to vector<16x16xf32>
    %717 = arith.divf %713, %716 : vector<16x16xf32>
    %718 = vector.extract_strided_slice %663 {offsets = [0, 16], sizes = [16, 8], strides = [1, 1]} : vector<16x32xf32> to vector<16x8xf32>
    %cst_330 = arith.constant dense<0.000000e+00> : vector<16x8xf32>
    %719 = tpu.matmul %717, %718, %cst_330 {dimension_numbers = #tpu.dot_dimension_numbers<[1], [0], [0], [1], [0, 0, 1, 1], [], []>} : vector<16x16xf32>, vector<16x8xf32>, vector<16x8xf32> -> vector<16x8xf32>
    %720 = vector.extract_strided_slice %655 {offsets = [16, 0], sizes = [8, 32], strides = [1, 1]} : vector<32x32xf32> to vector<8x32xf32>
    %cst_331 = arith.constant dense<0.000000e+00> : vector<16x32xf32>
    %721 = tpu.matmul %719, %720, %cst_331 {dimension_numbers = #tpu.dot_dimension_numbers<[1], [0], [0], [1], [0, 0, 1, 1], [], []>} : vector<16x8xf32>, vector<8x32xf32>, vector<16x32xf32> -> vector<16x32xf32>
    %722 = arith.addf %702, %721 : vector<16x32xf32>
    %723 = vector.extract_strided_slice %661 {offsets = [0, 24], sizes = [16, 8], strides = [1, 1]} : vector<16x32xf32> to vector<16x8xf32>
    %724 = vector.extract_strided_slice %662 {offsets = [0, 24], sizes = [16, 8], strides = [1, 1]} : vector<16x32xf32> to vector<16x8xf32>
    %cst_332 = arith.constant dense<0.000000e+00> : vector<16x16xf32>
    %725 = tpu.matmul %723, %724, %cst_332 {dimension_numbers = #tpu.dot_dimension_numbers<[1], [1], [0], [0], [0, 0, 1, 0], [], []>} : vector<16x8xf32>, vector<16x8xf32>, vector<16x16xf32> -> vector<16x16xf32>
    %cst_333 = arith.constant 0.353553385 : f32
    %726 = vector.broadcast %cst_333 : f32 to vector<16x16xf32>
    %727 = arith.mulf %725, %726 : vector<16x16xf32>
    %728 = arith.addf %727, %3 : vector<16x16xf32>
    %cst_334 = arith.constant dense<0xFF800000> : vector<16xf32>
    %729 = vector.multi_reduction <maximumf>, %728, %cst_334 [1] : vector<16x16xf32> to vector<16xf32>
    %730 = vector.shape_cast %729 : vector<16xf32> to vector<16x1xf32>
    %731 = vector.broadcast %730 : vector<16x1xf32> to vector<16x16xf32>
    %732 = arith.subf %728, %731 : vector<16x16xf32>
    %733 = math.exp %732 : vector<16x16xf32>
    %cst_335 = arith.constant dense<0.000000e+00> : vector<16xf32>
    %734 = vector.multi_reduction <add>, %733, %cst_335 [1] : vector<16x16xf32> to vector<16xf32>
    %735 = vector.shape_cast %734 : vector<16xf32> to vector<16x1xf32>
    %736 = vector.broadcast %735 : vector<16x1xf32> to vector<16x16xf32>
    %737 = arith.divf %733, %736 : vector<16x16xf32>
    %738 = vector.extract_strided_slice %663 {offsets = [0, 24], sizes = [16, 8], strides = [1, 1]} : vector<16x32xf32> to vector<16x8xf32>
    %cst_336 = arith.constant dense<0.000000e+00> : vector<16x8xf32>
    %739 = tpu.matmul %737, %738, %cst_336 {dimension_numbers = #tpu.dot_dimension_numbers<[1], [0], [0], [1], [0, 0, 1, 1], [], []>} : vector<16x16xf32>, vector<16x8xf32>, vector<16x8xf32> -> vector<16x8xf32>
    %740 = vector.extract_strided_slice %655 {offsets = [24, 0], sizes = [8, 32], strides = [1, 1]} : vector<32x32xf32> to vector<8x32xf32>
    %cst_337 = arith.constant dense<0.000000e+00> : vector<16x32xf32>
    %741 = tpu.matmul %739, %740, %cst_337 {dimension_numbers = #tpu.dot_dimension_numbers<[1], [0], [0], [1], [0, 0, 1, 1], [], []>} : vector<16x8xf32>, vector<8x32xf32>, vector<16x32xf32> -> vector<16x32xf32>
    %742 = arith.addf %722, %741 : vector<16x32xf32>
    %743 = vector.broadcast %657 : vector<1x32xf32> to vector<16x32xf32>
    %744 = arith.addf %742, %743 : vector<16x32xf32>
    %745 = arith.addf %1, %744 : vector<16x32xf32>
    %c0_338 = arith.constant 0 : index
    %c0_339 = arith.constant 0 : index
    %c0_340 = arith.constant 0 : index
    %746 = vector.load %arg29[%c0_338, %c0_339, %c0_340] : memref<2x1x32xf32, #tpu.memory_space<vmem>>, vector<1x1x32xf32>
    %747 = vector.shape_cast %746 : vector<1x1x32xf32> to vector<1x32xf32>
    %c0_341 = arith.constant 0 : index
    %c0_342 = arith.constant 0 : index
    %c0_343 = arith.constant 0 : index
    %748 = vector.load %arg30[%c0_341, %c0_342, %c0_343] : memref<2x1x32xf32, #tpu.memory_space<vmem>>, vector<1x1x32xf32>
    %749 = vector.shape_cast %748 : vector<1x1x32xf32> to vector<1x32xf32>
    %cst_344 = arith.constant dense<0.000000e+00> : vector<16xf32>
    %750 = vector.multi_reduction <add>, %745, %cst_344 [1] : vector<16x32xf32> to vector<16xf32>
    %751 = vector.shape_cast %750 : vector<16xf32> to vector<16x1xf32>
    %cst_345 = arith.constant 3.200000e+01 : f32
    %752 = vector.broadcast %cst_345 : f32 to vector<16x1xf32>
    %753 = arith.divf %751, %752 : vector<16x1xf32>
    %754 = vector.broadcast %753 : vector<16x1xf32> to vector<16x32xf32>
    %755 = arith.subf %745, %754 : vector<16x32xf32>
    %756 = arith.mulf %755, %755 : vector<16x32xf32>
    %cst_346 = arith.constant dense<0.000000e+00> : vector<16xf32>
    %757 = vector.multi_reduction <add>, %756, %cst_346 [1] : vector<16x32xf32> to vector<16xf32>
    %758 = vector.shape_cast %757 : vector<16xf32> to vector<16x1xf32>
    %cst_347 = arith.constant 3.100000e+01 : f32
    %759 = vector.broadcast %cst_347 : f32 to vector<16x1xf32>
    %760 = arith.divf %758, %759 : vector<16x1xf32>
    %761 = vector.broadcast %747 : vector<1x32xf32> to vector<16x32xf32>
    %762 = arith.mulf %761, %755 : vector<16x32xf32>
    %763 = math.sqrt %760 : vector<16x1xf32>
    %cst_348 = arith.constant 9.99999997E-7 : f32
    %764 = vector.broadcast %cst_348 : f32 to vector<16x1xf32>
    %765 = arith.addf %763, %764 : vector<16x1xf32>
    %766 = vector.broadcast %765 : vector<16x1xf32> to vector<16x32xf32>
    %767 = arith.divf %762, %766 : vector<16x32xf32>
    %768 = vector.broadcast %749 : vector<1x32xf32> to vector<16x32xf32>
    %769 = arith.addf %767, %768 : vector<16x32xf32>
    %c0_349 = arith.constant 0 : index
    %c0_350 = arith.constant 0 : index
    %c0_351 = arith.constant 0 : index
    %770 = vector.load %arg21[%c0_349, %c0_350, %c0_351] : memref<2x32x96xf32, #tpu.memory_space<vmem>>, vector<1x32x96xf32>
    %771 = vector.shape_cast %770 : vector<1x32x96xf32> to vector<32x96xf32>
    %c0_352 = arith.constant 0 : index
    %c0_353 = arith.constant 0 : index
    %c0_354 = arith.constant 0 : index
    %772 = vector.load %arg22[%c0_352, %c0_353, %c0_354] : memref<2x1x96xf32, #tpu.memory_space<vmem>>, vector<1x1x96xf32>
    %773 = vector.shape_cast %772 : vector<1x1x96xf32> to vector<1x96xf32>
    %c0_355 = arith.constant 0 : index
    %c0_356 = arith.constant 0 : index
    %c0_357 = arith.constant 0 : index
    %774 = vector.load %arg23[%c0_355, %c0_356, %c0_357] : memref<2x32x32xf32, #tpu.memory_space<vmem>>, vector<1x32x32xf32>
    %775 = vector.shape_cast %774 : vector<1x32x32xf32> to vector<32x32xf32>
    %c0_358 = arith.constant 0 : index
    %c0_359 = arith.constant 0 : index
    %c0_360 = arith.constant 0 : index
    %776 = vector.load %arg24[%c0_358, %c0_359, %c0_360] : memref<2x1x32xf32, #tpu.memory_space<vmem>>, vector<1x1x32xf32>
    %777 = vector.shape_cast %776 : vector<1x1x32xf32> to vector<1x32xf32>
    %778 = vector.extract_strided_slice %771 {offsets = [0, 0], sizes = [32, 32], strides = [1, 1]} : vector<32x96xf32> to vector<32x32xf32>
    %cst_361 = arith.constant dense<0.000000e+00> : vector<16x32xf32>
    %779 = tpu.matmul %769, %778, %cst_361 {dimension_numbers = #tpu.dot_dimension_numbers<[1], [0], [0], [1], [0, 0, 1, 1], [], []>} : vector<16x32xf32>, vector<32x32xf32>, vector<16x32xf32> -> vector<16x32xf32>
    %780 = vector.extract_strided_slice %773 {offsets = [0, 0], sizes = [1, 32], strides = [1, 1]} : vector<1x96xf32> to vector<1x32xf32>
    %781 = vector.broadcast %780 : vector<1x32xf32> to vector<16x32xf32>
    %782 = arith.addf %779, %781 : vector<16x32xf32>
    %783 = vector.extract_strided_slice %771 {offsets = [0, 32], sizes = [32, 64], strides = [1, 1]} : vector<32x96xf32> to vector<32x64xf32>
    %cst_362 = arith.constant dense<0.000000e+00> : vector<32x64xf32>
    %784 = tpu.matmul %649, %783, %cst_362 {dimension_numbers = #tpu.dot_dimension_numbers<[1], [0], [0], [1], [0, 0, 1, 1], [], []>} : vector<32x32xf32>, vector<32x64xf32>, vector<32x64xf32> -> vector<32x64xf32>
    %785 = vector.extract_strided_slice %773 {offsets = [0, 32], sizes = [1, 64], strides = [1, 1]} : vector<1x96xf32> to vector<1x64xf32>
    %786 = vector.broadcast %785 : vector<1x64xf32> to vector<32x64xf32>
    %787 = arith.addf %784, %786 : vector<32x64xf32>
    %788 = vector.extract_strided_slice %787 {offsets = [0, 0], sizes = [32, 32], strides = [1, 1]} : vector<32x64xf32> to vector<32x32xf32>
    %789 = vector.extract_strided_slice %787 {offsets = [0, 32], sizes = [32, 32], strides = [1, 1]} : vector<32x64xf32> to vector<32x32xf32>
    %790 = vector.extract_strided_slice %782 {offsets = [0, 0], sizes = [16, 8], strides = [1, 1]} : vector<16x32xf32> to vector<16x8xf32>
    %791 = vector.extract_strided_slice %788 {offsets = [0, 0], sizes = [32, 8], strides = [1, 1]} : vector<32x32xf32> to vector<32x8xf32>
    %cst_363 = arith.constant dense<0.000000e+00> : vector<16x32xf32>
    %792 = tpu.matmul %790, %791, %cst_363 {dimension_numbers = #tpu.dot_dimension_numbers<[1], [1], [0], [0], [0, 0, 1, 0], [], []>} : vector<16x8xf32>, vector<32x8xf32>, vector<16x32xf32> -> vector<16x32xf32>
    %cst_364 = arith.constant 0.353553385 : f32
    %793 = vector.broadcast %cst_364 : f32 to vector<16x32xf32>
    %794 = arith.mulf %792, %793 : vector<16x32xf32>
    %795 = arith.addf %794, %4 : vector<16x32xf32>
    %cst_365 = arith.constant dense<0xFF800000> : vector<16xf32>
    %796 = vector.multi_reduction <maximumf>, %795, %cst_365 [1] : vector<16x32xf32> to vector<16xf32>
    %797 = vector.shape_cast %796 : vector<16xf32> to vector<16x1xf32>
    %798 = vector.broadcast %797 : vector<16x1xf32> to vector<16x32xf32>
    %799 = arith.subf %795, %798 : vector<16x32xf32>
    %800 = math.exp %799 : vector<16x32xf32>
    %cst_366 = arith.constant dense<0.000000e+00> : vector<16xf32>
    %801 = vector.multi_reduction <add>, %800, %cst_366 [1] : vector<16x32xf32> to vector<16xf32>
    %802 = vector.shape_cast %801 : vector<16xf32> to vector<16x1xf32>
    %803 = vector.broadcast %802 : vector<16x1xf32> to vector<16x32xf32>
    %804 = arith.divf %800, %803 : vector<16x32xf32>
    %805 = vector.extract_strided_slice %789 {offsets = [0, 0], sizes = [32, 8], strides = [1, 1]} : vector<32x32xf32> to vector<32x8xf32>
    %cst_367 = arith.constant dense<0.000000e+00> : vector<16x8xf32>
    %806 = tpu.matmul %804, %805, %cst_367 {dimension_numbers = #tpu.dot_dimension_numbers<[1], [0], [0], [1], [0, 0, 1, 1], [], []>} : vector<16x32xf32>, vector<32x8xf32>, vector<16x8xf32> -> vector<16x8xf32>
    %807 = vector.extract_strided_slice %775 {offsets = [0, 0], sizes = [8, 32], strides = [1, 1]} : vector<32x32xf32> to vector<8x32xf32>
    %cst_368 = arith.constant dense<0.000000e+00> : vector<16x32xf32>
    %808 = tpu.matmul %806, %807, %cst_368 {dimension_numbers = #tpu.dot_dimension_numbers<[1], [0], [0], [1], [0, 0, 1, 1], [], []>} : vector<16x8xf32>, vector<8x32xf32>, vector<16x32xf32> -> vector<16x32xf32>
    %809 = vector.extract_strided_slice %782 {offsets = [0, 8], sizes = [16, 8], strides = [1, 1]} : vector<16x32xf32> to vector<16x8xf32>
    %810 = vector.extract_strided_slice %788 {offsets = [0, 8], sizes = [32, 8], strides = [1, 1]} : vector<32x32xf32> to vector<32x8xf32>
    %cst_369 = arith.constant dense<0.000000e+00> : vector<16x32xf32>
    %811 = tpu.matmul %809, %810, %cst_369 {dimension_numbers = #tpu.dot_dimension_numbers<[1], [1], [0], [0], [0, 0, 1, 0], [], []>} : vector<16x8xf32>, vector<32x8xf32>, vector<16x32xf32> -> vector<16x32xf32>
    %cst_370 = arith.constant 0.353553385 : f32
    %812 = vector.broadcast %cst_370 : f32 to vector<16x32xf32>
    %813 = arith.mulf %811, %812 : vector<16x32xf32>
    %814 = arith.addf %813, %4 : vector<16x32xf32>
    %cst_371 = arith.constant dense<0xFF800000> : vector<16xf32>
    %815 = vector.multi_reduction <maximumf>, %814, %cst_371 [1] : vector<16x32xf32> to vector<16xf32>
    %816 = vector.shape_cast %815 : vector<16xf32> to vector<16x1xf32>
    %817 = vector.broadcast %816 : vector<16x1xf32> to vector<16x32xf32>
    %818 = arith.subf %814, %817 : vector<16x32xf32>
    %819 = math.exp %818 : vector<16x32xf32>
    %cst_372 = arith.constant dense<0.000000e+00> : vector<16xf32>
    %820 = vector.multi_reduction <add>, %819, %cst_372 [1] : vector<16x32xf32> to vector<16xf32>
    %821 = vector.shape_cast %820 : vector<16xf32> to vector<16x1xf32>
    %822 = vector.broadcast %821 : vector<16x1xf32> to vector<16x32xf32>
    %823 = arith.divf %819, %822 : vector<16x32xf32>
    %824 = vector.extract_strided_slice %789 {offsets = [0, 8], sizes = [32, 8], strides = [1, 1]} : vector<32x32xf32> to vector<32x8xf32>
    %cst_373 = arith.constant dense<0.000000e+00> : vector<16x8xf32>
    %825 = tpu.matmul %823, %824, %cst_373 {dimension_numbers = #tpu.dot_dimension_numbers<[1], [0], [0], [1], [0, 0, 1, 1], [], []>} : vector<16x32xf32>, vector<32x8xf32>, vector<16x8xf32> -> vector<16x8xf32>
    %826 = vector.extract_strided_slice %775 {offsets = [8, 0], sizes = [8, 32], strides = [1, 1]} : vector<32x32xf32> to vector<8x32xf32>
    %cst_374 = arith.constant dense<0.000000e+00> : vector<16x32xf32>
    %827 = tpu.matmul %825, %826, %cst_374 {dimension_numbers = #tpu.dot_dimension_numbers<[1], [0], [0], [1], [0, 0, 1, 1], [], []>} : vector<16x8xf32>, vector<8x32xf32>, vector<16x32xf32> -> vector<16x32xf32>
    %828 = arith.addf %808, %827 : vector<16x32xf32>
    %829 = vector.extract_strided_slice %782 {offsets = [0, 16], sizes = [16, 8], strides = [1, 1]} : vector<16x32xf32> to vector<16x8xf32>
    %830 = vector.extract_strided_slice %788 {offsets = [0, 16], sizes = [32, 8], strides = [1, 1]} : vector<32x32xf32> to vector<32x8xf32>
    %cst_375 = arith.constant dense<0.000000e+00> : vector<16x32xf32>
    %831 = tpu.matmul %829, %830, %cst_375 {dimension_numbers = #tpu.dot_dimension_numbers<[1], [1], [0], [0], [0, 0, 1, 0], [], []>} : vector<16x8xf32>, vector<32x8xf32>, vector<16x32xf32> -> vector<16x32xf32>
    %cst_376 = arith.constant 0.353553385 : f32
    %832 = vector.broadcast %cst_376 : f32 to vector<16x32xf32>
    %833 = arith.mulf %831, %832 : vector<16x32xf32>
    %834 = arith.addf %833, %4 : vector<16x32xf32>
    %cst_377 = arith.constant dense<0xFF800000> : vector<16xf32>
    %835 = vector.multi_reduction <maximumf>, %834, %cst_377 [1] : vector<16x32xf32> to vector<16xf32>
    %836 = vector.shape_cast %835 : vector<16xf32> to vector<16x1xf32>
    %837 = vector.broadcast %836 : vector<16x1xf32> to vector<16x32xf32>
    %838 = arith.subf %834, %837 : vector<16x32xf32>
    %839 = math.exp %838 : vector<16x32xf32>
    %cst_378 = arith.constant dense<0.000000e+00> : vector<16xf32>
    %840 = vector.multi_reduction <add>, %839, %cst_378 [1] : vector<16x32xf32> to vector<16xf32>
    %841 = vector.shape_cast %840 : vector<16xf32> to vector<16x1xf32>
    %842 = vector.broadcast %841 : vector<16x1xf32> to vector<16x32xf32>
    %843 = arith.divf %839, %842 : vector<16x32xf32>
    %844 = vector.extract_strided_slice %789 {offsets = [0, 16], sizes = [32, 8], strides = [1, 1]} : vector<32x32xf32> to vector<32x8xf32>
    %cst_379 = arith.constant dense<0.000000e+00> : vector<16x8xf32>
    %845 = tpu.matmul %843, %844, %cst_379 {dimension_numbers = #tpu.dot_dimension_numbers<[1], [0], [0], [1], [0, 0, 1, 1], [], []>} : vector<16x32xf32>, vector<32x8xf32>, vector<16x8xf32> -> vector<16x8xf32>
    %846 = vector.extract_strided_slice %775 {offsets = [16, 0], sizes = [8, 32], strides = [1, 1]} : vector<32x32xf32> to vector<8x32xf32>
    %cst_380 = arith.constant dense<0.000000e+00> : vector<16x32xf32>
    %847 = tpu.matmul %845, %846, %cst_380 {dimension_numbers = #tpu.dot_dimension_numbers<[1], [0], [0], [1], [0, 0, 1, 1], [], []>} : vector<16x8xf32>, vector<8x32xf32>, vector<16x32xf32> -> vector<16x32xf32>
    %848 = arith.addf %828, %847 : vector<16x32xf32>
    %849 = vector.extract_strided_slice %782 {offsets = [0, 24], sizes = [16, 8], strides = [1, 1]} : vector<16x32xf32> to vector<16x8xf32>
    %850 = vector.extract_strided_slice %788 {offsets = [0, 24], sizes = [32, 8], strides = [1, 1]} : vector<32x32xf32> to vector<32x8xf32>
    %cst_381 = arith.constant dense<0.000000e+00> : vector<16x32xf32>
    %851 = tpu.matmul %849, %850, %cst_381 {dimension_numbers = #tpu.dot_dimension_numbers<[1], [1], [0], [0], [0, 0, 1, 0], [], []>} : vector<16x8xf32>, vector<32x8xf32>, vector<16x32xf32> -> vector<16x32xf32>
    %cst_382 = arith.constant 0.353553385 : f32
    %852 = vector.broadcast %cst_382 : f32 to vector<16x32xf32>
    %853 = arith.mulf %851, %852 : vector<16x32xf32>
    %854 = arith.addf %853, %4 : vector<16x32xf32>
    %cst_383 = arith.constant dense<0xFF800000> : vector<16xf32>
    %855 = vector.multi_reduction <maximumf>, %854, %cst_383 [1] : vector<16x32xf32> to vector<16xf32>
    %856 = vector.shape_cast %855 : vector<16xf32> to vector<16x1xf32>
    %857 = vector.broadcast %856 : vector<16x1xf32> to vector<16x32xf32>
    %858 = arith.subf %854, %857 : vector<16x32xf32>
    %859 = math.exp %858 : vector<16x32xf32>
    %cst_384 = arith.constant dense<0.000000e+00> : vector<16xf32>
    %860 = vector.multi_reduction <add>, %859, %cst_384 [1] : vector<16x32xf32> to vector<16xf32>
    %861 = vector.shape_cast %860 : vector<16xf32> to vector<16x1xf32>
    %862 = vector.broadcast %861 : vector<16x1xf32> to vector<16x32xf32>
    %863 = arith.divf %859, %862 : vector<16x32xf32>
    %864 = vector.extract_strided_slice %789 {offsets = [0, 24], sizes = [32, 8], strides = [1, 1]} : vector<32x32xf32> to vector<32x8xf32>
    %cst_385 = arith.constant dense<0.000000e+00> : vector<16x8xf32>
    %865 = tpu.matmul %863, %864, %cst_385 {dimension_numbers = #tpu.dot_dimension_numbers<[1], [0], [0], [1], [0, 0, 1, 1], [], []>} : vector<16x32xf32>, vector<32x8xf32>, vector<16x8xf32> -> vector<16x8xf32>
    %866 = vector.extract_strided_slice %775 {offsets = [24, 0], sizes = [8, 32], strides = [1, 1]} : vector<32x32xf32> to vector<8x32xf32>
    %cst_386 = arith.constant dense<0.000000e+00> : vector<16x32xf32>
    %867 = tpu.matmul %865, %866, %cst_386 {dimension_numbers = #tpu.dot_dimension_numbers<[1], [0], [0], [1], [0, 0, 1, 1], [], []>} : vector<16x8xf32>, vector<8x32xf32>, vector<16x32xf32> -> vector<16x32xf32>
    %868 = arith.addf %848, %867 : vector<16x32xf32>
    %869 = vector.broadcast %777 : vector<1x32xf32> to vector<16x32xf32>
    %870 = arith.addf %868, %869 : vector<16x32xf32>
    %871 = arith.addf %769, %870 : vector<16x32xf32>
    %c0_387 = arith.constant 0 : index
    %c0_388 = arith.constant 0 : index
    %c0_389 = arith.constant 0 : index
    %872 = vector.load %arg31[%c0_387, %c0_388, %c0_389] : memref<2x1x32xf32, #tpu.memory_space<vmem>>, vector<1x1x32xf32>
    %873 = vector.shape_cast %872 : vector<1x1x32xf32> to vector<1x32xf32>
    %c0_390 = arith.constant 0 : index
    %c0_391 = arith.constant 0 : index
    %c0_392 = arith.constant 0 : index
    %874 = vector.load %arg32[%c0_390, %c0_391, %c0_392] : memref<2x1x32xf32, #tpu.memory_space<vmem>>, vector<1x1x32xf32>
    %875 = vector.shape_cast %874 : vector<1x1x32xf32> to vector<1x32xf32>
    %cst_393 = arith.constant dense<0.000000e+00> : vector<16xf32>
    %876 = vector.multi_reduction <add>, %871, %cst_393 [1] : vector<16x32xf32> to vector<16xf32>
    %877 = vector.shape_cast %876 : vector<16xf32> to vector<16x1xf32>
    %cst_394 = arith.constant 3.200000e+01 : f32
    %878 = vector.broadcast %cst_394 : f32 to vector<16x1xf32>
    %879 = arith.divf %877, %878 : vector<16x1xf32>
    %880 = vector.broadcast %879 : vector<16x1xf32> to vector<16x32xf32>
    %881 = arith.subf %871, %880 : vector<16x32xf32>
    %882 = arith.mulf %881, %881 : vector<16x32xf32>
    %cst_395 = arith.constant dense<0.000000e+00> : vector<16xf32>
    %883 = vector.multi_reduction <add>, %882, %cst_395 [1] : vector<16x32xf32> to vector<16xf32>
    %884 = vector.shape_cast %883 : vector<16xf32> to vector<16x1xf32>
    %cst_396 = arith.constant 3.100000e+01 : f32
    %885 = vector.broadcast %cst_396 : f32 to vector<16x1xf32>
    %886 = arith.divf %884, %885 : vector<16x1xf32>
    %887 = vector.broadcast %873 : vector<1x32xf32> to vector<16x32xf32>
    %888 = arith.mulf %887, %881 : vector<16x32xf32>
    %889 = math.sqrt %886 : vector<16x1xf32>
    %cst_397 = arith.constant 9.99999997E-7 : f32
    %890 = vector.broadcast %cst_397 : f32 to vector<16x1xf32>
    %891 = arith.addf %889, %890 : vector<16x1xf32>
    %892 = vector.broadcast %891 : vector<16x1xf32> to vector<16x32xf32>
    %893 = arith.divf %888, %892 : vector<16x32xf32>
    %894 = vector.broadcast %875 : vector<1x32xf32> to vector<16x32xf32>
    %895 = arith.addf %893, %894 : vector<16x32xf32>
    %c0_398 = arith.constant 0 : index
    %c0_399 = arith.constant 0 : index
    %c0_400 = arith.constant 0 : index
    %896 = vector.load %arg25[%c0_398, %c0_399, %c0_400] : memref<2x32x128xf32, #tpu.memory_space<vmem>>, vector<1x32x128xf32>
    %897 = vector.shape_cast %896 : vector<1x32x128xf32> to vector<32x128xf32>
    %c0_401 = arith.constant 0 : index
    %c0_402 = arith.constant 0 : index
    %c0_403 = arith.constant 0 : index
    %898 = vector.load %arg26[%c0_401, %c0_402, %c0_403] : memref<2x1x128xf32, #tpu.memory_space<vmem>>, vector<1x1x128xf32>
    %899 = vector.shape_cast %898 : vector<1x1x128xf32> to vector<1x128xf32>
    %c0_404 = arith.constant 0 : index
    %c0_405 = arith.constant 0 : index
    %c0_406 = arith.constant 0 : index
    %900 = vector.load %arg27[%c0_404, %c0_405, %c0_406] : memref<2x128x32xf32, #tpu.memory_space<vmem>>, vector<1x128x32xf32>
    %901 = vector.shape_cast %900 : vector<1x128x32xf32> to vector<128x32xf32>
    %c0_407 = arith.constant 0 : index
    %c0_408 = arith.constant 0 : index
    %c0_409 = arith.constant 0 : index
    %902 = vector.load %arg28[%c0_407, %c0_408, %c0_409] : memref<2x1x32xf32, #tpu.memory_space<vmem>>, vector<1x1x32xf32>
    %903 = vector.shape_cast %902 : vector<1x1x32xf32> to vector<1x32xf32>
    %cst_410 = arith.constant dense<0.000000e+00> : vector<16x128xf32>
    %904 = tpu.matmul %895, %897, %cst_410 {dimension_numbers = #tpu.dot_dimension_numbers<[1], [0], [0], [1], [0, 0, 1, 1], [], []>} : vector<16x32xf32>, vector<32x128xf32>, vector<16x128xf32> -> vector<16x128xf32>
    %905 = vector.broadcast %899 : vector<1x128xf32> to vector<16x128xf32>
    %906 = arith.addf %904, %905 : vector<16x128xf32>
    %cst_411 = arith.constant 0.000000e+00 : f32
    %907 = vector.broadcast %cst_411 : f32 to vector<16x128xf32>
    %908 = arith.maximumf %906, %907 : vector<16x128xf32>
    %cst_412 = arith.constant dense<0.000000e+00> : vector<16x32xf32>
    %909 = tpu.matmul %908, %901, %cst_412 {dimension_numbers = #tpu.dot_dimension_numbers<[1], [0], [0], [1], [0, 0, 1, 1], [], []>} : vector<16x128xf32>, vector<128x32xf32>, vector<16x32xf32> -> vector<16x32xf32>
    %910 = vector.broadcast %903 : vector<1x32xf32> to vector<16x32xf32>
    %911 = arith.addf %909, %910 : vector<16x32xf32>
    %912 = arith.addf %895, %911 : vector<16x32xf32>
    %c0_413 = arith.constant 0 : index
    %c0_414 = arith.constant 0 : index
    %c0_415 = arith.constant 0 : index
    %913 = vector.load %arg33[%c0_413, %c0_414, %c0_415] : memref<2x1x32xf32, #tpu.memory_space<vmem>>, vector<1x1x32xf32>
    %914 = vector.shape_cast %913 : vector<1x1x32xf32> to vector<1x32xf32>
    %c0_416 = arith.constant 0 : index
    %c0_417 = arith.constant 0 : index
    %c0_418 = arith.constant 0 : index
    %915 = vector.load %arg34[%c0_416, %c0_417, %c0_418] : memref<2x1x32xf32, #tpu.memory_space<vmem>>, vector<1x1x32xf32>
    %916 = vector.shape_cast %915 : vector<1x1x32xf32> to vector<1x32xf32>
    %cst_419 = arith.constant dense<0.000000e+00> : vector<16xf32>
    %917 = vector.multi_reduction <add>, %912, %cst_419 [1] : vector<16x32xf32> to vector<16xf32>
    %918 = vector.shape_cast %917 : vector<16xf32> to vector<16x1xf32>
    %cst_420 = arith.constant 3.200000e+01 : f32
    %919 = vector.broadcast %cst_420 : f32 to vector<16x1xf32>
    %920 = arith.divf %918, %919 : vector<16x1xf32>
    %921 = vector.broadcast %920 : vector<16x1xf32> to vector<16x32xf32>
    %922 = arith.subf %912, %921 : vector<16x32xf32>
    %923 = arith.mulf %922, %922 : vector<16x32xf32>
    %cst_421 = arith.constant dense<0.000000e+00> : vector<16xf32>
    %924 = vector.multi_reduction <add>, %923, %cst_421 [1] : vector<16x32xf32> to vector<16xf32>
    %925 = vector.shape_cast %924 : vector<16xf32> to vector<16x1xf32>
    %cst_422 = arith.constant 3.100000e+01 : f32
    %926 = vector.broadcast %cst_422 : f32 to vector<16x1xf32>
    %927 = arith.divf %925, %926 : vector<16x1xf32>
    %928 = vector.broadcast %914 : vector<1x32xf32> to vector<16x32xf32>
    %929 = arith.mulf %928, %922 : vector<16x32xf32>
    %930 = math.sqrt %927 : vector<16x1xf32>
    %cst_423 = arith.constant 9.99999997E-7 : f32
    %931 = vector.broadcast %cst_423 : f32 to vector<16x1xf32>
    %932 = arith.addf %930, %931 : vector<16x1xf32>
    %933 = vector.broadcast %932 : vector<16x1xf32> to vector<16x32xf32>
    %934 = arith.divf %929, %933 : vector<16x32xf32>
    %935 = vector.broadcast %916 : vector<1x32xf32> to vector<16x32xf32>
    %936 = arith.addf %934, %935 : vector<16x32xf32>
    %c1_424 = arith.constant 1 : index
    %c0_425 = arith.constant 0 : index
    %c0_426 = arith.constant 0 : index
    %937 = vector.load %arg17[%c1_424, %c0_425, %c0_426] : memref<2x32x96xf32, #tpu.memory_space<vmem>>, vector<1x32x96xf32>
    %938 = vector.shape_cast %937 : vector<1x32x96xf32> to vector<32x96xf32>
    %c1_427 = arith.constant 1 : index
    %c0_428 = arith.constant 0 : index
    %c0_429 = arith.constant 0 : index
    %939 = vector.load %arg18[%c1_427, %c0_428, %c0_429] : memref<2x1x96xf32, #tpu.memory_space<vmem>>, vector<1x1x96xf32>
    %940 = vector.shape_cast %939 : vector<1x1x96xf32> to vector<1x96xf32>
    %c1_430 = arith.constant 1 : index
    %c0_431 = arith.constant 0 : index
    %c0_432 = arith.constant 0 : index
    %941 = vector.load %arg19[%c1_430, %c0_431, %c0_432] : memref<2x32x32xf32, #tpu.memory_space<vmem>>, vector<1x32x32xf32>
    %942 = vector.shape_cast %941 : vector<1x32x32xf32> to vector<32x32xf32>
    %c1_433 = arith.constant 1 : index
    %c0_434 = arith.constant 0 : index
    %c0_435 = arith.constant 0 : index
    %943 = vector.load %arg20[%c1_433, %c0_434, %c0_435] : memref<2x1x32xf32, #tpu.memory_space<vmem>>, vector<1x1x32xf32>
    %944 = vector.shape_cast %943 : vector<1x1x32xf32> to vector<1x32xf32>
    %cst_436 = arith.constant dense<0.000000e+00> : vector<16x96xf32>
    %945 = tpu.matmul %936, %938, %cst_436 {dimension_numbers = #tpu.dot_dimension_numbers<[1], [0], [0], [1], [0, 0, 1, 1], [], []>} : vector<16x32xf32>, vector<32x96xf32>, vector<16x96xf32> -> vector<16x96xf32>
    %946 = vector.broadcast %940 : vector<1x96xf32> to vector<16x96xf32>
    %947 = arith.addf %945, %946 : vector<16x96xf32>
    %948 = vector.extract_strided_slice %947 {offsets = [0, 0], sizes = [16, 32], strides = [1, 1]} : vector<16x96xf32> to vector<16x32xf32>
    %949 = vector.extract_strided_slice %947 {offsets = [0, 32], sizes = [16, 32], strides = [1, 1]} : vector<16x96xf32> to vector<16x32xf32>
    %950 = vector.extract_strided_slice %947 {offsets = [0, 64], sizes = [16, 32], strides = [1, 1]} : vector<16x96xf32> to vector<16x32xf32>
    %951 = vector.extract_strided_slice %948 {offsets = [0, 0], sizes = [16, 8], strides = [1, 1]} : vector<16x32xf32> to vector<16x8xf32>
    %952 = vector.extract_strided_slice %949 {offsets = [0, 0], sizes = [16, 8], strides = [1, 1]} : vector<16x32xf32> to vector<16x8xf32>
    %cst_437 = arith.constant dense<0.000000e+00> : vector<16x16xf32>
    %953 = tpu.matmul %951, %952, %cst_437 {dimension_numbers = #tpu.dot_dimension_numbers<[1], [1], [0], [0], [0, 0, 1, 0], [], []>} : vector<16x8xf32>, vector<16x8xf32>, vector<16x16xf32> -> vector<16x16xf32>
    %cst_438 = arith.constant 0.353553385 : f32
    %954 = vector.broadcast %cst_438 : f32 to vector<16x16xf32>
    %955 = arith.mulf %953, %954 : vector<16x16xf32>
    %956 = arith.addf %955, %3 : vector<16x16xf32>
    %cst_439 = arith.constant dense<0xFF800000> : vector<16xf32>
    %957 = vector.multi_reduction <maximumf>, %956, %cst_439 [1] : vector<16x16xf32> to vector<16xf32>
    %958 = vector.shape_cast %957 : vector<16xf32> to vector<16x1xf32>
    %959 = vector.broadcast %958 : vector<16x1xf32> to vector<16x16xf32>
    %960 = arith.subf %956, %959 : vector<16x16xf32>
    %961 = math.exp %960 : vector<16x16xf32>
    %cst_440 = arith.constant dense<0.000000e+00> : vector<16xf32>
    %962 = vector.multi_reduction <add>, %961, %cst_440 [1] : vector<16x16xf32> to vector<16xf32>
    %963 = vector.shape_cast %962 : vector<16xf32> to vector<16x1xf32>
    %964 = vector.broadcast %963 : vector<16x1xf32> to vector<16x16xf32>
    %965 = arith.divf %961, %964 : vector<16x16xf32>
    %966 = vector.extract_strided_slice %950 {offsets = [0, 0], sizes = [16, 8], strides = [1, 1]} : vector<16x32xf32> to vector<16x8xf32>
    %cst_441 = arith.constant dense<0.000000e+00> : vector<16x8xf32>
    %967 = tpu.matmul %965, %966, %cst_441 {dimension_numbers = #tpu.dot_dimension_numbers<[1], [0], [0], [1], [0, 0, 1, 1], [], []>} : vector<16x16xf32>, vector<16x8xf32>, vector<16x8xf32> -> vector<16x8xf32>
    %968 = vector.extract_strided_slice %942 {offsets = [0, 0], sizes = [8, 32], strides = [1, 1]} : vector<32x32xf32> to vector<8x32xf32>
    %cst_442 = arith.constant dense<0.000000e+00> : vector<16x32xf32>
    %969 = tpu.matmul %967, %968, %cst_442 {dimension_numbers = #tpu.dot_dimension_numbers<[1], [0], [0], [1], [0, 0, 1, 1], [], []>} : vector<16x8xf32>, vector<8x32xf32>, vector<16x32xf32> -> vector<16x32xf32>
    %970 = vector.extract_strided_slice %948 {offsets = [0, 8], sizes = [16, 8], strides = [1, 1]} : vector<16x32xf32> to vector<16x8xf32>
    %971 = vector.extract_strided_slice %949 {offsets = [0, 8], sizes = [16, 8], strides = [1, 1]} : vector<16x32xf32> to vector<16x8xf32>
    %cst_443 = arith.constant dense<0.000000e+00> : vector<16x16xf32>
    %972 = tpu.matmul %970, %971, %cst_443 {dimension_numbers = #tpu.dot_dimension_numbers<[1], [1], [0], [0], [0, 0, 1, 0], [], []>} : vector<16x8xf32>, vector<16x8xf32>, vector<16x16xf32> -> vector<16x16xf32>
    %cst_444 = arith.constant 0.353553385 : f32
    %973 = vector.broadcast %cst_444 : f32 to vector<16x16xf32>
    %974 = arith.mulf %972, %973 : vector<16x16xf32>
    %975 = arith.addf %974, %3 : vector<16x16xf32>
    %cst_445 = arith.constant dense<0xFF800000> : vector<16xf32>
    %976 = vector.multi_reduction <maximumf>, %975, %cst_445 [1] : vector<16x16xf32> to vector<16xf32>
    %977 = vector.shape_cast %976 : vector<16xf32> to vector<16x1xf32>
    %978 = vector.broadcast %977 : vector<16x1xf32> to vector<16x16xf32>
    %979 = arith.subf %975, %978 : vector<16x16xf32>
    %980 = math.exp %979 : vector<16x16xf32>
    %cst_446 = arith.constant dense<0.000000e+00> : vector<16xf32>
    %981 = vector.multi_reduction <add>, %980, %cst_446 [1] : vector<16x16xf32> to vector<16xf32>
    %982 = vector.shape_cast %981 : vector<16xf32> to vector<16x1xf32>
    %983 = vector.broadcast %982 : vector<16x1xf32> to vector<16x16xf32>
    %984 = arith.divf %980, %983 : vector<16x16xf32>
    %985 = vector.extract_strided_slice %950 {offsets = [0, 8], sizes = [16, 8], strides = [1, 1]} : vector<16x32xf32> to vector<16x8xf32>
    %cst_447 = arith.constant dense<0.000000e+00> : vector<16x8xf32>
    %986 = tpu.matmul %984, %985, %cst_447 {dimension_numbers = #tpu.dot_dimension_numbers<[1], [0], [0], [1], [0, 0, 1, 1], [], []>} : vector<16x16xf32>, vector<16x8xf32>, vector<16x8xf32> -> vector<16x8xf32>
    %987 = vector.extract_strided_slice %942 {offsets = [8, 0], sizes = [8, 32], strides = [1, 1]} : vector<32x32xf32> to vector<8x32xf32>
    %cst_448 = arith.constant dense<0.000000e+00> : vector<16x32xf32>
    %988 = tpu.matmul %986, %987, %cst_448 {dimension_numbers = #tpu.dot_dimension_numbers<[1], [0], [0], [1], [0, 0, 1, 1], [], []>} : vector<16x8xf32>, vector<8x32xf32>, vector<16x32xf32> -> vector<16x32xf32>
    %989 = arith.addf %969, %988 : vector<16x32xf32>
    %990 = vector.extract_strided_slice %948 {offsets = [0, 16], sizes = [16, 8], strides = [1, 1]} : vector<16x32xf32> to vector<16x8xf32>
    %991 = vector.extract_strided_slice %949 {offsets = [0, 16], sizes = [16, 8], strides = [1, 1]} : vector<16x32xf32> to vector<16x8xf32>
    %cst_449 = arith.constant dense<0.000000e+00> : vector<16x16xf32>
    %992 = tpu.matmul %990, %991, %cst_449 {dimension_numbers = #tpu.dot_dimension_numbers<[1], [1], [0], [0], [0, 0, 1, 0], [], []>} : vector<16x8xf32>, vector<16x8xf32>, vector<16x16xf32> -> vector<16x16xf32>
    %cst_450 = arith.constant 0.353553385 : f32
    %993 = vector.broadcast %cst_450 : f32 to vector<16x16xf32>
    %994 = arith.mulf %992, %993 : vector<16x16xf32>
    %995 = arith.addf %994, %3 : vector<16x16xf32>
    %cst_451 = arith.constant dense<0xFF800000> : vector<16xf32>
    %996 = vector.multi_reduction <maximumf>, %995, %cst_451 [1] : vector<16x16xf32> to vector<16xf32>
    %997 = vector.shape_cast %996 : vector<16xf32> to vector<16x1xf32>
    %998 = vector.broadcast %997 : vector<16x1xf32> to vector<16x16xf32>
    %999 = arith.subf %995, %998 : vector<16x16xf32>
    %1000 = math.exp %999 : vector<16x16xf32>
    %cst_452 = arith.constant dense<0.000000e+00> : vector<16xf32>
    %1001 = vector.multi_reduction <add>, %1000, %cst_452 [1] : vector<16x16xf32> to vector<16xf32>
    %1002 = vector.shape_cast %1001 : vector<16xf32> to vector<16x1xf32>
    %1003 = vector.broadcast %1002 : vector<16x1xf32> to vector<16x16xf32>
    %1004 = arith.divf %1000, %1003 : vector<16x16xf32>
    %1005 = vector.extract_strided_slice %950 {offsets = [0, 16], sizes = [16, 8], strides = [1, 1]} : vector<16x32xf32> to vector<16x8xf32>
    %cst_453 = arith.constant dense<0.000000e+00> : vector<16x8xf32>
    %1006 = tpu.matmul %1004, %1005, %cst_453 {dimension_numbers = #tpu.dot_dimension_numbers<[1], [0], [0], [1], [0, 0, 1, 1], [], []>} : vector<16x16xf32>, vector<16x8xf32>, vector<16x8xf32> -> vector<16x8xf32>
    %1007 = vector.extract_strided_slice %942 {offsets = [16, 0], sizes = [8, 32], strides = [1, 1]} : vector<32x32xf32> to vector<8x32xf32>
    %cst_454 = arith.constant dense<0.000000e+00> : vector<16x32xf32>
    %1008 = tpu.matmul %1006, %1007, %cst_454 {dimension_numbers = #tpu.dot_dimension_numbers<[1], [0], [0], [1], [0, 0, 1, 1], [], []>} : vector<16x8xf32>, vector<8x32xf32>, vector<16x32xf32> -> vector<16x32xf32>
    %1009 = arith.addf %989, %1008 : vector<16x32xf32>
    %1010 = vector.extract_strided_slice %948 {offsets = [0, 24], sizes = [16, 8], strides = [1, 1]} : vector<16x32xf32> to vector<16x8xf32>
    %1011 = vector.extract_strided_slice %949 {offsets = [0, 24], sizes = [16, 8], strides = [1, 1]} : vector<16x32xf32> to vector<16x8xf32>
    %cst_455 = arith.constant dense<0.000000e+00> : vector<16x16xf32>
    %1012 = tpu.matmul %1010, %1011, %cst_455 {dimension_numbers = #tpu.dot_dimension_numbers<[1], [1], [0], [0], [0, 0, 1, 0], [], []>} : vector<16x8xf32>, vector<16x8xf32>, vector<16x16xf32> -> vector<16x16xf32>
    %cst_456 = arith.constant 0.353553385 : f32
    %1013 = vector.broadcast %cst_456 : f32 to vector<16x16xf32>
    %1014 = arith.mulf %1012, %1013 : vector<16x16xf32>
    %1015 = arith.addf %1014, %3 : vector<16x16xf32>
    %cst_457 = arith.constant dense<0xFF800000> : vector<16xf32>
    %1016 = vector.multi_reduction <maximumf>, %1015, %cst_457 [1] : vector<16x16xf32> to vector<16xf32>
    %1017 = vector.shape_cast %1016 : vector<16xf32> to vector<16x1xf32>
    %1018 = vector.broadcast %1017 : vector<16x1xf32> to vector<16x16xf32>
    %1019 = arith.subf %1015, %1018 : vector<16x16xf32>
    %1020 = math.exp %1019 : vector<16x16xf32>
    %cst_458 = arith.constant dense<0.000000e+00> : vector<16xf32>
    %1021 = vector.multi_reduction <add>, %1020, %cst_458 [1] : vector<16x16xf32> to vector<16xf32>
    %1022 = vector.shape_cast %1021 : vector<16xf32> to vector<16x1xf32>
    %1023 = vector.broadcast %1022 : vector<16x1xf32> to vector<16x16xf32>
    %1024 = arith.divf %1020, %1023 : vector<16x16xf32>
    %1025 = vector.extract_strided_slice %950 {offsets = [0, 24], sizes = [16, 8], strides = [1, 1]} : vector<16x32xf32> to vector<16x8xf32>
    %cst_459 = arith.constant dense<0.000000e+00> : vector<16x8xf32>
    %1026 = tpu.matmul %1024, %1025, %cst_459 {dimension_numbers = #tpu.dot_dimension_numbers<[1], [0], [0], [1], [0, 0, 1, 1], [], []>} : vector<16x16xf32>, vector<16x8xf32>, vector<16x8xf32> -> vector<16x8xf32>
    %1027 = vector.extract_strided_slice %942 {offsets = [24, 0], sizes = [8, 32], strides = [1, 1]} : vector<32x32xf32> to vector<8x32xf32>
    %cst_460 = arith.constant dense<0.000000e+00> : vector<16x32xf32>
    %1028 = tpu.matmul %1026, %1027, %cst_460 {dimension_numbers = #tpu.dot_dimension_numbers<[1], [0], [0], [1], [0, 0, 1, 1], [], []>} : vector<16x8xf32>, vector<8x32xf32>, vector<16x32xf32> -> vector<16x32xf32>
    %1029 = arith.addf %1009, %1028 : vector<16x32xf32>
    %1030 = vector.broadcast %944 : vector<1x32xf32> to vector<16x32xf32>
    %1031 = arith.addf %1029, %1030 : vector<16x32xf32>
    %1032 = arith.addf %936, %1031 : vector<16x32xf32>
    %c1_461 = arith.constant 1 : index
    %c0_462 = arith.constant 0 : index
    %c0_463 = arith.constant 0 : index
    %1033 = vector.load %arg29[%c1_461, %c0_462, %c0_463] : memref<2x1x32xf32, #tpu.memory_space<vmem>>, vector<1x1x32xf32>
    %1034 = vector.shape_cast %1033 : vector<1x1x32xf32> to vector<1x32xf32>
    %c1_464 = arith.constant 1 : index
    %c0_465 = arith.constant 0 : index
    %c0_466 = arith.constant 0 : index
    %1035 = vector.load %arg30[%c1_464, %c0_465, %c0_466] : memref<2x1x32xf32, #tpu.memory_space<vmem>>, vector<1x1x32xf32>
    %1036 = vector.shape_cast %1035 : vector<1x1x32xf32> to vector<1x32xf32>
    %cst_467 = arith.constant dense<0.000000e+00> : vector<16xf32>
    %1037 = vector.multi_reduction <add>, %1032, %cst_467 [1] : vector<16x32xf32> to vector<16xf32>
    %1038 = vector.shape_cast %1037 : vector<16xf32> to vector<16x1xf32>
    %cst_468 = arith.constant 3.200000e+01 : f32
    %1039 = vector.broadcast %cst_468 : f32 to vector<16x1xf32>
    %1040 = arith.divf %1038, %1039 : vector<16x1xf32>
    %1041 = vector.broadcast %1040 : vector<16x1xf32> to vector<16x32xf32>
    %1042 = arith.subf %1032, %1041 : vector<16x32xf32>
    %1043 = arith.mulf %1042, %1042 : vector<16x32xf32>
    %cst_469 = arith.constant dense<0.000000e+00> : vector<16xf32>
    %1044 = vector.multi_reduction <add>, %1043, %cst_469 [1] : vector<16x32xf32> to vector<16xf32>
    %1045 = vector.shape_cast %1044 : vector<16xf32> to vector<16x1xf32>
    %cst_470 = arith.constant 3.100000e+01 : f32
    %1046 = vector.broadcast %cst_470 : f32 to vector<16x1xf32>
    %1047 = arith.divf %1045, %1046 : vector<16x1xf32>
    %1048 = vector.broadcast %1034 : vector<1x32xf32> to vector<16x32xf32>
    %1049 = arith.mulf %1048, %1042 : vector<16x32xf32>
    %1050 = math.sqrt %1047 : vector<16x1xf32>
    %cst_471 = arith.constant 9.99999997E-7 : f32
    %1051 = vector.broadcast %cst_471 : f32 to vector<16x1xf32>
    %1052 = arith.addf %1050, %1051 : vector<16x1xf32>
    %1053 = vector.broadcast %1052 : vector<16x1xf32> to vector<16x32xf32>
    %1054 = arith.divf %1049, %1053 : vector<16x32xf32>
    %1055 = vector.broadcast %1036 : vector<1x32xf32> to vector<16x32xf32>
    %1056 = arith.addf %1054, %1055 : vector<16x32xf32>
    %c1_472 = arith.constant 1 : index
    %c0_473 = arith.constant 0 : index
    %c0_474 = arith.constant 0 : index
    %1057 = vector.load %arg21[%c1_472, %c0_473, %c0_474] : memref<2x32x96xf32, #tpu.memory_space<vmem>>, vector<1x32x96xf32>
    %1058 = vector.shape_cast %1057 : vector<1x32x96xf32> to vector<32x96xf32>
    %c1_475 = arith.constant 1 : index
    %c0_476 = arith.constant 0 : index
    %c0_477 = arith.constant 0 : index
    %1059 = vector.load %arg22[%c1_475, %c0_476, %c0_477] : memref<2x1x96xf32, #tpu.memory_space<vmem>>, vector<1x1x96xf32>
    %1060 = vector.shape_cast %1059 : vector<1x1x96xf32> to vector<1x96xf32>
    %c1_478 = arith.constant 1 : index
    %c0_479 = arith.constant 0 : index
    %c0_480 = arith.constant 0 : index
    %1061 = vector.load %arg23[%c1_478, %c0_479, %c0_480] : memref<2x32x32xf32, #tpu.memory_space<vmem>>, vector<1x32x32xf32>
    %1062 = vector.shape_cast %1061 : vector<1x32x32xf32> to vector<32x32xf32>
    %c1_481 = arith.constant 1 : index
    %c0_482 = arith.constant 0 : index
    %c0_483 = arith.constant 0 : index
    %1063 = vector.load %arg24[%c1_481, %c0_482, %c0_483] : memref<2x1x32xf32, #tpu.memory_space<vmem>>, vector<1x1x32xf32>
    %1064 = vector.shape_cast %1063 : vector<1x1x32xf32> to vector<1x32xf32>
    %1065 = vector.extract_strided_slice %1058 {offsets = [0, 0], sizes = [32, 32], strides = [1, 1]} : vector<32x96xf32> to vector<32x32xf32>
    %cst_484 = arith.constant dense<0.000000e+00> : vector<16x32xf32>
    %1066 = tpu.matmul %1056, %1065, %cst_484 {dimension_numbers = #tpu.dot_dimension_numbers<[1], [0], [0], [1], [0, 0, 1, 1], [], []>} : vector<16x32xf32>, vector<32x32xf32>, vector<16x32xf32> -> vector<16x32xf32>
    %1067 = vector.extract_strided_slice %1060 {offsets = [0, 0], sizes = [1, 32], strides = [1, 1]} : vector<1x96xf32> to vector<1x32xf32>
    %1068 = vector.broadcast %1067 : vector<1x32xf32> to vector<16x32xf32>
    %1069 = arith.addf %1066, %1068 : vector<16x32xf32>
    %1070 = vector.extract_strided_slice %1058 {offsets = [0, 32], sizes = [32, 64], strides = [1, 1]} : vector<32x96xf32> to vector<32x64xf32>
    %cst_485 = arith.constant dense<0.000000e+00> : vector<32x64xf32>
    %1071 = tpu.matmul %649, %1070, %cst_485 {dimension_numbers = #tpu.dot_dimension_numbers<[1], [0], [0], [1], [0, 0, 1, 1], [], []>} : vector<32x32xf32>, vector<32x64xf32>, vector<32x64xf32> -> vector<32x64xf32>
    %1072 = vector.extract_strided_slice %1060 {offsets = [0, 32], sizes = [1, 64], strides = [1, 1]} : vector<1x96xf32> to vector<1x64xf32>
    %1073 = vector.broadcast %1072 : vector<1x64xf32> to vector<32x64xf32>
    %1074 = arith.addf %1071, %1073 : vector<32x64xf32>
    %1075 = vector.extract_strided_slice %1074 {offsets = [0, 0], sizes = [32, 32], strides = [1, 1]} : vector<32x64xf32> to vector<32x32xf32>
    %1076 = vector.extract_strided_slice %1074 {offsets = [0, 32], sizes = [32, 32], strides = [1, 1]} : vector<32x64xf32> to vector<32x32xf32>
    %1077 = vector.extract_strided_slice %1069 {offsets = [0, 0], sizes = [16, 8], strides = [1, 1]} : vector<16x32xf32> to vector<16x8xf32>
    %1078 = vector.extract_strided_slice %1075 {offsets = [0, 0], sizes = [32, 8], strides = [1, 1]} : vector<32x32xf32> to vector<32x8xf32>
    %cst_486 = arith.constant dense<0.000000e+00> : vector<16x32xf32>
    %1079 = tpu.matmul %1077, %1078, %cst_486 {dimension_numbers = #tpu.dot_dimension_numbers<[1], [1], [0], [0], [0, 0, 1, 0], [], []>} : vector<16x8xf32>, vector<32x8xf32>, vector<16x32xf32> -> vector<16x32xf32>
    %cst_487 = arith.constant 0.353553385 : f32
    %1080 = vector.broadcast %cst_487 : f32 to vector<16x32xf32>
    %1081 = arith.mulf %1079, %1080 : vector<16x32xf32>
    %1082 = arith.addf %1081, %4 : vector<16x32xf32>
    %cst_488 = arith.constant dense<0xFF800000> : vector<16xf32>
    %1083 = vector.multi_reduction <maximumf>, %1082, %cst_488 [1] : vector<16x32xf32> to vector<16xf32>
    %1084 = vector.shape_cast %1083 : vector<16xf32> to vector<16x1xf32>
    %1085 = vector.broadcast %1084 : vector<16x1xf32> to vector<16x32xf32>
    %1086 = arith.subf %1082, %1085 : vector<16x32xf32>
    %1087 = math.exp %1086 : vector<16x32xf32>
    %cst_489 = arith.constant dense<0.000000e+00> : vector<16xf32>
    %1088 = vector.multi_reduction <add>, %1087, %cst_489 [1] : vector<16x32xf32> to vector<16xf32>
    %1089 = vector.shape_cast %1088 : vector<16xf32> to vector<16x1xf32>
    %1090 = vector.broadcast %1089 : vector<16x1xf32> to vector<16x32xf32>
    %1091 = arith.divf %1087, %1090 : vector<16x32xf32>
    %1092 = vector.extract_strided_slice %1076 {offsets = [0, 0], sizes = [32, 8], strides = [1, 1]} : vector<32x32xf32> to vector<32x8xf32>
    %cst_490 = arith.constant dense<0.000000e+00> : vector<16x8xf32>
    %1093 = tpu.matmul %1091, %1092, %cst_490 {dimension_numbers = #tpu.dot_dimension_numbers<[1], [0], [0], [1], [0, 0, 1, 1], [], []>} : vector<16x32xf32>, vector<32x8xf32>, vector<16x8xf32> -> vector<16x8xf32>
    %1094 = vector.extract_strided_slice %1062 {offsets = [0, 0], sizes = [8, 32], strides = [1, 1]} : vector<32x32xf32> to vector<8x32xf32>
    %cst_491 = arith.constant dense<0.000000e+00> : vector<16x32xf32>
    %1095 = tpu.matmul %1093, %1094, %cst_491 {dimension_numbers = #tpu.dot_dimension_numbers<[1], [0], [0], [1], [0, 0, 1, 1], [], []>} : vector<16x8xf32>, vector<8x32xf32>, vector<16x32xf32> -> vector<16x32xf32>
    %1096 = vector.extract_strided_slice %1069 {offsets = [0, 8], sizes = [16, 8], strides = [1, 1]} : vector<16x32xf32> to vector<16x8xf32>
    %1097 = vector.extract_strided_slice %1075 {offsets = [0, 8], sizes = [32, 8], strides = [1, 1]} : vector<32x32xf32> to vector<32x8xf32>
    %cst_492 = arith.constant dense<0.000000e+00> : vector<16x32xf32>
    %1098 = tpu.matmul %1096, %1097, %cst_492 {dimension_numbers = #tpu.dot_dimension_numbers<[1], [1], [0], [0], [0, 0, 1, 0], [], []>} : vector<16x8xf32>, vector<32x8xf32>, vector<16x32xf32> -> vector<16x32xf32>
    %cst_493 = arith.constant 0.353553385 : f32
    %1099 = vector.broadcast %cst_493 : f32 to vector<16x32xf32>
    %1100 = arith.mulf %1098, %1099 : vector<16x32xf32>
    %1101 = arith.addf %1100, %4 : vector<16x32xf32>
    %cst_494 = arith.constant dense<0xFF800000> : vector<16xf32>
    %1102 = vector.multi_reduction <maximumf>, %1101, %cst_494 [1] : vector<16x32xf32> to vector<16xf32>
    %1103 = vector.shape_cast %1102 : vector<16xf32> to vector<16x1xf32>
    %1104 = vector.broadcast %1103 : vector<16x1xf32> to vector<16x32xf32>
    %1105 = arith.subf %1101, %1104 : vector<16x32xf32>
    %1106 = math.exp %1105 : vector<16x32xf32>
    %cst_495 = arith.constant dense<0.000000e+00> : vector<16xf32>
    %1107 = vector.multi_reduction <add>, %1106, %cst_495 [1] : vector<16x32xf32> to vector<16xf32>
    %1108 = vector.shape_cast %1107 : vector<16xf32> to vector<16x1xf32>
    %1109 = vector.broadcast %1108 : vector<16x1xf32> to vector<16x32xf32>
    %1110 = arith.divf %1106, %1109 : vector<16x32xf32>
    %1111 = vector.extract_strided_slice %1076 {offsets = [0, 8], sizes = [32, 8], strides = [1, 1]} : vector<32x32xf32> to vector<32x8xf32>
    %cst_496 = arith.constant dense<0.000000e+00> : vector<16x8xf32>
    %1112 = tpu.matmul %1110, %1111, %cst_496 {dimension_numbers = #tpu.dot_dimension_numbers<[1], [0], [0], [1], [0, 0, 1, 1], [], []>} : vector<16x32xf32>, vector<32x8xf32>, vector<16x8xf32> -> vector<16x8xf32>
    %1113 = vector.extract_strided_slice %1062 {offsets = [8, 0], sizes = [8, 32], strides = [1, 1]} : vector<32x32xf32> to vector<8x32xf32>
    %cst_497 = arith.constant dense<0.000000e+00> : vector<16x32xf32>
    %1114 = tpu.matmul %1112, %1113, %cst_497 {dimension_numbers = #tpu.dot_dimension_numbers<[1], [0], [0], [1], [0, 0, 1, 1], [], []>} : vector<16x8xf32>, vector<8x32xf32>, vector<16x32xf32> -> vector<16x32xf32>
    %1115 = arith.addf %1095, %1114 : vector<16x32xf32>
    %1116 = vector.extract_strided_slice %1069 {offsets = [0, 16], sizes = [16, 8], strides = [1, 1]} : vector<16x32xf32> to vector<16x8xf32>
    %1117 = vector.extract_strided_slice %1075 {offsets = [0, 16], sizes = [32, 8], strides = [1, 1]} : vector<32x32xf32> to vector<32x8xf32>
    %cst_498 = arith.constant dense<0.000000e+00> : vector<16x32xf32>
    %1118 = tpu.matmul %1116, %1117, %cst_498 {dimension_numbers = #tpu.dot_dimension_numbers<[1], [1], [0], [0], [0, 0, 1, 0], [], []>} : vector<16x8xf32>, vector<32x8xf32>, vector<16x32xf32> -> vector<16x32xf32>
    %cst_499 = arith.constant 0.353553385 : f32
    %1119 = vector.broadcast %cst_499 : f32 to vector<16x32xf32>
    %1120 = arith.mulf %1118, %1119 : vector<16x32xf32>
    %1121 = arith.addf %1120, %4 : vector<16x32xf32>
    %cst_500 = arith.constant dense<0xFF800000> : vector<16xf32>
    %1122 = vector.multi_reduction <maximumf>, %1121, %cst_500 [1] : vector<16x32xf32> to vector<16xf32>
    %1123 = vector.shape_cast %1122 : vector<16xf32> to vector<16x1xf32>
    %1124 = vector.broadcast %1123 : vector<16x1xf32> to vector<16x32xf32>
    %1125 = arith.subf %1121, %1124 : vector<16x32xf32>
    %1126 = math.exp %1125 : vector<16x32xf32>
    %cst_501 = arith.constant dense<0.000000e+00> : vector<16xf32>
    %1127 = vector.multi_reduction <add>, %1126, %cst_501 [1] : vector<16x32xf32> to vector<16xf32>
    %1128 = vector.shape_cast %1127 : vector<16xf32> to vector<16x1xf32>
    %1129 = vector.broadcast %1128 : vector<16x1xf32> to vector<16x32xf32>
    %1130 = arith.divf %1126, %1129 : vector<16x32xf32>
    %1131 = vector.extract_strided_slice %1076 {offsets = [0, 16], sizes = [32, 8], strides = [1, 1]} : vector<32x32xf32> to vector<32x8xf32>
    %cst_502 = arith.constant dense<0.000000e+00> : vector<16x8xf32>
    %1132 = tpu.matmul %1130, %1131, %cst_502 {dimension_numbers = #tpu.dot_dimension_numbers<[1], [0], [0], [1], [0, 0, 1, 1], [], []>} : vector<16x32xf32>, vector<32x8xf32>, vector<16x8xf32> -> vector<16x8xf32>
    %1133 = vector.extract_strided_slice %1062 {offsets = [16, 0], sizes = [8, 32], strides = [1, 1]} : vector<32x32xf32> to vector<8x32xf32>
    %cst_503 = arith.constant dense<0.000000e+00> : vector<16x32xf32>
    %1134 = tpu.matmul %1132, %1133, %cst_503 {dimension_numbers = #tpu.dot_dimension_numbers<[1], [0], [0], [1], [0, 0, 1, 1], [], []>} : vector<16x8xf32>, vector<8x32xf32>, vector<16x32xf32> -> vector<16x32xf32>
    %1135 = arith.addf %1115, %1134 : vector<16x32xf32>
    %1136 = vector.extract_strided_slice %1069 {offsets = [0, 24], sizes = [16, 8], strides = [1, 1]} : vector<16x32xf32> to vector<16x8xf32>
    %1137 = vector.extract_strided_slice %1075 {offsets = [0, 24], sizes = [32, 8], strides = [1, 1]} : vector<32x32xf32> to vector<32x8xf32>
    %cst_504 = arith.constant dense<0.000000e+00> : vector<16x32xf32>
    %1138 = tpu.matmul %1136, %1137, %cst_504 {dimension_numbers = #tpu.dot_dimension_numbers<[1], [1], [0], [0], [0, 0, 1, 0], [], []>} : vector<16x8xf32>, vector<32x8xf32>, vector<16x32xf32> -> vector<16x32xf32>
    %cst_505 = arith.constant 0.353553385 : f32
    %1139 = vector.broadcast %cst_505 : f32 to vector<16x32xf32>
    %1140 = arith.mulf %1138, %1139 : vector<16x32xf32>
    %1141 = arith.addf %1140, %4 : vector<16x32xf32>
    %cst_506 = arith.constant dense<0xFF800000> : vector<16xf32>
    %1142 = vector.multi_reduction <maximumf>, %1141, %cst_506 [1] : vector<16x32xf32> to vector<16xf32>
    %1143 = vector.shape_cast %1142 : vector<16xf32> to vector<16x1xf32>
    %1144 = vector.broadcast %1143 : vector<16x1xf32> to vector<16x32xf32>
    %1145 = arith.subf %1141, %1144 : vector<16x32xf32>
    %1146 = math.exp %1145 : vector<16x32xf32>
    %cst_507 = arith.constant dense<0.000000e+00> : vector<16xf32>
    %1147 = vector.multi_reduction <add>, %1146, %cst_507 [1] : vector<16x32xf32> to vector<16xf32>
    %1148 = vector.shape_cast %1147 : vector<16xf32> to vector<16x1xf32>
    %1149 = vector.broadcast %1148 : vector<16x1xf32> to vector<16x32xf32>
    %1150 = arith.divf %1146, %1149 : vector<16x32xf32>
    %1151 = vector.extract_strided_slice %1076 {offsets = [0, 24], sizes = [32, 8], strides = [1, 1]} : vector<32x32xf32> to vector<32x8xf32>
    %cst_508 = arith.constant dense<0.000000e+00> : vector<16x8xf32>
    %1152 = tpu.matmul %1150, %1151, %cst_508 {dimension_numbers = #tpu.dot_dimension_numbers<[1], [0], [0], [1], [0, 0, 1, 1], [], []>} : vector<16x32xf32>, vector<32x8xf32>, vector<16x8xf32> -> vector<16x8xf32>
    %1153 = vector.extract_strided_slice %1062 {offsets = [24, 0], sizes = [8, 32], strides = [1, 1]} : vector<32x32xf32> to vector<8x32xf32>
    %cst_509 = arith.constant dense<0.000000e+00> : vector<16x32xf32>
    %1154 = tpu.matmul %1152, %1153, %cst_509 {dimension_numbers = #tpu.dot_dimension_numbers<[1], [0], [0], [1], [0, 0, 1, 1], [], []>} : vector<16x8xf32>, vector<8x32xf32>, vector<16x32xf32> -> vector<16x32xf32>
    %1155 = arith.addf %1135, %1154 : vector<16x32xf32>
    %1156 = vector.broadcast %1064 : vector<1x32xf32> to vector<16x32xf32>
    %1157 = arith.addf %1155, %1156 : vector<16x32xf32>
    %1158 = arith.addf %1056, %1157 : vector<16x32xf32>
    %c1_510 = arith.constant 1 : index
    %c0_511 = arith.constant 0 : index
    %c0_512 = arith.constant 0 : index
    %1159 = vector.load %arg31[%c1_510, %c0_511, %c0_512] : memref<2x1x32xf32, #tpu.memory_space<vmem>>, vector<1x1x32xf32>
    %1160 = vector.shape_cast %1159 : vector<1x1x32xf32> to vector<1x32xf32>
    %c1_513 = arith.constant 1 : index
    %c0_514 = arith.constant 0 : index
    %c0_515 = arith.constant 0 : index
    %1161 = vector.load %arg32[%c1_513, %c0_514, %c0_515] : memref<2x1x32xf32, #tpu.memory_space<vmem>>, vector<1x1x32xf32>
    %1162 = vector.shape_cast %1161 : vector<1x1x32xf32> to vector<1x32xf32>
    %cst_516 = arith.constant dense<0.000000e+00> : vector<16xf32>
    %1163 = vector.multi_reduction <add>, %1158, %cst_516 [1] : vector<16x32xf32> to vector<16xf32>
    %1164 = vector.shape_cast %1163 : vector<16xf32> to vector<16x1xf32>
    %cst_517 = arith.constant 3.200000e+01 : f32
    %1165 = vector.broadcast %cst_517 : f32 to vector<16x1xf32>
    %1166 = arith.divf %1164, %1165 : vector<16x1xf32>
    %1167 = vector.broadcast %1166 : vector<16x1xf32> to vector<16x32xf32>
    %1168 = arith.subf %1158, %1167 : vector<16x32xf32>
    %1169 = arith.mulf %1168, %1168 : vector<16x32xf32>
    %cst_518 = arith.constant dense<0.000000e+00> : vector<16xf32>
    %1170 = vector.multi_reduction <add>, %1169, %cst_518 [1] : vector<16x32xf32> to vector<16xf32>
    %1171 = vector.shape_cast %1170 : vector<16xf32> to vector<16x1xf32>
    %cst_519 = arith.constant 3.100000e+01 : f32
    %1172 = vector.broadcast %cst_519 : f32 to vector<16x1xf32>
    %1173 = arith.divf %1171, %1172 : vector<16x1xf32>
    %1174 = vector.broadcast %1160 : vector<1x32xf32> to vector<16x32xf32>
    %1175 = arith.mulf %1174, %1168 : vector<16x32xf32>
    %1176 = math.sqrt %1173 : vector<16x1xf32>
    %cst_520 = arith.constant 9.99999997E-7 : f32
    %1177 = vector.broadcast %cst_520 : f32 to vector<16x1xf32>
    %1178 = arith.addf %1176, %1177 : vector<16x1xf32>
    %1179 = vector.broadcast %1178 : vector<16x1xf32> to vector<16x32xf32>
    %1180 = arith.divf %1175, %1179 : vector<16x32xf32>
    %1181 = vector.broadcast %1162 : vector<1x32xf32> to vector<16x32xf32>
    %1182 = arith.addf %1180, %1181 : vector<16x32xf32>
    %c1_521 = arith.constant 1 : index
    %c0_522 = arith.constant 0 : index
    %c0_523 = arith.constant 0 : index
    %1183 = vector.load %arg25[%c1_521, %c0_522, %c0_523] : memref<2x32x128xf32, #tpu.memory_space<vmem>>, vector<1x32x128xf32>
    %1184 = vector.shape_cast %1183 : vector<1x32x128xf32> to vector<32x128xf32>
    %c1_524 = arith.constant 1 : index
    %c0_525 = arith.constant 0 : index
    %c0_526 = arith.constant 0 : index
    %1185 = vector.load %arg26[%c1_524, %c0_525, %c0_526] : memref<2x1x128xf32, #tpu.memory_space<vmem>>, vector<1x1x128xf32>
    %1186 = vector.shape_cast %1185 : vector<1x1x128xf32> to vector<1x128xf32>
    %c1_527 = arith.constant 1 : index
    %c0_528 = arith.constant 0 : index
    %c0_529 = arith.constant 0 : index
    %1187 = vector.load %arg27[%c1_527, %c0_528, %c0_529] : memref<2x128x32xf32, #tpu.memory_space<vmem>>, vector<1x128x32xf32>
    %1188 = vector.shape_cast %1187 : vector<1x128x32xf32> to vector<128x32xf32>
    %c1_530 = arith.constant 1 : index
    %c0_531 = arith.constant 0 : index
    %c0_532 = arith.constant 0 : index
    %1189 = vector.load %arg28[%c1_530, %c0_531, %c0_532] : memref<2x1x32xf32, #tpu.memory_space<vmem>>, vector<1x1x32xf32>
    %1190 = vector.shape_cast %1189 : vector<1x1x32xf32> to vector<1x32xf32>
    %cst_533 = arith.constant dense<0.000000e+00> : vector<16x128xf32>
    %1191 = tpu.matmul %1182, %1184, %cst_533 {dimension_numbers = #tpu.dot_dimension_numbers<[1], [0], [0], [1], [0, 0, 1, 1], [], []>} : vector<16x32xf32>, vector<32x128xf32>, vector<16x128xf32> -> vector<16x128xf32>
    %1192 = vector.broadcast %1186 : vector<1x128xf32> to vector<16x128xf32>
    %1193 = arith.addf %1191, %1192 : vector<16x128xf32>
    %cst_534 = arith.constant 0.000000e+00 : f32
    %1194 = vector.broadcast %cst_534 : f32 to vector<16x128xf32>
    %1195 = arith.maximumf %1193, %1194 : vector<16x128xf32>
    %cst_535 = arith.constant dense<0.000000e+00> : vector<16x32xf32>
    %1196 = tpu.matmul %1195, %1188, %cst_535 {dimension_numbers = #tpu.dot_dimension_numbers<[1], [0], [0], [1], [0, 0, 1, 1], [], []>} : vector<16x128xf32>, vector<128x32xf32>, vector<16x32xf32> -> vector<16x32xf32>
    %1197 = vector.broadcast %1190 : vector<1x32xf32> to vector<16x32xf32>
    %1198 = arith.addf %1196, %1197 : vector<16x32xf32>
    %1199 = arith.addf %1182, %1198 : vector<16x32xf32>
    %c1_536 = arith.constant 1 : index
    %c0_537 = arith.constant 0 : index
    %c0_538 = arith.constant 0 : index
    %1200 = vector.load %arg33[%c1_536, %c0_537, %c0_538] : memref<2x1x32xf32, #tpu.memory_space<vmem>>, vector<1x1x32xf32>
    %1201 = vector.shape_cast %1200 : vector<1x1x32xf32> to vector<1x32xf32>
    %c1_539 = arith.constant 1 : index
    %c0_540 = arith.constant 0 : index
    %c0_541 = arith.constant 0 : index
    %1202 = vector.load %arg34[%c1_539, %c0_540, %c0_541] : memref<2x1x32xf32, #tpu.memory_space<vmem>>, vector<1x1x32xf32>
    %1203 = vector.shape_cast %1202 : vector<1x1x32xf32> to vector<1x32xf32>
    %cst_542 = arith.constant dense<0.000000e+00> : vector<16xf32>
    %1204 = vector.multi_reduction <add>, %1199, %cst_542 [1] : vector<16x32xf32> to vector<16xf32>
    %1205 = vector.shape_cast %1204 : vector<16xf32> to vector<16x1xf32>
    %cst_543 = arith.constant 3.200000e+01 : f32
    %1206 = vector.broadcast %cst_543 : f32 to vector<16x1xf32>
    %1207 = arith.divf %1205, %1206 : vector<16x1xf32>
    %1208 = vector.broadcast %1207 : vector<16x1xf32> to vector<16x32xf32>
    %1209 = arith.subf %1199, %1208 : vector<16x32xf32>
    %1210 = arith.mulf %1209, %1209 : vector<16x32xf32>
    %cst_544 = arith.constant dense<0.000000e+00> : vector<16xf32>
    %1211 = vector.multi_reduction <add>, %1210, %cst_544 [1] : vector<16x32xf32> to vector<16xf32>
    %1212 = vector.shape_cast %1211 : vector<16xf32> to vector<16x1xf32>
    %cst_545 = arith.constant 3.100000e+01 : f32
    %1213 = vector.broadcast %cst_545 : f32 to vector<16x1xf32>
    %1214 = arith.divf %1212, %1213 : vector<16x1xf32>
    %1215 = vector.broadcast %1201 : vector<1x32xf32> to vector<16x32xf32>
    %1216 = arith.mulf %1215, %1209 : vector<16x32xf32>
    %1217 = math.sqrt %1214 : vector<16x1xf32>
    %cst_546 = arith.constant 9.99999997E-7 : f32
    %1218 = vector.broadcast %cst_546 : f32 to vector<16x1xf32>
    %1219 = arith.addf %1217, %1218 : vector<16x1xf32>
    %1220 = vector.broadcast %1219 : vector<16x1xf32> to vector<16x32xf32>
    %1221 = arith.divf %1216, %1220 : vector<16x32xf32>
    %1222 = vector.broadcast %1203 : vector<1x32xf32> to vector<16x32xf32>
    %1223 = arith.addf %1221, %1222 : vector<16x32xf32>
    %c0_547 = arith.constant 0 : index
    %c0_548 = arith.constant 0 : index
    %1224 = vector.load %arg35[%c0_547, %c0_548] : memref<32x32xf32, #tpu.memory_space<vmem>>, vector<32x32xf32>
    tpu.vector_store %arg35[%c0_547, %c0_548], %649 {strides = array<i32>} : memref<32x32xf32, #tpu.memory_space<vmem>>, vector<32x32xf32>,
    %c0_549 = arith.constant 0 : index
    %c0_550 = arith.constant 0 : index
    %1225 = vector.load %arg36[%c0_549, %c0_550] : memref<16x32xf32, #tpu.memory_space<vmem>>, vector<16x32xf32>
    tpu.vector_store %arg36[%c0_549, %c0_550], %1223 {strides = array<i32>} : memref<16x32xf32, #tpu.memory_space<vmem>>, vector<16x32xf32>,
    return
  }
}

</mosaic_0001>

<bundles_post_ra>
// kernel: ne.22
= control target key start
LH: loop header
LB: loop body
LE: loop exit
PB: predicated region body
PF: predicated region fallthrough
CT: control target
= control target key end

     0   :  { %vm7_vm0 = vcmask 130048   ;;  %vm13_vm1 = vcmask 261248   ;;  %s39_s0 = inlined_call_operand.vmem [shape: s32[2,16], index: 0, kind: input, shape index: {}]   ;;  %s40_s1 = inlined_call_operand.vmem [shape: s32[32], index: 1, kind: output, shape index: {}]  }
   0x1   :  { %v4_v0 = vld [vmem:[%s39_s0] sm:$0x3]  ;;  %s22_s0 = smov 16  }
   0x2   :  { %5 = vst [vmem:[#allocation1] sm:$0x3] %v4_v0 }
   0x9   :  { %v10_v1 = vld [vmem:[#allocation1 + $0x1] sm:$0x1]   ;;  %v6_v2 = vld [vmem:[#allocation1] sm:$0x1]  }
   0xa   :  { %11 = vrot.lane.b32.xlu0 %v10_v1, %s22_s0  ;;  %8 = vst.msk [vmem:[#allocation0] sm:$0x1] %vm7_vm0, %v6_v2  }
  0x7c   :  { %v12_v3 = vpop.permute.xlu0 %11  }
  0x7d   :  { %14 = vst.msk [vmem:[#allocation0] sm:$0x1] %vm13_vm1, %v12_v3  }
  0x84   :  { %v18_v4 = vld [vmem:[#allocation0] sm:$0x1] }
  0x85   :  { %20 = vst [vmem:[%s40_s1] sm:$0x1] %v18_v4 }

// kernel: ne.29
= control target key start
LH: loop header
LB: loop body
LE: loop exit
PB: predicated region body
PF: predicated region fallthrough
CT: control target
= control target key end

     0   :  { %vm7_vm0 = vcmask 64512   ;;  %vm13_vm1 = vcmask 130112   ;;  %s39_s0 = inlined_call_operand.vmem [shape: s32[2,8], index: 0, kind: input, shape index: {}]   ;;  %s40_s1 = inlined_call_operand.vmem [shape: s32[16], index: 1, kind: output, shape index: {}]  }
   0x1   :  { %v4_v0 = vld [vmem:[%s39_s0] sm:$0x3]  ;;  %s22_s0 = smov 8  }
   0x2   :  { %5 = vst [vmem:[#allocation1] sm:$0x3] %v4_v0 }
   0x9   :  { %v10_v1 = vld [vmem:[#allocation1 + $0x1] sm:$0x1]   ;;  %v6_v2 = vld [vmem:[#allocation1] sm:$0x1]  }
   0xa   :  { %11 = vrot.lane.b32.xlu0 %v10_v1, %s22_s0  ;;  %8 = vst.msk [vmem:[#allocation0] sm:$0x1] %vm7_vm0, %v6_v2  }
  0x7c   :  { %v12_v3 = vpop.permute.xlu0 %11  }
  0x7d   :  { %14 = vst.msk [vmem:[#allocation0] sm:$0x1] %vm13_vm1, %v12_v3  }
  0x84   :  { %v18_v4 = vld [vmem:[#allocation0] sm:$0x1] }
  0x85   :  { %20 = vst [vmem:[%s40_s1] sm:$0x1] %v18_v4 }

// kernel: dcan_forward.1
= control target key start
LH: loop header
LB: loop body
LE: loop exit
PB: predicated region body
PF: predicated region fallthrough
CT: control target
= control target key end

     0   :  { %s19595_s6 = smov 1   ;;  %s19596_s10 = smov 2   ;;  %s22397_s0 = inlined_call_operand.smem [shape: u32[37], index: -1, kind: input, shape index: {}] }
   0x1   :  { %s19654_s5 = sld [smem:[%s22397_s0]]   ;;  %s19597_s14 = smov 3  }
   0x2   :  { %s19659_s9 = sld [smem:[%s22397_s0 + %s19595_s6]]   ;;  %s19598_s18 = smov 4  }
   0x3   :  { %s19664_s13 = sld [smem:[%s22397_s0 + %s19596_s10]]   ;;  %s19599_s22 = smov 5  }
   0x4   :  { %s19669_s17 = sld [smem:[%s22397_s0 + %s19597_s14]]   ;;  %s19600_s26 = smov 6  }
   0x5   :  { %s19674_s21 = sld [smem:[%s22397_s0 + %s19598_s18]]   ;;  %s19601_s30 = smov 7  }
   0x6   :  { %s19679_s25 = sld [smem:[%s22397_s0 + %s19599_s22]]   ;;  %s19602_s4 = smov 8  }
   0x7   :  { %s19684_s29 = sld [smem:[%s22397_s0 + %s19600_s26]]   ;;  %s19603_s10 = smov 9  }
   0x8   :  { %22419 = sst [smem:[#allocation8_spill]] %s19659_s9  ;;  %s19604_s15 = smov 10  }
   0x9   :  { %s19689_s3 = sld [smem:[%s22397_s0 + %s19601_s30]]   ;;  %s19605_s20 = smov 11  }
   0xa   :  { %22420 = sst [smem:[#allocation9_spill]] %s19669_s17  ;;  %s19606_s26 = smov 12  }
   0xb   :  { %22421 = sst [smem:[#allocation10_spill]] %s19674_s21  ;;  %s19607_s1 = smov 13  }
   0xc   :  { %s19694_s8 = sld [smem:[%s22397_s0 + %s19602_s4]]   ;;  %s19608_s7 = smov 14  }
   0xd   :  { %s19699_s14 = sld [smem:[%s22397_s0 + %s19603_s10]]   ;;  %s19610_s22 = smov 16  }
   0xe   :  { %s19704_s19 = sld [smem:[%s22397_s0 + %s19604_s15]]   ;;  %s19609_s15 = smov 15  }
   0xf   :  { %s19709_s24 = sld [smem:[%s22397_s0 + %s19605_s20]]   ;;  %s19611_s28 = smov 17  }
  0x10   :  { %s19714_s30 = sld [smem:[%s22397_s0 + %s19606_s26]]  }
  0x11   :  { %s19719_s6 = sld [smem:[%s22397_s0 + %s19607_s1]]  }
  0x12   :  { %s19724_s12 = sld [smem:[%s22397_s0 + %s19608_s7]]   ;;  %s19612_s7 = smov 18  }
  0x13   :  { %s19729_s20 = sld [smem:[%s22397_s0 + %s19609_s15]]   ;;  %s19613_s15 = smov 19  }
  0x14   :  { %s19734_s27 = sld [smem:[%s22397_s0 + %s19610_s22]]   ;;  %s19614_s22 = smov 20  }
  0x15   :  { %s19739_s4 = sld [smem:[%s22397_s0 + %s19611_s28]]   ;;  %s19615_s28 = smov 21  }
  0x16   :  { %s19744_s21 = sld [smem:[%s22397_s0 + %s19612_s7]]   ;;  %s19616_s7 = smov 22  }
  0x17   :  { %s19749_s17 = sld [smem:[%s22397_s0 + %s19613_s15]]   ;;  %s19617_s15 = smov 23  }
  0x18   :  { %s19754_s9 = sld [smem:[%s22397_s0 + %s19614_s22]]   ;;  %s19618_s22 = smov 24  }
  0x1b   :  { %22422 = sst [smem:[#allocation11_spill]] %s19739_s4 }
  0x1c   :  { %22423 = sst [smem:[#allocation12_spill]] %s19744_s21 }
  0x1d   :  { %22424 = sst [smem:[#allocation13_spill]] %s19749_s17 }
  0x1e   :  { %22425 = sst [smem:[#allocation14_spill]] %s19754_s9 }
  0x1f   :  { %s19759_s4 = sld [smem:[%s22397_s0 + %s19615_s28]]   ;;  %s19619_s28 = smov 25  }
  0x20   :  { %s19764_s21 = sld [smem:[%s22397_s0 + %s19616_s7]]   ;;  %s19620_s7 = smov 26  }
  0x21   :  { %s19769_s17 = sld [smem:[%s22397_s0 + %s19617_s15]]   ;;  %s19621_s15 = smov 27  }
  0x22   :  { %s19774_s9 = sld [smem:[%s22397_s0 + %s19618_s22]]   ;;  %s19622_s22 = smov 28  }
  0x25   :  { %22426 = sst [smem:[#allocation15_spill]] %s19759_s4 }
  0x26   :  { %22427 = sst [smem:[#allocation16_spill]] %s19764_s21 }
  0x27   :  { %22428 = sst [smem:[#allocation17_spill]] %s19769_s17 }
  0x28   :  { %22429 = sst [smem:[#allocation18_spill]] %s19774_s9 }
  0x29   :  { %s19779_s4 = sld [smem:[%s22397_s0 + %s19619_s28]]   ;;  %s19623_s28 = smov 29  }
  0x2a   :  { %s19784_s21 = sld [smem:[%s22397_s0 + %s19620_s7]]   ;;  %s19624_s7 = smov 30  }
  0x2b   :  { %s19789_s17 = sld [smem:[%s22397_s0 + %s19621_s15]]   ;;  %s19625_s15 = smov 31  }
  0x2c   :  { %s19794_s9 = sld [smem:[%s22397_s0 + %s19622_s22]]   ;;  %s19626_s22 = smov 32  }
  0x2f   :  { %22430 = sst [smem:[#allocation19_spill]] %s19779_s4 }
  0x30   :  { %22431 = sst [smem:[#allocation20_spill]] %s19784_s21 }
  0x31   :  { %22432 = sst [smem:[#allocation21_spill]] %s19789_s17 }
  0x32   :  { %22433 = sst [smem:[#allocation22_spill]] %s19794_s9 }
  0x33   :  { %s19799_s4 = sld [smem:[%s22397_s0 + %s19623_s28]]   ;;  %s19627_s28 = smov 33  }
  0x34   :  { %s19804_s21 = sld [smem:[%s22397_s0 + %s19624_s7]]   ;;  %s19628_s7 = smov 34  }
  0x35   :  { %s19809_s17 = sld [smem:[%s22397_s0 + %s19625_s15]]   ;;  %s19629_s15 = smov 35  }
  0x36   :  { %s19814_s9 = sld [smem:[%s22397_s0 + %s19626_s22]]   ;;  %s19630_s22 = smov 36  }
  0x39   :  { %22434 = sst [smem:[#allocation23_spill]] %s19799_s4 }
  0x3a   :  { %22435 = sst [smem:[#allocation24_spill]] %s19804_s21 }
  0x3b   :  { %22436 = sst [smem:[#allocation25_spill]] %s19809_s17 }
  0x3c   :  { %22437 = sst [smem:[#allocation26_spill]] %s19814_s9 }
  0x3d   :  { %s19819_s4 = sld [smem:[%s22397_s0 + %s19627_s28]]  }
  0x3e   :  { %s19824_s21 = sld [smem:[%s22397_s0 + %s19628_s7]]  }
  0x3f   :  { %s19829_s17 = sld [smem:[%s22397_s0 + %s19629_s15]]  }
  0x40   :  { %s19834_s9 = sld [smem:[%s22397_s0 + %s19630_s22]]  }
  0x41   :  { %79 = vsyncpa [#allocation3], 0  ;;  %v165_v0 = vld [vmem:[%s19679_s25] sm:$0xff]  ;;  %v166_v1 = vld [vmem:[%s19679_s25 + $0x8] sm:$0xff]  ;;  %vm181_vm0 = vcmask 261120  }
  0x42   :  { %v167_v2 = vld [vmem:[%s19679_s25 + $0x10] sm:$0xff]  ;;  %v17394_v3 = vpack.c.bf16 %v166_v1, %v165_v0  ;;  %v168_v4 = vld [vmem:[%s19679_s25 + $0x18] sm:$0xff]  ;;  %v151_v5 = vld [vmem:[%s19654_s5] sm:$0xff] }
  0x43   :  { %v17398_v6 = vpack.c.bf16 %v168_v4, %v167_v2  ;;  %16030 = vmatprep.mubr.msk.f32.mxu0 %vm181_vm0, %v151_v5 }
  0x44   :  { %80 = vsyncpa [#allocation5], 0  ;;  %17395 = vmatprep.subr.bf16.mxu0 %v17394_v3  ;;  %v152_v7 = vld [vmem:[%s19654_s5 + $0x8] sm:$0xff]  ;;  %v153_v8 = vld [vmem:[%s19654_s5 + $0x10] sm:$0xff]  ;;  %vm291_vm1 = vcmask 64512   ;;  %s19631_s0 = smov 88  }
  0x45   :  { %17397 = vmatpush3.bf16.msra.mxu0 %v17394_v3  ;;  %v154_v9 = vld [vmem:[%s19654_s5 + $0x18] sm:$0xff]  ;;  %v14582_v10 = vld [vmem:[%s19684_s29] ss:$0 sm:$0xff]  ;;  %s19632_s28 = smov 96   ;;  %s19633_s1 = smov 120   ;;  %vm19885_vm2 = vmpackc.low %vm291_vm1, %vm291_vm1 }
  0x46   :  { %17399 = vmatprep.subr.bf16.mxu0 %v17398_v6  ;;  %v19916_v43 = vld [vmem:[%s19664_s13 + $0x8] sm:$0xff]  ;;  %v19919_v46 = vld [vmem:[%s19664_s13] sm:$0xff]  ;;  %v19925_v53 = vld [vmem:[%s19664_s13 + $0x10] sm:$0xff]  ;;  %s19634_s2 = smov 64   ;;  %s19635_s7 = smov 80  }
  0x47   :  { %v19929_v57 = vld [vmem:[%s19664_s13 + $0x18] sm:$0xff]  ;;  %s19636_s10 = smov 112   ;;  %s19637_s11 = smov 56  }
  0x48   :  { %s19638_s15 = smov 72   ;;  %s19639_s16 = smov 104  }
  0x49   :  { %17401 = vmatpush3.bf16.msra.mxu0 %v17398_v6  ;;  %s22418_s18 = smov 48   ;;  %s22417_s22 = smov 40  }
  0x4a   :  { %s22454_s23 = sld [smem:[#allocation21_spill]]  ;;  %s22455_s26 = sld [smem:[#allocation25_spill]] }
  0x4c   :  { %16031 = vmatmul.mubr.msk.f32.vlgmr.msra.gmra.mrb[0].mxu0 %vm181_vm0, %v152_v7 }
  0x4d   :  { %16033 = vmatprep.mubr.msk.f32.mxu0 %vm181_vm0, %v153_v8 }
  0x50   :  { %16034 = vmatmul.mubr.msk.f32.gmra.mrb[2].mxu0 %vm181_vm0, %v154_v9 }
 0x11f   :  { %v16032_v11 = vpop.f32.mrb[0].mxu0 }
 0x120   :  { %v19849_v12 = vadd.f32 %v16032_v11, %v14582_v10  ;;  %v260_v13 = vpop.f32.mrb[1].mxu0 }
 0x121   :  { %v19851_v14 = vadd.f32 %v14582_v10, %v260_v13 }
 0x123   :  { %v16035_v15 = vpop.f32.mrb[2].mxu0  ;;  %16044 = vmatprep.mubr.msk.f32.mxu1 %vm291_vm1, %v19851_v14  ;;  %v19857_v16 = vpack.i.bf16 %v19849_v12, %v19851_v14 }
 0x124   :  { %v19859_v17 = vadd.f32 %v16035_v15, %v14582_v10  ;;  %v270_v18 = vpop.f32.mrb[3].mxu0 }
 0x125   :  { %v19861_v19 = vadd.f32 %v14582_v10, %v270_v18  ;;  %18408 = vrot.lane.b32.xlu1 %v19857_v16, %s19631_s0  ;;  %18398 = vrot.lane.b32.xlu0 %v19857_v16, %s19632_s28 }
 0x127   :  { %v19869_v20 = vpack.i.bf16 %v19859_v17, %v19861_v19 }
 0x129   :  { %18413 = vrot.lane.b32.xlu1 %v19869_v20, %s19631_s0  ;;  %18403 = vrot.lane.b32.xlu0 %v19869_v20, %s19632_s28 }
 0x12d   :  { %556 = vrot.lane.b32.xlu1 %v19849_v12, %s19633_s1  ;;  %554 = vrot.lane.b32.xlu0 %v19851_v14, %s19633_s1 }
 0x131   :  { %560 = vrot.lane.b32.xlu1 %v19859_v17, %s19633_s1  ;;  %558 = vrot.lane.b32.xlu0 %v19861_v19, %s19633_s1 }
 0x197   :  { %v18399_v21 = vpop.permute.xlu0 %18398  ;;  %v18409_v29 = vpop.permute.xlu1 %18408 }
 0x198   :  { %v18401_v22 = vunpack.i.h.bf16 %v18399_v21  ;;  %v18400_v23 = vunpack.i.l.bf16 %v18399_v21  ;;  %v18411_v31 = vunpack.i.h.bf16 %v18409_v29  ;;  %v18410_v32 = vunpack.i.l.bf16 %v18409_v29 }
 0x19a   :  { %v17402_v25 = vpack.c.bf16 %v18401_v22, %v18400_v23  ;;  %v17422_v33 = vpack.c.bf16 %v18411_v31, %v18410_v32 }
 0x19b   :  { %v18404_v26 = vpop.permute.xlu0 %18403  ;;  %v18414_v34 = vpop.permute.xlu1 %18413 }
 0x19c   :  { %v18406_v27 = vunpack.i.h.bf16 %v18404_v26  ;;  %v18405_v28 = vunpack.i.l.bf16 %v18404_v26  ;;  %17404 = vmatprep.subr.msk.bf16.mxu1 %vm19885_vm2, %v17402_v25  ;;  %v18416_v35 = vunpack.i.h.bf16 %v18414_v34  ;;  %v18415_v36 = vunpack.i.l.bf16 %v18414_v34 }
 0x19d   :  { %17407 = vmatpush3.bf16.xpose.msk.msra.mxu1 %vm19885_vm2, %v17402_v25 }
 0x19e   :  { %v17408_v30 = vpack.c.bf16 %v18406_v27, %v18405_v28  ;;  %v17428_v37 = vpack.c.bf16 %v18416_v35, %v18415_v36 }
 0x19f   :  { %v555_v38 = vpop.permute.xlu0 %554  ;;  %v557_v39 = vpop.permute.xlu1 %556 }
 0x1a0   :  { %17410 = vmatprep.subr.msk.bf16.mxu1 %vm19885_vm2, %v17408_v30 }
 0x1a3   :  { %v559_v40 = vpop.permute.xlu0 %558  ;;  %v561_v41 = vpop.permute.xlu1 %560 }
 0x1a5   :  { %17413 = vmatpush3.bf16.xpose.msk.msra.mxu1 %vm19885_vm2, %v17408_v30 }
 0x1a6   :  { %17424 = vmatprep.subr.msk.bf16.mxu1 %vm19885_vm2, %v17422_v33 }
 0x1ac   :  { %16045 = vmatmul.mubr.msk.f32.vlgmr.msra.gmra.mrb[0].mxu1 %vm291_vm1, %v19849_v12 }
 0x1ad   :  { %16047 = vmatprep.mubr.msk.f32.mxu1 %vm291_vm1, %v19861_v19  ;;  %17427 = vmatpush3.bf16.xpose.msk.msra.mxu1 %vm19885_vm2, %v17422_v33 }
 0x1ae   :  { %17430 = vmatprep.subr.msk.bf16.mxu1 %vm19885_vm2, %v17428_v37 }
 0x1b0   :  { %16048 = vmatmul.mubr.msk.f32.gmra.mrb[2].mxu1 %vm291_vm1, %v19859_v17 }
 0x1b1   :  { %16072 = vmatprep.mubr.msk.f32.mxu1 %vm291_vm1, %v555_v38 }
 0x1b5   :  { %17433 = vmatpush3.bf16.xpose.msk.msra.mxu1 %vm19885_vm2, %v17428_v37 }
 0x1bc   :  { %16073 = vmatmul.mubr.msk.f32.vlgmr.msra.gmra.mrb[4].mxu1 %vm291_vm1, %v557_v39 }
 0x1bd   :  { %16075 = vmatprep.mubr.msk.f32.mxu1 %vm291_vm1, %v559_v40 }
 0x1c0   :  { %16076 = vmatmul.mubr.msk.f32.gmra.mrb[6].mxu1 %vm291_vm1, %v561_v41 }
 0x27f   :  { %v16046_v42 = vpop.f32.mrb[0].mxu1 }
 0x280   :  { %v394_v44 = vmul.f32 0.35355338, %v16046_v42  ;;  %v374_v45 = vpop.f32.mrb[1].mxu1 }
 0x281   :  { %v393_v47 = vmul.f32 0.35355338, %v374_v45 }
 0x282   :  { %v398_v48 = vadd.f32 %v394_v44, %v19916_v43 }
 0x283   :  { %v16049_v49 = vpop.f32.mrb[2].mxu1  ;;  %v397_v50 = vadd.f32 %v393_v47, %v19919_v46 }
 0x284   :  { %v384_v51 = vpop.f32.mrb[3].mxu1  ;;  %v404_v52 = vsel %vm181_vm0, %v398_v48, -inf  ;;  %v396_v54 = vmul.f32 0.35355338, %v16049_v49 }
 0x285   :  { %v395_v55 = vmul.f32 0.35355338, %v384_v51  ;;  %405 = vmax.xlane.f32.xlu1 %v404_v52  ;;  %v401_v56 = vsel %vm181_vm0, %v397_v50, -inf }
 0x286   :  { %402 = vmax.xlane.f32.xlu0 %v401_v56  ;;  %v400_v60 = vadd.f32 %v396_v54, %v19929_v57 }
 0x287   :  { %v399_v58 = vadd.f32 %v395_v55, %v19925_v53 }
 0x288   :  { %v410_v61 = vsel %vm181_vm0, %v400_v60, -inf }
 0x289   :  { %v407_v59 = vsel %vm181_vm0, %v399_v58, -inf }
 0x28a   :  { %408 = vmax.xlane.f32.xlu0 %v407_v59 }
 0x28e   :  { %411 = vmax.xlane.f32.xlu0 %v410_v61 }
 0x28f   :  { %v16074_v62 = vpop.f32.mrb[4].mxu1 }
 0x290   :  { %v652_v63 = vpop.f32.mrb[5].mxu1  ;;  %v672_v33 = vmul.f32 0.35355338, %v16074_v62 }
 0x291   :  { %v671_v34 = vmul.f32 0.35355338, %v652_v63 }
 0x292   :  { %v676_v35 = vadd.f32 %v672_v33, %v19916_v43 }
 0x293   :  { %v16077_v0 = vpop.f32.mrb[6].mxu1  ;;  %v19960_v37 = vadd.f32 %v671_v34, %v19919_v46 }
 0x294   :  { %v662_v1 = vpop.f32.mrb[7].mxu1  ;;  %v682_v38 = vsel %vm181_vm0, %v676_v35, -inf  ;;  %v674_v39 = vmul.f32 0.35355338, %v16077_v0 }
 0x295   :  { %v673_v36 = vmul.f32 0.35355338, %v662_v1  ;;  %v679_v40 = vsel %vm181_vm0, %v19960_v37, -inf }
 0x296   :  { %18418 = vrot.lane.b32.xlu1 %v19857_v16, %s19634_s2  ;;  %v19971_v44 = vadd.f32 %v674_v39, %v19929_v57 }
 0x297   :  { %v19966_v41 = vadd.f32 %v673_v36, %v19925_v53 }
 0x298   :  { %v688_v45 = vsel %vm181_vm0, %v19971_v44, -inf }
 0x299   :  { %v685_v42 = vsel %vm181_vm0, %v19966_v41, -inf }
 0x29a   :  { %18428 = vrot.lane.b32.xlu1 %v19857_v16, %s19635_s7 }
 0x29e   :  { %18433 = vrot.lane.b32.xlu1 %v19869_v20, %s19635_s7 }
 0x312   :  { %v406_v2 = vpop.xlane.xlu1 %405 }
 0x313   :  { %v414_v3 = vsub.f32 %v398_v48, %v406_v2  ;;  %v403_v4 = vpop.xlane.xlu0 %402 }
 0x314   :  { %v413_v5 = vsub.f32 %v397_v50, %v403_v4 }
 0x315   :  { %v419_v6 = vmul.f32 1.442695, %v414_v3 }
 0x316   :  { %v417_v7 = vmul.f32 1.442695, %v413_v5  ;;  %v18419_v8 = vpop.permute.xlu1 %18418 }
 0x317   :  { %18957 = vpow2.f32 %v419_v6  ;;  %v18421_v9 = vunpack.i.h.bf16 %v18419_v8  ;;  %v18420_v10 = vunpack.i.l.bf16 %v18419_v8  ;;  %v409_v22 = vpop.xlane.xlu0 %408 }
 0x318   :  { %18959 = vpow2.f32 %v417_v7  ;;  %v415_v26 = vsub.f32 %v399_v58, %v409_v22 }
 0x319   :  { %v17414_v11 = vpack.c.bf16 %v18421_v9, %v18420_v10 }
 0x31a   :  { %v421_v28 = vmul.f32 1.442695, %v415_v26  ;;  %v18429_v47 = vpop.permute.xlu1 %18428 }
 0x31b   :  { %17415 = vmatprep.subr.bf16.mxu0 %v17414_v11  ;;  %v412_v23 = vpop.xlane.xlu0 %411  ;;  %v18431_v52 = vunpack.i.h.bf16 %v18429_v47  ;;  %v18430_v54 = vunpack.i.l.bf16 %v18429_v47 }
 0x31c   :  { %17417 = vmatpush3.bf16.msra.mxu0 %v17414_v11  ;;  %v416_v25 = vsub.f32 %v400_v60, %v412_v23 }
 0x31d   :  { %v17442_v59 = vpack.c.bf16 %v18431_v52, %v18430_v54 }
 0x31e   :  { %v423_v27 = vmul.f32 1.442695, %v416_v25  ;;  %v18434_v48 = vpop.permute.xlu1 %18433 }
 0x31f   :  { %v18436_v63 = vunpack.i.h.bf16 %v18434_v48  ;;  %v18435_v0 = vunpack.i.l.bf16 %v18434_v48 }
 0x320   :  { %18961 = vpow2.f32 %v423_v27 }
 0x321   :  { %v19941_v13 = vpop.eup %18957  ;;  %18963 = vpow2.f32 %v421_v28  ;;  %v17448_v2 = vpack.c.bf16 %v18436_v63, %v18435_v0 }
 0x322   :  { %v18960_v15 = vpop.eup %18959  ;;  %v428_v18 = vsel %vm181_vm0, %v19941_v13, 0.0 }
 0x323   :  { %429 = vadd.xlane.f32.xlu0 %v428_v18  ;;  %v425_v21 = vsel %vm181_vm0, %v18960_v15, 0.0 }
 0x324   :  { %426 = vadd.xlane.f32.xlu1 %v425_v21 }
 0x32a   :  { %v18962_v29 = vpop.eup %18961 }
 0x32b   :  { %v18964_v30 = vpop.eup %18963  ;;  %v434_v31 = vsel %vm181_vm0, %v18962_v29, 0.0 }
 0x32c   :  { %v431_v32 = vsel %vm181_vm0, %v18964_v30, 0.0 }
 0x335   :  { %1028 = vrot.lane.b32.xlu1 %v19849_v12, %s19636_s10 }
 0x339   :  { %18423 = vrot.lane.b32.xlu0 %v19869_v20, %s19634_s2 }
 0x358   :  { %435 = vadd.xlane.f32.xlu0 %v434_v31 }
 0x359   :  { %432 = vadd.xlane.f32.xlu1 %v431_v32 }
 0x36a   :  { %1032 = vrot.lane.b32.xlu1 %v19859_v17, %s19636_s10 }
 0x36e   :  { %1026 = vrot.lane.b32.xlu0 %v19851_v14, %s19636_s10 }
 0x372   :  { %1030 = vrot.lane.b32.xlu0 %v19861_v19, %s19636_s10 }
 0x38e   :  { %683 = vmax.xlane.f32.xlu1 %v682_v38 }
 0x391   :  { %680 = vmax.xlane.f32.xlu0 %v679_v40 }
 0x395   :  { %686 = vmax.xlane.f32.xlu0 %v685_v42 }
 0x399   :  { %689 = vmax.xlane.f32.xlu0 %v688_v45 }
 0x3b0   :  { %v430_v49 = vpop.xlane.xlu0 %429 }
 0x3b1   :  { %18965 = vrcp.f32 %v430_v49  ;;  %v427_v50 = vpop.xlane.xlu1 %426 }
 0x3b2   :  { %18967 = vrcp.f32 %v427_v50 }
 0x3b4   :  { %v18424_v51 = vpop.permute.xlu0 %18423 }
 0x3b5   :  { %v18426_v55 = vunpack.i.h.bf16 %v18424_v51  ;;  %v18425_v56 = vunpack.i.l.bf16 %v18424_v51  ;;  %v1029_v3 = vpop.permute.xlu1 %1028 }
 0x3b7   :  { %v17418_v58 = vpack.c.bf16 %v18426_v55, %v18425_v56 }
 0x3b9   :  { %17419 = vmatprep.subr.bf16.mxu0 %v17418_v58 }
 0x3ba   :  { %17421 = vmatpush3.bf16.msra.mxu0 %v17418_v58 }
 0x3bb   :  { %v18966_v60 = vpop.eup %18965  ;;  %17444 = vmatprep.subr.msk.bf16.mxu0 %vm19885_vm2, %v17442_v59 }
 0x3bc   :  { %v18968_v61 = vpop.eup %18967  ;;  %v440_v1 = vmul.f32 %v18966_v60, %v19941_v13 }
 0x3bd   :  { %v438_v62 = vmul.f32 %v18968_v61, %v18960_v15 }
 0x3bf   :  { %16058 = vmatprep.mubr.msk.f32.mxu0 %vm181_vm0, %v438_v62 }
 0x3c0   :  { %16059 = vmatmul.mubr.msk.f32.vlgmr.msra.gmra.mrb[4].mxu0 %vm181_vm0, %v440_v1 }
 0x3c3   :  { %17447 = vmatpush3.bf16.xpose.msk.msra.mxu0 %vm19885_vm2, %v17442_v59 }
 0x3c4   :  { %17450 = vmatprep.subr.msk.bf16.mxu0 %vm19885_vm2, %v17448_v2 }
 0x3cb   :  { %17453 = vmatpush3.bf16.xpose.msk.msra.mxu0 %vm19885_vm2, %v17448_v2 }
 0x3e5   :  { %v436_v4 = vpop.xlane.xlu0 %435 }
 0x3e6   :  { %18969 = vrcp.f32 %v436_v4  ;;  %v433_v5 = vpop.xlane.xlu1 %432 }
 0x3e7   :  { %18971 = vrcp.f32 %v433_v5 }
 0x3e9   :  { %v1027_v9 = vpop.permute.xlu0 %1026 }
 0x3ea   :  { %v1033_v13 = vpop.permute.xlu1 %1032 }
 0x3ed   :  { %v1031_v11 = vpop.permute.xlu0 %1030 }
 0x3f0   :  { %v18970_v6 = vpop.eup %18969 }
 0x3f1   :  { %v18972_v7 = vpop.eup %18971  ;;  %v444_v10 = vmul.f32 %v18970_v6, %v18962_v29 }
 0x3f2   :  { %v442_v8 = vmul.f32 %v18972_v7, %v18964_v30 }
 0x3f4   :  { %16061 = vmatprep.mubr.msk.f32.mxu0 %vm181_vm0, %v442_v8 }
 0x3f5   :  { %16062 = vmatmul.mubr.msk.f32.gmra.mrb[6].mxu0 %vm181_vm0, %v444_v10 }
 0x3f6   :  { %16116 = vmatprep.mubr.msk.f32.mxu0 %vm291_vm1, %v1027_v9 }
 0x3f9   :  { %16117 = vmatmul.mubr.msk.f32.vlgmr.msra.gmra.mrb[8].mxu0 %vm291_vm1, %v1029_v3 }
 0x3fa   :  { %16119 = vmatprep.mubr.msk.f32.mxu0 %vm291_vm1, %v1031_v11 }
 0x3fd   :  { %16120 = vmatmul.mubr.msk.f32.gmra.mrb[10].mxu0 %vm291_vm1, %v1033_v13 }
 0x41b   :  { %v684_v15 = vpop.xlane.xlu1 %683 }
 0x41c   :  { %v692_v18 = vsub.f32 %v676_v35, %v684_v15 }
 0x41e   :  { %v697_v21 = vmul.f32 1.442695, %v692_v18  ;;  %v681_v22 = vpop.xlane.xlu0 %680 }
 0x41f   :  { %v691_v23 = vsub.f32 %v19960_v37, %v681_v22 }
 0x420   :  { %18973 = vpow2.f32 %v697_v21 }
 0x421   :  { %v695_v25 = vmul.f32 1.442695, %v691_v23 }
 0x422   :  { %v687_v26 = vpop.xlane.xlu0 %686 }
 0x423   :  { %18975 = vpow2.f32 %v695_v25  ;;  %v693_v27 = vsub.f32 %v19966_v41, %v687_v26 }
 0x425   :  { %v699_v28 = vmul.f32 1.442695, %v693_v27 }
 0x426   :  { %v690_v29 = vpop.xlane.xlu0 %689 }
 0x427   :  { %18977 = vpow2.f32 %v699_v28  ;;  %v694_v30 = vsub.f32 %v19971_v44, %v690_v29 }
 0x429   :  { %v701_v31 = vmul.f32 1.442695, %v694_v30 }
 0x42a   :  { %v19995_v32 = vpop.eup %18973 }
 0x42b   :  { %18979 = vpow2.f32 %v701_v31  ;;  %v706_v33 = vsel %vm181_vm0, %v19995_v32, 0.0 }
 0x42c   :  { %707 = vadd.xlane.f32.xlu0 %v706_v33 }
 0x42d   :  { %v18976_v34 = vpop.eup %18975 }
 0x42e   :  { %v703_v35 = vsel %vm181_vm0, %v18976_v34, 0.0 }
 0x42f   :  { %704 = vadd.xlane.f32.xlu1 %v703_v35  ;;  %v171_v35 = vld [vmem:[%s19689_s3 + $0x8] sm:$0xff] }
 0x431   :  { %v20000_v36 = vpop.eup %18977 }
 0x432   :  { %v709_v37 = vsel %vm181_vm0, %v20000_v36, 0.0 }
 0x433   :  { %710 = vadd.xlane.f32.xlu1 %v709_v37 }
 0x435   :  { %v20004_v38 = vpop.eup %18979 }
 0x436   :  { %v712_v39 = vsel %vm181_vm0, %v20004_v38, 0.0 }
 0x437   :  { %713 = vadd.xlane.f32.xlu0 %v712_v39 }
 0x444   :  { %18438 = vrot.lane.b32.xlu1 %v19857_v16, %s19637_s11 }
 0x448   :  { %18448 = vrot.lane.b32.xlu1 %v19857_v16, %s19638_s15 }
 0x44c   :  { %18453 = vrot.lane.b32.xlu1 %v19869_v20, %s19638_s15 }
 0x44d   :  { %18443 = vrot.lane.b32.xlu0 %v19869_v20, %s19637_s11 }
 0x450   :  { %1407 = vrot.lane.b32.xlu1 %v19849_v12, %s19639_s16 }
 0x451   :  { %1405 = vrot.lane.b32.xlu0 %v19851_v14, %s19639_s16 }
 0x454   :  { %1411 = vrot.lane.b32.xlu1 %v19859_v17, %s19639_s16 }
 0x455   :  { %1409 = vrot.lane.b32.xlu0 %v19861_v19, %s19639_s16 }
 0x493   :  { %v20024_v40 = vpop.f32.mrb[4].mxu0 }
 0x494   :  { %v20026_v41 = vpop.f32.mrb[5].mxu0 }
 0x4b9   :  { %v708_v44 = vpop.xlane.xlu0 %707 }
 0x4bc   :  { %v705_v42 = vpop.xlane.xlu1 %704 }
 0x4bd   :  { %18981 = vrcp.f32 %v705_v42 }
 0x4be   :  { %18983 = vrcp.f32 %v708_v44 }
 0x4c0   :  { %v711_v45 = vpop.xlane.xlu1 %710 }
 0x4c1   :  { %18985 = vrcp.f32 %v711_v45 }
 0x4c4   :  { %v18439_v12 = vpop.permute.xlu1 %18438  ;;  %v714_v47 = vpop.xlane.xlu0 %713 }
 0x4c5   :  { %v18441_v48 = vunpack.i.h.bf16 %v18439_v12  ;;  %v18440_v14 = vunpack.i.l.bf16 %v18439_v12  ;;  %18987 = vrcp.f32 %v714_v47 }
 0x4c7   :  { %v18982_v49 = vpop.eup %18981  ;;  %v17434_v17 = vpack.c.bf16 %v18441_v48, %v18440_v14 }
 0x4c8   :  { %v18449_v50 = vpop.permute.xlu1 %18448  ;;  %v18444_v51 = vpop.permute.xlu0 %18443  ;;  %v716_v19 = vmul.f32 %v18982_v49, %v18976_v34 }
 0x4c9   :  { %v18451_v52 = vunpack.i.h.bf16 %v18449_v50  ;;  %v18450_v54 = vunpack.i.l.bf16 %v18449_v50  ;;  %v18446_v55 = vunpack.i.h.bf16 %v18444_v51  ;;  %v18445_v56 = vunpack.i.l.bf16 %v18444_v51  ;;  %v20028_v58 = vpop.f32.mrb[6].mxu0  ;;  %17435 = vmatprep.subr.bf16.mxu1 %v17434_v17  ;;  %v18984_v62 = vpop.eup %18983 }
 0x4ca   :  { %v20030_v59 = vpop.f32.mrb[7].mxu0  ;;  %17437 = vmatpush3.bf16.msra.mxu1 %v17434_v17  ;;  %16086 = vmatprep.mubr.msk.f32.mxu1 %vm181_vm0, %v716_v19  ;;  %v718_v7 = vmul.f32 %v18984_v62, %v19995_v32 }
 0x4cb   :  { %v17462_v60 = vpack.c.bf16 %v18451_v52, %v18450_v54  ;;  %v17438_v61 = vpack.c.bf16 %v18446_v55, %v18445_v56  ;;  %v18986_v1 = vpop.eup %18985 }
 0x4cc   :  { %v18454_v63 = vpop.permute.xlu1 %18453  ;;  %v1406_v0 = vpop.permute.xlu0 %1405  ;;  %v720_v11 = vmul.f32 %v18986_v1, %v20000_v36  ;;  %v170_v36 = vld [vmem:[%s19689_s3] sm:$0xff] }
 0x4cd   :  { %v18456_v2 = vunpack.i.h.bf16 %v18454_v63  ;;  %v18455_v3 = vunpack.i.l.bf16 %v18454_v63  ;;  %v16118_v4 = vpop.f32.mrb[8].mxu0  ;;  %17439 = vmatprep.subr.bf16.mxu1 %v17438_v61  ;;  %17464 = vmatprep.subr.msk.bf16.mxu0 %vm19885_vm2, %v17462_v60 }
 0x4ce   :  { %v1144_v5 = vmul.f32 0.35355338, %v16118_v4  ;;  %v1124_v6 = vpop.f32.mrb[9].mxu0  ;;  %16152 = vmatprep.mubr.msk.f32.mxu0 %vm291_vm1, %v1406_v0  ;;  %17441 = vmatpush3.bf16.msra.mxu1 %v17438_v61 }
 0x4cf   :  { %v17468_v8 = vpack.c.bf16 %v18456_v2, %v18455_v3  ;;  %v1143_v9 = vmul.f32 0.35355338, %v1124_v6  ;;  %17467 = vmatpush3.bf16.xpose.msk.msra.mxu0 %vm19885_vm2, %v17462_v60  ;;  %v18988_v10 = vpop.eup %18987  ;;  %16092 = vmatprep.subr.mxu1 %v171_v35 }
 0x4d0   :  { %v1148_v13 = vadd.f32 %v1144_v5, %v19916_v43  ;;  %v16121_v15 = vpop.f32.mrb[10].mxu0  ;;  %v722_v27 = vmul.f32 %v18988_v10, %v20004_v38  ;;  %v1408_v31 = vpop.permute.xlu1 %1407 }
 0x4d1   :  { %16087 = vmatmul.mubr.msk.f32.vlgmr.msra.gmra.mrb[8].mxu1 %vm181_vm0, %v718_v7  ;;  %17470 = vmatprep.subr.msk.bf16.mxu0 %vm19885_vm2, %v17468_v8  ;;  %v1147_v18 = vadd.f32 %v1143_v9, %v19919_v46  ;;  %v1134_v21 = vpop.f32.mrb[11].mxu0  ;;  %v1146_v23 = vmul.f32 0.35355338, %v16121_v15  ;;  %v1410_v33 = vpop.permute.xlu0 %1409 }
 0x4d2   :  { %16089 = vmatprep.mubr.msk.f32.mxu1 %vm181_vm0, %v720_v11  ;;  %v1154_v22 = vsel %vm181_vm0, %v1148_v13, -inf  ;;  %v1145_v25 = vmul.f32 0.35355338, %v1134_v21  ;;  %16093 = vmatpush3.msra.mxu1 %v171_v35 }
 0x4d3   :  { %1155 = vmax.xlane.f32.xlu1 %v1154_v22  ;;  %v1151_v26 = vsel %vm181_vm0, %v1147_v18, -inf  ;;  %v1150_v30 = vadd.f32 %v1146_v23, %v19929_v57  ;;  %16100 = vmatprep.subr.mxu1 %v170_v36 }
 0x4d4   :  { %1152 = vmax.xlane.f32.xlu0 %v1151_v26  ;;  %v1149_v28 = vadd.f32 %v1145_v25, %v19925_v53  ;;  %v1412_v34 = vpop.permute.xlu1 %1411 }
 0x4d5   :  { %16090 = vmatmul.mubr.msk.f32.gmra.mrb[10].mxu1 %vm181_vm0, %v722_v27  ;;  %v1160_v32 = vsel %vm181_vm0, %v1150_v30, -inf }
 0x4d6   :  { %v1157_v29 = vsel %vm181_vm0, %v1149_v28, -inf }
 0x4d7   :  { %17473 = vmatpush3.bf16.xpose.msk.msra.mxu0 %vm19885_vm2, %v17468_v8 }
 0x4d8   :  { %1158 = vmax.xlane.f32.xlu0 %v1157_v29 }
 0x4dc   :  { %1161 = vmax.xlane.f32.xlu0 %v1160_v32 }
 0x4de   :  { %16153 = vmatmul.mubr.msk.f32.vlgmr.msra.gmra.mrb[12].mxu0 %vm291_vm1, %v1408_v31 }
 0x4df   :  { %16155 = vmatprep.mubr.msk.f32.mxu0 %vm291_vm1, %v1410_v33 }
 0x4e2   :  { %16156 = vmatmul.mubr.msk.f32.gmra.mrb[14].mxu0 %vm291_vm1, %v1412_v34 }
 0x560   :  { %v1156_v37 = vpop.xlane.xlu1 %1155 }
 0x561   :  { %v1164_v38 = vsub.f32 %v1148_v13, %v1156_v37  ;;  %v1153_v39 = vpop.xlane.xlu0 %1152 }
 0x562   :  { %v1163_v42 = vsub.f32 %v1147_v18, %v1153_v39 }
 0x563   :  { %v1169_v44 = vmul.f32 1.442695, %v1164_v38 }
 0x564   :  { %v1167_v45 = vmul.f32 1.442695, %v1163_v42 }
 0x565   :  { %18989 = vpow2.f32 %v1169_v44  ;;  %v1159_v12 = vpop.xlane.xlu0 %1158 }
 0x566   :  { %18991 = vpow2.f32 %v1167_v45  ;;  %v1165_v47 = vsub.f32 %v1149_v28, %v1159_v12 }
 0x568   :  { %v1171_v48 = vmul.f32 1.442695, %v1165_v47 }
 0x569   :  { %v1162_v14 = vpop.xlane.xlu0 %1161 }
 0x56a   :  { %18993 = vpow2.f32 %v1171_v48  ;;  %v1166_v49 = vsub.f32 %v1150_v30, %v1162_v14 }
 0x56c   :  { %v1173_v17 = vmul.f32 1.442695, %v1166_v49 }
 0x56e   :  { %18995 = vpow2.f32 %v1173_v17 }
 0x56f   :  { %v20061_v50 = vpop.eup %18989 }
 0x570   :  { %v18992_v51 = vpop.eup %18991  ;;  %v1178_v19 = vsel %vm181_vm0, %v20061_v50, 0.0 }
 0x571   :  { %1179 = vadd.xlane.f32.xlu0 %v1178_v19  ;;  %v1175_v52 = vsel %vm181_vm0, %v18992_v51, 0.0 }
 0x572   :  { %1176 = vadd.xlane.f32.xlu1 %v1175_v52 }
 0x574   :  { %v20066_v54 = vpop.eup %18993 }
 0x575   :  { %v1181_v55 = vsel %vm181_vm0, %v20066_v54, 0.0 }
 0x576   :  { %1182 = vadd.xlane.f32.xlu1 %v1181_v55 }
 0x578   :  { %v20070_v56 = vpop.eup %18995 }
 0x579   :  { %v1184_v60 = vsel %vm181_vm0, %v20070_v56, 0.0 }
 0x57a   :  { %1185 = vadd.xlane.f32.xlu0 %v1184_v60  ;;  %v172_v60 = vld [vmem:[%s19689_s3 + $0x10] sm:$0xff] }
 0x587   :  { %18458 = vrot.lane.b32.xlu1 %v19857_v16, %s22418_s18 }
 0x590   :  { %18463 = vrot.lane.b32.xlu0 %v19869_v20, %s22418_s18 }
 0x5a4   :  { %v16088_v61 = vpop.f32.mrb[8].mxu1 }
 0x5a5   :  { %v813_v62 = vpop.f32.mrb[9].mxu1 }
 0x5a6   :  { %16094 = vmatprep.mubr.msk.f32.mxu1 %vm291_vm1, %v813_v62 }
 0x5a7   :  { %16095 = vmatmul.mubr.msk.f32.vlgmr.msra.gmra.mrb[12].mxu1 %vm291_vm1, %v16088_v61 }
 0x5a8   :  { %v16091_v63 = vpop.f32.mrb[10].mxu1  ;;  %16101 = vmatpush3.msra.mxu1 %v170_v36 }
 0x5a9   :  { %v823_v0 = vpop.f32.mrb[11].mxu1 }
 0x5aa   :  { %16097 = vmatprep.mubr.msk.f32.mxu1 %vm291_vm1, %v823_v0 }
 0x5ab   :  { %16098 = vmatmul.mubr.msk.f32.gmra.mrb[14].mxu1 %vm291_vm1, %v16091_v63 }
 0x5ac   :  { %16102 = vmatprep.mubr.msk.f32.mxu1 %vm291_vm1, %v20026_v41 }
 0x5af   :  { %16103 = vmatmul.mubr.msk.f32.vlgmr.msra.gmra.mrb[12].mxu1 %vm291_vm1, %v20024_v40 }
 0x5b0   :  { %16105 = vmatprep.mubr.msk.f32.mxu1 %vm291_vm1, %v20030_v59 }
 0x5b1   :  { %v16154_v1 = vpop.f32.mrb[12].mxu0 }
 0x5b2   :  { %v1523_v2 = vmul.f32 0.35355338, %v16154_v1  ;;  %v1503_v3 = vpop.f32.mrb[13].mxu0 }
 0x5b3   :  { %v1522_v4 = vmul.f32 0.35355338, %v1503_v3  ;;  %16106 = vmatmul.mubr.msk.f32.gmra.mrb[14].mxu1 %vm291_vm1, %v20028_v58 }
 0x5b4   :  { %v1527_v5 = vadd.f32 %v1523_v2, %v19916_v43 }
 0x5b5   :  { %v16157_v6 = vpop.f32.mrb[14].mxu0  ;;  %v1526_v7 = vadd.f32 %v1522_v4, %v19919_v46 }
 0x5b6   :  { %v1525_v8 = vmul.f32 0.35355338, %v16157_v6  ;;  %v1513_v41 = vpop.f32.mrb[15].mxu0  ;;  %v1533_v9 = vsel %vm181_vm0, %v1527_v5, -inf }
 0x5b7   :  { %v1524_v40 = vmul.f32 0.35355338, %v1513_v41  ;;  %1534 = vmax.xlane.f32.xlu0 %v1533_v9  ;;  %v1530_v59 = vsel %vm181_vm0, %v1526_v7, -inf }
 0x5b8   :  { %1531 = vmax.xlane.f32.xlu1 %v1530_v59  ;;  %v1529_v10 = vadd.f32 %v1525_v8, %v19929_v57 }
 0x5b9   :  { %v1528_v11 = vadd.f32 %v1524_v40, %v19925_v53 }
 0x5ba   :  { %v1539_v58 = vsel %vm181_vm0, %v1529_v10, -inf }
 0x5bb   :  { %1540 = vmax.xlane.f32.xlu0 %v1539_v58  ;;  %v1536_v43 = vsel %vm181_vm0, %v1528_v11, -inf }
 0x5bc   :  { %1537 = vmax.xlane.f32.xlu1 %v1536_v43 }
 0x5fe   :  { %v1180_v13 = vpop.xlane.xlu0 %1179 }
 0x5ff   :  { %v1177_v46 = vpop.xlane.xlu1 %1176 }
 0x600   :  { %18997 = vrcp.f32 %v1177_v46 }
 0x601   :  { %18999 = vrcp.f32 %v1180_v13 }
 0x603   :  { %v1183_v15 = vpop.xlane.xlu1 %1182 }
 0x604   :  { %19001 = vrcp.f32 %v1183_v15 }
 0x607   :  { %v18459_v18 = vpop.permute.xlu1 %18458  ;;  %v1186_v21 = vpop.xlane.xlu0 %1185 }
 0x608   :  { %v18461_v22 = vunpack.i.h.bf16 %v18459_v18  ;;  %v18460_v23 = vunpack.i.l.bf16 %v18459_v18  ;;  %19003 = vrcp.f32 %v1186_v21 }
 0x60a   :  { %v18998_v57 = vpop.eup %18997  ;;  %v17454_v25 = vpack.c.bf16 %v18461_v22, %v18460_v23 }
 0x60b   :  { %v18464_v53 = vpop.permute.xlu0 %18463  ;;  %v1188_v26 = vmul.f32 %v18998_v57, %v18992_v51  ;;  %v19000_v30 = vpop.eup %18999  ;;  %v14651_v57 = vld [vmem:[%s19694_s8] ss:$0 sm:$0xff] }
 0x60c   :  { %v18466_v27 = vunpack.i.h.bf16 %v18464_v53  ;;  %v18465_v28 = vunpack.i.l.bf16 %v18464_v53  ;;  %17455 = vmatprep.subr.bf16.mxu1 %v17454_v25  ;;  %v1190_v32 = vmul.f32 %v19000_v30, %v20061_v50 }
 0x60d   :  { %17457 = vmatpush3.bf16.msra.mxu1 %v17454_v25  ;;  %16130 = vmatprep.mubr.msk.f32.mxu1 %vm181_vm0, %v1188_v26 }
 0x60e   :  { %v17458_v29 = vpack.c.bf16 %v18466_v27, %v18465_v28  ;;  %v19002_v31 = vpop.eup %19001  ;;  %v19517_v28 = vld [vmem:[%s19654_s5 + $0x8] sm:$0xff] }
 0x60f   :  { %v1192_v34 = vmul.f32 %v19002_v31, %v20066_v54  ;;  %v19518_v31 = vld [vmem:[%s19654_s5] sm:$0xff] }
 0x610   :  { %17459 = vmatprep.subr.bf16.mxu1 %v17458_v29 }
 0x611   :  { %17461 = vmatpush3.bf16.msra.mxu1 %v17458_v29 }
 0x612   :  { %v19004_v33 = vpop.eup %19003  ;;  %16136 = vmatprep.subr.mxu1 %v172_v60 }
 0x613   :  { %v1194_v35 = vmul.f32 %v19004_v33, %v20070_v56 }
 0x614   :  { %16131 = vmatmul.mubr.msk.f32.vlgmr.msra.gmra.mrb[16].mxu1 %vm181_vm0, %v1190_v32 }
 0x615   :  { %16133 = vmatprep.mubr.msk.f32.mxu1 %vm181_vm0, %v1192_v34  ;;  %16137 = vmatpush3.msra.mxu1 %v172_v60 }
 0x618   :  { %16134 = vmatmul.mubr.msk.f32.gmra.mrb[18].mxu1 %vm181_vm0, %v1194_v35 }
 0x644   :  { %v1535_v36 = vpop.xlane.xlu0 %1534 }
 0x645   :  { %v1543_v37 = vsub.f32 %v1527_v5, %v1535_v36  ;;  %v1532_v38 = vpop.xlane.xlu1 %1531 }
 0x646   :  { %v1542_v39 = vsub.f32 %v1526_v7, %v1532_v38  ;;  %v19519_v38 = vld [vmem:[%s19654_s5 + $0x18] sm:$0xff] }
 0x647   :  { %v1548_v42 = vmul.f32 1.442695, %v1543_v37 }
 0x648   :  { %v1546_v44 = vmul.f32 1.442695, %v1542_v39  ;;  %v1541_v45 = vpop.xlane.xlu0 %1540 }
 0x649   :  { %19005 = vpow2.f32 %v1548_v42  ;;  %v1545_v12 = vsub.f32 %v1529_v10, %v1541_v45  ;;  %v1538_v47 = vpop.xlane.xlu1 %1537  ;;  %v19520_v42 = vld [vmem:[%s19654_s5 + $0x10] sm:$0xff] }
 0x64a   :  { %19007 = vpow2.f32 %v1546_v44  ;;  %v1544_v48 = vsub.f32 %v1528_v11, %v1538_v47  ;;  %v173_v11 = vld [vmem:[%s19689_s3 + $0x18] sm:$0xff] }
 0x64b   :  { %v1552_v14 = vmul.f32 1.442695, %v1545_v12 }
 0x64c   :  { %v1550_v49 = vmul.f32 1.442695, %v1544_v48 }
 0x64d   :  { %19009 = vpow2.f32 %v1552_v14 }
 0x64e   :  { %19011 = vpow2.f32 %v1550_v49 }
 0x653   :  { %v19006_v17 = vpop.eup %19005 }
 0x654   :  { %v19008_v50 = vpop.eup %19007  ;;  %v1557_v51 = vsel %vm181_vm0, %v19006_v17, 0.0 }
 0x655   :  { %1558 = vadd.xlane.f32.xlu0 %v1557_v51  ;;  %v1554_v19 = vsel %vm181_vm0, %v19008_v50, 0.0 }
 0x656   :  { %1555 = vadd.xlane.f32.xlu1 %v1554_v19 }
 0x657   :  { %v19010_v52 = vpop.eup %19009 }
 0x658   :  { %v19012_v54 = vpop.eup %19011  ;;  %v1563_v55 = vsel %vm181_vm0, %v19010_v52, 0.0 }
 0x659   :  { %1564 = vadd.xlane.f32.xlu0 %v1563_v55  ;;  %v1560_v56 = vsel %vm181_vm0, %v19012_v54, 0.0 }
 0x65a   :  { %1561 = vadd.xlane.f32.xlu1 %v1560_v56 }
 0x66b   :  { %18468 = vrot.lane.b32.xlu1 %v19857_v16, %s22417_s22 }
 0x66f   :  { %18473 = vrot.lane.b32.xlu0 %v19869_v20, %s22417_s22 }
 0x6e2   :  { %v1559_v61 = vpop.xlane.xlu0 %1558 }
 0x6e3   :  { %v1556_v62 = vpop.xlane.xlu1 %1555 }
 0x6e4   :  { %19013 = vrcp.f32 %v1556_v62 }
 0x6e5   :  { %19015 = vrcp.f32 %v1559_v61 }
 0x6e6   :  { %v1565_v63 = vpop.xlane.xlu0 %1564 }
 0x6e7   :  { %v1562_v0 = vpop.xlane.xlu1 %1561  ;;  %v16132_v1 = vpop.f32.mrb[16].mxu1 }
 0x6e8   :  { %v1285_v2 = vpop.f32.mrb[17].mxu1  ;;  %19017 = vrcp.f32 %v1562_v0 }
 0x6e9   :  { %16138 = vmatprep.mubr.msk.f32.mxu1 %vm291_vm1, %v1285_v2  ;;  %19019 = vrcp.f32 %v1565_v63 }
 0x6ea   :  { %v18474_v3 = vpop.permute.xlu0 %18473  ;;  %16139 = vmatmul.mubr.msk.f32.vlgmr.msra.gmra.mrb[12].mxu1 %vm291_vm1, %v16132_v1 }
 0x6eb   :  { %v18469_v4 = vpop.permute.xlu1 %18468  ;;  %v16135_v5 = vpop.f32.mrb[18].mxu1  ;;  %v18476_v16 = vunpack.i.h.bf16 %v18474_v3  ;;  %v18475_v6 = vunpack.i.l.bf16 %v18474_v3 }
 0x6ec   :  { %v18471_v20 = vunpack.i.h.bf16 %v18469_v4  ;;  %v18470_v7 = vunpack.i.l.bf16 %v18469_v4  ;;  %v1295_v8 = vpop.f32.mrb[19].mxu1  ;;  %v1902_v4 = vld [vmem:[%s19699_s14] sm:$0xff] }
 0x6ed   :  { %16141 = vmatprep.mubr.msk.f32.mxu1 %vm291_vm1, %v1295_v8  ;;  %v17478_v59 = vpack.c.bf16 %v18476_v16, %v18475_v6  ;;  %v1904_v16 = vld [vmem:[%s19699_s14 + $0x10] sm:$0xff]  ;;  %v1907_v8 = vld [vmem:[%s19709_s24] sm:$0xff] }
 0x6ee   :  { %v19014_v41 = vpop.eup %19013  ;;  %16142 = vmatmul.mubr.msk.f32.gmra.mrb[14].mxu1 %vm291_vm1, %v16135_v5  ;;  %v17474_v9 = vpack.c.bf16 %v18471_v20, %v18470_v7  ;;  %v1903_v5 = vld [vmem:[%s19699_s14 + $0x8] sm:$0xff]  ;;  %v1905_v20 = vld [vmem:[%s19699_s14 + $0x18] sm:$0xff] }
 0x6ef   :  { %v1567_v40 = vmul.f32 %v19014_v41, %v19008_v50  ;;  %v19016_v10 = vpop.eup %19015  ;;  %v17482_v6 = vpack.c.bf16 %v1903_v5, %v1902_v4  ;;  %v17486_v7 = vpack.c.bf16 %v1905_v20, %v1904_v16  ;;  %v1908_v41 = vld [vmem:[%s19709_s24 + $0x8] sm:$0xff]  ;;  %v1913_v16 = vld [vmem:[%s19709_s24 + $0x30] sm:$0xff] }
 0x6f0   :  { %17475 = vmatprep.subr.bf16.mxu1 %v17474_v9  ;;  %v1569_v43 = vmul.f32 %v19016_v10, %v19006_v17 }
 0x6f1   :  { %17477 = vmatpush3.bf16.msra.mxu1 %v17474_v9  ;;  %16166 = vmatprep.mubr.msk.f32.mxu1 %vm181_vm0, %v1567_v40  ;;  %v20162_v9 = vpack.c.bf16 %v1908_v41, %v1907_v8  ;;  %v1916_v8 = vld [vmem:[%s19709_s24 + $0x48] sm:$0xff] }
 0x6f2   :  { %17479 = vmatprep.subr.bf16.mxu1 %v17478_v59  ;;  %v19018_v58 = vpop.eup %19017  ;;  %17483 = vmatprep.subr.bf16.mxu0 %v17482_v6 }
 0x6f3   :  { %v19020_v46 = vpop.eup %19019  ;;  %v1571_v13 = vmul.f32 %v19018_v58, %v19012_v54  ;;  %17485 = vmatpush3.bf16.msra.mxu0 %v17482_v6  ;;  %v1914_v6 = vld [vmem:[%s19709_s24 + $0x38] sm:$0xff] }
 0x6f4   :  { %v1573_v15 = vmul.f32 %v19020_v46, %v19010_v52  ;;  %17487 = vmatprep.subr.bf16.mxu0 %v17486_v7  ;;  %v17502_v20 = vpack.c.bf16 %v1914_v6, %v1913_v16 }
 0x6f5   :  { %17481 = vmatpush3.bf16.msra.mxu1 %v17478_v59 }
 0x6f6   :  { %16172 = vmatprep.subr.mxu1 %v173_v11 }
 0x6f7   :  { %17489 = vmatpush3.bf16.msra.mxu0 %v17486_v7  ;;  %v1915_v7 = vld [vmem:[%s19709_s24 + $0x40] sm:$0xff] }
 0x6f8   :  { %16167 = vmatmul.mubr.msk.f32.vlgmr.msra.gmra.mrb[20].mxu1 %vm181_vm0, %v1569_v43  ;;  %17491 = vmatprep.subr.bf16.mxu0 %v20162_v9  ;;  %v17506_v41 = vpack.c.bf16 %v1916_v8, %v1915_v7  ;;  %v14663_v7 = vld [vmem:[%s19679_s25 + $0x28] sm:$0xff]  ;;  %v14664_v8 = vld [vmem:[%s19679_s25 + $0x30] sm:$0xff] }
 0x6f9   :  { %16169 = vmatprep.mubr.msk.f32.mxu1 %vm181_vm0, %v1571_v13  ;;  %16173 = vmatpush3.msra.mxu1 %v173_v11 }
 0x6fc   :  { %16170 = vmatmul.mubr.msk.f32.gmra.mrb[22].mxu1 %vm181_vm0, %v1573_v15 }
 0x7cb   :  { %v16168_v18 = vpop.f32.mrb[20].mxu1 }
 0x7cc   :  { %v1664_v21 = vpop.f32.mrb[21].mxu1 }
 0x7cd   :  { %16174 = vmatprep.mubr.msk.f32.mxu1 %vm291_vm1, %v1664_v21 }
 0x7ce   :  { %16175 = vmatmul.mubr.msk.f32.vlgmr.msra.gmra.mrb[12].mxu1 %vm291_vm1, %v16168_v18 }
 0x7cf   :  { %v16171_v22 = vpop.f32.mrb[22].mxu1 }
 0x7d0   :  { %v1674_v23 = vpop.f32.mrb[23].mxu1 }
 0x7d1   :  { %16177 = vmatprep.mubr.msk.f32.mxu1 %vm291_vm1, %v1674_v23 }
 0x7d2   :  { %16178 = vmatmul.mubr.msk.f32.gmra.mrb[14].mxu1 %vm291_vm1, %v16171_v22 }
 0x8a1   :  { %v16176_v25 = vpop.f32.mrb[12].mxu1 }
 0x8a2   :  { %v1791_v53 = vadd.f32 %v16176_v25, %v14651_v57  ;;  %v1761_v26 = vpop.f32.mrb[13].mxu1 }
 0x8a3   :  { %v1790_v27 = vadd.f32 %v14651_v57, %v1761_v26 }
 0x8a4   :  { %v1795_v29 = vadd.f32 %v19517_v28, %v1791_v53 }
 0x8a5   :  { %v16179_v30 = vpop.f32.mrb[14].mxu1  ;;  %v1794_v32 = vadd.f32 %v19518_v31, %v1790_v27 }
 0x8a6   :  { %v1793_v33 = vadd.f32 %v16179_v30, %v14651_v57  ;;  %v1771_v34 = vpop.f32.mrb[15].mxu1  ;;  %v1803_v35 = vsel %vm181_vm0, %v1795_v29, 0.0 }
 0x8a7   :  { %v1792_v36 = vadd.f32 %v14651_v57, %v1771_v34  ;;  %1804 = vadd.xlane.f32.xlu0 %v1803_v35  ;;  %v1800_v37 = vsel %vm181_vm0, %v1794_v32, 0.0 }
 0x8a8   :  { %1801 = vadd.xlane.f32.xlu1 %v1800_v37  ;;  %v1797_v39 = vadd.f32 %v19519_v38, %v1793_v33 }
 0x8a9   :  { %v1796_v44 = vadd.f32 %v19520_v42, %v1792_v36 }
 0x8aa   :  { %v1809_v45 = vsel %vm181_vm0, %v1797_v39, 0.0 }
 0x8ab   :  { %1810 = vadd.xlane.f32.xlu0 %v1809_v45  ;;  %v1806_v12 = vsel %vm181_vm0, %v1796_v44, 0.0  ;;  %v14652_v45 = vld [vmem:[%s19719_s6] ss:$0 sm:$0xff] }
 0x8ac   :  { %1807 = vadd.xlane.f32.xlu1 %v1806_v12 }
 0x934   :  { %v1805_v47 = vpop.xlane.xlu0 %1804 }
 0x935   :  { %v1814_v48 = vmul.f32 0.03125, %v1805_v47  ;;  %v1802_v14 = vpop.xlane.xlu1 %1801 }
 0x936   :  { %v1813_v49 = vmul.f32 0.03125, %v1802_v14 }
 0x937   :  { %v20136_v17 = vsub.f32 %v1795_v29, %v1814_v48 }
 0x938   :  { %v20138_v50 = vsub.f32 %v1794_v32, %v1813_v49  ;;  %v1811_v51 = vpop.xlane.xlu0 %1810  ;;  %v14653_v49 = vld [vmem:[%s19724_s12] ss:$0 sm:$0xff] }
 0x939   :  { %v1816_v19 = vmul.f32 0.03125, %v1811_v51  ;;  %v1808_v52 = vpop.xlane.xlu1 %1807  ;;  %v1822_v54 = vmul.f32 %v20136_v17, %v20136_v17  ;;  %v1849_v12 = vmul.f32 %v14652_v45, %v20136_v17 }
 0x93a   :  { %v1815_v55 = vmul.f32 0.03125, %v1808_v52  ;;  %v1821_v56 = vmul.f32 %v20138_v50, %v20138_v50  ;;  %v1848_v48 = vmul.f32 %v14652_v45, %v20138_v50  ;;  %v1909_v52 = vld [vmem:[%s19709_s24 + $0x10] sm:$0xff] }
 0x93b   :  { %v20144_v60 = vsub.f32 %v1797_v39, %v1816_v19  ;;  %v1828_v61 = vsel %vm181_vm0, %v1822_v54, 0.0  ;;  %v1910_v54 = vld [vmem:[%s19709_s24 + $0x18] sm:$0xff] }
 0x93c   :  { %v20147_v62 = vsub.f32 %v1796_v44, %v1815_v55  ;;  %1829 = vadd.xlane.f32.xlu0 %v1828_v61  ;;  %v1825_v63 = vsel %vm181_vm0, %v1821_v56, 0.0 }
 0x93d   :  { %1826 = vadd.xlane.f32.xlu1 %v1825_v63  ;;  %v1824_v0 = vmul.f32 %v20144_v60, %v20144_v60  ;;  %v1851_v55 = vmul.f32 %v14652_v45, %v20144_v60  ;;  %v1912_v60 = vld [vmem:[%s19709_s24 + $0x28] sm:$0xff] }
 0x93e   :  { %v1823_v1 = vmul.f32 %v20147_v62, %v20147_v62  ;;  %v1850_v61 = vmul.f32 %v14652_v45, %v20147_v62 }
 0x93f   :  { %v1834_v2 = vsel %vm181_vm0, %v1824_v0, 0.0 }
 0x940   :  { %1835 = vadd.xlane.f32.xlu0 %v1834_v2  ;;  %v1831_v3 = vsel %vm181_vm0, %v1823_v1, 0.0  ;;  %v17494_v1 = vpack.c.bf16 %v1910_v54, %v1909_v52 }
 0x941   :  { %1832 = vadd.xlane.f32.xlu1 %v1831_v3  ;;  %v1911_v3 = vld [vmem:[%s19709_s24 + $0x20] sm:$0xff] }
 0x942   :  { %v17498_v5 = vpack.c.bf16 %v1912_v60, %v1911_v3 }
 0x9c9   :  { %v1830_v40 = vpop.xlane.xlu0 %1829 }
 0x9ca   :  { %v1839_v59 = vmul.f32 0.032258064, %v1830_v40  ;;  %v1827_v10 = vpop.xlane.xlu1 %1826  ;;  %v1918_v40 = vld [vmem:[%s19709_s24 + $0x58] sm:$0xff] }
 0x9cb   :  { %v1838_v11 = vmul.f32 0.032258064, %v1827_v10  ;;  %v1919_v10 = vld [vmem:[%s19709_s24 + $0x60] sm:$0xff] }
 0x9cc   :  { %19021 = vrsqrt.f32 %v1839_v59  ;;  %vm1861_vm3 = vcmp.eq.f32.partialorder %v1839_v59, inf  ;;  %v1864_v22 = vand.u32 2147483648, %v1839_v59  ;;  %vm1863_vm4 = vcmp.eq.f32.partialorder %v1839_v59, 0.0 }
 0x9cd   :  { %19023 = vrsqrt.f32 %v1838_v11  ;;  %v1836_v58 = vpop.xlane.xlu0 %1835  ;;  %vm1854_vm5 = vcmp.eq.f32.partialorder %v1838_v11, inf  ;;  %v1857_v25 = vand.u32 2147483648, %v1838_v11  ;;  %vm1856_vm6 = vcmp.eq.f32.partialorder %v1838_v11, 0.0 }
 0x9ce   :  { %v1841_v43 = vmul.f32 0.032258064, %v1836_v58  ;;  %v1833_v46 = vpop.xlane.xlu1 %1832 }
 0x9cf   :  { %v1840_v13 = vmul.f32 0.032258064, %v1833_v46  ;;  %v1922_v46 = vld [vmem:[%s19709_s24 + $0x78] sm:$0xff] }
 0x9d0   :  { %19025 = vrsqrt.f32 %v1841_v43  ;;  %vm1875_vm7 = vcmp.eq.f32.partialorder %v1841_v43, inf  ;;  %vm1877_vm8 = vcmp.eq.f32.partialorder %v1841_v43, 0.0  ;;  %v1878_v32 = vand.u32 2147483648, %v1841_v43 }
 0x9d1   :  { %19027 = vrsqrt.f32 %v1840_v13  ;;  %vm1868_vm9 = vcmp.eq.f32.partialorder %v1840_v13, inf  ;;  %v1871_v36 = vand.u32 2147483648, %v1840_v13  ;;  %vm1870_vm10 = vcmp.eq.f32.partialorder %v1840_v13, 0.0 }
 0x9d6   :  { %v19022_v15 = vpop.eup %19021 }
 0x9d7   :  { %v19024_v18 = vpop.eup %19023  ;;  %v1860_v21 = vmul.f32 %v19022_v15, %v1839_v59  ;;  %v14654_v15 = vld [vmem:[%s19704_s19] ss:$0 sm:$0xff] }
 0x9d8   :  { %v1853_v23 = vmul.f32 %v19024_v18, %v1838_v11 }
 0x9d9   :  { %v1862_v57 = vsel %vm1861_vm3, %v1839_v59, %v1860_v21 }
 0x9da   :  { %v19026_v53 = vpop.eup %19025  ;;  %v1865_v26 = vsel %vm1863_vm4, %v1864_v22, %v1862_v57  ;;  %v1855_v27 = vsel %vm1854_vm5, %v1838_v11, %v1853_v23  ;;  %v1920_v11 = vld [vmem:[%s19709_s24 + $0x68] sm:$0xff] }
 0x9db   :  { %v19028_v28 = vpop.eup %19027  ;;  %v1881_v29 = vadd.f32 1e-06, %v1865_v26  ;;  %v1874_v30 = vmul.f32 %v19026_v53, %v1841_v43  ;;  %v1858_v31 = vsel %vm1856_vm6, %v1857_v25, %v1855_v27  ;;  %v17514_v58 = vpack.c.bf16 %v1920_v11, %v1919_v10 }
 0x9dc   :  { %v1867_v33 = vmul.f32 %v19028_v28, %v1840_v13  ;;  %v1880_v34 = vadd.f32 1e-06, %v1858_v31  ;;  %v14659_v31 = vld [vmem:[%s19714_s30] ss:$0 sm:$0xff] }
 0x9dd   :  { %19029 = vrcp.f32 %v1881_v29  ;;  %v1876_v35 = vsel %vm1875_vm7, %v1841_v43, %v1874_v30  ;;  %v1921_v43 = vld [vmem:[%s19709_s24 + $0x70] sm:$0xff] }
 0x9de   :  { %v1869_v37 = vsel %vm1868_vm9, %v1840_v13, %v1867_v33  ;;  %19031 = vrcp.f32 %v1880_v34  ;;  %v1879_v38 = vsel %vm1877_vm8, %v1878_v32, %v1876_v35  ;;  %v17518_v13 = vpack.c.bf16 %v1922_v46, %v1921_v43 }
 0x9df   :  { %v1872_v39 = vsel %vm1870_vm10, %v1871_v36, %v1869_v37  ;;  %v1883_v42 = vadd.f32 1e-06, %v1879_v38 }
 0x9e0   :  { %v1882_v44 = vadd.f32 1e-06, %v1872_v39 }
 0x9e1   :  { %19033 = vrcp.f32 %v1883_v42 }
 0x9e2   :  { %19035 = vrcp.f32 %v1882_v44 }
 0x9e7   :  { %v19030_v47 = vpop.eup %19029 }
 0x9e8   :  { %v19032_v14 = vpop.eup %19031  ;;  %v1887_v51 = vmul.f32 %v19030_v47, %v1849_v12 }
 0x9e9   :  { %v1885_v19 = vmul.f32 %v19032_v14, %v1848_v48 }
 0x9ea   :  { %v20175_v0 = vadd.f32 %v14653_v49, %v1887_v51 }
 0x9eb   :  { %v19034_v56 = vpop.eup %19033  ;;  %v20173_v63 = vadd.f32 %v14653_v49, %v1885_v19 }
 0x9ec   :  { %v19036_v17 = vpop.eup %19035  ;;  %v1891_v50 = vmul.f32 %v19034_v56, %v1851_v55 }
 0x9ed   :  { %16188 = vmatprep.mubr.msk.f32.mxu0 %vm181_vm0, %v20173_v63  ;;  %v1889_v2 = vmul.f32 %v19036_v17, %v1850_v61 }
 0x9ee   :  { %16189 = vmatmul.mubr.msk.f32.vlgmr.msra.gmra.mrb[16].mxu0 %vm181_vm0, %v20175_v0  ;;  %v20186_v4 = vadd.f32 %v14653_v49, %v1891_v50 }
 0x9ef   :  { %v20183_v62 = vadd.f32 %v14653_v49, %v1889_v2  ;;  %17493 = vmatpush3.bf16.msra.mxu0 %v20162_v9  ;;  %v1917_v9 = vld [vmem:[%s19709_s24 + $0x50] sm:$0xff] }
 0x9f0   :  { %17495 = vmatprep.subr.bf16.mxu0 %v17494_v1  ;;  %v17510_v59 = vpack.c.bf16 %v1918_v40, %v1917_v9  ;;  %v14665_v9 = vld [vmem:[%s19679_s25 + $0x38] sm:$0xff] }
 0x9f1   :  { %16191 = vmatprep.mubr.msk.f32.mxu0 %vm181_vm0, %v20183_v62  ;;  %v17526_v40 = vpack.c.bf16 %v14665_v9, %v14664_v8 }
 0x9f2   :  { %16192 = vmatmul.mubr.msk.f32.gmra.mrb[18].mxu0 %vm181_vm0, %v20186_v4 }
 0x9f3   :  { %17497 = vmatpush3.bf16.msra.mxu0 %v17494_v1 }
 0x9f4   :  { %17499 = vmatprep.subr.bf16.mxu0 %v17498_v5 }
 0x9f7   :  { %17501 = vmatpush3.bf16.msra.mxu0 %v17498_v5 }
 0x9f8   :  { %17503 = vmatprep.subr.bf16.mxu0 %v17502_v20 }
 0x9fb   :  { %17505 = vmatpush3.bf16.msra.mxu0 %v17502_v20  ;;  %v14662_v20 = vld [vmem:[%s19679_s25 + $0x20] sm:$0xff] }
 0x9fc   :  { %17507 = vmatprep.subr.bf16.mxu0 %v17506_v41 }
 0x9ff   :  { %17509 = vmatpush3.bf16.msra.mxu0 %v17506_v41  ;;  %v17522_v41 = vpack.c.bf16 %v14663_v7, %v14662_v20 }
 0xa00   :  { %17511 = vmatprep.subr.bf16.mxu0 %v17510_v59 }
 0xa01   :  { %17523 = vmatprep.subr.bf16.mxu1 %v17522_v41 }
 0xa02   :  { %17525 = vmatpush3.bf16.msra.mxu1 %v17522_v41 }
 0xa03   :  { %17513 = vmatpush3.bf16.msra.mxu0 %v17510_v59  ;;  %17527 = vmatprep.subr.bf16.mxu1 %v17526_v40 }
 0xa04   :  { %17515 = vmatprep.subr.bf16.mxu0 %v17514_v58 }
 0xa06   :  { %17529 = vmatpush3.bf16.msra.mxu1 %v17526_v40 }
 0xa07   :  { %17517 = vmatpush3.bf16.msra.mxu0 %v17514_v58 }
 0xa08   :  { %17519 = vmatprep.subr.bf16.mxu0 %v17518_v13 }
 0xa0b   :  { %17521 = vmatpush3.bf16.msra.mxu0 %v17518_v13 }
 0xac1   :  { %v16190_v18 = vpop.f32.mrb[16].mxu0 }
 0xac2   :  { %v2014_v21 = vadd.f32 %v16190_v18, %v14654_v15  ;;  %v2008_v22 = vpop.f32.mrb[17].mxu0 }
 0xac3   :  { %v2009_v23 = vadd.f32 %v14654_v15, %v2008_v22 }
 0xac4   :  { %v2028_v53 = vmax.f32 %v2014_v21, 0.0 }
 0xac5   :  { %v2027_v57 = vmax.f32 %v2009_v23, 0.0  ;;  %v16193_v25 = vpop.f32.mrb[18].mxu0 }
 0xac6   :  { %v2024_v26 = vadd.f32 %v16193_v25, %v14654_v15  ;;  %v2018_v27 = vpop.f32.mrb[19].mxu0 }
 0xac7   :  { %v2019_v28 = vadd.f32 %v14654_v15, %v2018_v27  ;;  %16226 = vmatprep.mubr.f32.mxu0 %v2027_v57 }
 0xac8   :  { %16227 = vmatmul.mubr.f32.vlgmr.msra.gmra.mrb[20].mxu0 %v2028_v53  ;;  %v2030_v30 = vmax.f32 %v2024_v26, 0.0 }
 0xac9   :  { %v2029_v29 = vmax.f32 %v2019_v28, 0.0 }
 0xacb   :  { %16229 = vmatprep.mubr.f32.mxu0 %v2029_v29 }
 0xacc   :  { %16230 = vmatmul.mubr.f32.gmra.mrb[22].mxu0 %v2030_v30 }
 0xb9b   :  { %v16228_v32 = vpop.f32.mrb[20].mxu0 }
 0xb9c   :  { %v2109_v33 = vadd.f32 %v16228_v32, %v14659_v31  ;;  %v2103_v34 = vpop.f32.mrb[21].mxu0 }
 0xb9d   :  { %v2104_v35 = vadd.f32 %v14659_v31, %v2103_v34 }
 0xb9e   :  { %v2123_v36 = vadd.f32 %v2109_v33, %v20175_v0 }
 0xb9f   :  { %v16231_v37 = vpop.f32.mrb[22].mxu0  ;;  %v2122_v38 = vadd.f32 %v2104_v35, %v20173_v63 }
 0xba0   :  { %v2119_v39 = vadd.f32 %v16231_v37, %v14659_v31  ;;  %v2113_v42 = vpop.f32.mrb[23].mxu0  ;;  %v2131_v44 = vsel %vm181_vm0, %v2123_v36, 0.0 }
 0xba1   :  { %v2114_v45 = vadd.f32 %v14659_v31, %v2113_v42  ;;  %2132 = vadd.xlane.f32.xlu0 %v2131_v44  ;;  %v2128_v12 = vsel %vm181_vm0, %v2122_v38, 0.0 }
 0xba2   :  { %2129 = vadd.xlane.f32.xlu1 %v2128_v12  ;;  %v2125_v47 = vadd.f32 %v2119_v39, %v20186_v4  ;;  %v14660_v12 = vld [vmem:[%s19729_s20] ss:$0 sm:$0xff] }
 0xba3   :  { %v2124_v48 = vadd.f32 %v2114_v45, %v20183_v62 }
 0xba4   :  { %v2137_v14 = vsel %vm181_vm0, %v2125_v47, 0.0 }
 0xba5   :  { %2138 = vadd.xlane.f32.xlu0 %v2137_v14  ;;  %v2134_v49 = vsel %vm181_vm0, %v2124_v48, 0.0 }
 0xba6   :  { %2135 = vadd.xlane.f32.xlu1 %v2134_v49 }
 0xc2e   :  { %v2133_v51 = vpop.xlane.xlu0 %2132 }
 0xc2f   :  { %v2141_v19 = vmul.f32 0.03125, %v2133_v51  ;;  %v2130_v52 = vpop.xlane.xlu1 %2129  ;;  %v14661_v51 = vld [vmem:[%s19734_s27] ss:$0 sm:$0xff] }
 0xc30   :  { %v2140_v54 = vmul.f32 0.03125, %v2130_v52 }
 0xc31   :  { %v20212_v55 = vsub.f32 %v2123_v36, %v2141_v19 }
 0xc32   :  { %v20214_v56 = vsub.f32 %v2122_v38, %v2140_v54  ;;  %v2139_v61 = vpop.xlane.xlu0 %2138 }
 0xc33   :  { %v2143_v63 = vmul.f32 0.03125, %v2139_v61  ;;  %v2136_v17 = vpop.xlane.xlu1 %2135  ;;  %v2149_v0 = vmul.f32 %v20212_v55, %v20212_v55 }
 0xc34   :  { %v2142_v50 = vmul.f32 0.03125, %v2136_v17  ;;  %v2148_v1 = vmul.f32 %v20214_v56, %v20214_v56  ;;  %v2174_v14 = vmul.f32 %v14660_v12, %v20214_v56 }
 0xc35   :  { %v20220_v2 = vsub.f32 %v2125_v47, %v2143_v63  ;;  %v2155_v3 = vsel %vm181_vm0, %v2149_v0, 0.0  ;;  %v2175_v47 = vmul.f32 %v14660_v12, %v20212_v55 }
 0xc36   :  { %v20223_v60 = vsub.f32 %v2124_v48, %v2142_v50  ;;  %2156 = vadd.xlane.f32.xlu0 %v2155_v3  ;;  %v2152_v62 = vsel %vm181_vm0, %v2148_v1, 0.0 }
 0xc37   :  { %2153 = vadd.xlane.f32.xlu1 %v2152_v62  ;;  %v2151_v4 = vmul.f32 %v20220_v2, %v20220_v2  ;;  %v2177_v54 = vmul.f32 %v14660_v12, %v20220_v2  ;;  %v14672_v2 = vld [vmem:[%s19684_s29 + $0x1] ss:$0 sm:$0xff] }
 0xc38   :  { %v2150_v5 = vmul.f32 %v20223_v60, %v20223_v60  ;;  %v2176_v63 = vmul.f32 %v14660_v12, %v20223_v60 }
 0xc39   :  { %v2161_v16 = vsel %vm181_vm0, %v2151_v4, 0.0 }
 0xc3a   :  { %2162 = vadd.xlane.f32.xlu0 %v2161_v16  ;;  %v2158_v6 = vsel %vm181_vm0, %v2150_v5, 0.0 }
 0xc3b   :  { %2159 = vadd.xlane.f32.xlu1 %v2158_v6 }
 0xcc3   :  { %v2157_v59 = vpop.xlane.xlu0 %2156 }
 0xcc4   :  { %v2165_v10 = vmul.f32 0.032258064, %v2157_v59  ;;  %v2154_v11 = vpop.xlane.xlu1 %2153 }
 0xcc5   :  { %v2164_v58 = vmul.f32 0.032258064, %v2154_v11 }
 0xcc6   :  { %19037 = vrsqrt.f32 %v2165_v10  ;;  %vm2187_vm11 = vcmp.eq.f32.partialorder %v2165_v10, inf  ;;  %v2190_v23 = vand.u32 2147483648, %v2165_v10  ;;  %vm2189_vm12 = vcmp.eq.f32.partialorder %v2165_v10, 0.0 }
 0xcc7   :  { %19039 = vrsqrt.f32 %v2164_v58  ;;  %v2163_v43 = vpop.xlane.xlu0 %2162  ;;  %vm2180_vm13 = vcmp.eq.f32.partialorder %v2164_v58, inf  ;;  %v2183_v53 = vand.u32 2147483648, %v2164_v58  ;;  %vm2182_vm14 = vcmp.eq.f32.partialorder %v2164_v58, 0.0 }
 0xcc8   :  { %v2167_v46 = vmul.f32 0.032258064, %v2163_v43  ;;  %v2160_v13 = vpop.xlane.xlu1 %2159 }
 0xcc9   :  { %v2166_v15 = vmul.f32 0.032258064, %v2160_v13 }
 0xcca   :  { %19041 = vrsqrt.f32 %v2167_v46  ;;  %vm2201_vm15 = vcmp.eq.f32.partialorder %v2167_v46, inf  ;;  %vm2203_vm3 = vcmp.eq.f32.partialorder %v2167_v46, 0.0  ;;  %v2204_v33 = vand.u32 2147483648, %v2167_v46 }
 0xccb   :  { %19043 = vrsqrt.f32 %v2166_v15  ;;  %vm2194_vm4 = vcmp.eq.f32.partialorder %v2166_v15, inf  ;;  %v2197_v37 = vand.u32 2147483648, %v2166_v15  ;;  %vm2196_vm5 = vcmp.eq.f32.partialorder %v2166_v15, 0.0 }
 0xcd0   :  { %v19038_v18 = vpop.eup %19037 }
 0xcd1   :  { %v19040_v21 = vpop.eup %19039  ;;  %v2186_v22 = vmul.f32 %v19038_v18, %v2165_v10 }
 0xcd2   :  { %v2179_v57 = vmul.f32 %v19040_v21, %v2164_v58 }
 0xcd3   :  { %v2188_v25 = vsel %vm2187_vm11, %v2165_v10, %v2186_v22 }
 0xcd4   :  { %v19042_v26 = vpop.eup %19041  ;;  %v2191_v27 = vsel %vm2189_vm12, %v2190_v23, %v2188_v25  ;;  %v2181_v28 = vsel %vm2180_vm13, %v2164_v58, %v2179_v57 }
 0xcd5   :  { %v19044_v29 = vpop.eup %19043  ;;  %v2207_v30 = vadd.f32 1e-06, %v2191_v27  ;;  %v2200_v31 = vmul.f32 %v19042_v26, %v2167_v46  ;;  %v2184_v32 = vsel %vm2182_vm14, %v2183_v53, %v2181_v28 }
 0xcd6   :  { %v2193_v34 = vmul.f32 %v19044_v29, %v2166_v15  ;;  %v2206_v35 = vadd.f32 1e-06, %v2184_v32 }
 0xcd7   :  { %19045 = vrcp.f32 %v2207_v30  ;;  %v2202_v36 = vsel %vm2201_vm15, %v2167_v46, %v2200_v31 }
 0xcd8   :  { %v2195_v38 = vsel %vm2194_vm4, %v2166_v15, %v2193_v34  ;;  %19047 = vrcp.f32 %v2206_v35  ;;  %v2205_v39 = vsel %vm2203_vm3, %v2204_v33, %v2202_v36 }
 0xcd9   :  { %v2198_v42 = vsel %vm2196_vm5, %v2197_v37, %v2195_v38  ;;  %v2209_v44 = vadd.f32 1e-06, %v2205_v39 }
 0xcda   :  { %v2208_v45 = vadd.f32 1e-06, %v2198_v42 }
 0xcdb   :  { %19049 = vrcp.f32 %v2209_v44 }
 0xcdc   :  { %19051 = vrcp.f32 %v2208_v45 }
 0xce1   :  { %v19046_v48 = vpop.eup %19045 }
 0xce2   :  { %v19048_v49 = vpop.eup %19047  ;;  %v2213_v19 = vmul.f32 %v19046_v48, %v2175_v47  ;;  %v20344_v48 = vld [vmem:[%s19664_s13 + $0x8] sm:$0xff] }
 0xce3   :  { %v2211_v52 = vmul.f32 %v19048_v49, %v2174_v14 }
 0xce4   :  { %v20244_v50 = vadd.f32 %v14661_v51, %v2213_v19  ;;  %v20348_v19 = vld [vmem:[%s19664_s13] sm:$0xff] }
 0xce5   :  { %v19050_v61 = vpop.eup %19049  ;;  %v20242_v17 = vadd.f32 %v14661_v51, %v2211_v52 }
 0xce6   :  { %v19052_v0 = vpop.eup %19051  ;;  %v2217_v1 = vmul.f32 %v19050_v61, %v2177_v54 }
 0xce7   :  { %16240 = vmatprep.mubr.msk.f32.mxu1 %vm181_vm0, %v20242_v17  ;;  %v2215_v55 = vmul.f32 %v19052_v0, %v2176_v63 }
 0xce8   :  { %16241 = vmatmul.mubr.msk.f32.vlgmr.msra.gmra.mrb[24].mxu1 %vm181_vm0, %v20244_v50  ;;  %v20252_v3 = vadd.f32 %v14661_v51, %v2217_v1 }
 0xce9   :  { %v20250_v56 = vadd.f32 %v14661_v51, %v2215_v55 }
 0xceb   :  { %16243 = vmatprep.mubr.msk.f32.mxu1 %vm181_vm0, %v20250_v56 }
 0xcec   :  { %16244 = vmatmul.mubr.msk.f32.gmra.mrb[26].mxu1 %vm181_vm0, %v20252_v3 }
 0xdbb   :  { %v16242_v60 = vpop.f32.mrb[24].mxu1 }
 0xdbc   :  { %v20259_v62 = vadd.f32 %v16242_v60, %v14672_v2  ;;  %v2326_v4 = vpop.f32.mrb[25].mxu1 }
 0xdbd   :  { %v20261_v5 = vadd.f32 %v14672_v2, %v2326_v4 }
 0xdbf   :  { %v16245_v16 = vpop.f32.mrb[26].mxu1  ;;  %16254 = vmatprep.mubr.msk.f32.mxu1 %vm291_vm1, %v20261_v5  ;;  %v20267_v6 = vpack.i.bf16 %v20259_v62, %v20261_v5 }
 0xdc0   :  { %v20269_v20 = vadd.f32 %v16245_v16, %v14672_v2  ;;  %v2336_v7 = vpop.f32.mrb[27].mxu1  ;;  %v20355_v16 = vld [vmem:[%s19664_s13 + $0x10] sm:$0xff] }
 0xdc1   :  { %v20271_v8 = vadd.f32 %v14672_v2, %v2336_v7  ;;  %18478 = vrot.lane.b32.xlu1 %v20267_v6, %s19632_s28 }
 0xdc3   :  { %v20277_v41 = vpack.i.bf16 %v20269_v20, %v20271_v8 }
 0xdc5   :  { %18488 = vrot.lane.b32.xlu1 %v20267_v6, %s19631_s0  ;;  %18483 = vrot.lane.b32.xlu0 %v20277_v41, %s19632_s28 }
 0xdc9   :  { %18493 = vrot.lane.b32.xlu1 %v20277_v41, %s19631_s0  ;;  %2619 = vrot.lane.b32.xlu0 %v20261_v5, %s19633_s1 }
 0xdcd   :  { %2621 = vrot.lane.b32.xlu1 %v20259_v62, %s19633_s1  ;;  %2623 = vrot.lane.b32.xlu0 %v20271_v8, %s19633_s1 }
 0xdd1   :  { %2625 = vrot.lane.b32.xlu1 %v20269_v20, %s19633_s1  ;;  %18498 = vrot.lane.b32.xlu0 %v20267_v6, %s19635_s7 }
 0xdd5   :  { %3093 = vrot.lane.b32.xlu1 %v20259_v62, %s19636_s10  ;;  %3091 = vrot.lane.b32.xlu0 %v20261_v5, %s19636_s10 }
 0xdd9   :  { %18503 = vrot.lane.b32.xlu1 %v20277_v41, %s19635_s7  ;;  %3095 = vrot.lane.b32.xlu0 %v20271_v8, %s19636_s10 }
 0xddd   :  { %3097 = vrot.lane.b32.xlu1 %v20269_v20, %s19636_s10 }
 0xe33   :  { %v18479_v9 = vpop.permute.xlu1 %18478 }
 0xe34   :  { %v18481_v40 = vunpack.i.h.bf16 %v18479_v9  ;;  %v18480_v59 = vunpack.i.l.bf16 %v18479_v9 }
 0xe36   :  { %v17530_v10 = vpack.c.bf16 %v18481_v40, %v18480_v59 }
 0xe37   :  { %v18484_v11 = vpop.permute.xlu0 %18483  ;;  %v18489_v58 = vpop.permute.xlu1 %18488 }
 0xe38   :  { %v18486_v43 = vunpack.i.h.bf16 %v18484_v11  ;;  %v18485_v46 = vunpack.i.l.bf16 %v18484_v11  ;;  %v18491_v13 = vunpack.i.h.bf16 %v18489_v58  ;;  %v18490_v15 = vunpack.i.l.bf16 %v18489_v58  ;;  %17532 = vmatprep.subr.msk.bf16.mxu1 %vm19885_vm2, %v17530_v10  ;;  %v20364_v58 = vld [vmem:[%s19664_s13 + $0x18] sm:$0xff] }
 0xe39   :  { %17535 = vmatpush3.bf16.xpose.msk.msra.mxu1 %vm19885_vm2, %v17530_v10 }
 0xe3a   :  { %v17536_v18 = vpack.c.bf16 %v18486_v43, %v18485_v46  ;;  %v17550_v21 = vpack.c.bf16 %v18491_v13, %v18490_v15 }
 0xe3b   :  { %v2620_v22 = vpop.permute.xlu0 %2619  ;;  %v18494_v23 = vpop.permute.xlu1 %18493 }
 0xe3c   :  { %v18496_v57 = vunpack.i.h.bf16 %v18494_v23  ;;  %v18495_v25 = vunpack.i.l.bf16 %v18494_v23  ;;  %17538 = vmatprep.subr.msk.bf16.mxu1 %vm19885_vm2, %v17536_v18  ;;  %17552 = vmatprep.subr.msk.bf16.mxu0 %vm19885_vm2, %v17550_v21 }
 0xe3d   :  { %16282 = vmatprep.mubr.msk.f32.mxu0 %vm291_vm1, %v2620_v22  ;;  %17555 = vmatpush3.bf16.xpose.msk.msra.mxu0 %vm19885_vm2, %v17550_v21 }
 0xe3e   :  { %v17556_v53 = vpack.c.bf16 %v18496_v57, %v18495_v25 }
 0xe3f   :  { %v2624_v26 = vpop.permute.xlu0 %2623  ;;  %v2622_v27 = vpop.permute.xlu1 %2621 }
 0xe40   :  { %17558 = vmatprep.subr.msk.bf16.mxu0 %vm19885_vm2, %v17556_v53 }
 0xe41   :  { %17541 = vmatpush3.bf16.xpose.msk.msra.mxu1 %vm19885_vm2, %v17536_v18 }
 0xe43   :  { %v18499_v28 = vpop.permute.xlu0 %18498  ;;  %v2626_v29 = vpop.permute.xlu1 %2625 }
 0xe44   :  { %v18501_v30 = vunpack.i.h.bf16 %v18499_v28  ;;  %v18500_v31 = vunpack.i.l.bf16 %v18499_v28 }
 0xe45   :  { %17561 = vmatpush3.bf16.xpose.msk.msra.mxu0 %vm19885_vm2, %v17556_v53 }
 0xe46   :  { %v17570_v32 = vpack.c.bf16 %v18501_v30, %v18500_v31 }
 0xe47   :  { %v3094_v33 = vpop.permute.xlu1 %3093  ;;  %v3092_v38 = vpop.permute.xlu0 %3091 }
 0xe48   :  { %16255 = vmatmul.mubr.msk.f32.vlgmr.msra.gmra.mrb[28].mxu1 %vm291_vm1, %v20259_v62  ;;  %17572 = vmatprep.subr.msk.bf16.mxu0 %vm19885_vm2, %v17570_v32 }
 0xe49   :  { %16257 = vmatprep.mubr.msk.f32.mxu1 %vm291_vm1, %v20271_v8 }
 0xe4b   :  { %v18504_v34 = vpop.permute.xlu1 %18503  ;;  %v3096_v39 = vpop.permute.xlu0 %3095 }
 0xe4c   :  { %v18506_v35 = vunpack.i.h.bf16 %v18504_v34  ;;  %v18505_v36 = vunpack.i.l.bf16 %v18504_v34  ;;  %16258 = vmatmul.mubr.msk.f32.gmra.mrb[30].mxu1 %vm291_vm1, %v20269_v20  ;;  %16283 = vmatmul.mubr.msk.f32.vlgmr.msra.gmra.mrb[24].mxu0 %vm291_vm1, %v2622_v27 }
 0xe4d   :  { %16285 = vmatprep.mubr.msk.f32.mxu0 %vm291_vm1, %v2624_v26  ;;  %17575 = vmatpush3.bf16.xpose.msk.msra.mxu0 %vm19885_vm2, %v17570_v32 }
 0xe4e   :  { %v17576_v37 = vpack.c.bf16 %v18506_v35, %v18505_v36 }
 0xe4f   :  { %v3098_v42 = vpop.permute.xlu1 %3097 }
 0xe50   :  { %16286 = vmatmul.mubr.msk.f32.gmra.mrb[26].mxu0 %vm291_vm1, %v2626_v29  ;;  %17578 = vmatprep.subr.msk.bf16.mxu0 %vm19885_vm2, %v17576_v37 }
 0xe51   :  { %16326 = vmatprep.mubr.msk.f32.mxu0 %vm291_vm1, %v3092_v38 }
 0xe55   :  { %17581 = vmatpush3.bf16.xpose.msk.msra.mxu0 %vm19885_vm2, %v17576_v37 }
 0xe5c   :  { %16327 = vmatmul.mubr.msk.f32.vlgmr.msra.gmra.mrb[28].mxu0 %vm291_vm1, %v3094_v33 }
 0xe5d   :  { %16329 = vmatprep.mubr.msk.f32.mxu0 %vm291_vm1, %v3096_v39 }
 0xe60   :  { %16330 = vmatmul.mubr.msk.f32.gmra.mrb[30].mxu0 %vm291_vm1, %v3098_v42 }
 0xf1b   :  { %v16256_v44 = vpop.f32.mrb[28].mxu1 }
 0xf1c   :  { %v2459_v45 = vmul.f32 0.35355338, %v16256_v44  ;;  %v2439_v12 = vpop.f32.mrb[29].mxu1 }
 0xf1d   :  { %v2458_v47 = vmul.f32 0.35355338, %v2439_v12 }
 0xf1e   :  { %v2463_v14 = vadd.f32 %v20344_v48, %v2459_v45 }
 0xf1f   :  { %v16259_v49 = vpop.f32.mrb[30].mxu1  ;;  %v16284_v51 = vpop.f32.mrb[24].mxu0  ;;  %v2462_v52 = vadd.f32 %v20348_v19, %v2458_v47 }
 0xf20   :  { %v2461_v54 = vmul.f32 0.35355338, %v16259_v49  ;;  %v2449_v61 = vpop.f32.mrb[31].mxu1  ;;  %v2717_v63 = vpop.f32.mrb[25].mxu0  ;;  %v2469_v55 = vsel %vm181_vm0, %v2463_v14, -inf }
 0xf21   :  { %v2460_v0 = vmul.f32 0.35355338, %v2449_v61  ;;  %v2736_v1 = vmul.f32 0.35355338, %v2717_v63  ;;  %v2466_v2 = vsel %vm181_vm0, %v2462_v52, -inf  ;;  %2470 = vmax.xlane.f32.xlu1 %v2469_v55 }
 0xf22   :  { %2467 = vmax.xlane.f32.xlu0 %v2466_v2  ;;  %v2737_v9 = vmul.f32 0.35355338, %v16284_v51  ;;  %v2465_v43 = vadd.f32 %v20364_v58, %v2461_v54 }
 0xf23   :  { %v16287_v60 = vpop.f32.mrb[26].mxu0  ;;  %v2740_v4 = vadd.f32 %v20348_v19, %v2736_v1  ;;  %v20358_v7 = vadd.f32 %v20355_v16, %v2460_v0 }
 0xf24   :  { %v2727_v40 = vpop.f32.mrb[27].mxu0  ;;  %v2739_v13 = vmul.f32 0.35355338, %v16287_v60  ;;  %v2475_v18 = vsel %vm181_vm0, %v2465_v43, -inf  ;;  %v2741_v21 = vadd.f32 %v20344_v48, %v2737_v9 }
 0xf25   :  { %v2738_v59 = vmul.f32 0.35355338, %v2727_v40  ;;  %v2744_v10 = vsel %vm181_vm0, %v2740_v4, -inf  ;;  %v2472_v11 = vsel %vm181_vm0, %v20358_v7, -inf }
 0xf26   :  { %2745 = vmax.xlane.f32.xlu1 %v2744_v10  ;;  %2473 = vmax.xlane.f32.xlu0 %v2472_v11  ;;  %v2743_v22 = vadd.f32 %v20364_v58, %v2739_v13  ;;  %v2747_v23 = vsel %vm181_vm0, %v2741_v21, -inf }
 0xf27   :  { %v20368_v46 = vadd.f32 %v20355_v16, %v2738_v59 }
 0xf28   :  { %v2753_v53 = vsel %vm181_vm0, %v2743_v22, -inf }
 0xf29   :  { %v2750_v15 = vsel %vm181_vm0, %v20368_v46, -inf }
 0xf2a   :  { %2751 = vmax.xlane.f32.xlu1 %v2750_v15  ;;  %2476 = vmax.xlane.f32.xlu0 %v2475_v18 }
 0xf2e   :  { %2748 = vmax.xlane.f32.xlu0 %v2747_v23 }
 0xf2f   :  { %v20376_v57 = vpop.f32.mrb[28].mxu0 }
 0xf30   :  { %v20378_v25 = vpop.f32.mrb[29].mxu0 }
 0xf32   :  { %2754 = vmax.xlane.f32.xlu0 %v2753_v53  ;;  %v3208_v53 = vmul.f32 0.35355338, %v20378_v25 }
 0xf33   :  { %v20381_v26 = vpop.f32.mrb[30].mxu0 }
 0xf34   :  { %v20383_v27 = vpop.f32.mrb[31].mxu0 }
 0xf3b   :  { %18508 = vrot.lane.b32.xlu1 %v20267_v6, %s19634_s2 }
 0xfae   :  { %v2471_v28 = vpop.xlane.xlu1 %2470 }
 0xfaf   :  { %v2468_v29 = vpop.xlane.xlu0 %2467  ;;  %v2479_v30 = vsub.f32 %v2463_v14, %v2471_v28  ;;  %v3211_v28 = vmul.f32 0.35355338, %v20381_v26 }
 0xfb0   :  { %v2478_v31 = vsub.f32 %v2462_v52, %v2468_v29 }
 0xfb1   :  { %v2484_v32 = vmul.f32 1.442695, %v2479_v30  ;;  %v20449_v25 = vadd.f32 %v20364_v58, %v3211_v28 }
 0xfb2   :  { %v2482_v33 = vmul.f32 1.442695, %v2478_v31  ;;  %v3209_v31 = vmul.f32 0.35355338, %v20376_v57 }
 0xfb3   :  { %v2746_v34 = vpop.xlane.xlu1 %2745  ;;  %v2474_v35 = vpop.xlane.xlu0 %2473  ;;  %19053 = vpow2.f32 %v2484_v32  ;;  %v3225_v26 = vsel %vm181_vm0, %v20449_v25, -inf }
 0xfb4   :  { %v2756_v36 = vsub.f32 %v2740_v4, %v2746_v34  ;;  %19055 = vpow2.f32 %v2482_v33  ;;  %v2480_v13 = vsub.f32 %v20358_v7, %v2474_v35  ;;  %v20459_v32 = vadd.f32 %v20344_v48, %v3209_v31 }
 0xfb6   :  { %v2760_v37 = vmul.f32 1.442695, %v2756_v36  ;;  %v2486_v15 = vmul.f32 1.442695, %v2480_v13 }
 0xfb7   :  { %v2752_v38 = vpop.xlane.xlu1 %2751  ;;  %v2477_v39 = vpop.xlane.xlu0 %2476 }
 0xfb8   :  { %19057 = vpow2.f32 %v2760_v37  ;;  %v2481_v42 = vsub.f32 %v2465_v43, %v2477_v39  ;;  %v2758_v18 = vsub.f32 %v20368_v46, %v2752_v38 }
 0xfba   :  { %v2488_v14 = vmul.f32 1.442695, %v2481_v42 }
 0xfbb   :  { %v18509_v44 = vpop.permute.xlu1 %18508  ;;  %v2749_v45 = vpop.xlane.xlu0 %2748 }
 0xfbc   :  { %v18511_v12 = vunpack.i.h.bf16 %v18509_v44  ;;  %v18510_v47 = vunpack.i.l.bf16 %v18509_v44  ;;  %v2757_v49 = vsub.f32 %v2741_v21, %v2749_v45  ;;  %v2764_v21 = vmul.f32 1.442695, %v2758_v18 }
 0xfbd   :  { %v20387_v51 = vpop.eup %19053 }
 0xfbe   :  { %v2762_v52 = vmul.f32 1.442695, %v2757_v49  ;;  %v17542_v54 = vpack.c.bf16 %v18511_v12, %v18510_v47  ;;  %v20389_v61 = vpop.eup %19055  ;;  %v2493_v63 = vsel %vm181_vm0, %v20387_v51, 0.0 }
 0xfbf   :  { %v2755_v0 = vpop.xlane.xlu0 %2754  ;;  %2494 = vadd.xlane.f32.xlu0 %v2493_v63  ;;  %v2490_v55 = vsel %vm181_vm0, %v20389_v61, 0.0 }
 0xfc0   :  { %19059 = vpow2.f32 %v2762_v52  ;;  %v2759_v1 = vsub.f32 %v2743_v22, %v2755_v0  ;;  %17543 = vmatprep.subr.bf16.mxu1 %v17542_v54  ;;  %2491 = vadd.xlane.f32.xlu1 %v2490_v55 }
 0xfc1   :  { %17545 = vmatpush3.bf16.msra.mxu1 %v17542_v54  ;;  %19061 = vpow2.f32 %v2488_v14 }
 0xfc2   :  { %v20395_v2 = vpop.eup %19057  ;;  %v2766_v60 = vmul.f32 1.442695, %v2759_v1 }
 0xfc3   :  { %v2768_v4 = vsel %vm181_vm0, %v20395_v2, 0.0 }
 0xfc4   :  { %2769 = vadd.xlane.f32.xlu1 %v2768_v4  ;;  %19063 = vpow2.f32 %v2766_v60 }
 0xfc5   :  { %19065 = vpow2.f32 %v2486_v15 }
 0xfc6   :  { %19067 = vpow2.f32 %v2764_v21 }
 0xfca   :  { %v20399_v9 = vpop.eup %19059 }
 0xfcb   :  { %v2771_v40 = vsel %vm181_vm0, %v20399_v9, 0.0  ;;  %v20403_v59 = vpop.eup %19061 }
 0xfcc   :  { %2772 = vadd.xlane.f32.xlu0 %v2771_v40  ;;  %v2499_v10 = vsel %vm181_vm0, %v20403_v59, 0.0 }
 0xfce   :  { %v20407_v11 = vpop.eup %19063 }
 0xfcf   :  { %v2777_v43 = vsel %vm181_vm0, %v20407_v11, 0.0  ;;  %v20421_v22 = vpop.eup %19065 }
 0xfd0   :  { %2500 = vadd.xlane.f32.xlu0 %v2499_v10  ;;  %v2496_v7 = vsel %vm181_vm0, %v20421_v22, 0.0  ;;  %v20427_v46 = vpop.eup %19067 }
 0xfd1   :  { %v2774_v23 = vsel %vm181_vm0, %v20427_v46, 0.0 }
 0xfd4   :  { %2778 = vadd.xlane.f32.xlu0 %v2777_v43 }
 0xfd5   :  { %18518 = vrot.lane.b32.xlu1 %v20267_v6, %s19637_s11 }
 0xfea   :  { %18513 = vrot.lane.b32.xlu0 %v20277_v41, %s19634_s2 }
 0xfee   :  { %18528 = vrot.lane.b32.xlu0 %v20267_v6, %s19638_s15 }
 0xff2   :  { %3470 = vrot.lane.b32.xlu0 %v20261_v5, %s19639_s16  ;;  %v20435_v5 = vadd.f32 %v20348_v19, %v3208_v53 }
 0xff4   :  { %v3216_v30 = vsel %vm181_vm0, %v20435_v5, -inf }
 0xff6   :  { %3474 = vrot.lane.b32.xlu0 %v20271_v8, %s19639_s16  ;;  %v3210_v8 = vmul.f32 0.35355338, %v20383_v27 }
 0xff8   :  { %v20442_v29 = vadd.f32 %v20355_v16, %v3210_v8 }
 0xff9   :  { %2497 = vadd.xlane.f32.xlu1 %v2496_v7 }
 0xffa   :  { %v3222_v27 = vsel %vm181_vm0, %v20442_v29, -inf }
 0xffd   :  { %2775 = vadd.xlane.f32.xlu1 %v2774_v23 }
0x100e   :  { %18523 = vrot.lane.b32.xlu1 %v20277_v41, %s19637_s11 }
0x1012   :  { %18533 = vrot.lane.b32.xlu1 %v20277_v41, %s19638_s15 }
0x1015   :  { %3217 = vmax.xlane.f32.xlu0 %v3216_v30 }
0x1016   :  { %3472 = vrot.lane.b32.xlu1 %v20259_v62, %s19639_s16  ;;  %v3219_v62 = vsel %vm181_vm0, %v20459_v32, -inf }
0x1019   :  { %3223 = vmax.xlane.f32.xlu0 %v3222_v27 }
0x101a   :  { %3476 = vrot.lane.b32.xlu1 %v20269_v20, %s19639_s16 }
0x101d   :  { %3226 = vmax.xlane.f32.xlu0 %v3225_v26 }
0x103e   :  { %3220 = vmax.xlane.f32.xlu1 %v3219_v62 }
0x104c   :  { %v2495_v34 = vpop.xlane.xlu0 %2494 }
0x104d   :  { %v2492_v33 = vpop.xlane.xlu1 %2491 }
0x104e   :  { %19069 = vrcp.f32 %v2492_v33 }
0x104f   :  { %19071 = vrcp.f32 %v2495_v34 }
0x1051   :  { %v2770_v37 = vpop.xlane.xlu1 %2769 }
0x1052   :  { %19073 = vrcp.f32 %v2770_v37 }
0x1055   :  { %v18519_v39 = vpop.permute.xlu1 %18518 }
0x1056   :  { %v18521_v44 = vunpack.i.h.bf16 %v18519_v39  ;;  %v18520_v45 = vunpack.i.l.bf16 %v18519_v39 }
0x1058   :  { %v19070_v35 = vpop.eup %19069  ;;  %v17562_v0 = vpack.c.bf16 %v18521_v44, %v18520_v45 }
0x1059   :  { %v2773_v36 = vpop.xlane.xlu0 %2772  ;;  %v2503_v20 = vmul.f32 %v19070_v35, %v20389_v61  ;;  %v19072_v14 = vpop.eup %19071 }
0x105a   :  { %v2505_v61 = vmul.f32 %v19072_v14, %v20387_v51 }
0x105b   :  { %16268 = vmatprep.mubr.msk.f32.mxu1 %vm181_vm0, %v2503_v20 }
0x105c   :  { %v19074_v40 = vpop.eup %19073 }
0x105d   :  { %v2501_v38 = vpop.xlane.xlu0 %2500  ;;  %v2781_v30 = vmul.f32 %v19074_v40, %v20395_v2 }
0x105e   :  { %19075 = vrcp.f32 %v2501_v38 }
0x1061   :  { %v2779_v57 = vpop.xlane.xlu0 %2778 }
0x1065   :  { %v18514_v42 = vpop.permute.xlu0 %18513 }
0x1066   :  { %v18516_v12 = vunpack.i.h.bf16 %v18514_v42  ;;  %v18515_v47 = vunpack.i.l.bf16 %v18514_v42 }
0x1068   :  { %v17546_v49 = vpack.c.bf16 %v18516_v12, %v18515_v47  ;;  %v19076_v13 = vpop.eup %19075 }
0x1069   :  { %v18529_v52 = vpop.permute.xlu0 %18528  ;;  %v2509_v8 = vmul.f32 %v19076_v13, %v20403_v59 }
0x106a   :  { %v18531_v54 = vunpack.i.h.bf16 %v18529_v52  ;;  %v18530_v63 = vunpack.i.l.bf16 %v18529_v52  ;;  %17547 = vmatprep.subr.bf16.mxu1 %v17546_v49 }
0x106b   :  { %17549 = vmatpush3.bf16.msra.mxu1 %v17546_v49 }
0x106c   :  { %v17590_v1 = vpack.c.bf16 %v18531_v54, %v18530_v63  ;;  %17563 = vmatprep.subr.bf16.mxu1 %v17562_v0 }
0x106d   :  { %v3471_v55 = vpop.permute.xlu0 %3470 }
0x106e   :  { %16269 = vmatmul.mubr.msk.f32.vlgmr.msra.gmra.mrb[32].mxu1 %vm181_vm0, %v2505_v61  ;;  %17592 = vmatprep.subr.msk.bf16.mxu0 %vm19885_vm2, %v17590_v1 }
0x106f   :  { %16362 = vmatprep.mubr.msk.f32.mxu0 %vm291_vm1, %v3471_v55  ;;  %17565 = vmatpush3.bf16.msra.mxu1 %v17562_v0 }
0x1070   :  { %17595 = vmatpush3.bf16.xpose.msk.msra.mxu0 %vm19885_vm2, %v17590_v1 }
0x1071   :  { %v3475_v33 = vpop.permute.xlu0 %3474 }
0x1086   :  { %v2498_v60 = vpop.xlane.xlu1 %2497 }
0x1087   :  { %19077 = vrcp.f32 %v2498_v60 }
0x1088   :  { %19079 = vrcp.f32 %v2773_v36 }
0x108a   :  { %v2776_v51 = vpop.xlane.xlu1 %2775 }
0x108b   :  { %19081 = vrcp.f32 %v2776_v51 }
0x108c   :  { %19083 = vrcp.f32 %v2779_v57 }
0x108e   :  { %v18524_v4 = vpop.permute.xlu1 %18523 }
0x108f   :  { %v18526_v10 = vunpack.i.h.bf16 %v18524_v4  ;;  %v18525_v43 = vunpack.i.l.bf16 %v18524_v4 }
0x1091   :  { %v19078_v15 = vpop.eup %19077  ;;  %v17566_v18 = vpack.c.bf16 %v18526_v10, %v18525_v43 }
0x1092   :  { %v18534_v21 = vpop.permute.xlu1 %18533  ;;  %v2507_v7 = vmul.f32 %v19078_v15, %v20421_v22  ;;  %v19080_v28 = vpop.eup %19079 }
0x1093   :  { %v18536_v23 = vunpack.i.h.bf16 %v18534_v21  ;;  %v18535_v53 = vunpack.i.l.bf16 %v18534_v21  ;;  %17567 = vmatprep.subr.bf16.mxu1 %v17566_v18  ;;  %v2783_v31 = vmul.f32 %v19080_v28, %v20399_v9 }
0x1094   :  { %16271 = vmatprep.mubr.msk.f32.mxu1 %vm181_vm0, %v2507_v7  ;;  %17569 = vmatpush3.bf16.msra.mxu1 %v17566_v18 }
0x1095   :  { %v19082_v27 = vpop.eup %19081  ;;  %v17596_v26 = vpack.c.bf16 %v18536_v23, %v18535_v53  ;;  %16272 = vmatmul.mubr.msk.f32.gmra.mrb[34].mxu1 %vm181_vm0, %v2509_v8 }
0x1096   :  { %16296 = vmatprep.mubr.msk.f32.mxu1 %vm181_vm0, %v2781_v30  ;;  %v19084_v22 = vpop.eup %19083  ;;  %v2785_v59 = vmul.f32 %v19082_v27, %v20427_v46  ;;  %v3473_v62 = vpop.permute.xlu1 %3472 }
0x1097   :  { %17598 = vmatprep.subr.msk.bf16.mxu0 %vm19885_vm2, %v17596_v26  ;;  %v2787_v2 = vmul.f32 %v19084_v22, %v20407_v11 }
0x1098   :  { %17601 = vmatpush3.bf16.xpose.msk.msra.mxu0 %vm19885_vm2, %v17596_v26 }
0x1099   :  { %16297 = vmatmul.mubr.msk.f32.vlgmr.msra.gmra.mrb[36].mxu1 %vm181_vm0, %v2783_v31 }
0x109a   :  { %16299 = vmatprep.mubr.msk.f32.mxu1 %vm181_vm0, %v2785_v59  ;;  %v3477_v34 = vpop.permute.xlu1 %3476 }
0x109d   :  { %16300 = vmatmul.mubr.msk.f32.gmra.mrb[38].mxu1 %vm181_vm0, %v2787_v2 }
0x109f   :  { %16363 = vmatmul.mubr.msk.f32.vlgmr.msra.gmra.mrb[32].mxu0 %vm291_vm1, %v3473_v62 }
0x10a0   :  { %16365 = vmatprep.mubr.msk.f32.mxu0 %vm291_vm1, %v3475_v33 }
0x10a2   :  { %v3218_v9 = vpop.xlane.xlu0 %3217 }
0x10a3   :  { %v3228_v35 = vsub.f32 %v20435_v5, %v3218_v9  ;;  %16366 = vmatmul.mubr.msk.f32.gmra.mrb[34].mxu0 %vm291_vm1, %v3477_v34 }
0x10a5   :  { %v3232_v46 = vmul.f32 1.442695, %v3228_v35 }
0x10a6   :  { %v3224_v36 = vpop.xlane.xlu0 %3223 }
0x10a7   :  { %19085 = vpow2.f32 %v3232_v46  ;;  %v3230_v20 = vsub.f32 %v20442_v29, %v3224_v36 }
0x10a9   :  { %v3236_v11 = vmul.f32 1.442695, %v3230_v20 }
0x10aa   :  { %v3227_v39 = vpop.xlane.xlu0 %3226 }
0x10ab   :  { %19087 = vpow2.f32 %v3236_v11  ;;  %v3231_v29 = vsub.f32 %v20449_v25, %v3227_v39  ;;  %v14668_v25 = vld [vmem:[%s19689_s3 + $0x28] sm:$0xff] }
0x10ac   :  { %16302 = vmatprep.subr.mxu1 %v14668_v25 }
0x10ad   :  { %v3238_v45 = vmul.f32 1.442695, %v3231_v29  ;;  %16303 = vmatpush3.msra.mxu1 %v14668_v25 }
0x10b1   :  { %v20493_v37 = vpop.eup %19085 }
0x10b2   :  { %v3240_v38 = vsel %vm181_vm0, %v20493_v37, 0.0 }
0x10b3   :  { %3241 = vadd.xlane.f32.xlu1 %v3240_v38 }
0x10b5   :  { %v20497_v57 = vpop.eup %19087 }
0x10b6   :  { %v3246_v5 = vsel %vm181_vm0, %v20497_v57, 0.0 }
0x10b7   :  { %3247 = vadd.xlane.f32.xlu1 %v3246_v5 }
0x10c8   :  { %18538 = vrot.lane.b32.xlu1 %v20267_v6, %s22418_s18 }
0x10cb   :  { %v3221_v42 = vpop.xlane.xlu1 %3220 }
0x10cc   :  { %v3229_v44 = vsub.f32 %v20459_v32, %v3221_v42  ;;  %v14667_v32 = vld [vmem:[%s19689_s3 + $0x20] sm:$0xff] }
0x10cd   :  { %16310 = vmatprep.subr.mxu1 %v14667_v32 }
0x10ce   :  { %v3234_v12 = vmul.f32 1.442695, %v3229_v44 }
0x10d0   :  { %19089 = vpow2.f32 %v3234_v12 }
0x10d1   :  { %19091 = vpow2.f32 %v3238_v45 }
0x10da   :  { %v20505_v47 = vpop.eup %19089 }
0x10db   :  { %v3243_v49 = vsel %vm181_vm0, %v20505_v47, 0.0  ;;  %v20509_v14 = vpop.eup %19091 }
0x10dc   :  { %3244 = vadd.xlane.f32.xlu0 %v3243_v49  ;;  %v3249_v52 = vsel %vm181_vm0, %v20509_v14, 0.0 }
0x10e0   :  { %3250 = vadd.xlane.f32.xlu0 %v3249_v52 }
0x10f6   :  { %18543 = vrot.lane.b32.xlu0 %v20277_v41, %s22418_s18 }
0x1140   :  { %v3242_v0 = vpop.xlane.xlu1 %3241 }
0x1141   :  { %v16270_v54 = vpop.f32.mrb[32].mxu1  ;;  %19093 = vrcp.f32 %v3242_v0 }
0x1142   :  { %v2600_v63 = vpop.f32.mrb[33].mxu1 }
0x1144   :  { %v3248_v61 = vpop.xlane.xlu1 %3247 }
0x1148   :  { %v18539_v1 = vpop.permute.xlu1 %18538 }
0x1149   :  { %v18541_v4 = vunpack.i.h.bf16 %v18539_v1  ;;  %v18540_v40 = vunpack.i.l.bf16 %v18539_v1 }
0x114b   :  { %v17582_v15 = vpack.c.bf16 %v18541_v4, %v18540_v40  ;;  %v19094_v9 = vpop.eup %19093 }
0x114c   :  { %v3253_v11 = vmul.f32 %v19094_v9, %v20493_v37  ;;  %v14669_v37 = vld [vmem:[%s19689_s3 + $0x30] sm:$0xff] }
0x1168   :  { %v16273_v55 = vpop.f32.mrb[34].mxu1 }
0x1169   :  { %v3245_v60 = vpop.xlane.xlu0 %3244  ;;  %v2610_v51 = vpop.f32.mrb[35].mxu1 }
0x116a   :  { %19095 = vrcp.f32 %v3245_v60 }
0x116b   :  { %19097 = vrcp.f32 %v3248_v61 }
0x116c   :  { %v16298_v10 = vpop.f32.mrb[36].mxu1 }
0x116d   :  { %v3251_v43 = vpop.xlane.xlu0 %3250  ;;  %v2878_v13 = vpop.f32.mrb[37].mxu1 }
0x116e   :  { %16304 = vmatprep.mubr.msk.f32.mxu1 %vm291_vm1, %v2878_v13  ;;  %19099 = vrcp.f32 %v3251_v43 }
0x116f   :  { %16305 = vmatmul.mubr.msk.f32.vlgmr.msra.gmra.mrb[40].mxu1 %vm291_vm1, %v16298_v10 }
0x1170   :  { %16311 = vmatpush3.msra.mxu1 %v14667_v32  ;;  %v16301_v18 = vpop.f32.mrb[38].mxu1 }
0x1171   :  { %17583 = vmatprep.subr.bf16.mxu1 %v17582_v15  ;;  %v18544_v21 = vpop.permute.xlu0 %18543  ;;  %v2888_v7 = vpop.f32.mrb[39].mxu1 }
0x1172   :  { %16307 = vmatprep.mubr.msk.f32.mxu1 %vm291_vm1, %v2888_v7  ;;  %v16364_v23 = vpop.f32.mrb[32].mxu0  ;;  %v18546_v53 = vunpack.i.h.bf16 %v18544_v21  ;;  %v18545_v8 = vunpack.i.l.bf16 %v18544_v21 }
0x1173   :  { %v3588_v28 = vmul.f32 0.35355338, %v16364_v23  ;;  %16308 = vmatmul.mubr.msk.f32.gmra.mrb[42].mxu1 %vm291_vm1, %v16301_v18  ;;  %v3568_v30 = vpop.f32.mrb[33].mxu0 }
0x1174   :  { %v3587_v27 = vmul.f32 0.35355338, %v3568_v30  ;;  %16312 = vmatprep.mubr.msk.f32.mxu1 %vm291_vm1, %v2600_v63  ;;  %v17586_v33 = vpack.c.bf16 %v18546_v53, %v18545_v8 }
0x1175   :  { %v3592_v26 = vadd.f32 %v20344_v48, %v3588_v28  ;;  %v19096_v48 = vpop.eup %19095 }
0x1176   :  { %v3591_v31 = vadd.f32 %v20348_v19, %v3587_v27  ;;  %v16367_v22 = vpop.f32.mrb[34].mxu0  ;;  %v19098_v36 = vpop.eup %19097 }
0x1177   :  { %v3590_v59 = vmul.f32 0.35355338, %v16367_v22  ;;  %16313 = vmatmul.mubr.msk.f32.vlgmr.msra.gmra.mrb[40].mxu1 %vm291_vm1, %v16270_v54  ;;  %v3578_v2 = vpop.f32.mrb[35].mxu0  ;;  %v3598_v62 = vsel %vm181_vm0, %v3592_v26, -inf  ;;  %v14670_v22 = vld [vmem:[%s19689_s3 + $0x38] sm:$0xff] }
0x1178   :  { %17585 = vmatpush3.bf16.msra.mxu1 %v17582_v15  ;;  %v3589_v34 = vmul.f32 0.35355338, %v3578_v2  ;;  %3599 = vmax.xlane.f32.xlu0 %v3598_v62  ;;  %v3595_v35 = vsel %vm181_vm0, %v3591_v31, -inf  ;;  %v19100_v5 = vpop.eup %19099 }
0x1179   :  { %v3594_v46 = vadd.f32 %v20364_v58, %v3590_v59  ;;  %16315 = vmatprep.mubr.msk.f32.mxu1 %vm291_vm1, %v2610_v51  ;;  %17587 = vmatprep.subr.bf16.mxu1 %v17586_v33  ;;  %v3255_v58 = vmul.f32 %v19096_v48, %v20505_v47  ;;  %v3259_v39 = vmul.f32 %v19100_v5, %v20509_v14  ;;  %v14780_v48 = vld [vmem:[%s19679_s25 + $0x50] sm:$0xff]  ;;  %v19525_v5 = vld [vmem:[%s19654_s5] sm:$0xff] }
0x117a   :  { %v3593_v19 = vadd.f32 %v20355_v16, %v3589_v34  ;;  %3596 = vmax.xlane.f32.xlu1 %v3595_v35  ;;  %v3257_v16 = vmul.f32 %v19098_v36, %v20497_v57  ;;  %v14778_v34 = vld [vmem:[%s19679_s25 + $0x40] sm:$0xff]  ;;  %v14779_v35 = vld [vmem:[%s19679_s25 + $0x48] sm:$0xff] }
0x117b   :  { %16316 = vmatmul.mubr.msk.f32.gmra.mrb[42].mxu1 %vm291_vm1, %v16273_v55  ;;  %v3604_v20 = vsel %vm181_vm0, %v3594_v46, -inf }
0x117c   :  { %17589 = vmatpush3.bf16.msra.mxu1 %v17586_v33  ;;  %3605 = vmax.xlane.f32.xlu0 %v3604_v20  ;;  %v3601_v38 = vsel %vm181_vm0, %v3593_v19, -inf }
0x117d   :  { %16340 = vmatprep.mubr.msk.f32.mxu1 %vm181_vm0, %v3253_v11  ;;  %16346 = vmatprep.subr.mxu1 %v14669_v37 }
0x117e   :  { %3602 = vmax.xlane.f32.xlu1 %v3601_v38 }
0x117f   :  { %16341 = vmatmul.mubr.msk.f32.vlgmr.msra.gmra.mrb[44].mxu1 %vm181_vm0, %v3255_v58 }
0x1180   :  { %16343 = vmatprep.mubr.msk.f32.mxu1 %vm181_vm0, %v3257_v16  ;;  %16347 = vmatpush3.msra.mxu1 %v14669_v37  ;;  %v19526_v16 = vld [vmem:[%s19654_s5 + $0x8] sm:$0xff]  ;;  %v19528_v37 = vld [vmem:[%s19654_s5 + $0x18] sm:$0xff] }
0x1183   :  { %16344 = vmatmul.mubr.msk.f32.gmra.mrb[46].mxu1 %vm181_vm0, %v3259_v39  ;;  %v19527_v39 = vld [vmem:[%s19654_s5 + $0x10] sm:$0xff] }
0x1205   :  { %v3600_v29 = vpop.xlane.xlu0 %3599 }
0x1206   :  { %v3608_v42 = vsub.f32 %v3592_v26, %v3600_v29  ;;  %v14741_v29 = vld [vmem:[%s19694_s8 + $0x1] ss:$0 sm:$0xff] }
0x1207   :  { %v3597_v44 = vpop.xlane.xlu1 %3596 }
0x1208   :  { %v3613_v45 = vmul.f32 1.442695, %v3608_v42  ;;  %v3607_v12 = vsub.f32 %v3591_v31, %v3597_v44 }
0x1209   :  { %v3606_v47 = vpop.xlane.xlu0 %3605 }
0x120a   :  { %19101 = vpow2.f32 %v3613_v45  ;;  %v3611_v49 = vmul.f32 1.442695, %v3607_v12  ;;  %v3610_v57 = vsub.f32 %v3594_v46, %v3606_v47  ;;  %v17650_v46 = vpack.c.bf16 %v14779_v35, %v14778_v34  ;;  %v14747_v34 = vld [vmem:[%s19699_s14 + $0x28] sm:$0xff] }
0x120b   :  { %v3603_v52 = vpop.xlane.xlu1 %3602 }
0x120c   :  { %19103 = vpow2.f32 %v3611_v49  ;;  %v3617_v25 = vmul.f32 1.442695, %v3610_v57  ;;  %v3609_v32 = vsub.f32 %v3593_v19, %v3603_v52  ;;  %v14781_v19 = vld [vmem:[%s19679_s25 + $0x58] sm:$0xff] }
0x120d   :  { %v17654_v11 = vpack.c.bf16 %v14781_v19, %v14780_v48  ;;  %v14749_v48 = vld [vmem:[%s19699_s14 + $0x38] sm:$0xff] }
0x120e   :  { %19105 = vpow2.f32 %v3617_v25  ;;  %v3615_v14 = vmul.f32 1.442695, %v3609_v32 }
0x1210   :  { %19107 = vpow2.f32 %v3615_v14 }
0x1214   :  { %v19102_v54 = vpop.eup %19101 }
0x1215   :  { %v3622_v63 = vsel %vm181_vm0, %v19102_v54, 0.0 }
0x1216   :  { %v19104_v0 = vpop.eup %19103  ;;  %3623 = vadd.xlane.f32.xlu0 %v3622_v63 }
0x1217   :  { %v3619_v61 = vsel %vm181_vm0, %v19104_v0, 0.0 }
0x1218   :  { %v19106_v1 = vpop.eup %19105  ;;  %3620 = vadd.xlane.f32.xlu1 %v3619_v61 }
0x1219   :  { %v3628_v55 = vsel %vm181_vm0, %v19106_v1, 0.0 }
0x121a   :  { %v19108_v60 = vpop.eup %19107  ;;  %3629 = vadd.xlane.f32.xlu0 %v3628_v55 }
0x121b   :  { %v3625_v51 = vsel %vm181_vm0, %v19108_v60, 0.0 }
0x121c   :  { %3626 = vadd.xlane.f32.xlu1 %v3625_v51 }
0x122d   :  { %18548 = vrot.lane.b32.xlu1 %v20267_v6, %s22417_s22 }
0x1230   :  { %18553 = vrot.lane.b32.xlu0 %v20277_v41, %s22417_s22 }
0x1252   :  { %v16342_v4 = vpop.f32.mrb[44].mxu1 }
0x1253   :  { %v3350_v40 = vpop.f32.mrb[45].mxu1 }
0x1254   :  { %16348 = vmatprep.mubr.msk.f32.mxu1 %vm291_vm1, %v3350_v40 }
0x1255   :  { %16349 = vmatmul.mubr.msk.f32.vlgmr.msra.gmra.mrb[40].mxu1 %vm291_vm1, %v16342_v4 }
0x1256   :  { %v16345_v10 = vpop.f32.mrb[46].mxu1 }
0x1257   :  { %v3360_v43 = vpop.f32.mrb[47].mxu1 }
0x1258   :  { %16351 = vmatprep.mubr.msk.f32.mxu1 %vm291_vm1, %v3360_v43 }
0x1259   :  { %16352 = vmatmul.mubr.msk.f32.gmra.mrb[42].mxu1 %vm291_vm1, %v16345_v10 }
0x12a3   :  { %v3624_v13 = vpop.xlane.xlu0 %3623 }
0x12a5   :  { %v3621_v15 = vpop.xlane.xlu1 %3620 }
0x12a6   :  { %19109 = vrcp.f32 %v3621_v15 }
0x12a7   :  { %v3630_v18 = vpop.xlane.xlu0 %3629  ;;  %19111 = vrcp.f32 %v3624_v13 }
0x12a9   :  { %v3627_v6 = vpop.xlane.xlu1 %3626 }
0x12aa   :  { %19113 = vrcp.f32 %v3627_v6 }
0x12ab   :  { %v18554_v21 = vpop.permute.xlu0 %18553  ;;  %19115 = vrcp.f32 %v3630_v18 }
0x12ac   :  { %v18556_v7 = vunpack.i.h.bf16 %v18554_v21  ;;  %v18555_v23 = vunpack.i.l.bf16 %v18554_v21 }
0x12ad   :  { %v18549_v41 = vpop.permute.xlu1 %18548 }
0x12ae   :  { %v18551_v53 = vunpack.i.h.bf16 %v18549_v41  ;;  %v18550_v8 = vunpack.i.l.bf16 %v18549_v41  ;;  %v17606_v26 = vpack.c.bf16 %v18556_v7, %v18555_v23 }
0x12b0   :  { %v19110_v28 = vpop.eup %19109  ;;  %v17602_v30 = vpack.c.bf16 %v18551_v53, %v18550_v8 }
0x12b1   :  { %v3632_v27 = vmul.f32 %v19110_v28, %v19104_v0  ;;  %v19112_v31 = vpop.eup %19111 }
0x12b2   :  { %17603 = vmatprep.subr.bf16.mxu1 %v17602_v30  ;;  %v3634_v2 = vmul.f32 %v19112_v31, %v19102_v54 }
0x12b3   :  { %17605 = vmatpush3.bf16.msra.mxu1 %v17602_v30  ;;  %16376 = vmatprep.mubr.msk.f32.mxu1 %vm181_vm0, %v3632_v27 }
0x12b4   :  { %17607 = vmatprep.subr.bf16.mxu1 %v17606_v26  ;;  %v19114_v59 = vpop.eup %19113 }
0x12b5   :  { %v19116_v62 = vpop.eup %19115  ;;  %v3636_v33 = vmul.f32 %v19114_v59, %v19108_v60 }
0x12b6   :  { %v3638_v9 = vmul.f32 %v19116_v62, %v19106_v1  ;;  %v14788_v1 = vld [vmem:[%s19684_s29 + $0x2] ss:$0 sm:$0xff] }
0x12b7   :  { %17609 = vmatpush3.bf16.msra.mxu1 %v17606_v26 }
0x12b8   :  { %16382 = vmatprep.subr.mxu1 %v14670_v22 }
0x12ba   :  { %16377 = vmatmul.mubr.msk.f32.vlgmr.msra.gmra.mrb[48].mxu1 %vm181_vm0, %v3634_v2 }
0x12bb   :  { %16379 = vmatprep.mubr.msk.f32.mxu1 %vm181_vm0, %v3636_v33  ;;  %16383 = vmatpush3.msra.mxu1 %v14670_v22 }
0x12bc   :  { %17651 = vmatprep.subr.bf16.mxu1 %v17650_v46 }
0x12be   :  { %16380 = vmatmul.mubr.msk.f32.gmra.mrb[50].mxu1 %vm181_vm0, %v3638_v9  ;;  %v14746_v9 = vld [vmem:[%s19699_s14 + $0x20] sm:$0xff] }
0x12bf   :  { %v17610_v35 = vpack.c.bf16 %v14747_v34, %v14746_v9  ;;  %v14745_v34 = vld [vmem:[%s19724_s12 + $0x1] ss:$0 sm:$0xff] }
0x12c1   :  { %17611 = vmatprep.subr.bf16.mxu0 %v17610_v35 }
0x12c2   :  { %17613 = vmatpush3.bf16.msra.mxu0 %v17610_v35 }
0x138d   :  { %v16378_v36 = vpop.f32.mrb[48].mxu1 }
0x138e   :  { %v3729_v20 = vpop.f32.mrb[49].mxu1 }
0x138f   :  { %16384 = vmatprep.mubr.msk.f32.mxu1 %vm291_vm1, %v3729_v20  ;;  %v14752_v20 = vld [vmem:[%s19709_s24 + $0x88] sm:$0xff] }
0x1390   :  { %16385 = vmatmul.mubr.msk.f32.vlgmr.msra.gmra.mrb[40].mxu1 %vm291_vm1, %v16378_v36  ;;  %v14751_v36 = vld [vmem:[%s19709_s24 + $0x80] sm:$0xff] }
0x1391   :  { %v16381_v38 = vpop.f32.mrb[50].mxu1  ;;  %17653 = vmatpush3.bf16.msra.mxu1 %v17650_v46  ;;  %v14748_v46 = vld [vmem:[%s19699_s14 + $0x30] sm:$0xff] }
0x1392   :  { %v3739_v58 = vpop.f32.mrb[51].mxu1  ;;  %17655 = vmatprep.subr.bf16.mxu1 %v17654_v11  ;;  %v17614_v19 = vpack.c.bf16 %v14749_v48, %v14748_v46  ;;  %v14753_v48 = vld [vmem:[%s19709_s24 + $0x90] sm:$0xff] }
0x1393   :  { %16387 = vmatprep.mubr.msk.f32.mxu1 %vm291_vm1, %v3739_v58 }
0x1394   :  { %16388 = vmatmul.mubr.msk.f32.gmra.mrb[42].mxu1 %vm291_vm1, %v16381_v38  ;;  %17615 = vmatprep.subr.bf16.mxu0 %v17614_v19 }
0x1395   :  { %17657 = vmatpush3.bf16.msra.mxu1 %v17654_v11  ;;  %16450 = vmatprep.mubr.msk.f32.mxu1 %vm181_vm0, %v19525_v5  ;;  %v20657_v11 = vpack.c.bf16 %v14752_v20, %v14751_v36 }
0x1396   :  { %17617 = vmatpush3.bf16.msra.mxu0 %v17614_v19  ;;  %v14754_v19 = vld [vmem:[%s19709_s24 + $0x98] sm:$0xff] }
0x1397   :  { %17619 = vmatprep.subr.bf16.mxu0 %v20657_v11 }
0x1398   :  { %16451 = vmatmul.mubr.msk.f32.vlgmr.msra.gmra.mrb[52].mxu1 %vm181_vm0, %v19526_v16 }
0x1399   :  { %16453 = vmatprep.mubr.msk.f32.mxu1 %vm181_vm0, %v19527_v39 }
0x139c   :  { %16454 = vmatmul.mubr.msk.f32.gmra.mrb[54].mxu1 %vm181_vm0, %v19528_v37 }
0x1463   :  { %v16386_v42 = vpop.f32.mrb[40].mxu1 }
0x1464   :  { %v3856_v44 = vadd.f32 %v16386_v42, %v14741_v29  ;;  %v3826_v45 = vpop.f32.mrb[41].mxu1 }
0x1465   :  { %v3855_v12 = vadd.f32 %v14741_v29, %v3826_v45 }
0x1466   :  { %v3860_v47 = vadd.f32 %v3856_v44, %v20244_v50 }
0x1467   :  { %v3859_v49 = vadd.f32 %v3855_v12, %v20242_v17  ;;  %v16389_v57 = vpop.f32.mrb[42].mxu1 }
0x1468   :  { %v3858_v52 = vadd.f32 %v16389_v57, %v14741_v29  ;;  %v3836_v25 = vpop.f32.mrb[43].mxu1  ;;  %v3870_v32 = vsel %vm181_vm0, %v3860_v47, 0.0 }
0x1469   :  { %v3857_v14 = vadd.f32 %v14741_v29, %v3836_v25  ;;  %3871 = vadd.xlane.f32.xlu0 %v3870_v32  ;;  %v3867_v54 = vsel %vm181_vm0, %v3859_v49, 0.0 }
0x146a   :  { %v3862_v63 = vadd.f32 %v3858_v52, %v20252_v3  ;;  %3868 = vadd.xlane.f32.xlu1 %v3867_v54 }
0x146b   :  { %v3861_v0 = vadd.f32 %v3857_v14, %v20250_v56  ;;  %v16452_v50 = vpop.f32.mrb[52].mxu1 }
0x146c   :  { %v3876_v61 = vsel %vm181_vm0, %v3862_v63, 0.0  ;;  %v20585_v55 = vadd.f32 %v16452_v50, %v14788_v1  ;;  %v4385_v60 = vpop.f32.mrb[53].mxu1 }
0x146d   :  { %3877 = vadd.xlane.f32.xlu0 %v3876_v61  ;;  %v3873_v17 = vsel %vm181_vm0, %v3861_v0, 0.0  ;;  %v20587_v51 = vadd.f32 %v14788_v1, %v4385_v60 }
0x146e   :  { %3874 = vadd.xlane.f32.xlu1 %v3873_v17 }
0x146f   :  { %16464 = vmatprep.mubr.msk.f32.mxu1 %vm291_vm1, %v20587_v51  ;;  %v16455_v3 = vpop.f32.mrb[54].mxu1  ;;  %v20617_v62 = vpack.i.bf16 %v20585_v55, %v20587_v51 }
0x1470   :  { %v20591_v4 = vadd.f32 %v16455_v3, %v14788_v1  ;;  %v4395_v56 = vpop.f32.mrb[55].mxu1 }
0x1471   :  { %v20593_v40 = vadd.f32 %v14788_v1, %v4395_v56 }
0x1473   :  { %v20623_v33 = vpack.i.bf16 %v20591_v4, %v20593_v40 }
0x14f6   :  { %v3872_v10 = vpop.xlane.xlu0 %3871 }
0x14f7   :  { %v3880_v43 = vmul.f32 0.03125, %v3872_v10  ;;  %v3869_v13 = vpop.xlane.xlu1 %3868 }
0x14f8   :  { %v3879_v15 = vmul.f32 0.03125, %v3869_v13 }
0x14f9   :  { %v20595_v18 = vsub.f32 %v3860_v47, %v3880_v43 }
0x14fa   :  { %v20597_v6 = vsub.f32 %v3859_v49, %v3879_v15  ;;  %v3878_v21 = vpop.xlane.xlu0 %3877 }
0x14fb   :  { %v3882_v41 = vmul.f32 0.03125, %v3878_v21  ;;  %v3875_v7 = vpop.xlane.xlu1 %3874  ;;  %v3888_v23 = vmul.f32 %v20595_v18, %v20595_v18 }
0x14fc   :  { %v3881_v53 = vmul.f32 0.03125, %v3875_v7  ;;  %v3887_v8 = vmul.f32 %v20597_v6, %v20597_v6 }
0x14fd   :  { %v20603_v28 = vsub.f32 %v3862_v63, %v3882_v41  ;;  %v3894_v30 = vsel %vm181_vm0, %v3888_v23, 0.0 }
0x14fe   :  { %v20606_v27 = vsub.f32 %v3861_v0, %v3881_v53  ;;  %3895 = vadd.xlane.f32.xlu0 %v3894_v30  ;;  %v3891_v26 = vsel %vm181_vm0, %v3887_v8, 0.0 }
0x14ff   :  { %3892 = vadd.xlane.f32.xlu1 %v3891_v26  ;;  %v3890_v31 = vmul.f32 %v20603_v28, %v20603_v28 }
0x1500   :  { %v3889_v22 = vmul.f32 %v20606_v27, %v20606_v27 }
0x1501   :  { %v3900_v59 = vsel %vm181_vm0, %v3890_v31, 0.0  ;;  %v14744_v31 = vld [vmem:[%s19719_s6 + $0x1] ss:$0 sm:$0xff] }
0x1502   :  { %3901 = vadd.xlane.f32.xlu0 %v3900_v59  ;;  %v3897_v2 = vsel %vm181_vm0, %v3889_v22, 0.0  ;;  %v3914_v22 = vmul.f32 %v14744_v31, %v20595_v18  ;;  %v3916_v36 = vmul.f32 %v14744_v31, %v20603_v28  ;;  %v3915_v20 = vmul.f32 %v14744_v31, %v20606_v27  ;;  %v14755_v28 = vld [vmem:[%s19709_s24 + $0xa0] sm:$0xff]  ;;  %v14756_v27 = vld [vmem:[%s19709_s24 + $0xa8] sm:$0xff] }
0x1503   :  { %3898 = vadd.xlane.f32.xlu1 %v3897_v2  ;;  %v3913_v2 = vmul.f32 %v14744_v31, %v20597_v6 }
0x1514   :  { %18558 = vrot.lane.b32.xlu1 %v20617_v62, %s19632_s28 }
0x1518   :  { %18563 = vrot.lane.b32.xlu0 %v20623_v33, %s19632_s28  ;;  %18568 = vrot.lane.b32.xlu1 %v20617_v62, %s19631_s0 }
0x151c   :  { %18573 = vrot.lane.b32.xlu1 %v20623_v33, %s19631_s0  ;;  %4678 = vrot.lane.b32.xlu0 %v20587_v51, %s19633_s1 }
0x1520   :  { %4680 = vrot.lane.b32.xlu1 %v20585_v55, %s19633_s1  ;;  %4682 = vrot.lane.b32.xlu0 %v20593_v40, %s19633_s1 }
0x1524   :  { %4684 = vrot.lane.b32.xlu1 %v20591_v4, %s19633_s1  ;;  %18578 = vrot.lane.b32.xlu0 %v20617_v62, %s19635_s7 }
0x1528   :  { %18583 = vrot.lane.b32.xlu1 %v20623_v33, %s19635_s7  ;;  %5150 = vrot.lane.b32.xlu0 %v20587_v51, %s19636_s10 }
0x152c   :  { %5152 = vrot.lane.b32.xlu1 %v20585_v55, %s19636_s10  ;;  %5154 = vrot.lane.b32.xlu0 %v20593_v40, %s19636_s10 }
0x1530   :  { %5156 = vrot.lane.b32.xlu1 %v20591_v4, %s19636_s10 }
0x158b   :  { %v3896_v38 = vpop.xlane.xlu0 %3895 }
0x158c   :  { %v3904_v58 = vmul.f32 0.032258064, %v3896_v38  ;;  %v3893_v5 = vpop.xlane.xlu1 %3892 }
0x158d   :  { %v3903_v16 = vmul.f32 0.032258064, %v3893_v5 }
0x158e   :  { %19117 = vrsqrt.f32 %v3904_v58  ;;  %vm3926_vm6 = vcmp.eq.f32.partialorder %v3904_v58, inf  ;;  %v3929_v63 = vand.u32 2147483648, %v3904_v58  ;;  %vm3928_vm7 = vcmp.eq.f32.partialorder %v3904_v58, 0.0 }
0x158f   :  { %19119 = vrsqrt.f32 %v3903_v16  ;;  %v3902_v39 = vpop.xlane.xlu0 %3901  ;;  %vm3919_vm8 = vcmp.eq.f32.partialorder %v3903_v16, inf  ;;  %v3922_v17 = vand.u32 2147483648, %v3903_v16  ;;  %vm3921_vm9 = vcmp.eq.f32.partialorder %v3903_v16, 0.0 }
0x1590   :  { %v3906_v37 = vmul.f32 0.032258064, %v3902_v39  ;;  %v3899_v29 = vpop.xlane.xlu1 %3898 }
0x1591   :  { %v3905_v42 = vmul.f32 0.032258064, %v3899_v29 }
0x1592   :  { %19121 = vrsqrt.f32 %v3906_v37  ;;  %vm3940_vm10 = vcmp.eq.f32.partialorder %v3906_v37, inf  ;;  %vm3942_vm11 = vcmp.eq.f32.partialorder %v3906_v37, 0.0  ;;  %v3943_v13 = vand.u32 2147483648, %v3906_v37 }
0x1593   :  { %19123 = vrsqrt.f32 %v3905_v42  ;;  %v18564_v44 = vpop.permute.xlu0 %18563  ;;  %vm3933_vm12 = vcmp.eq.f32.partialorder %v3905_v42, inf  ;;  %v3936_v7 = vand.u32 2147483648, %v3905_v42  ;;  %vm3935_vm13 = vcmp.eq.f32.partialorder %v3905_v42, 0.0 }
0x1594   :  { %v18559_v45 = vpop.permute.xlu1 %18558  ;;  %v18566_v12 = vunpack.i.h.bf16 %v18564_v44  ;;  %v18565_v47 = vunpack.i.l.bf16 %v18564_v44  ;;  %v14757_v44 = vld [vmem:[%s19709_s24 + $0xb0] sm:$0xff] }
0x1595   :  { %v18561_v49 = vunpack.i.h.bf16 %v18559_v45  ;;  %v18560_v57 = vunpack.i.l.bf16 %v18559_v45  ;;  %v14758_v45 = vld [vmem:[%s19709_s24 + $0xb8] sm:$0xff] }
0x1596   :  { %v17664_v25 = vpack.c.bf16 %v18566_v12, %v18565_v47  ;;  %v17630_v12 = vpack.c.bf16 %v14758_v45, %v14757_v44  ;;  %v14760_v47 = vld [vmem:[%s19709_s24 + $0xc8] sm:$0xff] }
0x1597   :  { %v17658_v52 = vpack.c.bf16 %v18561_v49, %v18560_v57  ;;  %v14761_v57 = vld [vmem:[%s19709_s24 + $0xd0] sm:$0xff] }
0x1598   :  { %v19118_v32 = vpop.eup %19117 }
0x1599   :  { %v19120_v14 = vpop.eup %19119  ;;  %v3925_v54 = vmul.f32 %v19118_v32, %v3904_v58  ;;  %17660 = vmatprep.subr.msk.bf16.mxu1 %vm19885_vm2, %v17658_v52  ;;  %v14763_v32 = vld [vmem:[%s19709_s24 + $0xe0] sm:$0xff] }
0x159a   :  { %v3918_v0 = vmul.f32 %v19120_v14, %v3903_v16  ;;  %17663 = vmatpush3.bf16.xpose.msk.msra.mxu1 %vm19885_vm2, %v17658_v52  ;;  %v14762_v52 = vld [vmem:[%s19709_s24 + $0xd8] sm:$0xff]  ;;  %v14764_v14 = vld [vmem:[%s19709_s24 + $0xe8] sm:$0xff] }
0x159b   :  { %v3927_v61 = vsel %vm3926_vm6, %v3904_v58, %v3925_v54  ;;  %17666 = vmatprep.subr.msk.bf16.mxu1 %vm19885_vm2, %v17664_v25  ;;  %v17642_v54 = vpack.c.bf16 %v14764_v14, %v14763_v32 }
0x159c   :  { %v19122_v50 = vpop.eup %19121  ;;  %v3930_v1 = vsel %vm3928_vm7, %v3929_v63, %v3927_v61  ;;  %v3920_v60 = vsel %vm3919_vm8, %v3903_v16, %v3918_v0  ;;  %v17622_v16 = vpack.c.bf16 %v14754_v19, %v14753_v48  ;;  %v14765_v63 = vld [vmem:[%s19709_s24 + $0xf0] sm:$0xff]  ;;  %v14766_v0 = vld [vmem:[%s19709_s24 + $0xf8] sm:$0xff]  ;;  %v18569_v61 = vpop.permute.xlu1 %18568 }
0x159d   :  { %v19124_v3 = vpop.eup %19123  ;;  %v3946_v56 = vadd.f32 1e-06, %v3930_v1  ;;  %v3939_v10 = vmul.f32 %v19122_v50, %v3906_v37  ;;  %v3923_v43 = vsel %vm3921_vm9, %v3922_v17, %v3920_v60  ;;  %v18571_v17 = vunpack.i.h.bf16 %v18569_v61 }
0x159e   :  { %v3932_v15 = vmul.f32 %v19124_v3, %v3905_v42  ;;  %v3945_v21 = vadd.f32 1e-06, %v3923_v43  ;;  %v18570_v50 = vunpack.i.l.bf16 %v18569_v61  ;;  %v17646_v1 = vpack.c.bf16 %v14766_v0, %v14765_v63 }
0x159f   :  { %19125 = vrcp.f32 %v3946_v56  ;;  %v3941_v41 = vsel %vm3940_vm10, %v3906_v37, %v3939_v10 }
0x15a0   :  { %v3934_v23 = vsel %vm3933_vm12, %v3905_v42, %v3932_v15  ;;  %19127 = vrcp.f32 %v3945_v21  ;;  %v3944_v53 = vsel %vm3942_vm11, %v3943_v13, %v3941_v41  ;;  %v17626_v42 = vpack.c.bf16 %v14756_v27, %v14755_v28  ;;  %v20714_v13 = vld [vmem:[%s19664_s13 + $0x8] sm:$0xff]  ;;  %v20720_v21 = vld [vmem:[%s19664_s13] sm:$0xff] }
0x15a1   :  { %v3937_v8 = vsel %vm3935_vm13, %v3936_v7, %v3934_v23  ;;  %v3948_v30 = vadd.f32 1e-06, %v3944_v53  ;;  %v17678_v60 = vpack.c.bf16 %v18571_v17, %v18570_v50  ;;  %v4679_v23 = vpop.permute.xlu0 %4678 }
0x15a2   :  { %17669 = vmatpush3.bf16.xpose.msk.msra.mxu1 %vm19885_vm2, %v17664_v25  ;;  %v3947_v26 = vadd.f32 1e-06, %v3937_v8  ;;  %v17638_v25 = vpack.c.bf16 %v14762_v52, %v14761_v57 }
0x15a3   :  { %19129 = vrcp.f32 %v3948_v30  ;;  %v14768_v30 = vld [vmem:[%s19704_s19 + $0x1] ss:$0 sm:$0xff] }
0x15a4   :  { %19131 = vrcp.f32 %v3947_v26 }
0x15a9   :  { %v19126_v59 = vpop.eup %19125  ;;  %16465 = vmatmul.mubr.msk.f32.vlgmr.msra.gmra.mrb[56].mxu1 %vm291_vm1, %v20585_v55 }
0x15aa   :  { %v19128_v9 = vpop.eup %19127  ;;  %16467 = vmatprep.mubr.msk.f32.mxu1 %vm291_vm1, %v20593_v40  ;;  %v3952_v35 = vmul.f32 %v19126_v59, %v3914_v22  ;;  %v18574_v59 = vpop.permute.xlu1 %18573 }
0x15ab   :  { %v3950_v46 = vmul.f32 %v19128_v9, %v3913_v2  ;;  %v20731_v9 = vld [vmem:[%s19664_s13 + $0x10] sm:$0xff]  ;;  %v18576_v19 = vunpack.i.h.bf16 %v18574_v59 }
0x15ac   :  { %v20684_v58 = vadd.f32 %v14745_v34, %v3952_v35 }
0x15ad   :  { %v19130_v18 = vpop.eup %19129  ;;  %16468 = vmatmul.mubr.msk.f32.gmra.mrb[58].mxu1 %vm291_vm1, %v20591_v4  ;;  %v20682_v6 = vadd.f32 %v14745_v34, %v3950_v46 }
0x15ae   :  { %v19132_v38 = vpop.eup %19131  ;;  %v3956_v5 = vmul.f32 %v19130_v18, %v3916_v36  ;;  %v18575_v36 = vunpack.i.l.bf16 %v18574_v59  ;;  %v20737_v18 = vld [vmem:[%s19664_s13 + $0x18] sm:$0xff]  ;;  %v4681_v44 = vpop.permute.xlu1 %4680 }
0x15af   :  { %16398 = vmatprep.mubr.msk.f32.mxu0 %vm181_vm0, %v20682_v6  ;;  %v3954_v39 = vmul.f32 %v19132_v38, %v3915_v20 }
0x15b0   :  { %16399 = vmatmul.mubr.msk.f32.vlgmr.msra.gmra.mrb[36].mxu0 %vm181_vm0, %v20684_v58  ;;  %v20695_v29 = vadd.f32 %v14745_v34, %v3956_v5  ;;  %v4683_v5 = vpop.permute.xlu0 %4682 }
0x15b1   :  { %v20692_v37 = vadd.f32 %v14745_v34, %v3954_v39  ;;  %17621 = vmatpush3.bf16.msra.mxu0 %v20657_v11  ;;  %v14759_v11 = vld [vmem:[%s19709_s24 + $0xc0] sm:$0xff] }
0x15b2   :  { %17623 = vmatprep.subr.bf16.mxu0 %v17622_v16  ;;  %v17634_v49 = vpack.c.bf16 %v14760_v47, %v14759_v11  ;;  %v4685_v32 = vpop.permute.xlu1 %4684 }
0x15b3   :  { %16401 = vmatprep.mubr.msk.f32.mxu0 %vm181_vm0, %v20692_v37 }
0x15b4   :  { %16402 = vmatmul.mubr.msk.f32.gmra.mrb[38].mxu0 %vm181_vm0, %v20695_v29  ;;  %v18579_v57 = vpop.permute.xlu0 %18578 }
0x15b5   :  { %17625 = vmatpush3.bf16.msra.mxu0 %v17622_v16  ;;  %v18581_v52 = vunpack.i.h.bf16 %v18579_v57 }
0x15b6   :  { %17627 = vmatprep.subr.bf16.mxu0 %v17626_v42 }
0x15b8   :  { %v5151_v17 = vpop.permute.xlu0 %5150 }
0x15b9   :  { %17629 = vmatpush3.bf16.msra.mxu0 %v17626_v42 }
0x15ba   :  { %17631 = vmatprep.subr.bf16.mxu0 %v17630_v12 }
0x15bd   :  { %17633 = vmatpush3.bf16.msra.mxu0 %v17630_v12  ;;  %v17684_v12 = vpack.c.bf16 %v18576_v19, %v18575_v36 }
0x15be   :  { %17635 = vmatprep.subr.bf16.mxu0 %v17634_v49 }
0x15c1   :  { %17637 = vmatpush3.bf16.msra.mxu0 %v17634_v49 }
0x15c2   :  { %17639 = vmatprep.subr.bf16.mxu0 %v17638_v25 }
0x15c5   :  { %17641 = vmatpush3.bf16.msra.mxu0 %v17638_v25  ;;  %v18580_v25 = vunpack.i.l.bf16 %v18579_v57 }
0x15c6   :  { %17643 = vmatprep.subr.bf16.mxu0 %v17642_v54 }
0x15c7   :  { %v17698_v14 = vpack.c.bf16 %v18581_v52, %v18580_v25 }
0x15c9   :  { %17645 = vmatpush3.bf16.msra.mxu0 %v17642_v54  ;;  %v18584_v54 = vpop.permute.xlu1 %18583 }
0x15ca   :  { %17647 = vmatprep.subr.bf16.mxu0 %v17646_v1  ;;  %v18586_v63 = vunpack.i.h.bf16 %v18584_v54  ;;  %v18585_v0 = vunpack.i.l.bf16 %v18584_v54 }
0x15cc   :  { %v17704_v61 = vpack.c.bf16 %v18586_v63, %v18585_v0 }
0x15cd   :  { %17649 = vmatpush3.bf16.msra.mxu0 %v17646_v1  ;;  %v5153_v50 = vpop.permute.xlu1 %5152  ;;  %v5155_v1 = vpop.permute.xlu0 %5154 }
0x15ce   :  { %17680 = vmatprep.subr.msk.bf16.mxu0 %vm19885_vm2, %v17678_v60 }
0x167c   :  { %v16466_v3 = vpop.f32.mrb[56].mxu1 }
0x167d   :  { %v4518_v56 = vmul.f32 0.35355338, %v16466_v3  ;;  %v4498_v10 = vpop.f32.mrb[57].mxu1 }
0x167e   :  { %v4517_v43 = vmul.f32 0.35355338, %v4498_v10 }
0x167f   :  { %v20717_v15 = vadd.f32 %v20714_v13, %v4518_v56 }
0x1680   :  { %v20723_v41 = vadd.f32 %v20720_v21, %v4517_v43  ;;  %v16469_v7 = vpop.f32.mrb[58].mxu1 }
0x1681   :  { %v4508_v53 = vpop.f32.mrb[59].mxu1  ;;  %v4528_v8 = vsel %vm181_vm0, %v20717_v15, -inf  ;;  %v4520_v26 = vmul.f32 0.35355338, %v16469_v7 }
0x1682   :  { %v4519_v31 = vmul.f32 0.35355338, %v4508_v53  ;;  %4529 = vmax.xlane.f32.xlu1 %v4528_v8  ;;  %v4525_v22 = vsel %vm181_vm0, %v20723_v41, -inf }
0x1683   :  { %v16400_v2 = vpop.f32.mrb[36].mxu0  ;;  %4526 = vmax.xlane.f32.xlu0 %v4525_v22  ;;  %v20740_v20 = vadd.f32 %v20737_v18, %v4520_v26 }
0x1684   :  { %v20734_v34 = vadd.f32 %v20731_v9, %v4519_v31  ;;  %v4083_v35 = vadd.f32 %v16400_v2, %v14768_v30  ;;  %v4077_v46 = vpop.f32.mrb[37].mxu0 }
0x1685   :  { %v4078_v48 = vadd.f32 %v14768_v30, %v4077_v46  ;;  %v4534_v11 = vsel %vm181_vm0, %v20740_v20, -inf }
0x1686   :  { %v4531_v38 = vsel %vm181_vm0, %v20734_v34, -inf  ;;  %v4097_v28 = vmax.f32 %v4083_v35, 0.0 }
0x1687   :  { %v4096_v16 = vmax.f32 %v4078_v48, 0.0  ;;  %v16403_v39 = vpop.f32.mrb[38].mxu0  ;;  %4532 = vmax.xlane.f32.xlu0 %v4531_v38 }
0x1688   :  { %v4093_v27 = vadd.f32 %v16403_v39, %v14768_v30  ;;  %v4087_v42 = vpop.f32.mrb[39].mxu0 }
0x1689   :  { %v4088_v45 = vadd.f32 %v14768_v30, %v4087_v42  ;;  %16436 = vmatprep.mubr.f32.mxu0 %v4096_v16 }
0x168a   :  { %16437 = vmatmul.mubr.f32.vlgmr.msra.gmra.mrb[40].mxu0 %v4097_v28  ;;  %v4099_v49 = vmax.f32 %v4093_v27, 0.0 }
0x168b   :  { %v4098_v47 = vmax.f32 %v4088_v45, 0.0  ;;  %17683 = vmatpush3.bf16.xpose.msk.msra.mxu0 %vm19885_vm2, %v17678_v60  ;;  %4535 = vmax.xlane.f32.xlu0 %v4534_v11  ;;  %v5157_v60 = vpop.permute.xlu1 %5156 }
0x168c   :  { %17686 = vmatprep.subr.msk.bf16.mxu0 %vm19885_vm2, %v17684_v12 }
0x168d   :  { %16439 = vmatprep.mubr.f32.mxu0 %v4098_v47 }
0x168e   :  { %16440 = vmatmul.mubr.f32.gmra.mrb[42].mxu0 %v4099_v49 }
0x168f   :  { %16492 = vmatprep.mubr.msk.f32.mxu0 %vm291_vm1, %v4679_v23 }
0x1693   :  { %17689 = vmatpush3.bf16.xpose.msk.msra.mxu0 %vm19885_vm2, %v17684_v12 }
0x1694   :  { %17700 = vmatprep.subr.msk.bf16.mxu0 %vm19885_vm2, %v17698_v14 }
0x169a   :  { %16493 = vmatmul.mubr.msk.f32.vlgmr.msra.gmra.mrb[44].mxu0 %vm291_vm1, %v4681_v44 }
0x169b   :  { %16495 = vmatprep.mubr.msk.f32.mxu0 %vm291_vm1, %v4683_v5  ;;  %17703 = vmatpush3.bf16.xpose.msk.msra.mxu0 %vm19885_vm2, %v17698_v14 }
0x169c   :  { %17706 = vmatprep.subr.msk.bf16.mxu0 %vm19885_vm2, %v17704_v61 }
0x169e   :  { %16496 = vmatmul.mubr.msk.f32.gmra.mrb[46].mxu0 %vm291_vm1, %v4685_v32 }
0x169f   :  { %16536 = vmatprep.mubr.msk.f32.mxu0 %vm291_vm1, %v5151_v17 }
0x16a3   :  { %17709 = vmatpush3.bf16.xpose.msk.msra.mxu0 %vm19885_vm2, %v17704_v61 }
0x16aa   :  { %16537 = vmatmul.mubr.msk.f32.vlgmr.msra.gmra.mrb[48].mxu0 %vm291_vm1, %v5153_v50 }
0x16ab   :  { %16539 = vmatprep.mubr.msk.f32.mxu0 %vm291_vm1, %v5155_v1 }
0x16ae   :  { %16540 = vmatmul.mubr.msk.f32.gmra.mrb[50].mxu0 %vm291_vm1, %v5157_v60 }
0x170f   :  { %v4530_v23 = vpop.xlane.xlu1 %4529 }
0x1710   :  { %v4527_v3 = vpop.xlane.xlu0 %4526  ;;  %v4538_v30 = vsub.f32 %v20717_v15, %v4530_v23 }
0x1711   :  { %v4537_v53 = vsub.f32 %v20723_v41, %v4527_v3 }
0x1712   :  { %v4543_v59 = vmul.f32 1.442695, %v4538_v30 }
0x1713   :  { %v4541_v26 = vmul.f32 1.442695, %v4537_v53 }
0x1714   :  { %v4533_v43 = vpop.xlane.xlu0 %4532 }
0x1715   :  { %v4539_v31 = vsub.f32 %v20734_v34, %v4533_v43  ;;  %19133 = vpow2.f32 %v4541_v26 }
0x1716   :  { %19135 = vpow2.f32 %v4543_v59 }
0x1717   :  { %v4545_v35 = vmul.f32 1.442695, %v4539_v31 }
0x1718   :  { %v4536_v22 = vpop.xlane.xlu0 %4535 }
0x1719   :  { %v4540_v2 = vsub.f32 %v20740_v20, %v4536_v22  ;;  %19137 = vpow2.f32 %v4545_v35 }
0x171b   :  { %v4547_v46 = vmul.f32 1.442695, %v4540_v2 }
0x171d   :  { %19139 = vpow2.f32 %v4547_v46 }
0x171f   :  { %v19134_v28 = vpop.eup %19133 }
0x1720   :  { %v20786_v44 = vpop.eup %19135  ;;  %v4549_v12 = vsel %vm181_vm0, %v19134_v28, 0.0 }
0x1721   :  { %v4552_v47 = vsel %vm181_vm0, %v20786_v44, 0.0 }
0x1723   :  { %v20789_v11 = vpop.eup %19137 }
0x1724   :  { %v4555_v52 = vsel %vm181_vm0, %v20789_v11, 0.0 }
0x1727   :  { %v20793_v49 = vpop.eup %19139 }
0x1728   :  { %v4558_v14 = vsel %vm181_vm0, %v20793_v49, 0.0 }
0x175d   :  { %v20768_v56 = vpop.f32.mrb[40].mxu0 }
0x175e   :  { %v20770_v10 = vpop.f32.mrb[41].mxu0 }
0x1761   :  { %v20772_v7 = vpop.f32.mrb[42].mxu0 }
0x1762   :  { %v20775_v8 = vpop.f32.mrb[43].mxu0 }
0x176d   :  { %v16494_v48 = vpop.f32.mrb[44].mxu0 }
0x176e   :  { %v4796_v19 = vmul.f32 0.35355338, %v16494_v48  ;;  %v4776_v36 = vpop.f32.mrb[45].mxu0 }
0x176f   :  { %v4795_v41 = vmul.f32 0.35355338, %v4776_v36 }
0x1770   :  { %v4800_v38 = vadd.f32 %v20714_v13, %v4796_v19 }
0x1771   :  { %v4799_v15 = vadd.f32 %v20720_v21, %v4795_v41  ;;  %v16497_v5 = vpop.f32.mrb[46].mxu0 }
0x1772   :  { %v4798_v34 = vmul.f32 0.35355338, %v16497_v5  ;;  %v4786_v16 = vpop.f32.mrb[47].mxu0  ;;  %v4806_v39 = vsel %vm181_vm0, %v4800_v38, -inf }
0x1773   :  { %4807 = vmax.xlane.f32.xlu0 %v4806_v39  ;;  %v4803_v20 = vsel %vm181_vm0, %v4799_v15, -inf  ;;  %v4797_v45 = vmul.f32 0.35355338, %v4786_v16 }
0x1774   :  { %v4802_v27 = vadd.f32 %v20737_v18, %v4798_v34  ;;  %4804 = vmax.xlane.f32.xlu1 %v4803_v20 }
0x1775   :  { %v4801_v57 = vadd.f32 %v20731_v9, %v4797_v45 }
0x1776   :  { %v4812_v42 = vsel %vm181_vm0, %v4802_v27, -inf }
0x1777   :  { %4813 = vmax.xlane.f32.xlu0 %v4812_v42  ;;  %v4809_v54 = vsel %vm181_vm0, %v4801_v57, -inf }
0x1778   :  { %4550 = vadd.xlane.f32.xlu1 %v4549_v12 }
0x177b   :  { %4553 = vadd.xlane.f32.xlu0 %v4552_v47 }
0x177c   :  { %4556 = vadd.xlane.f32.xlu1 %v4555_v52 }
0x177d   :  { %v20798_v25 = vpop.f32.mrb[48].mxu0 }
0x177e   :  { %v5248_v32 = vpop.f32.mrb[49].mxu0  ;;  %v5268_v52 = vmul.f32 0.35355338, %v20798_v25 }
0x177f   :  { %4559 = vadd.xlane.f32.xlu0 %v4558_v14 }
0x1780   :  { %4810 = vmax.xlane.f32.xlu1 %v4809_v54 }
0x1781   :  { %v16541_v63 = vpop.f32.mrb[50].mxu0 }
0x1782   :  { %v5258_v0 = vpop.f32.mrb[51].mxu0  ;;  %v5270_v45 = vmul.f32 0.35355338, %v16541_v63 }
0x1783   :  { %v5269_v42 = vmul.f32 0.35355338, %v5258_v0 }
0x1785   :  { %v20836_v12 = vadd.f32 %v20731_v9, %v5269_v42 }
0x1787   :  { %v5281_v47 = vsel %vm181_vm0, %v20836_v12, -inf }
0x1791   :  { %18588 = vrot.lane.b32.xlu1 %v20617_v62, %s19634_s2 }
0x1800   :  { %v4808_v61 = vpop.xlane.xlu0 %4807 }
0x1801   :  { %v4816_v17 = vsub.f32 %v4800_v38, %v4808_v61  ;;  %v4805_v50 = vpop.xlane.xlu1 %4804 }
0x1802   :  { %v4815_v1 = vsub.f32 %v4799_v15, %v4805_v50 }
0x1803   :  { %v4821_v60 = vmul.f32 1.442695, %v4816_v17 }
0x1804   :  { %v4819_v3 = vmul.f32 1.442695, %v4815_v1  ;;  %v4814_v43 = vpop.xlane.xlu0 %4813 }
0x1805   :  { %19141 = vpow2.f32 %v4821_v60  ;;  %v4818_v23 = vsub.f32 %v4802_v27, %v4814_v43  ;;  %v4551_v53 = vpop.xlane.xlu1 %4550 }
0x1806   :  { %19143 = vpow2.f32 %v4819_v3 }
0x1807   :  { %v4825_v30 = vmul.f32 1.442695, %v4818_v23  ;;  %19145 = vrcp.f32 %v4551_v53 }
0x1808   :  { %v4554_v54 = vpop.xlane.xlu0 %4553 }
0x1809   :  { %19147 = vpow2.f32 %v4825_v30  ;;  %v4557_v26 = vpop.xlane.xlu1 %4556 }
0x180c   :  { %v4560_v63 = vpop.xlane.xlu0 %4559 }
0x180d   :  { %v4811_v31 = vpop.xlane.xlu1 %4810 }
0x180e   :  { %v4817_v34 = vsub.f32 %v4801_v57, %v4811_v31 }
0x180f   :  { %v20805_v22 = vpop.eup %19141 }
0x1810   :  { %v20807_v59 = vpop.eup %19143  ;;  %v4830_v2 = vsel %vm181_vm0, %v20805_v22, 0.0  ;;  %v4823_v16 = vmul.f32 1.442695, %v4817_v34 }
0x1811   :  { %v19146_v35 = vpop.eup %19145  ;;  %v18589_v46 = vpop.permute.xlu1 %18588  ;;  %4831 = vadd.xlane.f32.xlu0 %v4830_v2  ;;  %v4827_v48 = vsel %vm181_vm0, %v20807_v59, 0.0 }
0x1812   :  { %v18591_v19 = vunpack.i.h.bf16 %v18589_v46  ;;  %v18590_v36 = vunpack.i.l.bf16 %v18589_v46  ;;  %4828 = vadd.xlane.f32.xlu1 %v4827_v48  ;;  %v4562_v41 = vmul.f32 %v19146_v35, %v19134_v28  ;;  %19149 = vpow2.f32 %v4823_v16 }
0x1813   :  { %v20813_v38 = vpop.eup %19147  ;;  %v5267_v28 = vmul.f32 0.35355338, %v5248_v32  ;;  %v20857_v32 = vadd.f32 %v20714_v13, %v5268_v52  ;;  %19151 = vrcp.f32 %v4554_v54 }
0x1814   :  { %16478 = vmatprep.mubr.msk.f32.mxu1 %vm181_vm0, %v4562_v41  ;;  %v4836_v15 = vsel %vm181_vm0, %v20813_v38, 0.0  ;;  %v17670_v5 = vpack.c.bf16 %v18591_v19, %v18590_v36  ;;  %19153 = vrcp.f32 %v4557_v26 }
0x1815   :  { %4837 = vadd.xlane.f32.xlu0 %v4836_v15  ;;  %v20833_v27 = vadd.f32 %v20720_v21, %v5267_v28  ;;  %v5278_v14 = vsel %vm181_vm0, %v20857_v32, -inf  ;;  %19155 = vrcp.f32 %v4560_v63 }
0x1816   :  { %17671 = vmatprep.subr.bf16.mxu1 %v17670_v5 }
0x1817   :  { %17673 = vmatpush3.bf16.msra.mxu1 %v17670_v5 }
0x181c   :  { %v20828_v39 = vpop.eup %19149 }
0x181d   :  { %v4833_v20 = vsel %vm181_vm0, %v20828_v39, 0.0  ;;  %v19152_v43 = vpop.eup %19151 }
0x181e   :  { %v19154_v53 = vpop.eup %19153  ;;  %v4564_v26 = vmul.f32 %v19152_v43, %v20786_v44 }
0x181f   :  { %v19156_v46 = vpop.eup %19155  ;;  %v4566_v19 = vmul.f32 %v19154_v53, %v20789_v11 }
0x1820   :  { %v4568_v44 = vmul.f32 %v19156_v46, %v20793_v49 }
0x1823   :  { %18598 = vrot.lane.b32.xlu1 %v20617_v62, %s19637_s11 }
0x182b   :  { %18593 = vrot.lane.b32.xlu0 %v20623_v33, %s19634_s2 }
0x182f   :  { %18608 = vrot.lane.b32.xlu0 %v20617_v62, %s19638_s15 }
0x1833   :  { %5529 = vrot.lane.b32.xlu0 %v20587_v51, %s19639_s16  ;;  %v5275_v51 = vsel %vm181_vm0, %v20833_v27, -inf }
0x1837   :  { %5533 = vrot.lane.b32.xlu0 %v20593_v40, %s19639_s16  ;;  %v20843_v40 = vadd.f32 %v20737_v18, %v5270_v45 }
0x1839   :  { %v5284_v57 = vsel %vm181_vm0, %v20843_v40, -inf }
0x1847   :  { %4834 = vadd.xlane.f32.xlu1 %v4833_v20 }
0x1856   :  { %5276 = vmax.xlane.f32.xlu0 %v5275_v51 }
0x1858   :  { %18603 = vrot.lane.b32.xlu1 %v20623_v33, %s19637_s11 }
0x185a   :  { %5282 = vmax.xlane.f32.xlu0 %v5281_v47 }
0x185c   :  { %18613 = vrot.lane.b32.xlu1 %v20623_v33, %s19638_s15 }
0x185e   :  { %5285 = vmax.xlane.f32.xlu0 %v5284_v57 }
0x1860   :  { %5531 = vrot.lane.b32.xlu1 %v20585_v55, %s19639_s16 }
0x1864   :  { %5535 = vrot.lane.b32.xlu1 %v20591_v4, %s19639_s16 }
0x1888   :  { %5279 = vmax.xlane.f32.xlu1 %v5278_v14 }
0x189e   :  { %v4832_v0 = vpop.xlane.xlu0 %4831 }
0x189f   :  { %v4829_v61 = vpop.xlane.xlu1 %4828 }
0x18a0   :  { %19157 = vrcp.f32 %v4829_v61 }
0x18a1   :  { %19159 = vrcp.f32 %v4832_v0 }
0x18a2   :  { %v4838_v17 = vpop.xlane.xlu0 %4837 }
0x18a3   :  { %v18599_v55 = vpop.permute.xlu1 %18598 }
0x18a4   :  { %v18601_v50 = vunpack.i.h.bf16 %v18599_v55  ;;  %v18600_v25 = vunpack.i.l.bf16 %v18599_v55 }
0x18a6   :  { %v18594_v4 = vpop.permute.xlu0 %18593  ;;  %v17690_v2 = vpack.c.bf16 %v18601_v50, %v18600_v25 }
0x18a7   :  { %v18596_v1 = vunpack.i.h.bf16 %v18594_v4  ;;  %v18595_v60 = vunpack.i.l.bf16 %v18594_v4 }
0x18a9   :  { %v17674_v3 = vpack.c.bf16 %v18596_v1, %v18595_v60 }
0x18aa   :  { %v18609_v23 = vpop.permute.xlu0 %18608  ;;  %v19158_v36 = vpop.eup %19157 }
0x18ab   :  { %v18611_v30 = vunpack.i.h.bf16 %v18609_v23  ;;  %v18610_v31 = vunpack.i.l.bf16 %v18609_v23  ;;  %17675 = vmatprep.subr.bf16.mxu1 %v17674_v3  ;;  %v4840_v41 = vmul.f32 %v19158_v36, %v20807_v59  ;;  %v19160_v20 = vpop.eup %19159 }
0x18ac   :  { %17677 = vmatpush3.bf16.msra.mxu1 %v17674_v3  ;;  %v4842_v59 = vmul.f32 %v19160_v20, %v20805_v22 }
0x18ad   :  { %v17718_v35 = vpack.c.bf16 %v18611_v30, %v18610_v31  ;;  %17691 = vmatprep.subr.bf16.mxu1 %v17690_v2 }
0x18ae   :  { %v5530_v48 = vpop.permute.xlu0 %5529 }
0x18af   :  { %16479 = vmatmul.mubr.msk.f32.vlgmr.msra.gmra.mrb[60].mxu1 %vm181_vm0, %v4564_v26  ;;  %17720 = vmatprep.subr.msk.bf16.mxu0 %vm19885_vm2, %v17718_v35 }
0x18b0   :  { %16572 = vmatprep.mubr.msk.f32.mxu0 %vm291_vm1, %v5530_v48  ;;  %16481 = vmatprep.mubr.msk.f32.mxu1 %vm181_vm0, %v4566_v19 }
0x18b1   :  { %17693 = vmatpush3.bf16.msra.mxu1 %v17690_v2  ;;  %17723 = vmatpush3.bf16.xpose.msk.msra.mxu0 %vm19885_vm2, %v17718_v35 }
0x18b2   :  { %v5534_v51 = vpop.permute.xlu0 %5533 }
0x18b3   :  { %16482 = vmatmul.mubr.msk.f32.gmra.mrb[62].mxu1 %vm181_vm0, %v4568_v44 }
0x18b4   :  { %16506 = vmatprep.mubr.msk.f32.mxu1 %vm181_vm0, %v4840_v41 }
0x18d4   :  { %v4835_v11 = vpop.xlane.xlu1 %4834 }
0x18d5   :  { %19161 = vrcp.f32 %v4835_v11 }
0x18d6   :  { %19163 = vrcp.f32 %v4838_v17 }
0x18d8   :  { %v18604_v15 = vpop.permute.xlu1 %18603 }
0x18d9   :  { %v18606_v5 = vunpack.i.h.bf16 %v18604_v15  ;;  %v18605_v34 = vunpack.i.l.bf16 %v18604_v15 }
0x18db   :  { %v17694_v16 = vpack.c.bf16 %v18606_v5, %v18605_v34 }
0x18dc   :  { %v18614_v28 = vpop.permute.xlu1 %18613 }
0x18dd   :  { %v18616_v42 = vunpack.i.h.bf16 %v18614_v28  ;;  %v18615_v45 = vunpack.i.l.bf16 %v18614_v28  ;;  %17695 = vmatprep.subr.bf16.mxu1 %v17694_v16 }
0x18de   :  { %17697 = vmatpush3.bf16.msra.mxu1 %v17694_v16 }
0x18df   :  { %v19162_v49 = vpop.eup %19161  ;;  %v17724_v47 = vpack.c.bf16 %v18616_v42, %v18615_v45 }
0x18e0   :  { %v19164_v57 = vpop.eup %19163  ;;  %v4844_v52 = vmul.f32 %v19162_v49, %v20828_v39  ;;  %v5532_v63 = vpop.permute.xlu1 %5531 }
0x18e1   :  { %16507 = vmatmul.mubr.msk.f32.vlgmr.msra.gmra.mrb[64].mxu1 %vm181_vm0, %v4842_v59  ;;  %17726 = vmatprep.subr.msk.bf16.mxu0 %vm19885_vm2, %v17724_v47  ;;  %v4846_v54 = vmul.f32 %v19164_v57, %v20813_v38 }
0x18e2   :  { %16509 = vmatprep.mubr.msk.f32.mxu1 %vm181_vm0, %v4844_v52  ;;  %17729 = vmatpush3.bf16.xpose.msk.msra.mxu0 %vm19885_vm2, %v17724_v47 }
0x18e3   :  { %v5277_v14 = vpop.xlane.xlu0 %5276 }
0x18e4   :  { %v5287_v22 = vsub.f32 %v20833_v27, %v5277_v14  ;;  %v5536_v55 = vpop.permute.xlu1 %5535 }
0x18e5   :  { %16510 = vmatmul.mubr.msk.f32.gmra.mrb[66].mxu1 %vm181_vm0, %v4846_v54 }
0x18e6   :  { %v5291_v0 = vmul.f32 1.442695, %v5287_v22 }
0x18e7   :  { %v5283_v39 = vpop.xlane.xlu0 %5282 }
0x18e8   :  { %19165 = vpow2.f32 %v5291_v0  ;;  %v5289_v61 = vsub.f32 %v20836_v12, %v5283_v39 }
0x18e9   :  { %16573 = vmatmul.mubr.msk.f32.vlgmr.msra.gmra.mrb[52].mxu0 %vm291_vm1, %v5532_v63 }
0x18ea   :  { %v5295_v17 = vmul.f32 1.442695, %v5289_v61  ;;  %16575 = vmatprep.mubr.msk.f32.mxu0 %vm291_vm1, %v5534_v51 }
0x18eb   :  { %v5286_v50 = vpop.xlane.xlu0 %5285 }
0x18ec   :  { %19167 = vpow2.f32 %v5295_v17  ;;  %v5290_v25 = vsub.f32 %v20843_v40, %v5286_v50  ;;  %v14784_v40 = vld [vmem:[%s19689_s3 + $0x48] sm:$0xff] }
0x18ed   :  { %16576 = vmatmul.mubr.msk.f32.gmra.mrb[54].mxu0 %vm291_vm1, %v5536_v55  ;;  %16512 = vmatprep.subr.mxu1 %v14784_v40 }
0x18ee   :  { %v5297_v3 = vmul.f32 1.442695, %v5290_v25  ;;  %16513 = vmatpush3.msra.mxu1 %v14784_v40 }
0x18f2   :  { %v20889_v38 = vpop.eup %19165 }
0x18f3   :  { %v5299_v27 = vsel %vm181_vm0, %v20889_v38, 0.0 }
0x18f4   :  { %5300 = vadd.xlane.f32.xlu1 %v5299_v27 }
0x18f6   :  { %v20893_v4 = vpop.eup %19167 }
0x18f7   :  { %v5305_v12 = vsel %vm181_vm0, %v20893_v4, 0.0 }
0x18f8   :  { %5306 = vadd.xlane.f32.xlu1 %v5305_v12 }
0x1909   :  { %18618 = vrot.lane.b32.xlu1 %v20617_v62, %s22418_s18 }
0x1915   :  { %v5280_v1 = vpop.xlane.xlu1 %5279 }
0x1916   :  { %v5288_v60 = vsub.f32 %v20857_v32, %v5280_v1  ;;  %v14783_v32 = vld [vmem:[%s19689_s3 + $0x40] sm:$0xff] }
0x1917   :  { %16520 = vmatprep.subr.mxu1 %v14783_v32 }
0x1918   :  { %v5293_v43 = vmul.f32 1.442695, %v5288_v60 }
0x191a   :  { %19169 = vpow2.f32 %v5293_v43 }
0x191b   :  { %19171 = vpow2.f32 %v5297_v3 }
0x1924   :  { %v20901_v23 = vpop.eup %19169 }
0x1925   :  { %v5302_v53 = vsel %vm181_vm0, %v20901_v23, 0.0  ;;  %v20905_v30 = vpop.eup %19171 }
0x1926   :  { %5303 = vadd.xlane.f32.xlu0 %v5302_v53  ;;  %v5308_v31 = vsel %vm181_vm0, %v20905_v30, 0.0 }
0x192a   :  { %5309 = vadd.xlane.f32.xlu0 %v5308_v31 }
0x1940   :  { %18623 = vrot.lane.b32.xlu0 %v20623_v33, %s22418_s18 }
0x1981   :  { %v5301_v48 = vpop.xlane.xlu1 %5300 }
0x1982   :  { %v16480_v2 = vpop.f32.mrb[60].mxu1  ;;  %19173 = vrcp.f32 %v5301_v48 }
0x1983   :  { %v4659_v26 = vpop.f32.mrb[61].mxu1 }
0x1985   :  { %v5307_v19 = vpop.xlane.xlu1 %5306 }
0x1986   :  { %v16483_v35 = vpop.f32.mrb[62].mxu1 }
0x1987   :  { %v4669_v46 = vpop.f32.mrb[63].mxu1 }
0x1989   :  { %v18619_v36 = vpop.permute.xlu1 %18618 }
0x198a   :  { %v18621_v44 = vunpack.i.h.bf16 %v18619_v36  ;;  %v18620_v41 = vunpack.i.l.bf16 %v18619_v36 }
0x198c   :  { %v17710_v16 = vpack.c.bf16 %v18621_v44, %v18620_v41  ;;  %v19174_v14 = vpop.eup %19173 }
0x19b3   :  { %v5304_v11 = vpop.xlane.xlu0 %5303 }
0x19b4   :  { %v16508_v15 = vpop.f32.mrb[64].mxu1  ;;  %19175 = vrcp.f32 %v5304_v11 }
0x19b5   :  { %v4937_v5 = vpop.f32.mrb[65].mxu1  ;;  %19177 = vrcp.f32 %v5307_v19 }
0x19b6   :  { %16514 = vmatprep.mubr.msk.f32.mxu1 %vm291_vm1, %v4937_v5 }
0x19b7   :  { %v5310_v34 = vpop.xlane.xlu0 %5309  ;;  %16515 = vmatmul.mubr.msk.f32.vlgmr.msra.gmra.mrb[68].mxu1 %vm291_vm1, %v16508_v15 }
0x19b8   :  { %16521 = vmatpush3.msra.mxu1 %v14783_v32  ;;  %v16511_v20 = vpop.f32.mrb[66].mxu1  ;;  %19179 = vrcp.f32 %v5310_v34 }
0x19b9   :  { %17711 = vmatprep.subr.bf16.mxu1 %v17710_v16  ;;  %v4947_v28 = vpop.f32.mrb[67].mxu1 }
0x19ba   :  { %16517 = vmatprep.mubr.msk.f32.mxu1 %vm291_vm1, %v4947_v28 }
0x19bb   :  { %v18624_v42 = vpop.permute.xlu0 %18623  ;;  %16518 = vmatmul.mubr.msk.f32.gmra.mrb[70].mxu1 %vm291_vm1, %v16511_v20 }
0x19bc   :  { %v18626_v45 = vunpack.i.h.bf16 %v18624_v42  ;;  %v18625_v49 = vunpack.i.l.bf16 %v18624_v42  ;;  %16522 = vmatprep.mubr.msk.f32.mxu1 %vm291_vm1, %v4659_v26  ;;  %v16574_v59 = vpop.f32.mrb[52].mxu0 }
0x19bd   :  { %v5647_v51 = vmul.f32 0.35355338, %v16574_v59  ;;  %v5627_v47 = vpop.f32.mrb[53].mxu0 }
0x19be   :  { %v5646_v57 = vmul.f32 0.35355338, %v5627_v47  ;;  %v17714_v52 = vpack.c.bf16 %v18626_v45, %v18625_v49  ;;  %v19176_v17 = vpop.eup %19175 }
0x19bf   :  { %v5651_v54 = vadd.f32 %v20714_v13, %v5647_v51  ;;  %16523 = vmatmul.mubr.msk.f32.vlgmr.msra.gmra.mrb[68].mxu1 %vm291_vm1, %v16480_v2  ;;  %v5312_v13 = vmul.f32 %v19174_v14, %v20889_v38  ;;  %v19178_v12 = vpop.eup %19177  ;;  %v5314_v25 = vmul.f32 %v19176_v17, %v20901_v23 }
0x19c0   :  { %v5650_v22 = vadd.f32 %v20720_v21, %v5646_v57  ;;  %17713 = vmatpush3.bf16.msra.mxu1 %v17710_v16  ;;  %16525 = vmatprep.mubr.msk.f32.mxu1 %vm291_vm1, %v4669_v46  ;;  %v16577_v63 = vpop.f32.mrb[54].mxu0  ;;  %v5316_v3 = vmul.f32 %v19178_v12, %v20893_v4 }
0x19c1   :  { %17715 = vmatprep.subr.bf16.mxu1 %v17714_v52  ;;  %v5649_v0 = vmul.f32 0.35355338, %v16577_v63  ;;  %v5637_v39 = vpop.f32.mrb[55].mxu0  ;;  %v5657_v61 = vsel %vm181_vm0, %v5651_v54, -inf }
0x19c2   :  { %v5648_v55 = vmul.f32 0.35355338, %v5637_v39  ;;  %5658 = vmax.xlane.f32.xlu0 %v5657_v61  ;;  %v5654_v27 = vsel %vm181_vm0, %v5650_v22, -inf  ;;  %v19180_v60 = vpop.eup %19179  ;;  %v14786_v39 = vld [vmem:[%s19689_s3 + $0x58] sm:$0xff] }
0x19c3   :  { %v5653_v50 = vadd.f32 %v20737_v18, %v5649_v0  ;;  %5655 = vmax.xlane.f32.xlu1 %v5654_v27  ;;  %16526 = vmatmul.mubr.msk.f32.gmra.mrb[70].mxu1 %vm291_vm1, %v16483_v35  ;;  %v14785_v18 = vld [vmem:[%s19689_s3 + $0x50] sm:$0xff] }
0x19c4   :  { %v5652_v21 = vadd.f32 %v20731_v9, %v5648_v55  ;;  %17717 = vmatpush3.bf16.msra.mxu1 %v17714_v52  ;;  %16550 = vmatprep.mubr.msk.f32.mxu1 %vm181_vm0, %v5312_v13  ;;  %v5318_v9 = vmul.f32 %v19180_v60, %v20905_v30 }
0x19c5   :  { %v5663_v1 = vsel %vm181_vm0, %v5653_v50, -inf  ;;  %16556 = vmatprep.subr.mxu1 %v14785_v18 }
0x19c6   :  { %5664 = vmax.xlane.f32.xlu0 %v5663_v1  ;;  %v5660_v38 = vsel %vm181_vm0, %v5652_v21, -inf  ;;  %v14857_v1 = vld [vmem:[%s19694_s8 + $0x2] ss:$0 sm:$0xff] }
0x19c7   :  { %5661 = vmax.xlane.f32.xlu1 %v5660_v38  ;;  %16551 = vmatmul.mubr.msk.f32.vlgmr.msra.gmra.mrb[72].mxu1 %vm181_vm0, %v5314_v25 }
0x19c8   :  { %16553 = vmatprep.mubr.msk.f32.mxu1 %vm181_vm0, %v5316_v3  ;;  %16557 = vmatpush3.msra.mxu1 %v14785_v18  ;;  %v19533_v18 = vld [vmem:[%s19654_s5 + $0x8] sm:$0xff] }
0x19cb   :  { %16554 = vmatmul.mubr.msk.f32.gmra.mrb[74].mxu1 %vm181_vm0, %v5318_v9 }
0x1a4f   :  { %v5659_v43 = vpop.xlane.xlu0 %5658 }
0x1a50   :  { %v5667_v23 = vsub.f32 %v5651_v54, %v5659_v43  ;;  %v5656_v53 = vpop.xlane.xlu1 %5655 }
0x1a51   :  { %v5666_v31 = vsub.f32 %v5650_v22, %v5656_v53 }
0x1a52   :  { %v5672_v40 = vmul.f32 1.442695, %v5667_v23  ;;  %v19534_v23 = vld [vmem:[%s19654_s5] sm:$0xff] }
0x1a53   :  { %v5670_v32 = vmul.f32 1.442695, %v5666_v31  ;;  %v5665_v2 = vpop.xlane.xlu0 %5664 }
0x1a54   :  { %19181 = vpow2.f32 %v5672_v40  ;;  %v5669_v4 = vsub.f32 %v5653_v50, %v5665_v2  ;;  %v5662_v26 = vpop.xlane.xlu1 %5661 }
0x1a55   :  { %19183 = vpow2.f32 %v5670_v32  ;;  %v5668_v35 = vsub.f32 %v5652_v21, %v5662_v26 }
0x1a56   :  { %v5676_v46 = vmul.f32 1.442695, %v5669_v4 }
0x1a57   :  { %v5674_v48 = vmul.f32 1.442695, %v5668_v35  ;;  %v19535_v35 = vld [vmem:[%s19654_s5 + $0x18] sm:$0xff] }
0x1a58   :  { %19185 = vpow2.f32 %v5676_v46 }
0x1a59   :  { %19187 = vpow2.f32 %v5674_v48  ;;  %v19536_v48 = vld [vmem:[%s19654_s5 + $0x10] sm:$0xff]  ;;  %s22440_s5 = sld [smem:[#allocation11_spill]] }
0x1a5e   :  { %v19182_v30 = vpop.eup %19181 }
0x1a5f   :  { %v19184_v19 = vpop.eup %19183  ;;  %v5681_v36 = vsel %vm181_vm0, %v19182_v30, 0.0 }
0x1a60   :  { %5682 = vadd.xlane.f32.xlu0 %v5681_v36  ;;  %v5678_v44 = vsel %vm181_vm0, %v19184_v19, 0.0 }
0x1a61   :  { %5679 = vadd.xlane.f32.xlu1 %v5678_v44 }
0x1a62   :  { %v19186_v41 = vpop.eup %19185 }
0x1a63   :  { %v19188_v11 = vpop.eup %19187  ;;  %v5687_v15 = vsel %vm181_vm0, %v19186_v41, 0.0 }
0x1a64   :  { %5688 = vadd.xlane.f32.xlu0 %v5687_v15  ;;  %v5684_v5 = vsel %vm181_vm0, %v19188_v11, 0.0 }
0x1a65   :  { %5685 = vadd.xlane.f32.xlu1 %v5684_v5 }
0x1a76   :  { %18628 = vrot.lane.b32.xlu1 %v20617_v62, %s22417_s22 }
0x1a7a   :  { %18633 = vrot.lane.b32.xlu0 %v20623_v33, %s22417_s22 }
0x1a9a   :  { %v16552_v34 = vpop.f32.mrb[72].mxu1 }
0x1a9b   :  { %v5409_v16 = vpop.f32.mrb[73].mxu1 }
0x1a9c   :  { %16558 = vmatprep.mubr.msk.f32.mxu1 %vm291_vm1, %v5409_v16 }
0x1a9d   :  { %16559 = vmatmul.mubr.msk.f32.vlgmr.msra.gmra.mrb[68].mxu1 %vm291_vm1, %v16552_v34 }
0x1a9e   :  { %v16555_v20 = vpop.f32.mrb[74].mxu1 }
0x1a9f   :  { %v5419_v28 = vpop.f32.mrb[75].mxu1 }
0x1aa0   :  { %16561 = vmatprep.mubr.msk.f32.mxu1 %vm291_vm1, %v5419_v28 }
0x1aa1   :  { %16562 = vmatmul.mubr.msk.f32.gmra.mrb[70].mxu1 %vm291_vm1, %v16555_v20 }
0x1aed   :  { %v5683_v42 = vpop.xlane.xlu0 %5682 }
0x1aee   :  { %v5680_v45 = vpop.xlane.xlu1 %5679 }
0x1aef   :  { %19189 = vrcp.f32 %v5680_v45 }
0x1af0   :  { %19191 = vrcp.f32 %v5683_v42 }
0x1af1   :  { %v5689_v49 = vpop.xlane.xlu0 %5688 }
0x1af2   :  { %v5686_v62 = vpop.xlane.xlu1 %5685 }
0x1af3   :  { %19193 = vrcp.f32 %v5686_v62 }
0x1af4   :  { %19195 = vrcp.f32 %v5689_v49 }
0x1af5   :  { %v18634_v33 = vpop.permute.xlu0 %18633 }
0x1af6   :  { %v18629_v59 = vpop.permute.xlu1 %18628  ;;  %v18636_v51 = vunpack.i.h.bf16 %v18634_v33  ;;  %v18635_v47 = vunpack.i.l.bf16 %v18634_v33 }
0x1af7   :  { %v18631_v57 = vunpack.i.h.bf16 %v18629_v59  ;;  %v18630_v52 = vunpack.i.l.bf16 %v18629_v59 }
0x1af8   :  { %v17734_v63 = vpack.c.bf16 %v18636_v51, %v18635_v47 }
0x1af9   :  { %v19190_v14 = vpop.eup %19189  ;;  %v17730_v54 = vpack.c.bf16 %v18631_v57, %v18630_v52 }
0x1afa   :  { %v5691_v22 = vmul.f32 %v19190_v14, %v19184_v19  ;;  %v19192_v0 = vpop.eup %19191 }
0x1afb   :  { %17731 = vmatprep.subr.bf16.mxu1 %v17730_v54  ;;  %v5693_v17 = vmul.f32 %v19192_v0, %v19182_v30 }
0x1afc   :  { %17733 = vmatpush3.bf16.msra.mxu1 %v17730_v54  ;;  %16586 = vmatprep.mubr.msk.f32.mxu1 %vm181_vm0, %v5691_v22  ;;  %v14862_v54 = vld [vmem:[%s19699_s14 + $0x40] sm:$0xff]  ;;  %v14863_v22 = vld [vmem:[%s19699_s14 + $0x48] sm:$0xff] }
0x1afd   :  { %17735 = vmatprep.subr.bf16.mxu1 %v17734_v63  ;;  %v19194_v61 = vpop.eup %19193  ;;  %v17738_v0 = vpack.c.bf16 %v14863_v22, %v14862_v54 }
0x1afe   :  { %v19196_v55 = vpop.eup %19195  ;;  %v5695_v27 = vmul.f32 %v19194_v61, %v19188_v11 }
0x1aff   :  { %v5697_v13 = vmul.f32 %v19196_v55, %v19186_v41  ;;  %17739 = vmatprep.subr.bf16.mxu0 %v17738_v0  ;;  %v14868_v55 = vld [vmem:[%s19709_s24 + $0x108] sm:$0xff] }
0x1b00   :  { %17737 = vmatpush3.bf16.msra.mxu1 %v17734_v63  ;;  %v14864_v63 = vld [vmem:[%s19699_s14 + $0x50] sm:$0xff]  ;;  %17741 = vmatpush3.bf16.msra.mxu0 %v17738_v0 }
0x1b01   :  { %16592 = vmatprep.subr.mxu1 %v14786_v39 }
0x1b03   :  { %16587 = vmatmul.mubr.msk.f32.vlgmr.msra.gmra.mrb[76].mxu1 %vm181_vm0, %v5693_v17  ;;  %v14867_v17 = vld [vmem:[%s19709_s24 + $0x100] sm:$0xff] }
0x1b04   :  { %16589 = vmatprep.mubr.msk.f32.mxu1 %vm181_vm0, %v5695_v27  ;;  %16593 = vmatpush3.msra.mxu1 %v14786_v39  ;;  %v14865_v39 = vld [vmem:[%s19699_s14 + $0x58] sm:$0xff]  ;;  %v20994_v27 = vpack.c.bf16 %v14868_v55, %v14867_v17  ;;  %v14871_v55 = vld [vmem:[%s19709_s24 + $0x120] sm:$0xff] }
0x1b05   :  { %v17742_v61 = vpack.c.bf16 %v14865_v39, %v14864_v63 }
0x1b07   :  { %16590 = vmatmul.mubr.msk.f32.gmra.mrb[78].mxu1 %vm181_vm0, %v5697_v13  ;;  %17743 = vmatprep.subr.bf16.mxu0 %v17742_v61 }
0x1b08   :  { %17745 = vmatpush3.bf16.msra.mxu0 %v17742_v61 }
0x1b09   :  { %17747 = vmatprep.subr.bf16.mxu0 %v20994_v27 }
0x1bd6   :  { %v16588_v12 = vpop.f32.mrb[76].mxu1 }
0x1bd7   :  { %v5788_v50 = vpop.f32.mrb[77].mxu1 }
0x1bd8   :  { %16594 = vmatprep.mubr.msk.f32.mxu1 %vm291_vm1, %v5788_v50 }
0x1bd9   :  { %16595 = vmatmul.mubr.msk.f32.vlgmr.msra.gmra.mrb[68].mxu1 %vm291_vm1, %v16588_v12 }
0x1bda   :  { %v16591_v21 = vpop.f32.mrb[78].mxu1 }
0x1bdb   :  { %v5798_v25 = vpop.f32.mrb[79].mxu1 }
0x1bdc   :  { %16597 = vmatprep.mubr.msk.f32.mxu1 %vm291_vm1, %v5798_v25 }
0x1bdd   :  { %16598 = vmatmul.mubr.msk.f32.gmra.mrb[70].mxu1 %vm291_vm1, %v16591_v21 }
0x1cac   :  { %v16596_v60 = vpop.f32.mrb[68].mxu1 }
0x1cad   :  { %v5915_v38 = vadd.f32 %v16596_v60, %v14857_v1  ;;  %v5885_v3 = vpop.f32.mrb[69].mxu1 }
0x1cae   :  { %v5914_v9 = vadd.f32 %v14857_v1, %v5885_v3 }
0x1caf   :  { %v5919_v43 = vadd.f32 %v19533_v18, %v5915_v38 }
0x1cb0   :  { %v5918_v53 = vadd.f32 %v19534_v23, %v5914_v9  ;;  %v16599_v31 = vpop.f32.mrb[70].mxu1 }
0x1cb1   :  { %v5917_v40 = vadd.f32 %v16599_v31, %v14857_v1  ;;  %v5895_v32 = vpop.f32.mrb[71].mxu1  ;;  %v5929_v2 = vsel %vm181_vm0, %v5919_v43, 0.0 }
0x1cb2   :  { %v5916_v4 = vadd.f32 %v14857_v1, %v5895_v32  ;;  %5930 = vadd.xlane.f32.xlu0 %v5929_v2  ;;  %v5926_v26 = vsel %vm181_vm0, %v5918_v53, 0.0 }
0x1cb3   :  { %v5921_v46 = vadd.f32 %v19535_v35, %v5917_v40  ;;  %5927 = vadd.xlane.f32.xlu1 %v5926_v26 }
0x1cb4   :  { %v5920_v30 = vadd.f32 %v19536_v48, %v5916_v4 }
0x1cb5   :  { %v5935_v19 = vsel %vm181_vm0, %v5921_v46, 0.0 }
0x1cb6   :  { %5936 = vadd.xlane.f32.xlu0 %v5935_v19  ;;  %v5932_v36 = vsel %vm181_vm0, %v5920_v30, 0.0 }
0x1cb7   :  { %5933 = vadd.xlane.f32.xlu1 %v5932_v36 }
0x1d3f   :  { %v5931_v44 = vpop.xlane.xlu0 %5930 }
0x1d40   :  { %v5939_v41 = vmul.f32 0.03125, %v5931_v44  ;;  %v5928_v11 = vpop.xlane.xlu1 %5927 }
0x1d41   :  { %v5938_v15 = vmul.f32 0.03125, %v5928_v11 }
0x1d42   :  { %v20968_v5 = vsub.f32 %v5919_v43, %v5939_v41 }
0x1d43   :  { %v20970_v34 = vsub.f32 %v5918_v53, %v5938_v15  ;;  %v5937_v16 = vpop.xlane.xlu0 %5936 }
0x1d44   :  { %v5941_v20 = vmul.f32 0.03125, %v5937_v16  ;;  %v5934_v28 = vpop.xlane.xlu1 %5933  ;;  %v5947_v42 = vmul.f32 %v20968_v5, %v20968_v5 }
0x1d45   :  { %v5940_v45 = vmul.f32 0.03125, %v5934_v28  ;;  %v5946_v49 = vmul.f32 %v20970_v34, %v20970_v34  ;;  %v14860_v28 = vld [vmem:[%s19719_s6 + $0x2] ss:$0 sm:$0xff] }
0x1d46   :  { %v20976_v62 = vsub.f32 %v5921_v46, %v5941_v20  ;;  %v5953_v33 = vsel %vm181_vm0, %v5947_v42, 0.0  ;;  %v5973_v42 = vmul.f32 %v14860_v28, %v20968_v5 }
0x1d47   :  { %v20979_v59 = vsub.f32 %v5920_v30, %v5940_v45  ;;  %5954 = vadd.xlane.f32.xlu0 %v5953_v33  ;;  %v5950_v51 = vsel %vm181_vm0, %v5946_v49, 0.0  ;;  %v5972_v49 = vmul.f32 %v14860_v28, %v20970_v34 }
0x1d48   :  { %5951 = vadd.xlane.f32.xlu1 %v5950_v51  ;;  %v5949_v47 = vmul.f32 %v20976_v62, %v20976_v62  ;;  %v14861_v51 = vld [vmem:[%s19724_s12 + $0x2] ss:$0 sm:$0xff]  ;;  %v5975_v54 = vmul.f32 %v14860_v28, %v20976_v62  ;;  %v14872_v62 = vld [vmem:[%s19709_s24 + $0x128] sm:$0xff] }
0x1d49   :  { %v5948_v57 = vmul.f32 %v20979_v59, %v20979_v59  ;;  %v5974_v63 = vmul.f32 %v14860_v28, %v20979_v59 }
0x1d4a   :  { %v5959_v52 = vsel %vm181_vm0, %v5949_v47, 0.0 }
0x1d4b   :  { %5960 = vadd.xlane.f32.xlu0 %v5959_v52  ;;  %v5956_v14 = vsel %vm181_vm0, %v5948_v57, 0.0  ;;  %v14869_v52 = vld [vmem:[%s19709_s24 + $0x110] sm:$0xff] }
0x1d4c   :  { %5957 = vadd.xlane.f32.xlu1 %v5956_v14  ;;  %v14870_v14 = vld [vmem:[%s19709_s24 + $0x118] sm:$0xff] }
0x1d4d   :  { %v17750_v61 = vpack.c.bf16 %v14870_v14, %v14869_v52 }
0x1dd4   :  { %v5955_v13 = vpop.xlane.xlu0 %5954 }
0x1dd5   :  { %v5963_v12 = vmul.f32 0.032258064, %v5955_v13  ;;  %v5952_v50 = vpop.xlane.xlu1 %5951 }
0x1dd6   :  { %v5962_v21 = vmul.f32 0.032258064, %v5952_v50  ;;  %v14873_v50 = vld [vmem:[%s19709_s24 + $0x130] sm:$0xff] }
0x1dd7   :  { %19197 = vrsqrt.f32 %v5963_v12  ;;  %vm5985_vm14 = vcmp.eq.f32.partialorder %v5963_v12, inf  ;;  %v5988_v43 = vand.u32 2147483648, %v5963_v12  ;;  %vm5987_vm15 = vcmp.eq.f32.partialorder %v5963_v12, 0.0 }
0x1dd8   :  { %19199 = vrsqrt.f32 %v5962_v21  ;;  %v5961_v25 = vpop.xlane.xlu0 %5960  ;;  %vm5978_vm3 = vcmp.eq.f32.partialorder %v5962_v21, inf  ;;  %v5981_v31 = vand.u32 2147483648, %v5962_v21  ;;  %vm5980_vm4 = vcmp.eq.f32.partialorder %v5962_v21, 0.0 }
0x1dd9   :  { %v5965_v1 = vmul.f32 0.032258064, %v5961_v25  ;;  %v5958_v60 = vpop.xlane.xlu1 %5957 }
0x1dda   :  { %v5964_v38 = vmul.f32 0.032258064, %v5958_v60 }
0x1ddb   :  { %19201 = vrsqrt.f32 %v5965_v1  ;;  %vm5999_vm5 = vcmp.eq.f32.partialorder %v5965_v1, inf  ;;  %vm6001_vm6 = vcmp.eq.f32.partialorder %v5965_v1, 0.0  ;;  %v6002_v48 = vand.u32 2147483648, %v5965_v1 }
0x1ddc   :  { %19203 = vrsqrt.f32 %v5964_v38  ;;  %vm5992_vm7 = vcmp.eq.f32.partialorder %v5964_v38, inf  ;;  %v5995_v44 = vand.u32 2147483648, %v5964_v38  ;;  %vm5994_vm8 = vcmp.eq.f32.partialorder %v5964_v38, 0.0 }
0x1de1   :  { %v19198_v3 = vpop.eup %19197 }
0x1de2   :  { %v19200_v9 = vpop.eup %19199  ;;  %v5984_v18 = vmul.f32 %v19198_v3, %v5963_v12  ;;  %v14878_v3 = vld [vmem:[%s19709_s24 + $0x158] sm:$0xff] }
0x1de3   :  { %v5977_v23 = vmul.f32 %v19200_v9, %v5962_v21 }
0x1de4   :  { %v5986_v53 = vsel %vm5985_vm14, %v5963_v12, %v5984_v18  ;;  %v17754_v12 = vpack.c.bf16 %v14872_v62, %v14871_v55  ;;  %v14879_v18 = vld [vmem:[%s19709_s24 + $0x160] sm:$0xff] }
0x1de5   :  { %v19202_v40 = vpop.eup %19201  ;;  %v5989_v32 = vsel %vm5987_vm15, %v5988_v43, %v5986_v53  ;;  %v5979_v2 = vsel %vm5978_vm3, %v5962_v21, %v5977_v23  ;;  %v14874_v21 = vld [vmem:[%s19709_s24 + $0x138] sm:$0xff]  ;;  %v14880_v43 = vld [vmem:[%s19709_s24 + $0x168] sm:$0xff]  ;;  %v14881_v53 = vld [vmem:[%s19709_s24 + $0x170] sm:$0xff] }
0x1de6   :  { %v19204_v4 = vpop.eup %19203  ;;  %v6005_v26 = vadd.f32 1e-06, %v5989_v32  ;;  %v5998_v35 = vmul.f32 %v19202_v40, %v5965_v1  ;;  %v5982_v46 = vsel %vm5980_vm4, %v5981_v31, %v5979_v2  ;;  %v17758_v25 = vpack.c.bf16 %v14874_v21, %v14873_v50  ;;  %v14882_v31 = vld [vmem:[%s19709_s24 + $0x178] sm:$0xff]  ;;  %v14884_v32 = vld [vmem:[%s19704_s19 + $0x2] ss:$0 sm:$0xff] }
0x1de7   :  { %v5991_v30 = vmul.f32 %v19204_v4, %v5964_v38  ;;  %v6004_v19 = vadd.f32 1e-06, %v5982_v46  ;;  %v17770_v23 = vpack.c.bf16 %v14880_v43, %v14879_v18  ;;  %v17774_v40 = vpack.c.bf16 %v14882_v31, %v14881_v53  ;;  %v14894_v43 = vld [vmem:[%s19679_s25 + $0x60] sm:$0xff]  ;;  %v14896_v53 = vld [vmem:[%s19679_s25 + $0x70] sm:$0xff] }
0x1de8   :  { %19205 = vrcp.f32 %v6005_v26  ;;  %v6000_v36 = vsel %vm5999_vm5, %v5965_v1, %v5998_v35  ;;  %v14876_v1 = vld [vmem:[%s19709_s24 + $0x148] sm:$0xff] }
0x1de9   :  { %v5993_v41 = vsel %vm5992_vm7, %v5964_v38, %v5991_v30  ;;  %19207 = vrcp.f32 %v6004_v19  ;;  %v6003_v11 = vsel %vm6001_vm6, %v6002_v48, %v6000_v36  ;;  %v14877_v38 = vld [vmem:[%s19709_s24 + $0x150] sm:$0xff] }
0x1dea   :  { %v5996_v15 = vsel %vm5994_vm8, %v5995_v44, %v5993_v41  ;;  %v6007_v16 = vadd.f32 1e-06, %v6003_v11  ;;  %v17766_v9 = vpack.c.bf16 %v14878_v3, %v14877_v38 }
0x1deb   :  { %v6006_v20 = vadd.f32 1e-06, %v5996_v15  ;;  %v14889_v15 = vld [vmem:[%s19714_s30 + $0x2] ss:$0 sm:$0xff] }
0x1dec   :  { %19209 = vrcp.f32 %v6007_v16 }
0x1ded   :  { %19211 = vrcp.f32 %v6006_v20 }
0x1df2   :  { %v19206_v45 = vpop.eup %19205 }
0x1df3   :  { %v19208_v33 = vpop.eup %19207  ;;  %v6011_v47 = vmul.f32 %v19206_v45, %v5973_v42 }
0x1df4   :  { %v6009_v57 = vmul.f32 %v19208_v33, %v5972_v49 }
0x1df5   :  { %v21007_v39 = vadd.f32 %v14861_v51, %v6011_v47 }
0x1df6   :  { %v19210_v22 = vpop.eup %19209  ;;  %v21005_v0 = vadd.f32 %v14861_v51, %v6009_v57 }
0x1df7   :  { %v19212_v5 = vpop.eup %19211  ;;  %v6015_v34 = vmul.f32 %v19210_v22, %v5975_v54 }
0x1df8   :  { %16608 = vmatprep.mubr.msk.f32.mxu0 %vm181_vm0, %v21005_v0  ;;  %v6013_v17 = vmul.f32 %v19212_v5, %v5974_v63 }
0x1df9   :  { %16609 = vmatmul.mubr.msk.f32.vlgmr.msra.gmra.mrb[56].mxu0 %vm181_vm0, %v21007_v39  ;;  %v21018_v13 = vadd.f32 %v14861_v51, %v6015_v34 }
0x1dfa   :  { %v21015_v59 = vadd.f32 %v14861_v51, %v6013_v17  ;;  %17749 = vmatpush3.bf16.msra.mxu0 %v20994_v27  ;;  %v14875_v27 = vld [vmem:[%s19709_s24 + $0x140] sm:$0xff] }
0x1dfb   :  { %17751 = vmatprep.subr.bf16.mxu0 %v17750_v61  ;;  %v17762_v60 = vpack.c.bf16 %v14876_v1, %v14875_v27 }
0x1dfc   :  { %16611 = vmatprep.mubr.msk.f32.mxu0 %vm181_vm0, %v21015_v59 }
0x1dfd   :  { %16612 = vmatmul.mubr.msk.f32.gmra.mrb[58].mxu0 %vm181_vm0, %v21018_v13 }
0x1dfe   :  { %17753 = vmatpush3.bf16.msra.mxu0 %v17750_v61 }
0x1dff   :  { %17755 = vmatprep.subr.bf16.mxu0 %v17754_v12 }
0x1e02   :  { %17757 = vmatpush3.bf16.msra.mxu0 %v17754_v12 }
0x1e03   :  { %17759 = vmatprep.subr.bf16.mxu0 %v17758_v25 }
0x1e06   :  { %17761 = vmatpush3.bf16.msra.mxu0 %v17758_v25 }
0x1e07   :  { %17763 = vmatprep.subr.bf16.mxu0 %v17762_v60 }
0x1e0a   :  { %17765 = vmatpush3.bf16.msra.mxu0 %v17762_v60 }
0x1e0b   :  { %17767 = vmatprep.subr.bf16.mxu0 %v17766_v9 }
0x1e0e   :  { %17769 = vmatpush3.bf16.msra.mxu0 %v17766_v9 }
0x1e0f   :  { %17771 = vmatprep.subr.bf16.mxu0 %v17770_v23 }
0x1e12   :  { %17773 = vmatpush3.bf16.msra.mxu0 %v17770_v23  ;;  %v14895_v23 = vld [vmem:[%s19679_s25 + $0x68] sm:$0xff] }
0x1e13   :  { %17775 = vmatprep.subr.bf16.mxu0 %v17774_v40  ;;  %v17778_v31 = vpack.c.bf16 %v14895_v23, %v14894_v43 }
0x1e15   :  { %17779 = vmatprep.subr.bf16.mxu1 %v17778_v31 }
0x1e16   :  { %17777 = vmatpush3.bf16.msra.mxu0 %v17774_v40  ;;  %v14897_v40 = vld [vmem:[%s19679_s25 + $0x78] sm:$0xff]  ;;  %17781 = vmatpush3.bf16.msra.mxu1 %v17778_v31  ;;  %s22442_s25 = sld [smem:[#allocation12_spill]] }
0x1ecc   :  { %v16610_v2 = vpop.f32.mrb[56].mxu0 }
0x1ecd   :  { %v6142_v4 = vadd.f32 %v16610_v2, %v14884_v32  ;;  %v6136_v26 = vpop.f32.mrb[57].mxu0 }
0x1ece   :  { %v6137_v35 = vadd.f32 %v14884_v32, %v6136_v26 }
0x1ecf   :  { %v6156_v30 = vmax.f32 %v6142_v4, 0.0 }
0x1ed0   :  { %v6155_v46 = vmax.f32 %v6137_v35, 0.0  ;;  %v16613_v48 = vpop.f32.mrb[58].mxu0 }
0x1ed1   :  { %v6152_v19 = vadd.f32 %v16613_v48, %v14884_v32  ;;  %v6146_v36 = vpop.f32.mrb[59].mxu0 }
0x1ed2   :  { %v6147_v44 = vadd.f32 %v14884_v32, %v6146_v36  ;;  %16646 = vmatprep.mubr.f32.mxu0 %v6155_v46  ;;  %v17782_v32 = vpack.c.bf16 %v14897_v40, %v14896_v53 }
0x1ed3   :  { %16647 = vmatmul.mubr.f32.vlgmr.msra.gmra.mrb[60].mxu0 %v6156_v30  ;;  %v6158_v11 = vmax.f32 %v6152_v19, 0.0 }
0x1ed4   :  { %v6157_v41 = vmax.f32 %v6147_v44, 0.0  ;;  %17783 = vmatprep.subr.bf16.mxu1 %v17782_v32 }
0x1ed5   :  { %17785 = vmatpush3.bf16.msra.mxu1 %v17782_v32 }
0x1ed6   :  { %16649 = vmatprep.mubr.f32.mxu0 %v6157_v41 }
0x1ed7   :  { %16650 = vmatmul.mubr.f32.gmra.mrb[62].mxu0 %v6158_v11 }
0x1fa6   :  { %v16648_v16 = vpop.f32.mrb[60].mxu0 }
0x1fa7   :  { %v6237_v20 = vadd.f32 %v16648_v16, %v14889_v15  ;;  %v6231_v28 = vpop.f32.mrb[61].mxu0 }
0x1fa8   :  { %v6232_v42 = vadd.f32 %v14889_v15, %v6231_v28 }
0x1fa9   :  { %v6251_v45 = vadd.f32 %v6237_v20, %v21007_v39 }
0x1faa   :  { %v6250_v49 = vadd.f32 %v6232_v42, %v21005_v0  ;;  %v16651_v33 = vpop.f32.mrb[62].mxu0 }
0x1fab   :  { %v6247_v51 = vadd.f32 %v16651_v33, %v14889_v15  ;;  %v6241_v47 = vpop.f32.mrb[63].mxu0  ;;  %v6261_v57 = vsel %vm181_vm0, %v6251_v45, 0.0 }
0x1fac   :  { %v6242_v52 = vadd.f32 %v14889_v15, %v6241_v47  ;;  %6262 = vadd.xlane.f32.xlu0 %v6261_v57  ;;  %v6258_v14 = vsel %vm181_vm0, %v6250_v49, 0.0 }
0x1fad   :  { %v6253_v54 = vadd.f32 %v6247_v51, %v21018_v13  ;;  %6259 = vadd.xlane.f32.xlu1 %v6258_v14 }
0x1fae   :  { %v6252_v22 = vadd.f32 %v6242_v52, %v21015_v59 }
0x1faf   :  { %v6267_v63 = vsel %vm181_vm0, %v6253_v54, 0.0 }
0x1fb0   :  { %6268 = vadd.xlane.f32.xlu0 %v6267_v63  ;;  %v6264_v5 = vsel %vm181_vm0, %v6252_v22, 0.0 }
0x1fb1   :  { %6265 = vadd.xlane.f32.xlu1 %v6264_v5 }
0x2039   :  { %v6263_v0 = vpop.xlane.xlu0 %6262 }
0x203a   :  { %v6271_v39 = vmul.f32 0.03125, %v6263_v0  ;;  %v6260_v34 = vpop.xlane.xlu1 %6259 }
0x203b   :  { %v6270_v61 = vmul.f32 0.03125, %v6260_v34 }
0x203c   :  { %v21044_v17 = vsub.f32 %v6251_v45, %v6271_v39 }
0x203d   :  { %v21046_v55 = vsub.f32 %v6250_v49, %v6270_v61  ;;  %v6269_v62 = vpop.xlane.xlu0 %6268  ;;  %v14892_v61 = vld [vmem:[%s19729_s20 + $0x2] ss:$0 sm:$0xff] }
0x203e   :  { %v6273_v12 = vmul.f32 0.03125, %v6269_v62  ;;  %v6266_v13 = vpop.xlane.xlu1 %6265  ;;  %v6279_v59 = vmul.f32 %v21044_v17, %v21044_v17  ;;  %v6305_v62 = vmul.f32 %v14892_v61, %v21044_v17 }
0x203f   :  { %v6272_v50 = vmul.f32 0.03125, %v6266_v13  ;;  %v6278_v21 = vmul.f32 %v21046_v55, %v21046_v55  ;;  %v6304_v13 = vmul.f32 %v14892_v61, %v21046_v55 }
0x2040   :  { %v21052_v25 = vsub.f32 %v6253_v54, %v6273_v12  ;;  %v6285_v27 = vsel %vm181_vm0, %v6279_v59, 0.0 }
0x2041   :  { %v21055_v1 = vsub.f32 %v6252_v22, %v6272_v50  ;;  %6286 = vadd.xlane.f32.xlu0 %v6285_v27  ;;  %v6282_v60 = vsel %vm181_vm0, %v6278_v21, 0.0  ;;  %v14893_v50 = vld [vmem:[%s19734_s27 + $0x2] ss:$0 sm:$0xff] }
0x2042   :  { %6283 = vadd.xlane.f32.xlu1 %v6282_v60  ;;  %v6281_v38 = vmul.f32 %v21052_v25, %v21052_v25  ;;  %v6307_v60 = vmul.f32 %v14892_v61, %v21052_v25  ;;  %v14904_v25 = vld [vmem:[%s19684_s29 + $0x3] ss:$0 sm:$0xff]  ;;  %s22443_s29 = sld [smem:[#allocation9_spill]] }
0x2043   :  { %v6280_v3 = vmul.f32 %v21055_v1, %v21055_v1 }
0x2044   :  { %v6291_v9 = vsel %vm181_vm0, %v6281_v38, 0.0 }
0x2045   :  { %6292 = vadd.xlane.f32.xlu0 %v6291_v9  ;;  %v6288_v18 = vsel %vm181_vm0, %v6280_v3, 0.0  ;;  %v6306_v3 = vmul.f32 %v14892_v61, %v21055_v1 }
0x2046   :  { %6289 = vadd.xlane.f32.xlu1 %v6288_v18 }
0x20ce   :  { %v6287_v2 = vpop.xlane.xlu0 %6286 }
0x20cf   :  { %v6295_v4 = vmul.f32 0.032258064, %v6287_v2  ;;  %v6284_v26 = vpop.xlane.xlu1 %6283 }
0x20d0   :  { %v6294_v35 = vmul.f32 0.032258064, %v6284_v26 }
0x20d1   :  { %19213 = vrsqrt.f32 %v6295_v4  ;;  %vm6317_vm9 = vcmp.eq.f32.partialorder %v6295_v4, inf  ;;  %v6320_v11 = vand.u32 2147483648, %v6295_v4  ;;  %vm6319_vm10 = vcmp.eq.f32.partialorder %v6295_v4, 0.0 }
0x20d2   :  { %19215 = vrsqrt.f32 %v6294_v35  ;;  %v6293_v46 = vpop.xlane.xlu0 %6292  ;;  %vm6310_vm11 = vcmp.eq.f32.partialorder %v6294_v35, inf  ;;  %v6313_v20 = vand.u32 2147483648, %v6294_v35  ;;  %vm6312_vm12 = vcmp.eq.f32.partialorder %v6294_v35, 0.0 }
0x20d3   :  { %v6297_v48 = vmul.f32 0.032258064, %v6293_v46  ;;  %v6290_v30 = vpop.xlane.xlu1 %6289 }
0x20d4   :  { %v6296_v19 = vmul.f32 0.032258064, %v6290_v30 }
0x20d5   :  { %19217 = vrsqrt.f32 %v6297_v48  ;;  %vm6331_vm13 = vcmp.eq.f32.partialorder %v6297_v48, inf  ;;  %vm6333_vm14 = vcmp.eq.f32.partialorder %v6297_v48, 0.0  ;;  %v6334_v57 = vand.u32 2147483648, %v6297_v48 }
0x20d6   :  { %19219 = vrsqrt.f32 %v6296_v19  ;;  %vm6324_vm15 = vcmp.eq.f32.partialorder %v6296_v19, inf  ;;  %v6327_v22 = vand.u32 2147483648, %v6296_v19  ;;  %vm6326_vm3 = vcmp.eq.f32.partialorder %v6296_v19, 0.0 }
0x20db   :  { %v19214_v36 = vpop.eup %19213 }
0x20dc   :  { %v19216_v44 = vpop.eup %19215  ;;  %v6316_v41 = vmul.f32 %v19214_v36, %v6295_v4 }
0x20dd   :  { %v6309_v15 = vmul.f32 %v19216_v44, %v6294_v35 }
0x20de   :  { %v6318_v16 = vsel %vm6317_vm9, %v6295_v4, %v6316_v41 }
0x20df   :  { %v19218_v28 = vpop.eup %19217  ;;  %v6321_v42 = vsel %vm6319_vm10, %v6320_v11, %v6318_v16  ;;  %v6311_v45 = vsel %vm6310_vm11, %v6294_v35, %v6309_v15 }
0x20e0   :  { %v19220_v49 = vpop.eup %19219  ;;  %v6337_v33 = vadd.f32 1e-06, %v6321_v42  ;;  %v6330_v51 = vmul.f32 %v19218_v28, %v6297_v48  ;;  %v6314_v47 = vsel %vm6312_vm12, %v6313_v20, %v6311_v45  ;;  %vm8623_vm12 = vcmask 130048  }
0x20e1   :  { %v6323_v52 = vmul.f32 %v19220_v49, %v6296_v19  ;;  %v6336_v14 = vadd.f32 1e-06, %v6314_v47 }
0x20e2   :  { %19221 = vrcp.f32 %v6337_v33  ;;  %v6332_v54 = vsel %vm6331_vm13, %v6297_v48, %v6330_v51 }
0x20e3   :  { %v6325_v63 = vsel %vm6324_vm15, %v6296_v19, %v6323_v52  ;;  %19223 = vrcp.f32 %v6336_v14  ;;  %v6335_v5 = vsel %vm6333_vm14, %v6334_v57, %v6332_v54 }
0x20e4   :  { %v6328_v0 = vsel %vm6326_vm3, %v6327_v22, %v6325_v63  ;;  %v6339_v39 = vadd.f32 1e-06, %v6335_v5 }
0x20e5   :  { %v6338_v34 = vadd.f32 1e-06, %v6328_v0 }
0x20e6   :  { %19225 = vrcp.f32 %v6339_v39 }
0x20e7   :  { %19227 = vrcp.f32 %v6338_v34 }
0x20ec   :  { %v19222_v12 = vpop.eup %19221 }
0x20ed   :  { %v19224_v59 = vpop.eup %19223  ;;  %v6343_v21 = vmul.f32 %v19222_v12, %v6305_v62 }
0x20ee   :  { %v6341_v27 = vmul.f32 %v19224_v59, %v6304_v13 }
0x20ef   :  { %v21076_v43 = vadd.f32 %v14893_v50, %v6343_v21 }
0x20f0   :  { %v19226_v38 = vpop.eup %19225  ;;  %v21074_v9 = vadd.f32 %v14893_v50, %v6341_v27 }
0x20f1   :  { %v19228_v18 = vpop.eup %19227  ;;  %v6347_v23 = vmul.f32 %v19226_v38, %v6307_v60 }
0x20f2   :  { %16660 = vmatprep.mubr.msk.f32.mxu1 %vm181_vm0, %v21074_v9  ;;  %v6345_v17 = vmul.f32 %v19228_v18, %v6306_v3  ;;  %v21176_v3 = vld [vmem:[%s19664_s13 + $0x8] sm:$0xff] }
0x20f3   :  { %16661 = vmatmul.mubr.msk.f32.vlgmr.msra.gmra.mrb[80].mxu1 %vm181_vm0, %v21076_v43  ;;  %v21084_v53 = vadd.f32 %v14893_v50, %v6347_v23  ;;  %v21180_v23 = vld [vmem:[%s19664_s13] sm:$0xff] }
0x20f4   :  { %v21082_v55 = vadd.f32 %v14893_v50, %v6345_v17 }
0x20f6   :  { %16663 = vmatprep.mubr.msk.f32.mxu1 %vm181_vm0, %v21082_v55 }
0x20f7   :  { %16664 = vmatmul.mubr.msk.f32.gmra.mrb[82].mxu1 %vm181_vm0, %v21084_v53 }
0x21c6   :  { %v16662_v1 = vpop.f32.mrb[80].mxu1 }
0x21c7   :  { %v21091_v31 = vadd.f32 %v16662_v1, %v14904_v25  ;;  %v6456_v40 = vpop.f32.mrb[81].mxu1 }
0x21c8   :  { %v21093_v32 = vadd.f32 %v14904_v25, %v6456_v40 }
0x21ca   :  { %v16665_v2 = vpop.f32.mrb[82].mxu1  ;;  %16674 = vmatprep.mubr.msk.f32.mxu1 %vm291_vm1, %v21093_v32  ;;  %v21099_v4 = vpack.i.bf16 %v21091_v31, %v21093_v32 }
0x21cb   :  { %v21101_v26 = vadd.f32 %v16665_v2, %v14904_v25  ;;  %v6466_v35 = vpop.f32.mrb[83].mxu1 }
0x21cc   :  { %v21103_v46 = vadd.f32 %v14904_v25, %v6466_v35  ;;  %18638 = vrot.lane.b32.xlu1 %v21099_v4, %s19632_s28 }
0x21ce   :  { %v21109_v48 = vpack.i.bf16 %v21101_v26, %v21103_v46 }
0x21d0   :  { %18648 = vrot.lane.b32.xlu1 %v21099_v4, %s19631_s0  ;;  %18643 = vrot.lane.b32.xlu0 %v21109_v48, %s19632_s28 }
0x21d4   :  { %18653 = vrot.lane.b32.xlu1 %v21109_v48, %s19631_s0  ;;  %6749 = vrot.lane.b32.xlu0 %v21093_v32, %s19633_s1 }
0x21d8   :  { %6751 = vrot.lane.b32.xlu1 %v21091_v31, %s19633_s1  ;;  %6753 = vrot.lane.b32.xlu0 %v21103_v46, %s19633_s1 }
0x21dc   :  { %6755 = vrot.lane.b32.xlu1 %v21101_v26, %s19633_s1  ;;  %18658 = vrot.lane.b32.xlu0 %v21099_v4, %s19635_s7 }
0x21e0   :  { %7223 = vrot.lane.b32.xlu1 %v21091_v31, %s19636_s10  ;;  %7221 = vrot.lane.b32.xlu0 %v21093_v32, %s19636_s10 }
0x21e4   :  { %18663 = vrot.lane.b32.xlu1 %v21109_v48, %s19635_s7  ;;  %7225 = vrot.lane.b32.xlu0 %v21103_v46, %s19636_s10 }
0x21e8   :  { %7227 = vrot.lane.b32.xlu1 %v21101_v26, %s19636_s10 }
0x223e   :  { %v18639_v30 = vpop.permute.xlu1 %18638 }
0x223f   :  { %v18641_v19 = vunpack.i.h.bf16 %v18639_v30  ;;  %v18640_v36 = vunpack.i.l.bf16 %v18639_v30 }
0x2241   :  { %v17786_v44 = vpack.c.bf16 %v18641_v19, %v18640_v36 }
0x2242   :  { %v18644_v41 = vpop.permute.xlu0 %18643  ;;  %v18649_v11 = vpop.permute.xlu1 %18648 }
0x2243   :  { %v18646_v15 = vunpack.i.h.bf16 %v18644_v41  ;;  %v18645_v16 = vunpack.i.l.bf16 %v18644_v41  ;;  %v18651_v20 = vunpack.i.h.bf16 %v18649_v11  ;;  %v18650_v28 = vunpack.i.l.bf16 %v18649_v11  ;;  %17788 = vmatprep.subr.msk.bf16.mxu1 %vm19885_vm2, %v17786_v44  ;;  %v21186_v41 = vld [vmem:[%s19664_s13 + $0x10] sm:$0xff] }
0x2244   :  { %17791 = vmatpush3.bf16.xpose.msk.msra.mxu1 %vm19885_vm2, %v17786_v44 }
0x2245   :  { %v17792_v42 = vpack.c.bf16 %v18646_v15, %v18645_v16  ;;  %v17806_v45 = vpack.c.bf16 %v18651_v20, %v18650_v28 }
0x2246   :  { %v6750_v49 = vpop.permute.xlu0 %6749  ;;  %v18654_v33 = vpop.permute.xlu1 %18653 }
0x2247   :  { %v18656_v51 = vunpack.i.h.bf16 %v18654_v33  ;;  %v18655_v47 = vunpack.i.l.bf16 %v18654_v33  ;;  %17794 = vmatprep.subr.msk.bf16.mxu1 %vm19885_vm2, %v17792_v42  ;;  %17808 = vmatprep.subr.msk.bf16.mxu0 %vm19885_vm2, %v17806_v45 }
0x2248   :  { %16702 = vmatprep.mubr.msk.f32.mxu0 %vm291_vm1, %v6750_v49  ;;  %17811 = vmatpush3.bf16.xpose.msk.msra.mxu0 %vm19885_vm2, %v17806_v45 }
0x2249   :  { %v17812_v57 = vpack.c.bf16 %v18656_v51, %v18655_v47 }
0x224a   :  { %v6754_v52 = vpop.permute.xlu0 %6753  ;;  %v6752_v14 = vpop.permute.xlu1 %6751 }
0x224b   :  { %17814 = vmatprep.subr.msk.bf16.mxu0 %vm19885_vm2, %v17812_v57 }
0x224c   :  { %17797 = vmatpush3.bf16.xpose.msk.msra.mxu1 %vm19885_vm2, %v17792_v42  ;;  %v21193_v42 = vld [vmem:[%s19664_s13 + $0x18] sm:$0xff]  ;;  %s22441_s13 = sld [smem:[#allocation8_spill]] }
0x224e   :  { %v18659_v54 = vpop.permute.xlu0 %18658  ;;  %v6756_v22 = vpop.permute.xlu1 %6755 }
0x224f   :  { %v18661_v63 = vunpack.i.h.bf16 %v18659_v54  ;;  %v18660_v5 = vunpack.i.l.bf16 %v18659_v54 }
0x2250   :  { %17817 = vmatpush3.bf16.xpose.msk.msra.mxu0 %vm19885_vm2, %v17812_v57 }
0x2251   :  { %v17826_v0 = vpack.c.bf16 %v18661_v63, %v18660_v5 }
0x2252   :  { %v7224_v39 = vpop.permute.xlu1 %7223  ;;  %v7222_v13 = vpop.permute.xlu0 %7221 }
0x2253   :  { %16675 = vmatmul.mubr.msk.f32.vlgmr.msra.gmra.mrb[84].mxu1 %vm291_vm1, %v21091_v31  ;;  %17828 = vmatprep.subr.msk.bf16.mxu0 %vm19885_vm2, %v17826_v0 }
0x2254   :  { %16677 = vmatprep.mubr.msk.f32.mxu1 %vm291_vm1, %v21103_v46 }
0x2256   :  { %v18664_v34 = vpop.permute.xlu1 %18663  ;;  %v7226_v59 = vpop.permute.xlu0 %7225 }
0x2257   :  { %v18666_v61 = vunpack.i.h.bf16 %v18664_v34  ;;  %v18665_v62 = vunpack.i.l.bf16 %v18664_v34  ;;  %16678 = vmatmul.mubr.msk.f32.gmra.mrb[86].mxu1 %vm291_vm1, %v21101_v26  ;;  %16703 = vmatmul.mubr.msk.f32.vlgmr.msra.gmra.mrb[64].mxu0 %vm291_vm1, %v6752_v14 }
0x2258   :  { %16705 = vmatprep.mubr.msk.f32.mxu0 %vm291_vm1, %v6754_v52  ;;  %17831 = vmatpush3.bf16.xpose.msk.msra.mxu0 %vm19885_vm2, %v17826_v0 }
0x2259   :  { %v17832_v12 = vpack.c.bf16 %v18666_v61, %v18665_v62 }
0x225a   :  { %v7228_v50 = vpop.permute.xlu1 %7227 }
0x225b   :  { %16706 = vmatmul.mubr.msk.f32.gmra.mrb[66].mxu0 %vm291_vm1, %v6756_v22  ;;  %17834 = vmatprep.subr.msk.bf16.mxu0 %vm19885_vm2, %v17832_v12 }
0x225c   :  { %16746 = vmatprep.mubr.msk.f32.mxu0 %vm291_vm1, %v7222_v13 }
0x2260   :  { %17837 = vmatpush3.bf16.xpose.msk.msra.mxu0 %vm19885_vm2, %v17832_v12 }
0x2267   :  { %16747 = vmatmul.mubr.msk.f32.vlgmr.msra.gmra.mrb[68].mxu0 %vm291_vm1, %v7224_v39 }
0x2268   :  { %16749 = vmatprep.mubr.msk.f32.mxu0 %vm291_vm1, %v7226_v59 }
0x226b   :  { %16750 = vmatmul.mubr.msk.f32.gmra.mrb[70].mxu0 %vm291_vm1, %v7228_v50 }
0x2326   :  { %v16676_v21 = vpop.f32.mrb[84].mxu1 }
0x2327   :  { %v6589_v27 = vmul.f32 0.35355338, %v16676_v21  ;;  %v6569_v60 = vpop.f32.mrb[85].mxu1 }
0x2328   :  { %v6588_v38 = vmul.f32 0.35355338, %v6569_v60 }
0x2329   :  { %v6593_v18 = vadd.f32 %v21176_v3, %v6589_v27 }
0x232a   :  { %v6592_v17 = vadd.f32 %v21180_v23, %v6588_v38  ;;  %v16679_v25 = vpop.f32.mrb[86].mxu1  ;;  %v16704_v1 = vpop.f32.mrb[64].mxu0 }
0x232b   :  { %v6591_v40 = vmul.f32 0.35355338, %v16679_v25  ;;  %v6579_v2 = vpop.f32.mrb[87].mxu1  ;;  %v6847_v35 = vpop.f32.mrb[65].mxu0  ;;  %v6599_v36 = vsel %vm181_vm0, %v6593_v18, -inf }
0x232c   :  { %v6590_v30 = vmul.f32 0.35355338, %v6579_v2  ;;  %v6866_v19 = vmul.f32 0.35355338, %v6847_v35  ;;  %v6596_v44 = vsel %vm181_vm0, %v6592_v17, -inf  ;;  %6600 = vmax.xlane.f32.xlu1 %v6599_v36 }
0x232d   :  { %6597 = vmax.xlane.f32.xlu0 %v6596_v44  ;;  %v6867_v20 = vmul.f32 0.35355338, %v16704_v1  ;;  %v6595_v45 = vadd.f32 %v21193_v42, %v6591_v40 }
0x232e   :  { %v21189_v11 = vadd.f32 %v21186_v41, %v6590_v30  ;;  %v6870_v15 = vadd.f32 %v21180_v23, %v6866_v19  ;;  %v16707_v16 = vpop.f32.mrb[66].mxu0 }
0x232f   :  { %v6857_v28 = vpop.f32.mrb[67].mxu0  ;;  %v6871_v57 = vadd.f32 %v21176_v3, %v6867_v20  ;;  %v6869_v52 = vmul.f32 0.35355338, %v16707_v16  ;;  %v6605_v54 = vsel %vm181_vm0, %v6595_v45, -inf }
0x2330   :  { %v6868_v49 = vmul.f32 0.35355338, %v6857_v28  ;;  %v6874_v33 = vsel %vm181_vm0, %v6870_v15, -inf  ;;  %v6602_v51 = vsel %vm181_vm0, %v21189_v11, -inf }
0x2331   :  { %6875 = vmax.xlane.f32.xlu1 %v6874_v33  ;;  %6603 = vmax.xlane.f32.xlu0 %v6602_v51  ;;  %v6873_v22 = vadd.f32 %v21193_v42, %v6869_v52  ;;  %v6877_v63 = vsel %vm181_vm0, %v6871_v57, -inf }
0x2332   :  { %v21200_v47 = vadd.f32 %v21186_v41, %v6868_v49 }
0x2333   :  { %v6883_v39 = vsel %vm181_vm0, %v6873_v22, -inf }
0x2334   :  { %v6880_v14 = vsel %vm181_vm0, %v21200_v47, -inf }
0x2335   :  { %6881 = vmax.xlane.f32.xlu1 %v6880_v14  ;;  %6606 = vmax.xlane.f32.xlu0 %v6605_v54 }
0x2339   :  { %6878 = vmax.xlane.f32.xlu0 %v6877_v63 }
0x233a   :  { %v21208_v5 = vpop.f32.mrb[68].mxu0 }
0x233b   :  { %v21210_v0 = vpop.f32.mrb[69].mxu0 }
0x233d   :  { %6884 = vmax.xlane.f32.xlu0 %v6883_v39 }
0x233e   :  { %v21213_v34 = vpop.f32.mrb[70].mxu0 }
0x233f   :  { %v21215_v61 = vpop.f32.mrb[71].mxu0 }
0x2346   :  { %18668 = vrot.lane.b32.xlu1 %v21099_v4, %s19634_s2 }
0x23b9   :  { %v6601_v62 = vpop.xlane.xlu1 %6600 }
0x23ba   :  { %v6598_v12 = vpop.xlane.xlu0 %6597  ;;  %v6609_v13 = vsub.f32 %v6593_v18, %v6601_v62 }
0x23bb   :  { %v6608_v59 = vsub.f32 %v6592_v17, %v6598_v12 }
0x23bc   :  { %v6614_v50 = vmul.f32 1.442695, %v6609_v13 }
0x23bd   :  { %v6612_v21 = vmul.f32 1.442695, %v6608_v59 }
0x23be   :  { %v6876_v27 = vpop.xlane.xlu1 %6875  ;;  %v6604_v60 = vpop.xlane.xlu0 %6603  ;;  %19229 = vpow2.f32 %v6614_v50 }
0x23bf   :  { %v6886_v38 = vsub.f32 %v6870_v15, %v6876_v27  ;;  %19231 = vpow2.f32 %v6612_v21  ;;  %v6610_v12 = vsub.f32 %v21189_v11, %v6604_v60  ;;  %v7338_v60 = vmul.f32 0.35355338, %v21210_v0 }
0x23c1   :  { %v6890_v25 = vmul.f32 1.442695, %v6886_v38  ;;  %v6616_v13 = vmul.f32 1.442695, %v6610_v12  ;;  %v7341_v38 = vmul.f32 0.35355338, %v21213_v34 }
0x23c2   :  { %v6882_v1 = vpop.xlane.xlu1 %6881  ;;  %v6607_v40 = vpop.xlane.xlu0 %6606 }
0x23c3   :  { %19233 = vpow2.f32 %v6890_v25  ;;  %v6611_v2 = vsub.f32 %v6595_v45, %v6607_v40  ;;  %v6888_v59 = vsub.f32 %v21200_v47, %v6882_v1  ;;  %v21281_v0 = vadd.f32 %v21193_v42, %v7341_v38 }
0x23c4   :  { %v7339_v40 = vmul.f32 0.35355338, %v21208_v5 }
0x23c5   :  { %v6618_v18 = vmul.f32 1.442695, %v6611_v2  ;;  %v6894_v50 = vmul.f32 1.442695, %v6888_v59  ;;  %v7355_v34 = vsel %vm181_vm0, %v21281_v0, -inf }
0x23c6   :  { %v18669_v35 = vpop.permute.xlu1 %18668  ;;  %v6879_v30 = vpop.xlane.xlu0 %6878  ;;  %v21291_v2 = vadd.f32 %v21176_v3, %v7339_v40 }
0x23c7   :  { %v18671_v19 = vunpack.i.h.bf16 %v18669_v35  ;;  %v18670_v36 = vunpack.i.l.bf16 %v18669_v35  ;;  %v6887_v44 = vsub.f32 %v6871_v57, %v6879_v30 }
0x23c8   :  { %v21219_v16 = vpop.eup %19229 }
0x23c9   :  { %v6892_v17 = vmul.f32 1.442695, %v6887_v44  ;;  %v17798_v20 = vpack.c.bf16 %v18671_v19, %v18670_v36  ;;  %v21221_v28 = vpop.eup %19231  ;;  %v6623_v15 = vsel %vm181_vm0, %v21219_v16, 0.0 }
0x23ca   :  { %v6885_v49 = vpop.xlane.xlu0 %6884  ;;  %6624 = vadd.xlane.f32.xlu0 %v6623_v15  ;;  %v6620_v45 = vsel %vm181_vm0, %v21221_v28, 0.0 }
0x23cb   :  { %19235 = vpow2.f32 %v6892_v17  ;;  %v6889_v33 = vsub.f32 %v6873_v22, %v6885_v49  ;;  %17799 = vmatprep.subr.bf16.mxu1 %v17798_v20  ;;  %6621 = vadd.xlane.f32.xlu1 %v6620_v45 }
0x23cc   :  { %17801 = vmatpush3.bf16.msra.mxu1 %v17798_v20  ;;  %19237 = vpow2.f32 %v6618_v18 }
0x23cd   :  { %v21227_v51 = vpop.eup %19233  ;;  %v6896_v57 = vmul.f32 1.442695, %v6889_v33 }
0x23ce   :  { %v6898_v52 = vsel %vm181_vm0, %v21227_v51, 0.0 }
0x23cf   :  { %6899 = vadd.xlane.f32.xlu1 %v6898_v52  ;;  %19239 = vpow2.f32 %v6896_v57 }
0x23d0   :  { %19241 = vpow2.f32 %v6616_v13 }
0x23d1   :  { %19243 = vpow2.f32 %v6894_v50 }
0x23d5   :  { %v21231_v14 = vpop.eup %19235 }
0x23d6   :  { %v6901_v54 = vsel %vm181_vm0, %v21231_v14, 0.0  ;;  %v21235_v22 = vpop.eup %19237 }
0x23d7   :  { %6902 = vadd.xlane.f32.xlu0 %v6901_v54  ;;  %v6629_v63 = vsel %vm181_vm0, %v21235_v22, 0.0 }
0x23d9   :  { %v21239_v39 = vpop.eup %19239 }
0x23da   :  { %v6907_v62 = vsel %vm181_vm0, %v21239_v39, 0.0  ;;  %v21253_v21 = vpop.eup %19241 }
0x23db   :  { %6630 = vadd.xlane.f32.xlu0 %v6629_v63  ;;  %v6626_v11 = vsel %vm181_vm0, %v21253_v21, 0.0  ;;  %v21259_v47 = vpop.eup %19243 }
0x23dc   :  { %v6904_v27 = vsel %vm181_vm0, %v21259_v47, 0.0 }
0x23df   :  { %6908 = vadd.xlane.f32.xlu0 %v6907_v62 }
0x23e0   :  { %18678 = vrot.lane.b32.xlu1 %v21099_v4, %s19637_s11 }
0x23f5   :  { %18673 = vrot.lane.b32.xlu0 %v21109_v48, %s19634_s2 }
0x23f9   :  { %18688 = vrot.lane.b32.xlu0 %v21099_v4, %s19638_s15 }
0x23fd   :  { %7600 = vrot.lane.b32.xlu0 %v21093_v32, %s19639_s16  ;;  %v21267_v32 = vadd.f32 %v21180_v23, %v7338_v60 }
0x23ff   :  { %v7346_v1 = vsel %vm181_vm0, %v21267_v32, -inf }
0x2401   :  { %7604 = vrot.lane.b32.xlu0 %v21103_v46, %s19639_s16  ;;  %v7340_v46 = vmul.f32 0.35355338, %v21215_v61 }
0x2403   :  { %v21274_v25 = vadd.f32 %v21186_v41, %v7340_v46 }
0x2404   :  { %6627 = vadd.xlane.f32.xlu1 %v6626_v11 }
0x2405   :  { %v7352_v61 = vsel %vm181_vm0, %v21274_v25, -inf }
0x2408   :  { %6905 = vadd.xlane.f32.xlu1 %v6904_v27 }
0x2419   :  { %18683 = vrot.lane.b32.xlu1 %v21109_v48, %s19637_s11 }
0x241d   :  { %18693 = vrot.lane.b32.xlu1 %v21109_v48, %s19638_s15 }
0x2420   :  { %7347 = vmax.xlane.f32.xlu0 %v7346_v1 }
0x2421   :  { %7602 = vrot.lane.b32.xlu1 %v21091_v31, %s19639_s16  ;;  %v7349_v31 = vsel %vm181_vm0, %v21291_v2, -inf }
0x2424   :  { %7353 = vmax.xlane.f32.xlu0 %v7352_v61 }
0x2425   :  { %7606 = vrot.lane.b32.xlu1 %v21101_v26, %s19639_s16 }
0x2428   :  { %7356 = vmax.xlane.f32.xlu0 %v7355_v34 }
0x2449   :  { %7350 = vmax.xlane.f32.xlu1 %v7349_v31 }
0x2457   :  { %v6625_v30 = vpop.xlane.xlu0 %6624 }
0x2458   :  { %v6622_v35 = vpop.xlane.xlu1 %6621 }
0x2459   :  { %19245 = vrcp.f32 %v6622_v35 }
0x245a   :  { %19247 = vrcp.f32 %v6625_v30 }
0x245c   :  { %v6900_v44 = vpop.xlane.xlu1 %6899 }
0x245d   :  { %19249 = vrcp.f32 %v6900_v44 }
0x2460   :  { %v18679_v17 = vpop.permute.xlu1 %18678 }
0x2461   :  { %v18681_v15 = vunpack.i.h.bf16 %v18679_v17  ;;  %v18680_v49 = vunpack.i.l.bf16 %v18679_v17 }
0x2463   :  { %v19246_v19 = vpop.eup %19245  ;;  %v17818_v12 = vpack.c.bf16 %v18681_v15, %v18680_v49 }
0x2464   :  { %v6903_v36 = vpop.xlane.xlu0 %6902  ;;  %v6633_v26 = vmul.f32 %v19246_v19, %v21221_v28  ;;  %v19248_v52 = vpop.eup %19247 }
0x2465   :  { %v6635_v28 = vmul.f32 %v19248_v52, %v21219_v16 }
0x2466   :  { %16688 = vmatprep.mubr.msk.f32.mxu1 %vm181_vm0, %v6633_v26 }
0x2467   :  { %v19250_v27 = vpop.eup %19249 }
0x2468   :  { %v6631_v18 = vpop.xlane.xlu0 %6630 }
0x2469   :  { %19251 = vrcp.f32 %v6631_v18 }
0x246c   :  { %v6909_v5 = vpop.xlane.xlu0 %6908 }
0x2470   :  { %v18674_v20 = vpop.permute.xlu0 %18673 }
0x2471   :  { %v18676_v33 = vunpack.i.h.bf16 %v18674_v20  ;;  %v18675_v45 = vunpack.i.l.bf16 %v18674_v20 }
0x2473   :  { %v17802_v57 = vpack.c.bf16 %v18676_v33, %v18675_v45  ;;  %v19252_v38 = vpop.eup %19251 }
0x2474   :  { %v18689_v54 = vpop.permute.xlu0 %18688  ;;  %v6639_v30 = vmul.f32 %v19252_v38, %v21235_v22 }
0x2475   :  { %v18691_v63 = vunpack.i.h.bf16 %v18689_v54  ;;  %v18690_v62 = vunpack.i.l.bf16 %v18689_v54  ;;  %17803 = vmatprep.subr.bf16.mxu1 %v17802_v57 }
0x2476   :  { %17805 = vmatpush3.bf16.msra.mxu1 %v17802_v57 }
0x2477   :  { %v17846_v13 = vpack.c.bf16 %v18691_v63, %v18690_v62  ;;  %17819 = vmatprep.subr.bf16.mxu1 %v17818_v12 }
0x2478   :  { %v7601_v59 = vpop.permute.xlu0 %7600 }
0x2479   :  { %16689 = vmatmul.mubr.msk.f32.vlgmr.msra.gmra.mrb[88].mxu1 %vm181_vm0, %v6635_v28  ;;  %17848 = vmatprep.subr.msk.bf16.mxu0 %vm19885_vm2, %v17846_v13 }
0x247a   :  { %16782 = vmatprep.mubr.msk.f32.mxu0 %vm291_vm1, %v7601_v59  ;;  %17821 = vmatpush3.bf16.msra.mxu1 %v17818_v12 }
0x247b   :  { %17851 = vmatpush3.bf16.xpose.msk.msra.mxu0 %vm19885_vm2, %v17846_v13 }
0x247c   :  { %v7605_v17 = vpop.permute.xlu0 %7604 }
0x2491   :  { %v6628_v50 = vpop.xlane.xlu1 %6627 }
0x2492   :  { %19253 = vrcp.f32 %v6628_v50 }
0x2493   :  { %19255 = vrcp.f32 %v6903_v36  ;;  %v6911_v36 = vmul.f32 %v19250_v27, %v21227_v51 }
0x2495   :  { %v6906_v16 = vpop.xlane.xlu1 %6905 }
0x2496   :  { %19257 = vrcp.f32 %v6906_v16 }
0x2497   :  { %19259 = vrcp.f32 %v6909_v5 }
0x2499   :  { %v18684_v11 = vpop.permute.xlu1 %18683 }
0x249a   :  { %v18686_v60 = vunpack.i.h.bf16 %v18684_v11  ;;  %v18685_v46 = vunpack.i.l.bf16 %v18684_v11 }
0x249c   :  { %v19254_v1 = vpop.eup %19253  ;;  %v17822_v61 = vpack.c.bf16 %v18686_v60, %v18685_v46 }
0x249d   :  { %v18694_v34 = vpop.permute.xlu1 %18693  ;;  %v6637_v40 = vmul.f32 %v19254_v1, %v21253_v21  ;;  %v19256_v19 = vpop.eup %19255 }
0x249e   :  { %v18696_v31 = vunpack.i.h.bf16 %v18694_v34  ;;  %v18695_v35 = vunpack.i.l.bf16 %v18694_v34  ;;  %17823 = vmatprep.subr.bf16.mxu1 %v17822_v61  ;;  %v6913_v18 = vmul.f32 %v19256_v19, %v21231_v14 }
0x249f   :  { %16691 = vmatprep.mubr.msk.f32.mxu1 %vm181_vm0, %v6637_v40  ;;  %17825 = vmatpush3.bf16.msra.mxu1 %v17822_v61 }
0x24a0   :  { %v19258_v26 = vpop.eup %19257  ;;  %v17852_v44 = vpack.c.bf16 %v18696_v31, %v18695_v35  ;;  %16692 = vmatmul.mubr.msk.f32.gmra.mrb[90].mxu1 %vm181_vm0, %v6639_v30 }
0x24a1   :  { %16716 = vmatprep.mubr.msk.f32.mxu1 %vm181_vm0, %v6911_v36  ;;  %v19260_v21 = vpop.eup %19259  ;;  %v6915_v22 = vmul.f32 %v19258_v26, %v21259_v47  ;;  %v7603_v5 = vpop.permute.xlu1 %7602 }
0x24a2   :  { %17854 = vmatprep.subr.msk.bf16.mxu0 %vm19885_vm2, %v17852_v44  ;;  %v6917_v51 = vmul.f32 %v19260_v21, %v21239_v39 }
0x24a3   :  { %17857 = vmatpush3.bf16.xpose.msk.msra.mxu0 %vm19885_vm2, %v17852_v44 }
0x24a4   :  { %16717 = vmatmul.mubr.msk.f32.vlgmr.msra.gmra.mrb[92].mxu1 %vm181_vm0, %v6913_v18 }
0x24a5   :  { %16719 = vmatprep.mubr.msk.f32.mxu1 %vm181_vm0, %v6915_v22  ;;  %v7607_v20 = vpop.permute.xlu1 %7606 }
0x24a8   :  { %16720 = vmatmul.mubr.msk.f32.gmra.mrb[94].mxu1 %vm181_vm0, %v6917_v51 }
0x24aa   :  { %16783 = vmatmul.mubr.msk.f32.vlgmr.msra.gmra.mrb[72].mxu0 %vm291_vm1, %v7603_v5 }
0x24ab   :  { %16785 = vmatprep.mubr.msk.f32.mxu0 %vm291_vm1, %v7605_v17 }
0x24ad   :  { %v7348_v14 = vpop.xlane.xlu0 %7347 }
0x24ae   :  { %v7358_v15 = vsub.f32 %v21267_v32, %v7348_v14  ;;  %16786 = vmatmul.mubr.msk.f32.gmra.mrb[74].mxu0 %vm291_vm1, %v7607_v20 }
0x24b0   :  { %v7362_v47 = vmul.f32 1.442695, %v7358_v15 }
0x24b1   :  { %v7354_v49 = vpop.xlane.xlu0 %7353 }
0x24b2   :  { %19261 = vpow2.f32 %v7362_v47  ;;  %v7360_v33 = vsub.f32 %v21274_v25, %v7354_v49 }
0x24b4   :  { %v7366_v39 = vmul.f32 1.442695, %v7360_v33 }
0x24b5   :  { %v7357_v54 = vpop.xlane.xlu0 %7356 }
0x24b6   :  { %19263 = vpow2.f32 %v7366_v39  ;;  %v7361_v25 = vsub.f32 %v21281_v0, %v7357_v54  ;;  %v14900_v0 = vld [vmem:[%s19689_s3 + $0x68] sm:$0xff] }
0x24b7   :  { %16722 = vmatprep.subr.mxu1 %v14900_v0 }
0x24b8   :  { %v7368_v12 = vmul.f32 1.442695, %v7361_v25  ;;  %16723 = vmatpush3.msra.mxu1 %v14900_v0 }
0x24bc   :  { %v21325_v45 = vpop.eup %19261 }
0x24bd   :  { %v7370_v57 = vsel %vm181_vm0, %v21325_v45, 0.0 }
0x24be   :  { %7371 = vadd.xlane.f32.xlu1 %v7370_v57 }
0x24c0   :  { %v21329_v52 = vpop.eup %19263 }
0x24c1   :  { %v7376_v32 = vsel %vm181_vm0, %v21329_v52, 0.0 }
0x24c2   :  { %7377 = vadd.xlane.f32.xlu1 %v7376_v32 }
0x24d3   :  { %18698 = vrot.lane.b32.xlu1 %v21099_v4, %s22418_s18 }
0x24d6   :  { %v7351_v63 = vpop.xlane.xlu1 %7350 }
0x24d7   :  { %v7359_v62 = vsub.f32 %v21291_v2, %v7351_v63  ;;  %v14899_v2 = vld [vmem:[%s19689_s3 + $0x60] sm:$0xff] }
0x24d8   :  { %16730 = vmatprep.subr.mxu1 %v14899_v2 }
0x24d9   :  { %v7364_v28 = vmul.f32 1.442695, %v7359_v62 }
0x24db   :  { %19265 = vpow2.f32 %v7364_v28 }
0x24dc   :  { %19267 = vpow2.f32 %v7368_v12 }
0x24e5   :  { %v21337_v13 = vpop.eup %19265 }
0x24e6   :  { %v7373_v59 = vsel %vm181_vm0, %v21337_v13, 0.0  ;;  %v21341_v50 = vpop.eup %19267 }
0x24e7   :  { %7374 = vadd.xlane.f32.xlu0 %v7373_v59  ;;  %v7379_v16 = vsel %vm181_vm0, %v21341_v50, 0.0 }
0x24eb   :  { %7380 = vadd.xlane.f32.xlu0 %v7379_v16 }
0x2501   :  { %18703 = vrot.lane.b32.xlu0 %v21109_v48, %s22418_s18 }
0x254b   :  { %v7372_v60 = vpop.xlane.xlu1 %7371 }
0x254c   :  { %v16690_v11 = vpop.f32.mrb[88].mxu1  ;;  %19269 = vrcp.f32 %v7372_v60 }
0x254d   :  { %v6730_v27 = vpop.f32.mrb[89].mxu1 }
0x254f   :  { %v7378_v46 = vpop.xlane.xlu1 %7377 }
0x2553   :  { %v18699_v38 = vpop.permute.xlu1 %18698 }
0x2554   :  { %v18701_v40 = vunpack.i.h.bf16 %v18699_v38  ;;  %v18700_v31 = vunpack.i.l.bf16 %v18699_v38 }
0x2556   :  { %v17838_v36 = vpack.c.bf16 %v18701_v40, %v18700_v31  ;;  %v19270_v32 = vpop.eup %19269 }
0x2557   :  { %v7383_v28 = vmul.f32 %v19270_v32, %v21325_v45  ;;  %v14901_v45 = vld [vmem:[%s19689_s3 + $0x70] sm:$0xff] }
0x2573   :  { %v16693_v1 = vpop.f32.mrb[90].mxu1 }
0x2574   :  { %v7375_v61 = vpop.xlane.xlu0 %7374  ;;  %v6740_v34 = vpop.f32.mrb[91].mxu1 }
0x2575   :  { %19271 = vrcp.f32 %v7375_v61 }
0x2576   :  { %19273 = vrcp.f32 %v7378_v46 }
0x2577   :  { %v16718_v35 = vpop.f32.mrb[92].mxu1 }
0x2578   :  { %v7381_v30 = vpop.xlane.xlu0 %7380  ;;  %v7008_v19 = vpop.f32.mrb[93].mxu1 }
0x2579   :  { %16724 = vmatprep.mubr.msk.f32.mxu1 %vm291_vm1, %v7008_v19  ;;  %19275 = vrcp.f32 %v7381_v30 }
0x257a   :  { %16725 = vmatmul.mubr.msk.f32.vlgmr.msra.gmra.mrb[96].mxu1 %vm291_vm1, %v16718_v35 }
0x257b   :  { %16731 = vmatpush3.msra.mxu1 %v14899_v2  ;;  %v16721_v26 = vpop.f32.mrb[94].mxu1 }
0x257c   :  { %17839 = vmatprep.subr.bf16.mxu1 %v17838_v36  ;;  %v18704_v44 = vpop.permute.xlu0 %18703  ;;  %v7018_v18 = vpop.f32.mrb[95].mxu1 }
0x257d   :  { %16727 = vmatprep.mubr.msk.f32.mxu1 %vm291_vm1, %v7018_v18  ;;  %v16784_v21 = vpop.f32.mrb[72].mxu0  ;;  %v18706_v22 = vunpack.i.h.bf16 %v18704_v44  ;;  %v18705_v51 = vunpack.i.l.bf16 %v18704_v44 }
0x257e   :  { %v7718_v5 = vmul.f32 0.35355338, %v16784_v21  ;;  %16728 = vmatmul.mubr.msk.f32.gmra.mrb[98].mxu1 %vm291_vm1, %v16721_v26  ;;  %v7698_v17 = vpop.f32.mrb[73].mxu0 }
0x257f   :  { %v7717_v14 = vmul.f32 0.35355338, %v7698_v17  ;;  %16732 = vmatprep.mubr.msk.f32.mxu1 %vm291_vm1, %v6730_v27  ;;  %v17842_v57 = vpack.c.bf16 %v18706_v22, %v18705_v51 }
0x2580   :  { %v7722_v20 = vadd.f32 %v21176_v3, %v7718_v5  ;;  %v19272_v3 = vpop.eup %19271 }
0x2581   :  { %v7721_v15 = vadd.f32 %v21180_v23, %v7717_v14  ;;  %v16787_v47 = vpop.f32.mrb[74].mxu0  ;;  %v19274_v62 = vpop.eup %19273 }
0x2582   :  { %v7720_v49 = vmul.f32 0.35355338, %v16787_v47  ;;  %16733 = vmatmul.mubr.msk.f32.vlgmr.msra.gmra.mrb[96].mxu1 %vm291_vm1, %v16690_v11  ;;  %v7708_v33 = vpop.f32.mrb[75].mxu0  ;;  %v7728_v39 = vsel %vm181_vm0, %v7722_v20, -inf }
0x2583   :  { %17841 = vmatpush3.bf16.msra.mxu1 %v17838_v36  ;;  %v7719_v54 = vmul.f32 0.35355338, %v7708_v33  ;;  %7729 = vmax.xlane.f32.xlu0 %v7728_v39  ;;  %v7725_v25 = vsel %vm181_vm0, %v7721_v15, -inf  ;;  %v19276_v16 = vpop.eup %19275 }
0x2584   :  { %v7724_v63 = vadd.f32 %v21193_v42, %v7720_v49  ;;  %16735 = vmatprep.mubr.msk.f32.mxu1 %vm291_vm1, %v6740_v34  ;;  %17843 = vmatprep.subr.bf16.mxu1 %v17842_v57  ;;  %v7385_v42 = vmul.f32 %v19272_v3, %v21337_v13  ;;  %v7389_v0 = vmul.f32 %v19276_v16, %v21341_v50 }
0x2585   :  { %v7723_v23 = vadd.f32 %v21186_v41, %v7719_v54  ;;  %7726 = vmax.xlane.f32.xlu1 %v7725_v25  ;;  %v7387_v41 = vmul.f32 %v19274_v62, %v21329_v52 }
0x2586   :  { %16736 = vmatmul.mubr.msk.f32.gmra.mrb[98].mxu1 %vm291_vm1, %v16693_v1  ;;  %v7734_v12 = vsel %vm181_vm0, %v7724_v63, -inf }
0x2587   :  { %17845 = vmatpush3.bf16.msra.mxu1 %v17842_v57  ;;  %7735 = vmax.xlane.f32.xlu0 %v7734_v12  ;;  %v7731_v59 = vsel %vm181_vm0, %v7723_v23, -inf }
0x2588   :  { %16760 = vmatprep.mubr.msk.f32.mxu1 %vm181_vm0, %v7383_v28  ;;  %16766 = vmatprep.subr.mxu1 %v14901_v45 }
0x2589   :  { %7732 = vmax.xlane.f32.xlu1 %v7731_v59  ;;  %v8433_v59 = vld [vmem:[%s22440_s5] sm:$0xff] }
0x258a   :  { %16761 = vmatmul.mubr.msk.f32.vlgmr.msra.gmra.mrb[100].mxu1 %vm181_vm0, %v7385_v42  ;;  %v8434_v42 = vld [vmem:[%s22440_s5 + $0x8] sm:$0xff] }
0x258b   :  { %16763 = vmatprep.mubr.msk.f32.mxu1 %vm181_vm0, %v7387_v41  ;;  %16767 = vmatpush3.msra.mxu1 %v14901_v45  ;;  %v17906_v16 = vpack.c.bf16 %v8434_v42, %v8433_v59  ;;  %v8435_v41 = vld [vmem:[%s22440_s5 + $0x10] sm:$0xff]  ;;  %v14978_v59 = vld [vmem:[%s19699_s14 + $0x60] sm:$0xff]  ;;  %v14979_v42 = vld [vmem:[%s19699_s14 + $0x68] sm:$0xff] }
0x258e   :  { %16764 = vmatmul.mubr.msk.f32.gmra.mrb[102].mxu1 %vm181_vm0, %v7389_v0  ;;  %v8436_v0 = vld [vmem:[%s22440_s5 + $0x18] sm:$0xff] }
0x2610   :  { %v7730_v2 = vpop.xlane.xlu0 %7729 }
0x2611   :  { %v7738_v11 = vsub.f32 %v7722_v20, %v7730_v2 }
0x2612   :  { %v7727_v13 = vpop.xlane.xlu1 %7726 }
0x2613   :  { %v7743_v27 = vmul.f32 1.442695, %v7738_v11  ;;  %v7737_v60 = vsub.f32 %v7721_v15, %v7727_v13  ;;  %v17910_v11 = vpack.c.bf16 %v8436_v0, %v8435_v41  ;;  %v17866_v41 = vpack.c.bf16 %v14979_v42, %v14978_v59  ;;  %v14981_v0 = vld [vmem:[%s19699_s14 + $0x78] sm:$0xff] }
0x2614   :  { %v7736_v46 = vpop.xlane.xlu0 %7735 }
0x2615   :  { %19277 = vpow2.f32 %v7743_v27  ;;  %v7741_v38 = vmul.f32 1.442695, %v7737_v60  ;;  %v7740_v52 = vsub.f32 %v7724_v63, %v7736_v46  ;;  %v14902_v63 = vld [vmem:[%s19689_s3 + $0x78] sm:$0xff]  ;;  %v155_v60 = vld [vmem:[%s22441_s13] sm:$0xff]  ;;  %v156_v46 = vld [vmem:[%s22441_s13 + $0x8] sm:$0xff]  ;;  %17867 = vmatprep.subr.bf16.mxu0 %v17866_v41  ;;  %s22444_s3 = sld [smem:[#allocation13_spill]] }
0x2616   :  { %v7733_v1 = vpop.xlane.xlu1 %7732  ;;  %17869 = vmatpush3.bf16.msra.mxu0 %v17866_v41 }
0x2617   :  { %19279 = vpow2.f32 %v7741_v38  ;;  %v7747_v61 = vmul.f32 1.442695, %v7740_v52  ;;  %v7739_v34 = vsub.f32 %v7723_v23, %v7733_v1  ;;  %v14973_v38 = vld [vmem:[%s19694_s8 + $0x3] ss:$0 sm:$0xff]  ;;  %s22445_s8 = sld [smem:[#allocation14_spill]] }
0x2619   :  { %19281 = vpow2.f32 %v7747_v61  ;;  %v7745_v50 = vmul.f32 1.442695, %v7739_v34 }
0x261b   :  { %19283 = vpow2.f32 %v7745_v50 }
0x261f   :  { %v19278_v40 = vpop.eup %19277 }
0x2620   :  { %v7752_v31 = vsel %vm181_vm0, %v19278_v40, 0.0 }
0x2621   :  { %v19280_v35 = vpop.eup %19279  ;;  %7753 = vadd.xlane.f32.xlu0 %v7752_v31 }
0x2622   :  { %v7749_v30 = vsel %vm181_vm0, %v19280_v35, 0.0 }
0x2623   :  { %v19282_v19 = vpop.eup %19281  ;;  %7750 = vadd.xlane.f32.xlu1 %v7749_v30 }
0x2624   :  { %v7758_v36 = vsel %vm181_vm0, %v19282_v19, 0.0 }
0x2625   :  { %v19284_v26 = vpop.eup %19283  ;;  %7759 = vadd.xlane.f32.xlu0 %v7758_v36 }
0x2626   :  { %v7755_v44 = vsel %vm181_vm0, %v19284_v26, 0.0 }
0x2627   :  { %7756 = vadd.xlane.f32.xlu1 %v7755_v44 }
0x2638   :  { %18708 = vrot.lane.b32.xlu1 %v21099_v4, %s22417_s22 }
0x263b   :  { %18713 = vrot.lane.b32.xlu0 %v21109_v48, %s22417_s22 }
0x265d   :  { %v16762_v18 = vpop.f32.mrb[100].mxu1 }
0x265e   :  { %v7480_v21 = vpop.f32.mrb[101].mxu1 }
0x265f   :  { %16768 = vmatprep.mubr.msk.f32.mxu1 %vm291_vm1, %v7480_v21 }
0x2660   :  { %16769 = vmatmul.mubr.msk.f32.vlgmr.msra.gmra.mrb[96].mxu1 %vm291_vm1, %v16762_v18 }
0x2661   :  { %v16765_v22 = vpop.f32.mrb[102].mxu1 }
0x2662   :  { %v7490_v51 = vpop.f32.mrb[103].mxu1 }
0x2663   :  { %16771 = vmatprep.mubr.msk.f32.mxu1 %vm291_vm1, %v7490_v51 }
0x2664   :  { %16772 = vmatmul.mubr.msk.f32.gmra.mrb[98].mxu1 %vm291_vm1, %v16765_v22  ;;  %v15010_v22 = vld [vmem:[%s22442_s25] ss:$0 sm:$0xff] }
0x26ae   :  { %v7754_v5 = vpop.xlane.xlu0 %7753 }
0x26b0   :  { %v7751_v17 = vpop.xlane.xlu1 %7750 }
0x26b1   :  { %19285 = vrcp.f32 %v7751_v17 }
0x26b2   :  { %v7760_v14 = vpop.xlane.xlu0 %7759  ;;  %19287 = vrcp.f32 %v7754_v5 }
0x26b4   :  { %v7757_v4 = vpop.xlane.xlu1 %7756 }
0x26b5   :  { %19289 = vrcp.f32 %v7757_v4 }
0x26b6   :  { %v18714_v20 = vpop.permute.xlu0 %18713  ;;  %19291 = vrcp.f32 %v7760_v14 }
0x26b7   :  { %v18716_v15 = vunpack.i.h.bf16 %v18714_v20  ;;  %v18715_v47 = vunpack.i.l.bf16 %v18714_v20 }
0x26b8   :  { %v18709_v48 = vpop.permute.xlu1 %18708 }
0x26b9   :  { %v18711_v49 = vunpack.i.h.bf16 %v18709_v48  ;;  %v18710_v33 = vunpack.i.l.bf16 %v18709_v48  ;;  %v17862_v54 = vpack.c.bf16 %v18716_v15, %v18715_v47 }
0x26bb   :  { %v19286_v39 = vpop.eup %19285  ;;  %v17858_v57 = vpack.c.bf16 %v18711_v49, %v18710_v33 }
0x26bc   :  { %v7762_v32 = vmul.f32 %v19286_v39, %v19280_v35  ;;  %v19288_v25 = vpop.eup %19287 }
0x26bd   :  { %17859 = vmatprep.subr.bf16.mxu1 %v17858_v57  ;;  %v7764_v23 = vmul.f32 %v19288_v25, %v19278_v40 }
0x26be   :  { %17861 = vmatpush3.bf16.msra.mxu1 %v17858_v57  ;;  %16796 = vmatprep.mubr.msk.f32.mxu1 %vm181_vm0, %v7762_v32 }
0x26bf   :  { %17863 = vmatprep.subr.bf16.mxu1 %v17862_v54  ;;  %v19290_v3 = vpop.eup %19289 }
0x26c0   :  { %v19292_v62 = vpop.eup %19291  ;;  %v7766_v12 = vmul.f32 %v19290_v3, %v19284_v26 }
0x26c1   :  { %v7768_v28 = vmul.f32 %v19292_v62, %v19282_v19 }
0x26c2   :  { %17865 = vmatpush3.bf16.msra.mxu1 %v17862_v54 }
0x26c3   :  { %16802 = vmatprep.subr.mxu1 %v14902_v63 }
0x26c5   :  { %16797 = vmatmul.mubr.msk.f32.vlgmr.msra.gmra.mrb[104].mxu1 %vm181_vm0, %v7764_v23 }
0x26c6   :  { %16799 = vmatprep.mubr.msk.f32.mxu1 %vm181_vm0, %v7766_v12  ;;  %16803 = vmatpush3.msra.mxu1 %v14902_v63 }
0x26c7   :  { %17907 = vmatprep.subr.bf16.mxu1 %v17906_v16 }
0x26c9   :  { %16800 = vmatmul.mubr.msk.f32.gmra.mrb[106].mxu1 %vm181_vm0, %v7768_v28 }
0x2798   :  { %v16798_v45 = vpop.f32.mrb[104].mxu1 }
0x2799   :  { %v7859_v2 = vpop.f32.mrb[105].mxu1 }
0x279a   :  { %16804 = vmatprep.mubr.msk.f32.mxu1 %vm291_vm1, %v7859_v2  ;;  %v14983_v2 = vld [vmem:[%s19709_s24 + $0x180] sm:$0xff] }
0x279b   :  { %16805 = vmatmul.mubr.msk.f32.vlgmr.msra.gmra.mrb[96].mxu1 %vm291_vm1, %v16798_v45 }
0x279c   :  { %v16801_v13 = vpop.f32.mrb[106].mxu1  ;;  %17909 = vmatpush3.bf16.msra.mxu1 %v17906_v16  ;;  %v14980_v16 = vld [vmem:[%s19699_s14 + $0x70] sm:$0xff]  ;;  %s22446_s14 = sld [smem:[#allocation15_spill]] }
0x279d   :  { %v7869_v27 = vpop.f32.mrb[107].mxu1  ;;  %17911 = vmatprep.subr.bf16.mxu1 %v17910_v11  ;;  %v17870_v45 = vpack.c.bf16 %v14981_v0, %v14980_v16  ;;  %v14977_v16 = vld [vmem:[%s19724_s12 + $0x3] ss:$0 sm:$0xff]  ;;  %s22451_s12 = sld [smem:[#allocation17_spill]] }
0x279e   :  { %16807 = vmatprep.mubr.msk.f32.mxu1 %vm291_vm1, %v7869_v27 }
0x279f   :  { %16808 = vmatmul.mubr.msk.f32.gmra.mrb[98].mxu1 %vm291_vm1, %v16801_v13  ;;  %17871 = vmatprep.subr.bf16.mxu0 %v17870_v45 }
0x27a0   :  { %17913 = vmatpush3.bf16.msra.mxu1 %v17910_v11  ;;  %16870 = vmatprep.mubr.msk.f32.mxu1 %vm181_vm0, %v155_v60  ;;  %v14984_v11 = vld [vmem:[%s19709_s24 + $0x188] sm:$0xff] }
0x27a1   :  { %17873 = vmatpush3.bf16.msra.mxu0 %v17870_v45  ;;  %v21457_v13 = vpack.c.bf16 %v14984_v11, %v14983_v2  ;;  %v14985_v45 = vld [vmem:[%s19709_s24 + $0x190] sm:$0xff]  ;;  %v14986_v2 = vld [vmem:[%s19709_s24 + $0x198] sm:$0xff] }
0x27a3   :  { %16871 = vmatmul.mubr.msk.f32.vlgmr.msra.gmra.mrb[108].mxu1 %vm181_vm0, %v156_v46  ;;  %17875 = vmatprep.subr.bf16.mxu0 %v21457_v13 }
0x286e   :  { %v16806_v52 = vpop.f32.mrb[96].mxu1 }
0x286f   :  { %v7986_v1 = vadd.f32 %v16806_v52, %v14973_v38  ;;  %v7956_v61 = vpop.f32.mrb[97].mxu1 }
0x2870   :  { %v7985_v34 = vadd.f32 %v14973_v38, %v7956_v61 }
0x2871   :  { %v7990_v50 = vadd.f32 %v7986_v1, %v21076_v43 }
0x2872   :  { %v7989_v40 = vadd.f32 %v7985_v34, %v21074_v9  ;;  %v16809_v31 = vpop.f32.mrb[98].mxu1 }
0x2873   :  { %v7988_v35 = vadd.f32 %v16809_v31, %v14973_v38  ;;  %v7966_v30 = vpop.f32.mrb[99].mxu1  ;;  %v8000_v19 = vsel %vm181_vm0, %v7990_v50, 0.0 }
0x2874   :  { %v7987_v36 = vadd.f32 %v14973_v38, %v7966_v30  ;;  %8001 = vadd.xlane.f32.xlu0 %v8000_v19  ;;  %v7997_v26 = vsel %vm181_vm0, %v7989_v40, 0.0 }
0x2875   :  { %v7992_v44 = vadd.f32 %v7988_v35, %v21084_v53  ;;  %7998 = vadd.xlane.f32.xlu1 %v7997_v26 }
0x2876   :  { %v7991_v18 = vadd.f32 %v7987_v36, %v21082_v55  ;;  %v16872_v43 = vpop.f32.mrb[108].mxu1 }
0x2877   :  { %v8006_v21 = vsel %vm181_vm0, %v7992_v44, 0.0  ;;  %v21413_v51 = vadd.f32 %v16872_v43, %v15010_v22  ;;  %v8521_v5 = vpop.f32.mrb[109].mxu1 }
0x2878   :  { %8007 = vadd.xlane.f32.xlu0 %v8006_v21  ;;  %v8003_v9 = vsel %vm181_vm0, %v7991_v18, 0.0  ;;  %v21415_v17 = vadd.f32 %v15010_v22, %v8521_v5 }
0x2879   :  { %8004 = vadd.xlane.f32.xlu1 %v8003_v9 }
0x287a   :  { %16877 = vmatprep.mubr.msk.f32.mxu1 %vm291_vm1, %v21415_v17  ;;  %v21441_v28 = vpack.i.bf16 %v21413_v51, %v21415_v17 }
0x2901   :  { %v8002_v53 = vpop.xlane.xlu0 %8001 }
0x2902   :  { %v8010_v14 = vmul.f32 0.03125, %v8002_v53  ;;  %v7999_v4 = vpop.xlane.xlu1 %7998 }
0x2903   :  { %v8009_v55 = vmul.f32 0.03125, %v7999_v4 }
0x2904   :  { %v21419_v20 = vsub.f32 %v7990_v50, %v8010_v14 }
0x2905   :  { %v21421_v48 = vsub.f32 %v7989_v40, %v8009_v55  ;;  %v8008_v15 = vpop.xlane.xlu0 %8007 }
0x2906   :  { %v8012_v47 = vmul.f32 0.03125, %v8008_v15  ;;  %v8005_v49 = vpop.xlane.xlu1 %8004  ;;  %v8018_v33 = vmul.f32 %v21419_v20, %v21419_v20 }
0x2907   :  { %v8011_v39 = vmul.f32 0.03125, %v8005_v49  ;;  %v8017_v57 = vmul.f32 %v21421_v48, %v21421_v48 }
0x2908   :  { %v21427_v32 = vsub.f32 %v7992_v44, %v8012_v47  ;;  %v8024_v54 = vsel %vm181_vm0, %v8018_v33, 0.0 }
0x2909   :  { %v21430_v25 = vsub.f32 %v7991_v18, %v8011_v39  ;;  %8025 = vadd.xlane.f32.xlu0 %v8024_v54  ;;  %v8021_v63 = vsel %vm181_vm0, %v8017_v57, 0.0 }
0x290a   :  { %8022 = vadd.xlane.f32.xlu1 %v8021_v63  ;;  %v8020_v3 = vmul.f32 %v21427_v32, %v21427_v32 }
0x290b   :  { %v8019_v23 = vmul.f32 %v21430_v25, %v21430_v25 }
0x290c   :  { %v8030_v62 = vsel %vm181_vm0, %v8020_v3, 0.0 }
0x290d   :  { %8031 = vadd.xlane.f32.xlu0 %v8030_v62  ;;  %v8027_v12 = vsel %vm181_vm0, %v8019_v23, 0.0  ;;  %v14976_v23 = vld [vmem:[%s19719_s6 + $0x3] ss:$0 sm:$0xff]  ;;  %s22450_s6 = sld [smem:[#allocation10_spill]] }
0x290e   :  { %8028 = vadd.xlane.f32.xlu1 %v8027_v12  ;;  %v8044_v62 = vmul.f32 %v14976_v23, %v21419_v20  ;;  %v8043_v59 = vmul.f32 %v14976_v23, %v21421_v48  ;;  %v8046_v11 = vmul.f32 %v14976_v23, %v21427_v32  ;;  %v17878_v48 = vpack.c.bf16 %v14986_v2, %v14985_v45  ;;  %v14988_v32 = vld [vmem:[%s19709_s24 + $0x1a8] sm:$0xff] }
0x291f   :  { %18718 = vrot.lane.b32.xlu1 %v21441_v28, %s19632_s28 }
0x2923   :  { %9099 = vrot.lane.b32.xlu1 %v21415_v17, %s19636_s10  ;;  %18723 = vrot.lane.b32.xlu0 %v21441_v28, %s19635_s7 }
0x2927   :  { %9101 = vrot.lane.b32.xlu1 %v21413_v51, %s19636_s10 }
0x2996   :  { %v8026_v27 = vpop.xlane.xlu0 %8025 }
0x2997   :  { %v8034_v60 = vmul.f32 0.032258064, %v8026_v27  ;;  %v8023_v46 = vpop.xlane.xlu1 %8022 }
0x2998   :  { %v8033_v38 = vmul.f32 0.032258064, %v8023_v46 }
0x2999   :  { %19293 = vrsqrt.f32 %v8034_v60  ;;  %vm8056_vm4 = vcmp.eq.f32.partialorder %v8034_v60, inf  ;;  %v8059_v26 = vand.u32 2147483648, %v8034_v60  ;;  %vm8058_vm5 = vcmp.eq.f32.partialorder %v8034_v60, 0.0 }
0x299a   :  { %19295 = vrsqrt.f32 %v8033_v38  ;;  %v8032_v52 = vpop.xlane.xlu0 %8031  ;;  %vm8049_vm6 = vcmp.eq.f32.partialorder %v8033_v38, inf  ;;  %v8052_v21 = vand.u32 2147483648, %v8033_v38  ;;  %vm8051_vm7 = vcmp.eq.f32.partialorder %v8033_v38, 0.0 }
0x299b   :  { %v8036_v1 = vmul.f32 0.032258064, %v8032_v52  ;;  %v8029_v61 = vpop.xlane.xlu1 %8028 }
0x299c   :  { %v8035_v34 = vmul.f32 0.032258064, %v8029_v61  ;;  %v14987_v61 = vld [vmem:[%s19709_s24 + $0x1a0] sm:$0xff] }
0x299d   :  { %19297 = vrsqrt.f32 %v8036_v1  ;;  %vm8070_vm8 = vcmp.eq.f32.partialorder %v8036_v1, inf  ;;  %vm8072_vm9 = vcmp.eq.f32.partialorder %v8036_v1, 0.0  ;;  %v8073_v55 = vand.u32 2147483648, %v8036_v1 }
0x299e   :  { %19299 = vrsqrt.f32 %v8035_v34  ;;  %vm8063_vm10 = vcmp.eq.f32.partialorder %v8035_v34, inf  ;;  %v8066_v33 = vand.u32 2147483648, %v8035_v34  ;;  %vm8065_vm11 = vcmp.eq.f32.partialorder %v8035_v34, 0.0 }
0x299f   :  { %v18719_v50 = vpop.permute.xlu1 %18718 }
0x29a0   :  { %v18721_v40 = vunpack.i.h.bf16 %v18719_v50  ;;  %v18720_v31 = vunpack.i.l.bf16 %v18719_v50  ;;  %v17882_v50 = vpack.c.bf16 %v14988_v32, %v14987_v61 }
0x29a2   :  { %v17914_v35 = vpack.c.bf16 %v18721_v40, %v18720_v31  ;;  %v14989_v40 = vld [vmem:[%s19709_s24 + $0x1b0] sm:$0xff]  ;;  %v14990_v31 = vld [vmem:[%s19709_s24 + $0x1b8] sm:$0xff] }
0x29a3   :  { %v19294_v30 = vpop.eup %19293 }
0x29a4   :  { %v19296_v19 = vpop.eup %19295  ;;  %v8055_v36 = vmul.f32 %v19294_v30, %v8034_v60  ;;  %17916 = vmatprep.subr.msk.bf16.mxu1 %vm19885_vm2, %v17914_v35  ;;  %v14992_v30 = vld [vmem:[%s19709_s24 + $0x1c8] sm:$0xff] }
0x29a5   :  { %v8048_v44 = vmul.f32 %v19296_v19, %v8033_v38  ;;  %17919 = vmatpush3.bf16.xpose.msk.msra.mxu1 %vm19885_vm2, %v17914_v35  ;;  %v14991_v35 = vld [vmem:[%s19709_s24 + $0x1c0] sm:$0xff] }
0x29a6   :  { %v8057_v18 = vsel %vm8056_vm4, %v8034_v60, %v8055_v36  ;;  %v8045_v60 = vmul.f32 %v14976_v23, %v21430_v25  ;;  %v17890_v19 = vpack.c.bf16 %v14992_v30, %v14991_v35  ;;  %v14993_v36 = vld [vmem:[%s19709_s24 + $0x1d0] sm:$0xff] }
0x29a7   :  { %v19298_v9 = vpop.eup %19297  ;;  %v8060_v43 = vsel %vm8058_vm5, %v8059_v26, %v8057_v18  ;;  %v8050_v22 = vsel %vm8049_vm6, %v8033_v38, %v8048_v44  ;;  %v14994_v26 = vld [vmem:[%s19709_s24 + $0x1d8] sm:$0xff]  ;;  %v14995_v18 = vld [vmem:[%s19709_s24 + $0x1e0] sm:$0xff] }
0x29a8   :  { %v19300_v5 = vpop.eup %19299  ;;  %v8076_v53 = vadd.f32 1e-06, %v8060_v43  ;;  %v8069_v14 = vmul.f32 %v19298_v9, %v8036_v1  ;;  %v8053_v4 = vsel %vm8051_vm7, %v8052_v21, %v8050_v22  ;;  %v17894_v44 = vpack.c.bf16 %v14994_v26, %v14993_v36  ;;  %v14996_v21 = vld [vmem:[%s19709_s24 + $0x1e8] sm:$0xff]  ;;  %v14997_v43 = vld [vmem:[%s19709_s24 + $0x1f0] sm:$0xff]  ;;  %v14998_v22 = vld [vmem:[%s19709_s24 + $0x1f8] sm:$0xff]  ;;  %s22448_s24 = sld [smem:[#allocation23_spill]] }
0x29a9   :  { %v8062_v15 = vmul.f32 %v19300_v5, %v8035_v34  ;;  %v8075_v47 = vadd.f32 1e-06, %v8053_v4  ;;  %v17898_v9 = vpack.c.bf16 %v14996_v21, %v14995_v18  ;;  %v18724_v5 = vpop.permute.xlu0 %18723  ;;  %v21531_v21 = vld [vmem:[%s19714_s30 + $0x3] ss:$0 sm:$0xff] }
0x29aa   :  { %19301 = vrcp.f32 %v8076_v53  ;;  %v8071_v49 = vsel %vm8070_vm8, %v8036_v1, %v8069_v14  ;;  %v17902_v53 = vpack.c.bf16 %v14998_v22, %v14997_v43  ;;  %v18726_v14 = vunpack.i.h.bf16 %v18724_v5 }
0x29ab   :  { %v8064_v39 = vsel %vm8063_vm10, %v8035_v34, %v8062_v15  ;;  %19303 = vrcp.f32 %v8075_v47  ;;  %v8074_v57 = vsel %vm8072_vm9, %v8073_v55, %v8071_v49  ;;  %v18725_v4 = vunpack.i.l.bf16 %v18724_v5  ;;  %v21506_v15 = vld [vmem:[%s22443_s29 + $0x8] sm:$0xff] }
0x29ac   :  { %16878 = vmatmul.mubr.msk.f32.vlgmr.msra.gmra.mrb[110].mxu1 %vm291_vm1, %v21413_v51  ;;  %v8067_v54 = vsel %vm8065_vm11, %v8066_v33, %v8064_v39  ;;  %v8078_v63 = vadd.f32 1e-06, %v8074_v57  ;;  %v21509_v33 = vld [vmem:[%s22443_s29] sm:$0xff] }
0x29ad   :  { %v8077_v3 = vadd.f32 1e-06, %v8067_v54  ;;  %v17934_v55 = vpack.c.bf16 %v18726_v14, %v18725_v4 }
0x29ae   :  { %19305 = vrcp.f32 %v8078_v63 }
0x29af   :  { %19307 = vrcp.f32 %v8077_v3 }
0x29b4   :  { %v19302_v12 = vpop.eup %19301 }
0x29b5   :  { %v19304_v42 = vpop.eup %19303  ;;  %v8082_v41 = vmul.f32 %v19302_v12, %v8044_v62  ;;  %v15000_v62 = vld [vmem:[%s19704_s19 + $0x3] ss:$0 sm:$0xff]  ;;  %s22447_s19 = sld [smem:[#allocation16_spill]] }
0x29b6   :  { %v8080_v0 = vmul.f32 %v19304_v42, %v8043_v59 }
0x29b7   :  { %v21476_v38 = vadd.f32 %v14977_v16, %v8082_v41 }
0x29b8   :  { %v19306_v27 = vpop.eup %19305  ;;  %v21474_v46 = vadd.f32 %v14977_v16, %v8080_v0 }
0x29b9   :  { %v19308_v20 = vpop.eup %19307  ;;  %v8086_v52 = vmul.f32 %v19306_v27, %v8046_v11 }
0x29ba   :  { %16818 = vmatprep.mubr.msk.f32.mxu0 %vm181_vm0, %v21474_v46  ;;  %v8084_v1 = vmul.f32 %v19308_v20, %v8045_v60  ;;  %v9100_v60 = vpop.permute.xlu1 %9099 }
0x29bb   :  { %16819 = vmatmul.mubr.msk.f32.vlgmr.msra.gmra.mrb[76].mxu0 %vm181_vm0, %v21476_v38  ;;  %v21487_v34 = vadd.f32 %v14977_v16, %v8086_v52 }
0x29bc   :  { %17877 = vmatpush3.bf16.msra.mxu0 %v21457_v13  ;;  %v21485_v25 = vadd.f32 %v14977_v16, %v8084_v1  ;;  %v17886_v13 = vpack.c.bf16 %v14990_v31, %v14989_v40 }
0x29bd   :  { %17879 = vmatprep.subr.bf16.mxu0 %v17878_v48 }
0x29be   :  { %16821 = vmatprep.mubr.msk.f32.mxu0 %vm181_vm0, %v21485_v25  ;;  %v9102_v52 = vpop.permute.xlu1 %9101 }
0x29bf   :  { %16822 = vmatmul.mubr.msk.f32.gmra.mrb[78].mxu0 %vm181_vm0, %v21487_v34 }
0x29c0   :  { %17881 = vmatpush3.bf16.msra.mxu0 %v17878_v48 }
0x29c1   :  { %17883 = vmatprep.subr.bf16.mxu0 %v17882_v50 }
0x29c4   :  { %17885 = vmatpush3.bf16.msra.mxu0 %v17882_v50 }
0x29c5   :  { %17887 = vmatprep.subr.bf16.mxu0 %v17886_v13 }
0x29c8   :  { %17889 = vmatpush3.bf16.msra.mxu0 %v17886_v13 }
0x29c9   :  { %17891 = vmatprep.subr.bf16.mxu0 %v17890_v19 }
0x29cc   :  { %17893 = vmatpush3.bf16.msra.mxu0 %v17890_v19 }
0x29cd   :  { %17895 = vmatprep.subr.bf16.mxu0 %v17894_v44 }
0x29d0   :  { %17897 = vmatpush3.bf16.msra.mxu0 %v17894_v44 }
0x29d1   :  { %17899 = vmatprep.subr.bf16.mxu0 %v17898_v9 }
0x29d4   :  { %17901 = vmatpush3.bf16.msra.mxu0 %v17898_v9 }
0x29d5   :  { %17903 = vmatprep.subr.bf16.mxu0 %v17902_v53 }
0x29d8   :  { %17905 = vmatpush3.bf16.msra.mxu0 %v17902_v53 }
0x29d9   :  { %17936 = vmatprep.subr.msk.bf16.mxu0 %vm19885_vm2, %v17934_v55 }
0x2a7f   :  { %v16879_v47 = vpop.f32.mrb[110].mxu1 }
0x2a80   :  { %v8620_v49 = vmul.f32 0.35355338, %v16879_v47  ;;  %v8610_v39 = vpop.f32.mrb[111].mxu1 }
0x2a81   :  { %v8619_v57 = vmul.f32 0.35355338, %v8610_v39 }
0x2a82   :  { %v8622_v54 = vadd.f32 %v8620_v49, %v21506_v15 }
0x2a83   :  { %v8621_v63 = vadd.f32 %v8619_v57, %v21509_v33 }
0x2a84   :  { %v8627_v3 = vsel %vm8623_vm12, %v8622_v54, -inf }
0x2a85   :  { %8628 = vmax.xlane.f32.xlu1 %v8627_v3  ;;  %v8624_v23 = vsel %vm8623_vm12, %v8621_v63, -inf }
0x2a86   :  { %8625 = vmax.xlane.f32.xlu0 %v8624_v23 }
0x2a8e   :  { %v16820_v12 = vpop.f32.mrb[76].mxu0 }
0x2a8f   :  { %v8213_v59 = vadd.f32 %v16820_v12, %v15000_v62  ;;  %v8207_v42 = vpop.f32.mrb[77].mxu0 }
0x2a90   :  { %v8208_v16 = vadd.f32 %v15000_v62, %v8207_v42 }
0x2a91   :  { %v8227_v45 = vmax.f32 %v8213_v59, 0.0 }
0x2a92   :  { %v8226_v41 = vmax.f32 %v8208_v16, 0.0  ;;  %v16823_v0 = vpop.f32.mrb[78].mxu0 }
0x2a93   :  { %v8223_v2 = vadd.f32 %v16823_v0, %v15000_v62  ;;  %v8217_v11 = vpop.f32.mrb[79].mxu0 }
0x2a94   :  { %v8218_v27 = vadd.f32 %v15000_v62, %v8217_v11  ;;  %16856 = vmatprep.mubr.f32.mxu0 %v8226_v41 }
0x2a95   :  { %16857 = vmatmul.mubr.f32.vlgmr.msra.gmra.mrb[80].mxu0 %v8227_v45  ;;  %v8229_v48 = vmax.f32 %v8223_v2, 0.0 }
0x2a96   :  { %v8228_v20 = vmax.f32 %v8218_v27, 0.0  ;;  %17939 = vmatpush3.bf16.xpose.msk.msra.mxu0 %vm19885_vm2, %v17934_v55  ;;  %18728 = vrot.lane.b32.xlu1 %v21441_v28, %s19634_s2 }
0x2a98   :  { %16859 = vmatprep.mubr.f32.mxu0 %v8228_v20 }
0x2a99   :  { %16860 = vmatmul.mubr.f32.gmra.mrb[82].mxu0 %v8229_v48 }
0x2a9a   :  { %16915 = vmatprep.mubr.msk.f32.mxu0 %vm291_vm1, %v9100_v60  ;;  %8733 = vrot.lane.b32.xlu1 %v21415_v17, %s19633_s1 }
0x2a9d   :  { %16916 = vmatmul.mubr.msk.f32.vlgmr.msra.gmra.mrb[84].mxu0 %vm291_vm1, %v9102_v52 }
0x2a9e   :  { %8735 = vrot.lane.b32.xlu1 %v21413_v51, %s19633_s1 }
0x2b12   :  { %v8629_v1 = vpop.xlane.xlu1 %8628 }
0x2b13   :  { %v8631_v61 = vsub.f32 %v8622_v54, %v8629_v1  ;;  %v8626_v32 = vpop.xlane.xlu0 %8625 }
0x2b14   :  { %v8630_v50 = vsub.f32 %v8621_v63, %v8626_v32 }
0x2b15   :  { %v8634_v40 = vmul.f32 1.442695, %v8631_v61 }
0x2b16   :  { %v8632_v31 = vmul.f32 1.442695, %v8630_v50  ;;  %v18729_v13 = vpop.permute.xlu1 %18728 }
0x2b17   :  { %19309 = vpow2.f32 %v8634_v40  ;;  %v18731_v35 = vunpack.i.h.bf16 %v18729_v13  ;;  %v18730_v30 = vunpack.i.l.bf16 %v18729_v13 }
0x2b18   :  { %19311 = vpow2.f32 %v8632_v31 }
0x2b19   :  { %v17920_v19 = vpack.c.bf16 %v18731_v35, %v18730_v30 }
0x2b1b   :  { %17921 = vmatprep.subr.bf16.mxu1 %v17920_v19 }
0x2b1c   :  { %17923 = vmatpush3.bf16.msra.mxu1 %v17920_v19 }
0x2b21   :  { %v19310_v36 = vpop.eup %19309 }
0x2b22   :  { %v8639_v26 = vsel %vm8623_vm12, %v19310_v36, 0.0  ;;  %v19312_v44 = vpop.eup %19311 }
0x2b23   :  { %8640 = vadd.xlane.f32.xlu0 %v8639_v26  ;;  %v8636_v18 = vsel %vm8623_vm12, %v19312_v44, 0.0 }
0x2b27   :  { %8637 = vadd.xlane.f32.xlu0 %v8636_v18 }
0x2b3d   :  { %18733 = vrot.lane.b32.xlu0 %v21441_v28, %s19631_s0 }
0x2b68   :  { %v16858_v9 = vpop.f32.mrb[80].mxu0 }
0x2b69   :  { %v21534_v43 = vadd.f32 %v16858_v9, %v21531_v21  ;;  %v21536_v22 = vpop.f32.mrb[81].mxu0 }
0x2b6c   :  { %v16861_v5 = vpop.f32.mrb[82].mxu0 }
0x2b6d   :  { %v21539_v53 = vadd.f32 %v16861_v5, %v21531_v21  ;;  %v8312_v14 = vpop.f32.mrb[83].mxu0 }
0x2b6e   :  { %v21542_v4 = vadd.f32 %v21531_v21, %v8312_v14 }
0x2b70   :  { %v16917_v55 = vpop.f32.mrb[84].mxu0 }
0x2b71   :  { %v9191_v47 = vmul.f32 0.35355338, %v16917_v55  ;;  %v9181_v49 = vpop.f32.mrb[85].mxu0 }
0x2b72   :  { %v9190_v39 = vmul.f32 0.35355338, %v9181_v49 }
0x2b73   :  { %v9193_v57 = vadd.f32 %v9191_v47, %v21506_v15 }
0x2b74   :  { %v9192_v54 = vadd.f32 %v9190_v39, %v21509_v33 }
0x2b75   :  { %v9197_v63 = vsel %vm8623_vm12, %v9193_v57, -inf }
0x2b76   :  { %9198 = vmax.xlane.f32.xlu1 %v9197_v63  ;;  %v9194_v3 = vsel %vm8623_vm12, %v9192_v54, -inf }
0x2b77   :  { %9195 = vmax.xlane.f32.xlu0 %v9194_v3 }
0x2b87   :  { %18738 = vrot.lane.b32.xlu1 %v21441_v28, %s22418_s18  ;;  %s22458_s18 = sld [smem:[#allocation22_spill]] }
0x2b8b   :  { %9386 = vrot.lane.b32.xlu1 %v21415_v17, %s19639_s16  ;;  %v8734_v17 = vpop.permute.xlu1 %8733 }
0x2b8f   :  { %9388 = vrot.lane.b32.xlu1 %v21413_v51, %s19639_s16  ;;  %v8736_v51 = vpop.permute.xlu1 %8735 }
0x2bb0   :  { %v8641_v23 = vpop.xlane.xlu0 %8640 }
0x2bb1   :  { %19313 = vrcp.f32 %v8641_v23 }
0x2bb4   :  { %v8638_v62 = vpop.xlane.xlu0 %8637 }
0x2bb5   :  { %19315 = vrcp.f32 %v8638_v62 }
0x2bb8   :  { %v18734_v12 = vpop.permute.xlu0 %18733 }
0x2bb9   :  { %v18736_v59 = vunpack.i.h.bf16 %v18734_v12  ;;  %v18735_v42 = vunpack.i.l.bf16 %v18734_v12 }
0x2bbb   :  { %v17924_v16 = vpack.c.bf16 %v18736_v59, %v18735_v42  ;;  %v19314_v41 = vpop.eup %19313 }
0x2bbc   :  { %v8645_v2 = vmul.f32 %v19314_v41, %v19310_v36 }
0x2bbd   :  { %17926 = vmatprep.subr.msk.bf16.mxu1 %vm19885_vm2, %v17924_v16 }
0x2bbf   :  { %v19316_v0 = vpop.eup %19315 }
0x2bc0   :  { %v8643_v45 = vmul.f32 %v19316_v0, %v19312_v44 }
0x2bc2   :  { %16884 = vmatprep.mubr.msk.f32.mxu1 %vm8623_vm12, %v8643_v45 }
0x2bc3   :  { %16885 = vmatmul.mubr.msk.f32.vlgmr.msra.gmra.mrb[112].mxu1 %vm8623_vm12, %v8645_v2 }
0x2bc4   :  { %17929 = vmatpush3.bf16.xpose.msk.msra.mxu1 %vm19885_vm2, %v17924_v16  ;;  %16891 = vmatprep.mubr.msk.f32.mxu1 %vm291_vm1, %v8734_v17  ;;  %v8303_v16 = vadd.f32 %v21531_v21, %v21536_v22 }
0x2bc6   :  { %v8321_v41 = vadd.f32 %v8303_v16, %v21474_v46 }
0x2bc8   :  { %v8329_v0 = vsel %vm181_vm0, %v8321_v41, 0.0 }
0x2bcb   :  { %16892 = vmatmul.mubr.msk.f32.vlgmr.msra.gmra.mrb[114].mxu1 %vm291_vm1, %v8736_v51 }
0x2c03   :  { %v9199_v11 = vpop.xlane.xlu1 %9198 }
0x2c04   :  { %v9201_v27 = vsub.f32 %v9193_v57, %v9199_v11  ;;  %v9196_v60 = vpop.xlane.xlu0 %9195 }
0x2c05   :  { %v9200_v20 = vsub.f32 %v9192_v54, %v9196_v60 }
0x2c06   :  { %v9204_v48 = vmul.f32 1.442695, %v9201_v27 }
0x2c07   :  { %v9202_v52 = vmul.f32 1.442695, %v9200_v20  ;;  %v18739_v1 = vpop.permute.xlu1 %18738 }
0x2c08   :  { %19317 = vpow2.f32 %v9204_v48  ;;  %v18741_v61 = vunpack.i.h.bf16 %v18739_v1  ;;  %v18740_v32 = vunpack.i.l.bf16 %v18739_v1 }
0x2c09   :  { %19319 = vpow2.f32 %v9202_v52 }
0x2c0a   :  { %v17940_v50 = vpack.c.bf16 %v18741_v61, %v18740_v32 }
0x2c0b   :  { %v9387_v59 = vpop.permute.xlu1 %9386 }
0x2c0c   :  { %17941 = vmatprep.subr.bf16.mxu0 %v17940_v50 }
0x2c0d   :  { %17943 = vmatpush3.bf16.msra.mxu0 %v17940_v50 }
0x2c0f   :  { %v9389_v42 = vpop.permute.xlu1 %9388 }
0x2c12   :  { %v19318_v40 = vpop.eup %19317 }
0x2c13   :  { %v9209_v31 = vsel %vm8623_vm12, %v19318_v40, 0.0  ;;  %v19320_v13 = vpop.eup %19319 }
0x2c14   :  { %9210 = vadd.xlane.f32.xlu0 %v9209_v31  ;;  %v9206_v35 = vsel %vm8623_vm12, %v19320_v13, 0.0 }
0x2c18   :  { %9207 = vadd.xlane.f32.xlu0 %v9206_v35 }
0x2c2e   :  { %18743 = vrot.lane.b32.xlu0 %v21441_v28, %s19638_s15 }
0x2c96   :  { %v21566_v30 = vpop.f32.mrb[112].mxu1 }
0x2c97   :  { %v21568_v19 = vpop.f32.mrb[113].mxu1 }
0x2c9e   :  { %v16893_v36 = vpop.f32.mrb[114].mxu1 }
0x2c9f   :  { %v8825_v26 = vmul.f32 0.35355338, %v16893_v36  ;;  %v8815_v44 = vpop.f32.mrb[115].mxu1 }
0x2ca0   :  { %v8824_v18 = vmul.f32 0.35355338, %v8815_v44 }
0x2ca1   :  { %v8827_v9 = vadd.f32 %v8825_v26, %v21506_v15  ;;  %v9211_v5 = vpop.xlane.xlu0 %9210 }
0x2ca2   :  { %v8826_v14 = vadd.f32 %v8824_v18, %v21509_v33  ;;  %19321 = vrcp.f32 %v9211_v5 }
0x2ca3   :  { %v8831_v55 = vsel %vm8623_vm12, %v8827_v9, -inf }
0x2ca4   :  { %8832 = vmax.xlane.f32.xlu1 %v8831_v55  ;;  %v8828_v47 = vsel %vm8623_vm12, %v8826_v14, -inf }
0x2ca5   :  { %8829 = vmax.xlane.f32.xlu0 %v8828_v47  ;;  %v9208_v49 = vpop.xlane.xlu0 %9207 }
0x2ca6   :  { %19323 = vrcp.f32 %v9208_v49 }
0x2ca9   :  { %v18744_v39 = vpop.permute.xlu0 %18743 }
0x2caa   :  { %v18746_v57 = vunpack.i.h.bf16 %v18744_v39  ;;  %v18745_v54 = vunpack.i.l.bf16 %v18744_v39 }
0x2cac   :  { %v17944_v63 = vpack.c.bf16 %v18746_v57, %v18745_v54  ;;  %v19322_v3 = vpop.eup %19321 }
0x2cad   :  { %v9215_v12 = vmul.f32 %v19322_v3, %v19318_v40 }
0x2cae   :  { %17946 = vmatprep.subr.msk.bf16.mxu0 %vm19885_vm2, %v17944_v63 }
0x2cb0   :  { %v19324_v23 = vpop.eup %19323 }
0x2cb1   :  { %v9213_v62 = vmul.f32 %v19324_v23, %v19320_v13 }
0x2cb3   :  { %16922 = vmatprep.mubr.msk.f32.mxu0 %vm8623_vm12, %v9213_v62 }
0x2cb4   :  { %16923 = vmatmul.mubr.msk.f32.vlgmr.msra.gmra.mrb[86].mxu0 %vm8623_vm12, %v9215_v12 }
0x2cb5   :  { %17949 = vmatpush3.bf16.xpose.msk.msra.mxu0 %vm19885_vm2, %v17944_v63  ;;  %18748 = vrot.lane.b32.xlu1 %v21441_v28, %s19637_s11 }
0x2cb6   :  { %16934 = vmatprep.mubr.msk.f32.mxu0 %vm291_vm1, %v9387_v59  ;;  %v14773_v59 = vld [vmem:[%s19714_s30 + $0x1] ss:$0 sm:$0xff]  ;;  %s22449_s30 = sld [smem:[#allocation24_spill]] }
0x2cb7   :  { %v4173_v16 = vadd.f32 %v14773_v59, %v20770_v10 }
0x2cb9   :  { %18753 = vrot.lane.b32.xlu1 %v21441_v28, %s22417_s22  ;;  %s22457_s22 = sld [smem:[#allocation20_spill]] }
0x2cbc   :  { %16935 = vmatmul.mubr.msk.f32.vlgmr.msra.gmra.mrb[88].mxu0 %vm291_vm1, %v9389_v42 }
0x2cdd   :  { %8330 = vadd.xlane.f32.xlu1 %v8329_v0  ;;  %v8439_v0 = vld [vmem:[%s22444_s3 + $0x8] sm:$0xff] }
0x2d31   :  { %v8833_v45 = vpop.xlane.xlu1 %8832 }
0x2d32   :  { %v8835_v2 = vsub.f32 %v8827_v9, %v8833_v45  ;;  %v8830_v17 = vpop.xlane.xlu0 %8829 }
0x2d33   :  { %v8834_v51 = vsub.f32 %v8826_v14, %v8830_v17  ;;  %v21615_v17 = vadd.f32 %v4173_v16, %v20682_v6 }
0x2d34   :  { %v8838_v11 = vmul.f32 1.442695, %v8835_v2  ;;  %v4178_v2 = vadd.f32 %v20768_v56, %v14773_v59  ;;  %v8322_v56 = vadd.f32 %v21534_v43, %v21476_v38 }
0x2d35   :  { %v8836_v27 = vmul.f32 1.442695, %v8834_v51  ;;  %v18749_v60 = vpop.permute.xlu1 %18748  ;;  %v4199_v10 = vsel %vm181_vm0, %v21615_v17, 0.0 }
0x2d36   :  { %v18751_v20 = vunpack.i.h.bf16 %v18749_v60  ;;  %v18750_v28 = vunpack.i.l.bf16 %v18749_v60  ;;  %v4183_v60 = vadd.f32 %v14773_v59, %v20775_v8 }
0x2d37   :  { %19325 = vpow2.f32 %v8836_v27  ;;  %v21620_v27 = vadd.f32 %v4178_v2, %v20684_v58  ;;  %v4188_v58 = vadd.f32 %v20772_v7, %v14773_v59 }
0x2d38   :  { %v17930_v48 = vpack.c.bf16 %v18751_v20, %v18750_v28  ;;  %19327 = vpow2.f32 %v8838_v11  ;;  %v8438_v11 = vld [vmem:[%s22444_s3] sm:$0xff]  ;;  %v21630_v20 = vadd.f32 %v4183_v60, %v20692_v37  ;;  %v8332_v28 = vsel %vm181_vm0, %v8322_v56, 0.0 }
0x2d39   :  { %v21592_v1 = vpop.permute.xlu1 %18753  ;;  %v4202_v6 = vsel %vm181_vm0, %v21620_v27, 0.0  ;;  %v21639_v38 = vadd.f32 %v4188_v58, %v20695_v29  ;;  %v8324_v37 = vadd.f32 %v21539_v53, %v21487_v34 }
0x2d3a   :  { %17931 = vmatprep.subr.bf16.mxu1 %v17930_v48  ;;  %v4205_v8 = vsel %vm181_vm0, %v21630_v20, 0.0  ;;  %v18756_v29 = vunpack.i.h.bf16 %v21592_v1  ;;  %v18755_v34 = vunpack.i.l.bf16 %v21592_v1 }
0x2d3b   :  { %17933 = vmatpush3.bf16.msra.mxu1 %v17930_v48  ;;  %v8323_v48 = vadd.f32 %v21542_v4, %v21485_v25  ;;  %v8338_v7 = vsel %vm181_vm0, %v8324_v37, 0.0 }
0x2d3c   :  { %16901 = vmatprep.subr.mxu1 %v8439_v0  ;;  %v17950_v53 = vpack.c.bf16 %v18756_v29, %v18755_v34 }
0x2d3d   :  { %v8335_v43 = vsel %vm181_vm0, %v8323_v48, 0.0 }
0x2d41   :  { %v19326_v21 = vpop.eup %19325 }
0x2d42   :  { %v8840_v46 = vsel %vm8623_vm12, %v19326_v21, 0.0  ;;  %v19328_v22 = vpop.eup %19327 }
0x2d43   :  { %8841 = vadd.xlane.f32.xlu0 %v8840_v46  ;;  %v8843_v52 = vsel %vm8623_vm12, %v19328_v22, 0.0  ;;  %v8440_v46 = vld [vmem:[%s22444_s3 + $0x10] sm:$0xff] }
0x2d47   :  { %8844 = vadd.xlane.f32.xlu0 %v8843_v52 }
0x2d6a   :  { %v8331_v61 = vpop.xlane.xlu1 %8330 }
0x2d6b   :  { %v8341_v32 = vmul.f32 0.03125, %v8331_v61 }
0x2d6d   :  { %v21594_v50 = vsub.f32 %v8321_v41, %v8341_v32 }
0x2d6f   :  { %v8349_v40 = vmul.f32 %v21594_v50, %v21594_v50 }
0x2d71   :  { %v8353_v31 = vsel %vm181_vm0, %v8349_v40, 0.0 }
0x2d72   :  { %8354 = vadd.xlane.f32.xlu1 %v8353_v31 }
0x2d87   :  { %v21599_v13 = vpop.f32.mrb[86].mxu0 }
0x2d88   :  { %v21601_v35 = vpop.f32.mrb[87].mxu0 }
0x2d8f   :  { %v16936_v36 = vpop.f32.mrb[88].mxu0 }
0x2d90   :  { %v9468_v26 = vpop.f32.mrb[89].mxu0  ;;  %v9478_v44 = vmul.f32 0.35355338, %v16936_v36 }
0x2d91   :  { %v9477_v18 = vmul.f32 0.35355338, %v9468_v26 }
0x2d92   :  { %v9480_v5 = vadd.f32 %v9478_v44, %v21506_v15 }
0x2d93   :  { %v9479_v9 = vadd.f32 %v9477_v18, %v21509_v33 }
0x2d94   :  { %v9484_v55 = vsel %vm8623_vm12, %v9480_v5, -inf }
0x2d95   :  { %v9481_v14 = vsel %vm8623_vm12, %v9479_v9, -inf }
0x2d96   :  { %9482 = vmax.xlane.f32.xlu0 %v9481_v14 }
0x2d9a   :  { %9485 = vmax.xlane.f32.xlu0 %v9484_v55 }
0x2dd0   :  { %v8842_v47 = vpop.xlane.xlu0 %8841 }
0x2dd1   :  { %19329 = vrcp.f32 %v8842_v47 }
0x2dd4   :  { %v8845_v49 = vpop.xlane.xlu0 %8844 }
0x2dd5   :  { %19331 = vrcp.f32 %v8845_v49 }
0x2ddb   :  { %v19330_v39 = vpop.eup %19329 }
0x2ddc   :  { %v8847_v57 = vmul.f32 %v19330_v39, %v19326_v21  ;;  %v4208_v21 = vsel %vm181_vm0, %v21639_v38, 0.0 }
0x2dde   :  { %16898 = vmatprep.mubr.msk.f32.mxu1 %vm8623_vm12, %v8847_v57 }
0x2ddf   :  { %v19332_v54 = vpop.eup %19331 }
0x2de0   :  { %v8849_v33 = vmul.f32 %v19332_v54, %v19328_v22 }
0x2de2   :  { %16899 = vmatmul.mubr.msk.f32.vlgmr.msra.gmra.mrb[116].mxu1 %vm8623_vm12, %v8849_v33 }
0x2de3   :  { %16902 = vmatpush3.msra.mxu1 %v8439_v0 }
0x2de4   :  { %16906 = vmatprep.subr.mxu1 %v8438_v11 }
0x2e23   :  { %v9483_v15 = vpop.xlane.xlu0 %9482 }
0x2e24   :  { %v9487_v63 = vsub.f32 %v9479_v9, %v9483_v15  ;;  %v8441_v15 = vld [vmem:[%s22444_s3 + $0x18] sm:$0xff] }
0x2e26   :  { %v9489_v3 = vmul.f32 1.442695, %v9487_v63 }
0x2e27   :  { %v9486_v23 = vpop.xlane.xlu0 %9485 }
0x2e28   :  { %19333 = vpow2.f32 %v9489_v3  ;;  %v9488_v62 = vsub.f32 %v9480_v5, %v9486_v23  ;;  %v15045_v23 = vld [vmem:[%s22445_s8] ss:$0 sm:$0xff] }
0x2e2a   :  { %v9491_v12 = vmul.f32 1.442695, %v9488_v62 }
0x2e2c   :  { %19335 = vpow2.f32 %v9491_v12 }
0x2e32   :  { %v19334_v42 = vpop.eup %19333 }
0x2e33   :  { %v9493_v41 = vsel %vm8623_vm12, %v19334_v42, 0.0 }
0x2e34   :  { %9494 = vadd.xlane.f32.xlu0 %v9493_v41  ;;  %v19541_v41 = vld [vmem:[%s22441_s13] sm:$0xff] }
0x2e36   :  { %v19336_v45 = vpop.eup %19335 }
0x2e37   :  { %v9496_v51 = vsel %vm8623_vm12, %v19336_v45, 0.0 }
0x2e38   :  { %9497 = vadd.xlane.f32.xlu0 %v9496_v51  ;;  %v19542_v51 = vld [vmem:[%s22441_s13 + $0x8] sm:$0xff]  ;;  %s22456_s13 = sld [smem:[#allocation26_spill]] }
0x2e3c   :  { %4200 = vadd.xlane.f32.xlu0 %v4199_v10 }
0x2e40   :  { %4203 = vadd.xlane.f32.xlu0 %v4202_v6 }
0x2e44   :  { %8333 = vadd.xlane.f32.xlu0 %v8332_v28 }
0x2e48   :  { %4206 = vadd.xlane.f32.xlu0 %v4205_v8 }
0x2e4c   :  { %8336 = vadd.xlane.f32.xlu0 %v8335_v43 }
0x2e50   :  { %4209 = vadd.xlane.f32.xlu0 %v4208_v21 }
0x2e54   :  { %8339 = vadd.xlane.f32.xlu0 %v8338_v7 }
0x2eb5   :  { %v16900_v25 = vpop.f32.mrb[116].mxu1 }
0x2eb6   :  { %v8928_v4 = vpop.f32.mrb[117].mxu1 }
0x2eb7   :  { %16903 = vmatprep.mubr.msk.f32.mxu1 %vm291_vm1, %v8928_v4 }
0x2eb8   :  { %16904 = vmatmul.mubr.msk.f32.vlgmr.msra.gmra.mrb[118].mxu1 %vm291_vm1, %v16900_v25  ;;  %v8355_v25 = vpop.xlane.xlu1 %8354 }
0x2eb9   :  { %16908 = vmatprep.mubr.msk.f32.mxu1 %vm291_vm1, %v21568_v19  ;;  %16907 = vmatpush3.msra.mxu1 %v8438_v11  ;;  %v8365_v4 = vmul.f32 0.032258064, %v8355_v25 }
0x2eba   :  { %16925 = vmatprep.subr.mxu1 %v8440_v46 }
0x2ebb   :  { %vm8381_vm13 = vcmp.eq.f32.partialorder %v8365_v4, inf  ;;  %vm8383_vm14 = vcmp.eq.f32.partialorder %v8365_v4, 0.0 }
0x2ec0   :  { %16909 = vmatmul.mubr.msk.f32.vlgmr.msra.gmra.mrb[118].mxu1 %vm291_vm1, %v21566_v30 }
0x2ec1   :  { %16926 = vmatpush3.msra.mxu1 %v8440_v46  ;;  %16927 = vmatprep.mubr.msk.f32.mxu1 %vm291_vm1, %v21601_v35  ;;  %v9495_v22 = vpop.xlane.xlu0 %9494 }
0x2ec2   :  { %17951 = vmatprep.subr.bf16.mxu1 %v17950_v53  ;;  %19337 = vrcp.f32 %v9495_v22 }
0x2ec5   :  { %v9498_v52 = vpop.xlane.xlu0 %9497 }
0x2ec6   :  { %19339 = vrcp.f32 %v9498_v52 }
0x2ec7   :  { %19341 = vrsqrt.f32 %v8365_v4 }
0x2ec8   :  { %16928 = vmatmul.mubr.msk.f32.vlgmr.msra.gmra.mrb[118].mxu1 %vm291_vm1, %v21599_v13 }
0x2ec9   :  { %17953 = vmatpush3.bf16.msra.mxu1 %v17950_v53  ;;  %v4201_v19 = vpop.xlane.xlu0 %4200 }
0x2eca   :  { %16944 = vmatprep.subr.mxu1 %v8441_v15  ;;  %v4211_v59 = vmul.f32 0.03125, %v4201_v19 }
0x2ecc   :  { %v19338_v61 = vpop.eup %19337 }
0x2ecd   :  { %v4204_v1 = vpop.xlane.xlu0 %4203  ;;  %v9500_v32 = vmul.f32 %v19338_v61, %v19334_v42 }
0x2ece   :  { %v4212_v2 = vmul.f32 0.03125, %v4204_v1 }
0x2ecf   :  { %16941 = vmatprep.mubr.msk.f32.mxu1 %vm8623_vm12, %v9500_v32 }
0x2ed0   :  { %v19340_v30 = vpop.eup %19339  ;;  %v21688_v60 = vsub.f32 %v21620_v27, %v4212_v2 }
0x2ed1   :  { %v8334_v40 = vpop.xlane.xlu0 %8333  ;;  %v9502_v31 = vmul.f32 %v19340_v30, %v19336_v45  ;;  %v21683_v45 = vsub.f32 %v21615_v17, %v4211_v59  ;;  %v19342_v32 = vpop.eup %19341 }
0x2ed2   :  { %v8342_v36 = vmul.f32 0.03125, %v8334_v40  ;;  %v4220_v8 = vmul.f32 %v21688_v60, %v21688_v60 }
0x2ed3   :  { %16942 = vmatmul.mubr.msk.f32.vlgmr.msra.gmra.mrb[120].mxu1 %vm8623_vm12, %v9502_v31  ;;  %v4219_v28 = vmul.f32 %v21683_v45, %v21683_v45 }
0x2ed4   :  { %v21662_v35 = vsub.f32 %v8322_v56, %v8342_v36  ;;  %16945 = vmatpush3.msra.mxu1 %v8441_v15  ;;  %v4226_v43 = vsel %vm181_vm0, %v4220_v8, 0.0  ;;  %v21744_v8 = vld [vmem:[%s22446_s14 + $0x10] sm:$0xff] }
0x2ed5   :  { %v4207_v26 = vpop.xlane.xlu0 %4206 }
0x2ed6   :  { %v8350_v44 = vmul.f32 %v21662_v35, %v21662_v35  ;;  %v4213_v56 = vmul.f32 0.03125, %v4207_v26  ;;  %v8380_v26 = vmul.f32 %v19342_v32, %v8365_v4 }
0x2ed8   :  { %v8356_v13 = vsel %vm181_vm0, %v8350_v44, 0.0  ;;  %v21694_v58 = vsub.f32 %v21630_v20, %v4213_v56 }
0x2ed9   :  { %8357 = vadd.xlane.f32.xlu1 %v8356_v13  ;;  %v8337_v18 = vpop.xlane.xlu0 %8336 }
0x2eda   :  { %v8343_v9 = vmul.f32 0.03125, %v8337_v18 }
0x2edc   :  { %v21667_v5 = vsub.f32 %v8323_v48, %v8343_v9  ;;  %v4223_v48 = vsel %vm181_vm0, %v4219_v28, 0.0  ;;  %v21736_v28 = vld [vmem:[%s22446_s14] sm:$0xff] }
0x2edd   :  { %v4210_v14 = vpop.xlane.xlu0 %4209 }
0x2ede   :  { %v8351_v55 = vmul.f32 %v21667_v5, %v21667_v5  ;;  %v4214_v17 = vmul.f32 0.03125, %v4210_v14  ;;  %v8382_v14 = vsel %vm8381_vm13, %v8365_v4, %v8380_v26 }
0x2ee0   :  { %v8359_v47 = vsel %vm181_vm0, %v8351_v55, 0.0  ;;  %v21700_v27 = vsub.f32 %v21639_v38, %v4214_v17 }
0x2ee1   :  { %8360 = vadd.xlane.f32.xlu1 %v8359_v47  ;;  %v8340_v49 = vpop.xlane.xlu0 %8339 }
0x2ee2   :  { %v8344_v39 = vmul.f32 0.03125, %v8340_v49  ;;  %v4222_v20 = vmul.f32 %v21700_v27, %v21700_v27 }
0x2ee4   :  { %v21672_v57 = vsub.f32 %v8324_v37, %v8344_v39  ;;  %v4221_v37 = vmul.f32 %v21694_v58, %v21694_v58  ;;  %v4232_v7 = vsel %vm181_vm0, %v4222_v20, 0.0  ;;  %v8384_v39 = vand.u32 2147483648, %v8365_v4 }
0x2ee6   :  { %v8352_v54 = vmul.f32 %v21672_v57, %v21672_v57  ;;  %v4229_v21 = vsel %vm181_vm0, %v4221_v37, 0.0  ;;  %v8385_v15 = vsel %vm8383_vm14, %v8384_v39, %v8382_v14 }
0x2ee8   :  { %v8362_v33 = vsel %vm181_vm0, %v8352_v54, 0.0 }
0x2ee9   :  { %8363 = vadd.xlane.f32.xlu1 %v8362_v33 }
0x2f66   :  { %v8358_v46 = vpop.xlane.xlu1 %8357 }
0x2f67   :  { %v8366_v38 = vmul.f32 0.032258064, %v8358_v46 }
0x2f69   :  { %19343 = vrsqrt.f32 %v8366_v38  ;;  %vm8388_vm15 = vcmp.eq.f32.partialorder %v8366_v38, inf  ;;  %vm8390_vm3 = vcmp.eq.f32.partialorder %v8366_v38, 0.0 }
0x2f6e   :  { %v8361_v29 = vpop.xlane.xlu1 %8360 }
0x2f6f   :  { %v21709_v34 = vmul.f32 0.032258064, %v8361_v29 }
0x2f71   :  { %19345 = vrsqrt.f32 %v21709_v34  ;;  %vm8395_vm4 = vcmp.eq.f32.partialorder %v21709_v34, inf  ;;  %v8398_v56 = vand.u32 2147483648, %v21709_v34  ;;  %vm8397_vm5 = vcmp.eq.f32.partialorder %v21709_v34, 0.0 }
0x2f73   :  { %v19344_v13 = vpop.eup %19343 }
0x2f74   :  { %v8387_v55 = vmul.f32 %v19344_v13, %v8366_v38  ;;  %v15008_v13 = vld [vmem:[%s19729_s20 + $0x3] ss:$0 sm:$0xff] }
0x2f75   :  { %v8375_v39 = vmul.f32 %v15008_v13, %v21594_v50  ;;  %v8376_v50 = vmul.f32 %v15008_v13, %v21662_v35 }
0x2f76   :  { %v8364_v22 = vpop.xlane.xlu1 %8363 }
0x2f77   :  { %v21714_v61 = vmul.f32 0.032258064, %v8364_v22 }
0x2f79   :  { %19347 = vrsqrt.f32 %v21714_v61  ;;  %vm8402_vm7 = vcmp.eq.f32.partialorder %v21714_v61, inf  ;;  %vm8404_vm9 = vcmp.eq.f32.partialorder %v21714_v61, 0.0  ;;  %v8405_v25 = vand.u32 2147483648, %v21714_v61 }
0x2f7b   :  { %v19346_v33 = vpop.eup %19345 }
0x2f83   :  { %v19348_v59 = vpop.eup %19347 }
0x2fa6   :  { %v16943_v63 = vpop.f32.mrb[120].mxu1 }
0x2fa7   :  { %v9581_v3 = vpop.f32.mrb[121].mxu1 }
0x2fa8   :  { %16946 = vmatprep.mubr.msk.f32.mxu1 %vm291_vm1, %v9581_v3 }
0x2fa9   :  { %16947 = vmatmul.mubr.msk.f32.vlgmr.msra.gmra.mrb[118].mxu1 %vm291_vm1, %v16943_v63  ;;  %v8389_v63 = vsel %vm8388_vm15, %v8366_v38, %v8387_v55  ;;  %v14776_v55 = vld [vmem:[%s19729_s20 + $0x1] ss:$0 sm:$0xff]  ;;  %s22452_s20 = sld [smem:[#allocation18_spill]] }
0x307c   :  { %v16948_v62 = vpop.f32.mrb[118].mxu1 }
0x307d   :  { %v9662_v12 = vpop.f32.mrb[119].mxu1  ;;  %v9680_v42 = vadd.f32 %v16948_v62, %v15045_v23  ;;  %v8394_v62 = vmul.f32 %v19346_v33, %v21709_v34 }
0x307e   :  { %v9679_v16 = vadd.f32 %v15045_v23, %v9662_v12  ;;  %v8391_v23 = vand.u32 2147483648, %v8366_v38 }
0x307f   :  { %v9682_v11 = vadd.f32 %v19542_v51, %v9680_v42  ;;  %v8407_v42 = vadd.f32 1e-06, %v8385_v15  ;;  %v8396_v2 = vsel %vm8395_vm4, %v21709_v34, %v8394_v62  ;;  %v8401_v51 = vmul.f32 %v19348_v59, %v21714_v61  ;;  %v14777_v59 = vld [vmem:[%s19734_s27 + $0x1] ss:$0 sm:$0xff] }
0x3080   :  { %v9681_v0 = vadd.f32 %v19541_v41, %v9679_v16  ;;  %v8392_v16 = vsel %vm8390_vm3, %v8391_v23, %v8389_v63  ;;  %v8399_v37 = vsel %vm8397_vm5, %v8398_v56, %v8396_v2  ;;  %v4245_v63 = vmul.f32 %v14776_v55, %v21683_v45 }
0x3081   :  { %v9688_v6 = vsel %vm181_vm0, %v9682_v11, 0.0  ;;  %v8377_v56 = vmul.f32 %v15008_v13, %v21667_v5 }
0x3082   :  { %v9685_v10 = vsel %vm181_vm0, %v9681_v0, 0.0 }
0x3083   :  { %9686 = vadd.xlane.f32.xlu0 %v9685_v10  ;;  %v8408_v10 = vadd.f32 1e-06, %v8392_v16 }
0x3087   :  { %9689 = vadd.xlane.f32.xlu0 %v9688_v6 }
0x308b   :  { %4224 = vadd.xlane.f32.xlu0 %v4223_v48  ;;  %v21741_v48 = vld [vmem:[%s22446_s14 + $0x8] sm:$0xff] }
0x308c   :  { %v18757_v29 = vpack.i.bf16 %v21741_v48, %v21736_v28 }
0x308f   :  { %4227 = vadd.xlane.f32.xlu0 %v4226_v43  ;;  %v21747_v43 = vld [vmem:[%s22446_s14 + $0x18] sm:$0xff] }
0x3090   :  { %v18762_v34 = vpack.i.bf16 %v21747_v43, %v21744_v8  ;;  %v17958_v35 = vpack.c.bf16 %v21747_v43, %v21744_v8 }
0x3093   :  { %4230 = vadd.xlane.f32.xlu0 %v4229_v21 }
0x3097   :  { %4233 = vadd.xlane.f32.xlu0 %v4232_v7  ;;  %v8403_v7 = vsel %vm8402_vm7, %v21714_v61, %v8401_v51 }
0x3110   :  { %v9687_v53 = vpop.xlane.xlu0 %9686 }
0x3111   :  { %v9691_v52 = vmul.f32 0.03125, %v9687_v53  ;;  %v8409_v53 = vadd.f32 1e-06, %v8399_v37 }
0x3113   :  { %v21711_v19 = vsub.f32 %v9681_v0, %v9691_v52  ;;  %v8406_v52 = vsel %vm8404_vm9, %v8405_v25, %v8403_v7  ;;  %v8378_v25 = vmul.f32 %v15008_v13, %v21672_v57 }
0x3114   :  { %v9690_v1 = vpop.xlane.xlu0 %9689 }
0x3115   :  { %v9692_v30 = vmul.f32 0.03125, %v9690_v1  ;;  %v9695_v40 = vmul.f32 %v21711_v19, %v21711_v19 }
0x3117   :  { %v21718_v31 = vsub.f32 %v9682_v11, %v9692_v30  ;;  %v9697_v36 = vsel %vm181_vm0, %v9695_v40, 0.0 }
0x3118   :  { %9698 = vadd.xlane.f32.xlu0 %v9697_v36  ;;  %v4225_v44 = vpop.xlane.xlu0 %4224  ;;  %v8410_v36 = vadd.f32 1e-06, %v8406_v52 }
0x3119   :  { %v4235_v18 = vmul.f32 0.032258064, %v4225_v44  ;;  %v9696_v9 = vmul.f32 %v21718_v31, %v21718_v31 }
0x311b   :  { %19349 = vrsqrt.f32 %v4235_v18  ;;  %v9700_v47 = vsel %vm181_vm0, %v9696_v9, 0.0  ;;  %vm4251_vm6 = vcmp.eq.f32.partialorder %v4235_v18, inf  ;;  %v4254_v17 = vand.u32 2147483648, %v4235_v18 }
0x311c   :  { %v4228_v49 = vpop.xlane.xlu0 %4227  ;;  %9701 = vadd.xlane.f32.xlu1 %v9700_v47  ;;  %vm4253_vm8 = vcmp.eq.f32.partialorder %v4235_v18, 0.0 }
0x311d   :  { %v4236_v54 = vmul.f32 0.032258064, %v4228_v49 }
0x311f   :  { %19351 = vrsqrt.f32 %v4236_v54  ;;  %vm4258_vm10 = vcmp.eq.f32.partialorder %v4236_v54, inf  ;;  %v4261_v22 = vand.u32 2147483648, %v4236_v54  ;;  %vm4260_vm11 = vcmp.eq.f32.partialorder %v4236_v54, 0.0 }
0x3120   :  { %v4231_v3 = vpop.xlane.xlu0 %4230 }
0x3121   :  { %v21726_v12 = vmul.f32 0.032258064, %v4231_v3 }
0x3123   :  { %19353 = vrsqrt.f32 %v21726_v12  ;;  %vm4265_vm13 = vcmp.eq.f32.partialorder %v21726_v12, inf  ;;  %v4268_v26 = vand.u32 2147483648, %v21726_v12  ;;  %vm4267_vm14 = vcmp.eq.f32.partialorder %v21726_v12, 0.0 }
0x3124   :  { %v4234_v41 = vpop.xlane.xlu0 %4233  ;;  %19355 = vrcp.f32 %v8407_v42  ;;  %v15009_v42 = vld [vmem:[%s19734_s27 + $0x3] ss:$0 sm:$0xff]  ;;  %s22453_s27 = sld [smem:[#allocation19_spill]] }
0x3125   :  { %v19350_v0 = vpop.eup %19349  ;;  %v21732_v11 = vmul.f32 0.032258064, %v4234_v41 }
0x3126   :  { %v4250_v6 = vmul.f32 %v19350_v0, %v4235_v18  ;;  %v4246_v0 = vmul.f32 %v14776_v55, %v21688_v60 }
0x3127   :  { %19357 = vrsqrt.f32 %v21732_v11  ;;  %vm4272_vm15 = vcmp.eq.f32.partialorder %v21732_v11, inf  ;;  %vm4274_vm3 = vcmp.eq.f32.partialorder %v21732_v11, 0.0 }
0x3128   :  { %v4252_v21 = vsel %vm4251_vm6, %v4235_v18, %v4250_v6  ;;  %19359 = vrcp.f32 %v8408_v10 }
0x3129   :  { %v19352_v20 = vpop.eup %19351  ;;  %v4255_v4 = vsel %vm4253_vm8, %v4254_v17, %v4252_v21  ;;  %v17954_v17 = vpack.c.bf16 %v21741_v48, %v21736_v28  ;;  %v4247_v21 = vmul.f32 %v14776_v55, %v21694_v58  ;;  %v4248_v58 = vmul.f32 %v14776_v55, %v21700_v27  ;;  %v21804_v27 = vld [vmem:[%s22447_s19] ss:$0 sm:$0xff] }
0x312a   :  { %v4277_v46 = vadd.f32 1e-06, %v4255_v4  ;;  %v4257_v38 = vmul.f32 %v19352_v20, %v4236_v54 }
0x312b   :  { %17955 = vmatprep.subr.bf16.mxu0 %v17954_v17 }
0x312c   :  { %v4259_v1 = vsel %vm4258_vm10, %v4236_v54, %v4257_v38  ;;  %19361 = vrcp.f32 %v4277_v46  ;;  %v4275_v54 = vand.u32 2147483648, %v21732_v11  ;;  %17957 = vmatpush3.bf16.msra.mxu0 %v17954_v17 }
0x312d   :  { %v19354_v32 = vpop.eup %19353  ;;  %v4262_v61 = vsel %vm4260_vm11, %v4261_v22, %v4259_v1  ;;  %18763 = vrot.lane.b32.xlu1 %v18762_v34, %s19632_s28  ;;  %19363 = vrcp.f32 %v8409_v53  ;;  %17959 = vmatprep.subr.bf16.mxu0 %v17958_v35 }
0x312e   :  { %v4278_v30 = vadd.f32 1e-06, %v4262_v61  ;;  %v4264_v40 = vmul.f32 %v19354_v32, %v21726_v12  ;;  %18758 = vrot.lane.b32.xlu0 %v18757_v29, %s19632_s28  ;;  %v19356_v44 = vpop.eup %19355 }
0x312f   :  { %v8412_v23 = vmul.f32 %v19356_v44, %v8375_v39 }
0x3130   :  { %19365 = vrcp.f32 %v4278_v30  ;;  %v4266_v18 = vsel %vm4265_vm13, %v21726_v12, %v4264_v40  ;;  %17961 = vmatpush3.bf16.msra.mxu0 %v17958_v35 }
0x3131   :  { %v19358_v9 = vpop.eup %19357  ;;  %v4269_v14 = vsel %vm4267_vm14, %v4268_v26, %v4266_v18  ;;  %19367 = vrcp.f32 %v8410_v36  ;;  %v8425_v51 = vadd.f32 %v15009_v42, %v8412_v23  ;;  %9854 = vrot.lane.b32.xlu1 %v21804_v27, %s19632_s28 }
0x3132   :  { %v4279_v47 = vadd.f32 1e-06, %v4269_v14  ;;  %v4271_v49 = vmul.f32 %v19358_v9, %v21732_v11  ;;  %v19360_v15 = vpop.eup %19359 }
0x3134   :  { %v4273_v33 = vsel %vm4272_vm15, %v21732_v11, %v4271_v49  ;;  %19369 = vrcp.f32 %v4279_v47  ;;  %v8414_v11 = vmul.f32 %v19360_v15, %v8376_v50 }
0x3135   :  { %v4276_v3 = vsel %vm4274_vm3, %v4275_v54, %v4273_v33 }
0x3136   :  { %v19362_v62 = vpop.eup %19361  ;;  %v4280_v12 = vadd.f32 1e-06, %v4276_v3  ;;  %v8426_v5 = vadd.f32 %v15009_v42, %v8414_v11 }
0x3137   :  { %v4282_v16 = vmul.f32 %v19362_v62, %v4245_v63  ;;  %v19364_v41 = vpop.eup %19363  ;;  %v15046_v62 = vld [vmem:[%s22448_s24] ss:$0 sm:$0xff] }
0x3138   :  { %19371 = vrcp.f32 %v4280_v12  ;;  %v8416_v20 = vmul.f32 %v19364_v41, %v8377_v56  ;;  %v9711_v12 = vmul.f32 %v15046_v62, %v21711_v19  ;;  %v9712_v41 = vmul.f32 %v15046_v62, %v21718_v31 }
0x3139   :  { %v4295_v2 = vadd.f32 %v14777_v59, %v4282_v16 }
0x313a   :  { %v19366_v10 = vpop.eup %19365  ;;  %v8427_v43 = vadd.f32 %v15009_v42, %v8416_v20 }
0x313b   :  { %v21778_v45 = vadd.f32 %v8425_v51, %v4295_v2  ;;  %v4284_v6 = vmul.f32 %v19366_v10, %v4246_v0  ;;  %v19368_v37 = vpop.eup %19367 }
0x313c   :  { %v8418_v4 = vmul.f32 %v19368_v37, %v8378_v25 }
0x313d   :  { %16968 = vmatprep.mubr.msk.f32.mxu1 %vm181_vm0, %v21778_v45  ;;  %14508 = vst.msk [vmem:[#allocation2] sm:$0xff] %vm181_vm0, %v21778_v45  ;;  %v4296_v60 = vadd.f32 %v14777_v59, %v4284_v6 }
0x313e   :  { %v19370_v7 = vpop.eup %19369  ;;  %v8428_v34 = vadd.f32 %v15009_v42, %v8418_v4  ;;  %v15047_v42 = vld [vmem:[%s22449_s30] ss:$0 sm:$0xff] }
0x313f   :  { %v21790_v28 = vadd.f32 %v8426_v5, %v4296_v60  ;;  %v4286_v48 = vmul.f32 %v19370_v7, %v4247_v21 }
0x3141   :  { %14509 = vst.msk [vmem:[#allocation2 + $0x8] sm:$0xff] %vm181_vm0, %v21790_v28  ;;  %v4297_v8 = vadd.f32 %v14777_v59, %v4286_v48 }
0x3142   :  { %v19372_v46 = vpop.eup %19371 }
0x3143   :  { %v21795_v38 = vadd.f32 %v8427_v43, %v4297_v8  ;;  %v4288_v29 = vmul.f32 %v19372_v46, %v4248_v58  ;;  %v21849_v8 = vld [vmem:[%s22450_s6 + $0x8] sm:$0xff]  ;;  %v21852_v46 = vld [vmem:[%s22450_s6] sm:$0xff] }
0x3145   :  { %14510 = vst.msk [vmem:[#allocation2 + $0x10] sm:$0xff] %vm181_vm0, %v21795_v38  ;;  %v4298_v57 = vadd.f32 %v14777_v59, %v4288_v29 }
0x3147   :  { %v21799_v53 = vadd.f32 %v8428_v34, %v4298_v57 }
0x3149   :  { %14511 = vst.msk [vmem:[#allocation2 + $0x18] sm:$0xff] %vm181_vm0, %v21799_v53 }
0x31a5   :  { %v9699_v22 = vpop.xlane.xlu0 %9698 }
0x31a6   :  { %v9703_v52 = vmul.f32 0.032258064, %v9699_v22 }
0x31a8   :  { %19373 = vrsqrt.f32 %v9703_v52  ;;  %vm9715_vm4 = vcmp.eq.f32.partialorder %v9703_v52, inf  ;;  %v9718_v55 = vand.u32 2147483648, %v9703_v52  ;;  %vm9717_vm5 = vcmp.eq.f32.partialorder %v9703_v52, 0.0 }
0x31a9   :  { %v18759_v1 = vpop.permute.xlu0 %18758  ;;  %v9702_v32 = vpop.xlane.xlu1 %9701 }
0x31aa   :  { %v18761_v61 = vunpack.i.h.bf16 %v18759_v1  ;;  %v18760_v30 = vunpack.i.l.bf16 %v18759_v1  ;;  %v9704_v40 = vmul.f32 0.032258064, %v9702_v32 }
0x31ac   :  { %v17962_v36 = vpack.c.bf16 %v18761_v61, %v18760_v30  ;;  %19375 = vrsqrt.f32 %v9704_v40  ;;  %vm9722_vm6 = vcmp.eq.f32.partialorder %v9704_v40, inf  ;;  %v9725_v15 = vand.u32 2147483648, %v9704_v40 }
0x31ad   :  { %v18764_v26 = vpop.permute.xlu1 %18763  ;;  %vm9724_vm7 = vcmp.eq.f32.partialorder %v9704_v40, 0.0 }
0x31ae   :  { %17963 = vmatprep.subr.bf16.mxu1 %v17962_v36  ;;  %v18766_v44 = vunpack.i.h.bf16 %v18764_v26  ;;  %v18765_v13 = vunpack.i.l.bf16 %v18764_v26 }
0x31af   :  { %17965 = vmatpush3.bf16.msra.mxu1 %v17962_v36 }
0x31b0   :  { %v17966_v18 = vpack.c.bf16 %v18766_v44, %v18765_v13 }
0x31b1   :  { %v9855_v11 = vpop.permute.xlu1 %9854 }
0x31b2   :  { %v19374_v9 = vpop.eup %19373  ;;  %17967 = vmatprep.subr.bf16.mxu1 %v17966_v18 }
0x31b3   :  { %v9714_v14 = vmul.f32 %v19374_v9, %v9703_v52  ;;  %17969 = vmatpush3.bf16.msra.mxu1 %v17966_v18 }
0x31b5   :  { %v9716_v47 = vsel %vm9715_vm4, %v9703_v52, %v9714_v14 }
0x31b6   :  { %v9719_v49 = vsel %vm9717_vm5, %v9718_v55, %v9716_v47  ;;  %v19376_v39 = vpop.eup %19375  ;;  %16969 = vmatmul.mubr.msk.f32.vlgmr.msra.gmra.mrb[122].mxu1 %vm181_vm0, %v21790_v28 }
0x31b7   :  { %v9727_v54 = vadd.f32 1e-06, %v9719_v49  ;;  %v9721_v33 = vmul.f32 %v19376_v39, %v9704_v40  ;;  %16971 = vmatprep.mubr.msk.f32.mxu1 %vm181_vm0, %v21795_v38 }
0x31b9   :  { %19377 = vrcp.f32 %v9727_v54  ;;  %v9723_v63 = vsel %vm9722_vm6, %v9704_v40, %v9721_v33 }
0x31ba   :  { %v9726_v3 = vsel %vm9724_vm7, %v9725_v15, %v9723_v63  ;;  %16972 = vmatmul.mubr.msk.f32.gmra.mrb[124].mxu1 %vm181_vm0, %v21799_v53 }
0x31bb   :  { %v9728_v23 = vadd.f32 1e-06, %v9726_v3 }
0x31bd   :  { %19379 = vrcp.f32 %v9728_v23 }
0x31c3   :  { %v19378_v59 = vpop.eup %19377 }
0x31c4   :  { %v9730_v50 = vmul.f32 %v19378_v59, %v9711_v12 }
0x31c6   :  { %v21817_v16 = vadd.f32 %v15047_v42, %v9730_v50 }
0x31c7   :  { %v19380_v0 = vpop.eup %19379 }
0x31c8   :  { %16957 = vmatprep.mubr.msk.f32.mxu0 %vm181_vm0, %v21817_v16  ;;  %v9732_v2 = vmul.f32 %v19380_v0, %v9712_v41 }
0x31ca   :  { %v21822_v51 = vadd.f32 %v15047_v42, %v9732_v2 }
0x31cc   :  { %16958 = vmatmul.mubr.msk.f32.vlgmr.msra.gmra.mrb[90].mxu0 %vm181_vm0, %v21822_v51 }
0x3289   :  { %v16970_v10 = vpop.f32.mrb[122].mxu1 }
0x328a   :  { %v9941_v19 = vadd.f32 %v16970_v10, %v9855_v11  ;;  %v9935_v56 = vpop.f32.mrb[123].mxu1 }
0x328b   :  { %v9936_v6 = vadd.f32 %v9935_v56, %v9855_v11 }
0x328d   :  { %v16973_v17 = vpop.f32.mrb[124].mxu1  ;;  %v17970_v35 = vpack.c.bf16 %v9941_v19, %v9936_v6  ;;  %v21826_v37 = vpack.i.bf16 %v9941_v19, %v9936_v6 }
0x328e   :  { %v9951_v31 = vadd.f32 %v16973_v17, %v9855_v11  ;;  %v9945_v21 = vpop.f32.mrb[125].mxu1 }
0x328f   :  { %v9946_v60 = vadd.f32 %v9945_v21, %v9855_v11  ;;  %17972 = vmatprep.subr.msk.bf16.mxu0 %vm19885_vm2, %v17970_v35 }
0x3290   :  { %17975 = vmatpush3.bf16.xpose.msk.msra.mxu0 %vm19885_vm2, %v17970_v35 }
0x3291   :  { %v17976_v5 = vpack.c.bf16 %v9951_v31, %v9946_v60  ;;  %v21832_v20 = vpack.i.bf16 %v9951_v31, %v9946_v60 }
0x3293   :  { %17978 = vmatprep.subr.msk.bf16.mxu0 %vm19885_vm2, %v17976_v5 }
0x3298   :  { %17981 = vmatpush3.bf16.xpose.msk.msra.mxu0 %vm19885_vm2, %v17976_v5 }
0x329f   :  { %v16959_v7 = vpop.f32.mrb[90].mxu0 }
0x32a0   :  { %v9829_v25 = vpop.f32.mrb[91].mxu0  ;;  %v21842_v58 = vadd.f32 %v16959_v7, %v21804_v27 }
0x32a1   :  { %v21839_v48 = vadd.f32 %v21804_v27, %v9829_v25 }
0x32a3   :  { %16982 = vmatprep.mubr.msk.f32.mxu0 %vm291_vm1, %v21839_v48 }
0x32a4   :  { %16983 = vmatmul.mubr.msk.f32.vlgmr.msra.gmra.mrb[92].mxu0 %vm291_vm1, %v21842_v58 }
0x3377   :  { %v16984_v43 = vpop.f32.mrb[92].mxu0 }
0x3378   :  { %v10048_v4 = vmul.f32 0.35355338, %v16984_v43  ;;  %v10038_v29 = vpop.f32.mrb[93].mxu0 }
0x3379   :  { %v10047_v57 = vmul.f32 0.35355338, %v10038_v29 }
0x337a   :  { %v10050_v34 = vadd.f32 %v10048_v4, %v21849_v8 }
0x337b   :  { %v10049_v22 = vadd.f32 %v10047_v57, %v21852_v46 }
0x337c   :  { %v10054_v27 = vsel %vm181_vm0, %v10050_v34, -inf }
0x337d   :  { %10055 = vmax.xlane.f32.xlu1 %v10054_v27  ;;  %v10051_v52 = vsel %vm181_vm0, %v10049_v22, -inf }
0x337e   :  { %10052 = vmax.xlane.f32.xlu0 %v10051_v52 }
0x338e   :  { %18768 = vrot.lane.b32.xlu1 %v21826_v37, %s19632_s28 }
0x3392   :  { %18778 = vrot.lane.b32.xlu1 %v21826_v37, %s19633_s1 }
0x3396   :  { %18783 = vrot.lane.b32.xlu1 %v21832_v20, %s19633_s1 }
0x339a   :  { %10168 = vrot.lane.b32.xlu1 %v21842_v58, %s19633_s1 }
0x339e   :  { %18793 = vrot.lane.b32.xlu1 %v21832_v20, %s19636_s10 }
0x33a2   :  { %10548 = vrot.lane.b32.xlu1 %v21842_v58, %s19636_s10 }
0x340a   :  { %v10056_v1 = vpop.xlane.xlu1 %10055 }
0x340b   :  { %v10058_v32 = vsub.f32 %v10050_v34, %v10056_v1  ;;  %v10053_v61 = vpop.xlane.xlu0 %10052 }
0x340c   :  { %v10057_v30 = vsub.f32 %v10049_v22, %v10053_v61 }
0x340d   :  { %v10061_v40 = vmul.f32 1.442695, %v10058_v32 }
0x340e   :  { %v10059_v36 = vmul.f32 1.442695, %v10057_v30  ;;  %v18769_v26 = vpop.permute.xlu1 %18768 }
0x340f   :  { %19381 = vpow2.f32 %v10061_v40  ;;  %v18771_v44 = vunpack.i.h.bf16 %v18769_v26  ;;  %v18770_v13 = vunpack.i.l.bf16 %v18769_v26 }
0x3410   :  { %19383 = vpow2.f32 %v10059_v36 }
0x3411   :  { %v17982_v18 = vpack.c.bf16 %v18771_v44, %v18770_v13 }
0x3412   :  { %v18779_v54 = vpop.permute.xlu1 %18778 }
0x3413   :  { %17983 = vmatprep.subr.bf16.mxu1 %v17982_v18  ;;  %v18781_v15 = vunpack.i.h.bf16 %v18779_v54  ;;  %v18780_v63 = vunpack.i.l.bf16 %v18779_v54 }
0x3414   :  { %17985 = vmatpush3.bf16.msra.mxu1 %v17982_v18 }
0x3415   :  { %v17990_v12 = vpack.c.bf16 %v18781_v15, %v18780_v63 }
0x3416   :  { %v18784_v50 = vpop.permute.xlu1 %18783 }
0x3417   :  { %v18786_v11 = vunpack.i.h.bf16 %v18784_v50  ;;  %v18785_v10 = vunpack.i.l.bf16 %v18784_v50 }
0x3419   :  { %v19382_v9 = vpop.eup %19381  ;;  %v17996_v19 = vpack.c.bf16 %v18786_v11, %v18785_v10 }
0x341a   :  { %v10066_v14 = vsel %vm181_vm0, %v19382_v9, 0.0  ;;  %v19384_v55 = vpop.eup %19383  ;;  %v10169_v6 = vpop.permute.xlu1 %10168 }
0x341b   :  { %10067 = vadd.xlane.f32.xlu0 %v10066_v14  ;;  %v10063_v47 = vsel %vm181_vm0, %v19384_v55, 0.0 }
0x341e   :  { %v18794_v21 = vpop.permute.xlu1 %18793 }
0x341f   :  { %10064 = vadd.xlane.f32.xlu0 %v10063_v47  ;;  %v18796_v60 = vunpack.i.h.bf16 %v18794_v21  ;;  %v18795_v5 = vunpack.i.l.bf16 %v18794_v21 }
0x3421   :  { %v18016_v7 = vpack.c.bf16 %v18796_v60, %v18795_v5 }
0x3422   :  { %v10549_v43 = vpop.permute.xlu1 %10548 }
0x3435   :  { %18773 = vrot.lane.b32.xlu0 %v21832_v20, %s19632_s28 }
0x3439   :  { %10166 = vrot.lane.b32.xlu0 %v21839_v48, %s19633_s1 }
0x343d   :  { %18788 = vrot.lane.b32.xlu0 %v21826_v37, %s19636_s10 }
0x3441   :  { %10546 = vrot.lane.b32.xlu0 %v21839_v48, %s19636_s10 }
0x34a8   :  { %v10068_v49 = vpop.xlane.xlu0 %10067 }
0x34a9   :  { %19385 = vrcp.f32 %v10068_v49 }
0x34ac   :  { %v10065_v39 = vpop.xlane.xlu0 %10064 }
0x34ad   :  { %19387 = vrcp.f32 %v10065_v39 }
0x34b0   :  { %v18774_v33 = vpop.permute.xlu0 %18773 }
0x34b1   :  { %v18776_v3 = vunpack.i.h.bf16 %v18774_v33  ;;  %v18775_v23 = vunpack.i.l.bf16 %v18774_v33 }
0x34b3   :  { %v17986_v62 = vpack.c.bf16 %v18776_v3, %v18775_v23  ;;  %v19386_v59 = vpop.eup %19385 }
0x34b4   :  { %v10072_v0 = vmul.f32 %v19386_v59, %v19382_v9  ;;  %v10167_v2 = vpop.permute.xlu0 %10166 }
0x34b5   :  { %17987 = vmatprep.subr.bf16.mxu1 %v17986_v62 }
0x34b6   :  { %17989 = vmatpush3.bf16.msra.mxu1 %v17986_v62 }
0x34b7   :  { %v19388_v42 = vpop.eup %19387  ;;  %17992 = vmatprep.subr.msk.bf16.mxu1 %vm19885_vm2, %v17990_v12 }
0x34b8   :  { %v10070_v41 = vmul.f32 %v19388_v42, %v19384_v55  ;;  %v18789_v56 = vpop.permute.xlu0 %18788 }
0x34b9   :  { %v18791_v17 = vunpack.i.h.bf16 %v18789_v56  ;;  %v18790_v35 = vunpack.i.l.bf16 %v18789_v56 }
0x34ba   :  { %16993 = vmatprep.mubr.msk.f32.mxu1 %vm181_vm0, %v10070_v41 }
0x34bb   :  { %16994 = vmatmul.mubr.msk.f32.vlgmr.msra.gmra.mrb[126].mxu1 %vm181_vm0, %v10072_v0  ;;  %v18010_v31 = vpack.c.bf16 %v18791_v17, %v18790_v35 }
0x34bc   :  { %17004 = vmatprep.mubr.msk.f32.mxu1 %vm291_vm1, %v10167_v2  ;;  %v10547_v25 = vpop.permute.xlu0 %10546 }
0x34bf   :  { %17995 = vmatpush3.bf16.xpose.msk.msra.mxu1 %vm19885_vm2, %v17990_v12 }
0x34c0   :  { %17998 = vmatprep.subr.msk.bf16.mxu1 %vm19885_vm2, %v17996_v19 }
0x34c7   :  { %18001 = vmatpush3.bf16.xpose.msk.msra.mxu1 %vm19885_vm2, %v17996_v19 }
0x34c8   :  { %18012 = vmatprep.subr.msk.bf16.mxu1 %vm19885_vm2, %v18010_v31 }
0x34ce   :  { %17005 = vmatmul.mubr.msk.f32.vlgmr.msra.gmra.mrb[128].mxu1 %vm291_vm1, %v10169_v6 }
0x34cf   :  { %18015 = vmatpush3.bf16.xpose.msk.msra.mxu1 %vm19885_vm2, %v18010_v31  ;;  %17036 = vmatprep.mubr.msk.f32.mxu1 %vm291_vm1, %v10547_v25 }
0x34d0   :  { %18018 = vmatprep.subr.msk.bf16.mxu1 %vm19885_vm2, %v18016_v7 }
0x34d7   :  { %18021 = vmatpush3.bf16.xpose.msk.msra.mxu1 %vm19885_vm2, %v18016_v7 }
0x34de   :  { %17037 = vmatmul.mubr.msk.f32.vlgmr.msra.gmra.mrb[130].mxu1 %vm291_vm1, %v10549_v43 }
0x358e   :  { %v21902_v4 = vpop.f32.mrb[126].mxu1 }
0x358f   :  { %v21904_v29 = vpop.f32.mrb[127].mxu1 }
0x35a1   :  { %v17006_v57 = vpop.f32.mrb[128].mxu1 }
0x35a2   :  { %v10266_v34 = vmul.f32 0.35355338, %v17006_v57  ;;  %v10256_v22 = vpop.f32.mrb[129].mxu1 }
0x35a3   :  { %v10265_v27 = vmul.f32 0.35355338, %v10256_v22 }
0x35a4   :  { %v10268_v52 = vadd.f32 %v10266_v34, %v21849_v8 }
0x35a5   :  { %v10267_v1 = vadd.f32 %v10265_v27, %v21852_v46 }
0x35a6   :  { %v10272_v32 = vsel %vm181_vm0, %v10268_v52, -inf }
0x35a7   :  { %10273 = vmax.xlane.f32.xlu1 %v10272_v32  ;;  %v10269_v61 = vsel %vm181_vm0, %v10267_v1, -inf }
0x35a8   :  { %10270 = vmax.xlane.f32.xlu0 %v10269_v61 }
0x35b1   :  { %v17038_v30 = vpop.f32.mrb[130].mxu1 }
0x35b2   :  { %v10636_v40 = vpop.f32.mrb[131].mxu1  ;;  %v10646_v36 = vmul.f32 0.35355338, %v17038_v30 }
0x35b3   :  { %v10645_v56 = vmul.f32 0.35355338, %v10636_v40  ;;  %v9747_v40 = vld [vmem:[%s22451_s12 + $0x8] sm:$0xff] }
0x35b4   :  { %v10648_v26 = vadd.f32 %v10646_v36, %v21849_v8  ;;  %v9746_v36 = vld [vmem:[%s22451_s12] sm:$0xff] }
0x35b5   :  { %v10647_v6 = vadd.f32 %v10645_v56, %v21852_v46 }
0x35b6   :  { %v10652_v44 = vsel %vm181_vm0, %v10648_v26, -inf }
0x35b7   :  { %v10649_v17 = vsel %vm181_vm0, %v10647_v6, -inf }
0x35b8   :  { %18798 = vrot.lane.b32.xlu1 %v21826_v37, %s19631_s0 }
0x35bc   :  { %18808 = vrot.lane.b32.xlu1 %v21826_v37, %s19639_s16 }
0x35c0   :  { %18813 = vrot.lane.b32.xlu1 %v21832_v20, %s19639_s16 }
0x35c4   :  { %10849 = vrot.lane.b32.xlu1 %v21842_v58, %s19639_s16 }
0x35e8   :  { %10653 = vmax.xlane.f32.xlu1 %v10652_v44 }
0x35f9   :  { %18818 = vrot.lane.b32.xlu1 %v21826_v37, %s19635_s7 }
0x3634   :  { %v10274_v13 = vpop.xlane.xlu1 %10273 }
0x3635   :  { %v10276_v18 = vsub.f32 %v10268_v52, %v10274_v13  ;;  %v10271_v9 = vpop.xlane.xlu0 %10270 }
0x3636   :  { %v10275_v14 = vsub.f32 %v10267_v1, %v10271_v9 }
0x3637   :  { %v10279_v55 = vmul.f32 1.442695, %v10276_v18 }
0x3638   :  { %v10277_v47 = vmul.f32 1.442695, %v10275_v14  ;;  %v18799_v49 = vpop.permute.xlu1 %18798 }
0x3639   :  { %19389 = vpow2.f32 %v10279_v55  ;;  %v18801_v39 = vunpack.i.h.bf16 %v18799_v49  ;;  %v18800_v54 = vunpack.i.l.bf16 %v18799_v49 }
0x363a   :  { %19391 = vpow2.f32 %v10277_v47 }
0x363b   :  { %v18002_v58 = vpack.c.bf16 %v18801_v39, %v18800_v54 }
0x363c   :  { %v18809_v33 = vpop.permute.xlu1 %18808 }
0x363d   :  { %v18811_v15 = vunpack.i.h.bf16 %v18809_v33  ;;  %v18810_v63 = vunpack.i.l.bf16 %v18809_v33  ;;  %18003 = vmatprep.subr.bf16.mxu0 %v18002_v58 }
0x363e   :  { %18005 = vmatpush3.bf16.msra.mxu0 %v18002_v58 }
0x363f   :  { %v18030_v3 = vpack.c.bf16 %v18811_v15, %v18810_v63 }
0x3640   :  { %v18814_v23 = vpop.permute.xlu1 %18813 }
0x3641   :  { %v18816_v62 = vunpack.i.h.bf16 %v18814_v23  ;;  %v18815_v12 = vunpack.i.l.bf16 %v18814_v23  ;;  %18032 = vmatprep.subr.msk.bf16.mxu1 %vm19885_vm2, %v18030_v3 }
0x3642   :  { %18035 = vmatpush3.bf16.xpose.msk.msra.mxu1 %vm19885_vm2, %v18030_v3 }
0x3643   :  { %v19390_v59 = vpop.eup %19389  ;;  %v18036_v42 = vpack.c.bf16 %v18816_v62, %v18815_v12 }
0x3644   :  { %v10284_v50 = vsel %vm181_vm0, %v19390_v59, 0.0  ;;  %v19392_v41 = vpop.eup %19391  ;;  %v10850_v2 = vpop.permute.xlu1 %10849 }
0x3645   :  { %18038 = vmatprep.subr.msk.bf16.mxu1 %vm19885_vm2, %v18036_v42  ;;  %10285 = vadd.xlane.f32.xlu0 %v10284_v50  ;;  %v10281_v0 = vsel %vm181_vm0, %v19392_v41, 0.0 }
0x3649   :  { %10282 = vadd.xlane.f32.xlu0 %v10281_v0 }
0x364a   :  { %18041 = vmatpush3.bf16.xpose.msk.msra.mxu1 %vm19885_vm2, %v18036_v42 }
0x365f   :  { %18803 = vrot.lane.b32.xlu0 %v21832_v20, %s19631_s0 }
0x3663   :  { %10847 = vrot.lane.b32.xlu0 %v21839_v48, %s19639_s16 }
0x3675   :  { %v10654_v11 = vpop.xlane.xlu1 %10653 }
0x3676   :  { %v10656_v10 = vsub.f32 %v10648_v26, %v10654_v11 }
0x3678   :  { %v10659_v19 = vmul.f32 1.442695, %v10656_v10 }
0x3679   :  { %v18819_v18 = vpop.permute.xlu1 %18818 }
0x367a   :  { %19393 = vpow2.f32 %v10659_v19  ;;  %v18821_v49 = vunpack.i.h.bf16 %v18819_v18  ;;  %v18820_v39 = vunpack.i.l.bf16 %v18819_v18 }
0x367c   :  { %v18022_v3 = vpack.c.bf16 %v18821_v49, %v18820_v39 }
0x3682   :  { %10650 = vmax.xlane.f32.xlu0 %v10649_v17 }
0x3684   :  { %v21938_v35 = vpop.eup %19393 }
0x3685   :  { %v10664_v31 = vsel %vm181_vm0, %v21938_v35, 0.0 }
0x3686   :  { %10665 = vadd.xlane.f32.xlu0 %v10664_v31 }
0x36d2   :  { %v10286_v21 = vpop.xlane.xlu0 %10285 }
0x36d3   :  { %19395 = vrcp.f32 %v10286_v21 }
0x36d6   :  { %v10283_v48 = vpop.xlane.xlu0 %10282 }
0x36d7   :  { %19397 = vrcp.f32 %v10283_v48 }
0x36da   :  { %v18804_v60 = vpop.permute.xlu0 %18803 }
0x36db   :  { %v18806_v5 = vunpack.i.h.bf16 %v18804_v60  ;;  %v18805_v7 = vunpack.i.l.bf16 %v18804_v60 }
0x36dd   :  { %v18006_v25 = vpack.c.bf16 %v18806_v5, %v18805_v7  ;;  %v19396_v57 = vpop.eup %19395 }
0x36de   :  { %v10848_v43 = vpop.permute.xlu0 %10847  ;;  %v10290_v27 = vmul.f32 %v19396_v57, %v19390_v59 }
0x36df   :  { %18007 = vmatprep.subr.bf16.mxu0 %v18006_v25  ;;  %17063 = vmatprep.mubr.msk.f32.mxu1 %vm291_vm1, %v10848_v43 }
0x36e0   :  { %18009 = vmatpush3.bf16.msra.mxu0 %v18006_v25  ;;  %17064 = vmatmul.mubr.msk.f32.vlgmr.msra.gmra.mrb[132].mxu1 %vm291_vm1, %v10850_v2 }
0x36e1   :  { %v19398_v34 = vpop.eup %19397  ;;  %17018 = vmatprep.subr.mxu0 %v9747_v40 }
0x36e2   :  { %v10288_v22 = vmul.f32 %v19398_v34, %v19392_v41 }
0x36e4   :  { %17015 = vmatprep.mubr.msk.f32.mxu0 %vm181_vm0, %v10288_v22 }
0x36e5   :  { %17016 = vmatmul.mubr.msk.f32.vlgmr.msra.gmra.mrb[94].mxu0 %vm181_vm0, %v10290_v27 }
0x36e6   :  { %17019 = vmatpush3.msra.mxu0 %v9747_v40 }
0x36e7   :  { %17023 = vmatprep.subr.mxu0 %v9746_v36 }
0x370f   :  { %v10651_v52 = vpop.xlane.xlu0 %10650 }
0x3710   :  { %v10655_v1 = vsub.f32 %v10647_v6, %v10651_v52  ;;  %v9749_v52 = vld [vmem:[%s22451_s12 + $0x18] sm:$0xff] }
0x3712   :  { %v10657_v32 = vmul.f32 1.442695, %v10655_v1 }
0x3713   :  { %v10666_v26 = vpop.xlane.xlu0 %10665 }
0x3714   :  { %19399 = vpow2.f32 %v10657_v32 }
0x371e   :  { %v19400_v61 = vpop.eup %19399 }
0x371f   :  { %v10661_v30 = vsel %vm181_vm0, %v19400_v61, 0.0 }
0x3720   :  { %10662 = vadd.xlane.f32.xlu0 %v10661_v30  ;;  %v15095_v30 = vld [vmem:[%s22452_s20] ss:$0 sm:$0xff] }
0x3736   :  { %18823 = vrot.lane.b32.xlu0 %v21832_v20, %s19635_s7 }
0x37ad   :  { %v10663_v44 = vpop.xlane.xlu0 %10662 }
0x37ae   :  { %19401 = vrcp.f32 %v10663_v44 }
0x37af   :  { %19403 = vrcp.f32 %v10666_v26 }
0x37b1   :  { %v18824_v23 = vpop.permute.xlu0 %18823 }
0x37b2   :  { %v18825_v62 = vunpack.i.l.bf16 %v18824_v23 }
0x37b3   :  { %v17065_v13 = vpop.f32.mrb[132].mxu1 }
0x37b4   :  { %v10947_v9 = vmul.f32 0.35355338, %v17065_v13  ;;  %v10937_v14 = vpop.f32.mrb[133].mxu1 }
0x37b5   :  { %v10946_v55 = vmul.f32 0.35355338, %v10937_v14 }
0x37b6   :  { %v10949_v47 = vadd.f32 %v10947_v9, %v21849_v8 }
0x37b7   :  { %v10948_v54 = vadd.f32 %v10946_v55, %v21852_v46  ;;  %v18826_v46 = vunpack.i.h.bf16 %v18824_v23  ;;  %v11218_v23 = vld [vmem:[%s22453_s27 + $0x10] sm:$0xff] }
0x37b8   :  { %v17017_v58 = vpop.f32.mrb[94].mxu0  ;;  %v10953_v33 = vsel %vm181_vm0, %v10949_v47, -inf  ;;  %v19402_v8 = vpop.eup %19401 }
0x37b9   :  { %10954 = vmax.xlane.f32.xlu0 %v10953_v33  ;;  %v10375_v15 = vpop.f32.mrb[95].mxu0  ;;  %v10950_v63 = vsel %vm181_vm0, %v10948_v54, -inf  ;;  %v10668_v12 = vmul.f32 %v19402_v8, %v19400_v61  ;;  %v18026_v59 = vpack.c.bf16 %v18826_v46, %v18825_v62  ;;  %v19404_v42 = vpop.eup %19403  ;;  %v11219_v46 = vld [vmem:[%s22453_s27 + $0x18] sm:$0xff] }
0x37ba   :  { %10951 = vmax.xlane.f32.xlu1 %v10950_v63  ;;  %17020 = vmatprep.mubr.msk.f32.mxu0 %vm291_vm1, %v10375_v15  ;;  %v10670_v50 = vmul.f32 %v19404_v42, %v21938_v35  ;;  %v11216_v63 = vld [vmem:[%s22453_s27] sm:$0xff]  ;;  %v18054_v62 = vpack.c.bf16 %v11219_v46, %v11218_v23  ;;  %v11223_v42 = vld [vmem:[%s22454_s23 + $0x10] sm:$0xff] }
0x37bb   :  { %17021 = vmatmul.mubr.msk.f32.vlgmr.msra.gmra.mrb[96].mxu0 %vm291_vm1, %v17017_v58  ;;  %v15101_v46 = vld [vmem:[%s22458_s18] ss:$0 sm:$0xff] }
0x37bc   :  { %17024 = vmatpush3.msra.mxu0 %v9746_v36  ;;  %17025 = vmatprep.mubr.msk.f32.mxu0 %vm291_vm1, %v21904_v29  ;;  %v9748_v29 = vld [vmem:[%s22451_s12 + $0x10] sm:$0xff] }
0x37bd   :  { %18023 = vmatprep.subr.bf16.mxu0 %v18022_v3 }
0x37c3   :  { %17026 = vmatmul.mubr.msk.f32.vlgmr.msra.gmra.mrb[96].mxu0 %vm291_vm1, %v21902_v4 }
0x37c4   :  { %18025 = vmatpush3.bf16.msra.mxu0 %v18022_v3  ;;  %17047 = vmatprep.mubr.msk.f32.mxu0 %vm181_vm0, %v10668_v12  ;;  %v11217_v3 = vld [vmem:[%s22453_s27 + $0x8] sm:$0xff]  ;;  %v11221_v12 = vld [vmem:[%s22454_s23] sm:$0xff] }
0x37c5   :  { %18027 = vmatprep.subr.bf16.mxu0 %v18026_v59  ;;  %v18050_v8 = vpack.c.bf16 %v11217_v3, %v11216_v63 }
0x37c8   :  { %18029 = vmatpush3.bf16.msra.mxu0 %v18026_v59  ;;  %v11222_v59 = vld [vmem:[%s22454_s23 + $0x8] sm:$0xff] }
0x37c9   :  { %17050 = vmatprep.subr.mxu0 %v9748_v29 }
0x37cb   :  { %17048 = vmatmul.mubr.msk.f32.vlgmr.msra.gmra.mrb[98].mxu0 %vm181_vm0, %v10670_v50  ;;  %v18058_v50 = vpack.c.bf16 %v11222_v59, %v11221_v12 }
0x37cc   :  { %17051 = vmatpush3.msra.mxu0 %v9748_v29  ;;  %v11224_v29 = vld [vmem:[%s22454_s23 + $0x18] sm:$0xff] }
0x37cd   :  { %18059 = vmatprep.subr.bf16.mxu1 %v18058_v50 }
0x37ce   :  { %18061 = vmatpush3.bf16.msra.mxu1 %v18058_v50 }
0x3846   :  { %v10955_v41 = vpop.xlane.xlu0 %10954 }
0x3847   :  { %v10957_v0 = vsub.f32 %v10949_v47, %v10955_v41  ;;  %v10952_v2 = vpop.xlane.xlu1 %10951  ;;  %v18062_v41 = vpack.c.bf16 %v11224_v29, %v11223_v42 }
0x3848   :  { %v10956_v11 = vsub.f32 %v10948_v54, %v10952_v2  ;;  %v11226_v2 = vld [vmem:[%s22454_s23 + $0x28] sm:$0xff] }
0x3849   :  { %v10960_v10 = vmul.f32 1.442695, %v10957_v0  ;;  %v11225_v0 = vld [vmem:[%s22454_s23 + $0x20] sm:$0xff]  ;;  %18063 = vmatprep.subr.bf16.mxu1 %v18062_v41 }
0x384a   :  { %v10958_v19 = vmul.f32 1.442695, %v10956_v11  ;;  %v18066_v11 = vpack.c.bf16 %v11226_v2, %v11225_v0  ;;  %18065 = vmatpush3.bf16.msra.mxu1 %v18062_v41 }
0x384b   :  { %19405 = vpow2.f32 %v10960_v10  ;;  %v11227_v10 = vld [vmem:[%s22454_s23 + $0x30] sm:$0xff] }
0x384c   :  { %19407 = vpow2.f32 %v10958_v19  ;;  %v11228_v19 = vld [vmem:[%s22454_s23 + $0x38] sm:$0xff]  ;;  %18067 = vmatprep.subr.bf16.mxu1 %v18066_v11 }
0x384e   :  { %18069 = vmatpush3.bf16.msra.mxu1 %v18066_v11 }
0x3855   :  { %v19406_v4 = vpop.eup %19405 }
0x3856   :  { %v19408_v56 = vpop.eup %19407  ;;  %v10965_v6 = vsel %vm181_vm0, %v19406_v4, 0.0 }
0x3857   :  { %10966 = vadd.xlane.f32.xlu0 %v10965_v6  ;;  %v10962_v17 = vsel %vm181_vm0, %v19408_v56, 0.0  ;;  %v11230_v6 = vld [vmem:[%s22454_s23 + $0x48] sm:$0xff] }
0x3858   :  { %10963 = vadd.xlane.f32.xlu1 %v10962_v17 }
0x3869   :  { %18828 = vrot.lane.b32.xlu1 %v21826_v37, %s19638_s15 }
0x386d   :  { %18833 = vrot.lane.b32.xlu0 %v21832_v20, %s19638_s15 }
0x389e   :  { %v17049_v35 = vpop.f32.mrb[98].mxu0 }
0x389f   :  { %v10755_v31 = vpop.f32.mrb[99].mxu0 }
0x38a0   :  { %17052 = vmatprep.mubr.msk.f32.mxu0 %vm291_vm1, %v10755_v31  ;;  %v11232_v31 = vld [vmem:[%s22454_s23 + $0x58] sm:$0xff] }
0x38a1   :  { %17053 = vmatmul.mubr.msk.f32.vlgmr.msra.gmra.mrb[96].mxu0 %vm291_vm1, %v17049_v35  ;;  %v11231_v35 = vld [vmem:[%s22454_s23 + $0x50] sm:$0xff] }
0x38e4   :  { %v10967_v21 = vpop.xlane.xlu0 %10966 }
0x38e5   :  { %v10964_v48 = vpop.xlane.xlu1 %10963 }
0x38e6   :  { %19409 = vrcp.f32 %v10964_v48  ;;  %v11233_v48 = vld [vmem:[%s22454_s23 + $0x60] sm:$0xff] }
0x38e7   :  { %19411 = vrcp.f32 %v10967_v21  ;;  %v18078_v21 = vpack.c.bf16 %v11232_v31, %v11231_v35 }
0x38e8   :  { %v18834_v60 = vpop.permute.xlu0 %18833 }
0x38e9   :  { %v18829_v5 = vpop.permute.xlu1 %18828  ;;  %v18836_v7 = vunpack.i.h.bf16 %v18834_v60  ;;  %v18835_v25 = vunpack.i.l.bf16 %v18834_v60  ;;  %v11234_v60 = vld [vmem:[%s22454_s23 + $0x68] sm:$0xff] }
0x38ea   :  { %v18831_v43 = vunpack.i.h.bf16 %v18829_v5  ;;  %v18830_v37 = vunpack.i.l.bf16 %v18829_v5  ;;  %v18082_v5 = vpack.c.bf16 %v11234_v60, %v11233_v48  ;;  %v15105_v48 = vld [vmem:[%s22440_s5 + $0x28] sm:$0xff]  ;;  %v15106_v60 = vld [vmem:[%s22440_s5 + $0x30] sm:$0xff] }
0x38eb   :  { %v18046_v34 = vpack.c.bf16 %v18836_v7, %v18835_v25 }
0x38ec   :  { %v18042_v57 = vpack.c.bf16 %v18831_v43, %v18830_v37 }
0x38ee   :  { %18043 = vmatprep.subr.bf16.mxu0 %v18042_v57 }
0x38ef   :  { %18045 = vmatpush3.bf16.msra.mxu0 %v18042_v57 }
0x38f0   :  { %v19410_v20 = vpop.eup %19409  ;;  %18047 = vmatprep.subr.bf16.mxu0 %v18046_v34 }
0x38f1   :  { %v19412_v22 = vpop.eup %19411  ;;  %v10969_v27 = vmul.f32 %v19410_v20, %v19408_v56  ;;  %v11229_v56 = vld [vmem:[%s22454_s23 + $0x40] sm:$0xff] }
0x38f2   :  { %v10971_v1 = vmul.f32 %v19412_v22, %v19406_v4  ;;  %v18070_v4 = vpack.c.bf16 %v11228_v19, %v11227_v10  ;;  %v18074_v17 = vpack.c.bf16 %v11230_v6, %v11229_v56 }
0x38f3   :  { %18049 = vmatpush3.bf16.msra.mxu0 %v18046_v34  ;;  %17074 = vmatprep.mubr.msk.f32.mxu0 %vm181_vm0, %v10969_v27 }
0x38f4   :  { %17077 = vmatprep.subr.mxu0 %v9749_v52  ;;  %18071 = vmatprep.subr.bf16.mxu1 %v18070_v4 }
0x38f5   :  { %18073 = vmatpush3.bf16.msra.mxu1 %v18070_v4 }
0x38f6   :  { %17075 = vmatmul.mubr.msk.f32.vlgmr.msra.gmra.mrb[100].mxu0 %vm181_vm0, %v10971_v1  ;;  %18075 = vmatprep.subr.bf16.mxu1 %v18074_v17 }
0x38f7   :  { %17078 = vmatpush3.msra.mxu0 %v9749_v52 }
0x38f8   :  { %18051 = vmatprep.subr.bf16.mxu0 %v18050_v8 }
0x38f9   :  { %18077 = vmatpush3.bf16.msra.mxu1 %v18074_v17 }
0x38fa   :  { %18079 = vmatprep.subr.bf16.mxu1 %v18078_v21 }
0x38fd   :  { %18081 = vmatpush3.bf16.msra.mxu1 %v18078_v21  ;;  %v15104_v21 = vld [vmem:[%s22440_s5 + $0x20] sm:$0xff] }
0x38fe   :  { %18083 = vmatprep.subr.bf16.mxu1 %v18082_v5 }
0x3901   :  { %18085 = vmatpush3.bf16.msra.mxu1 %v18082_v5  ;;  %v18090_v5 = vpack.c.bf16 %v15105_v48, %v15104_v21 }
0x39c9   :  { %v17076_v32 = vpop.f32.mrb[100].mxu0 }
0x39ca   :  { %v11056_v61 = vpop.f32.mrb[101].mxu0 }
0x39cb   :  { %17079 = vmatprep.mubr.msk.f32.mxu0 %vm291_vm1, %v11056_v61 }
0x39cc   :  { %17080 = vmatmul.mubr.msk.f32.vlgmr.msra.gmra.mrb[96].mxu0 %vm291_vm1, %v17076_v32 }
0x39cd   :  { %18053 = vmatpush3.bf16.msra.mxu0 %v18050_v8 }
0x39ce   :  { %18055 = vmatprep.subr.bf16.mxu0 %v18054_v62 }
0x39d1   :  { %18057 = vmatpush3.bf16.msra.mxu0 %v18054_v62 }
0x39d2   :  { %18091 = vmatprep.subr.bf16.mxu0 %v18090_v5 }
0x3a9f   :  { %v17081_v40 = vpop.f32.mrb[96].mxu0 }
0x3aa0   :  { %v11155_v36 = vadd.f32 %v17081_v40, %v15095_v30  ;;  %v11137_v26 = vpop.f32.mrb[97].mxu0 }
0x3aa1   :  { %v11154_v44 = vadd.f32 %v15095_v30, %v11137_v26  ;;  %v15096_v26 = vld [vmem:[%s22455_s26] ss:$0 sm:$0xff] }
0x3aa2   :  { %v11157_v13 = vadd.f32 %v11155_v36, %v21822_v51 }
0x3aa3   :  { %v11156_v18 = vadd.f32 %v11154_v44, %v21817_v16 }
0x3aa4   :  { %v11163_v9 = vsel %vm181_vm0, %v11157_v13, 0.0 }
0x3aa5   :  { %11164 = vadd.xlane.f32.xlu0 %v11163_v9  ;;  %v11160_v14 = vsel %vm181_vm0, %v11156_v18, 0.0 }
0x3aa6   :  { %11161 = vadd.xlane.f32.xlu1 %v11160_v14  ;;  %v15097_v14 = vld [vmem:[%s22456_s13] ss:$0 sm:$0xff] }
0x3b32   :  { %v11165_v55 = vpop.xlane.xlu0 %11164 }
0x3b33   :  { %v11167_v47 = vmul.f32 0.03125, %v11165_v55  ;;  %v11162_v49 = vpop.xlane.xlu1 %11161 }
0x3b34   :  { %v11166_v39 = vmul.f32 0.03125, %v11162_v49 }
0x3b35   :  { %v21983_v54 = vsub.f32 %v11157_v13, %v11167_v47 }
0x3b36   :  { %v21985_v58 = vsub.f32 %v11156_v18, %v11166_v39 }
0x3b37   :  { %v11171_v16 = vmul.f32 %v21983_v54, %v21983_v54  ;;  %v11187_v44 = vmul.f32 %v15096_v26, %v21983_v54  ;;  %v15098_v54 = vld [vmem:[%s22457_s22] ss:$0 sm:$0xff] }
0x3b38   :  { %v11170_v51 = vmul.f32 %v21985_v58, %v21985_v58  ;;  %v11186_v18 = vmul.f32 %v15096_v26, %v21985_v58 }
0x3b39   :  { %v11175_v33 = vsel %vm181_vm0, %v11171_v16, 0.0  ;;  %v11235_v16 = vld [vmem:[%s22454_s23 + $0x70] sm:$0xff] }
0x3b3a   :  { %11176 = vadd.xlane.f32.xlu0 %v11175_v33  ;;  %v11172_v15 = vsel %vm181_vm0, %v11170_v51, 0.0  ;;  %v11236_v51 = vld [vmem:[%s22454_s23 + $0x78] sm:$0xff] }
0x3b3b   :  { %11173 = vadd.xlane.f32.xlu1 %v11172_v15  ;;  %v18086_v33 = vpack.c.bf16 %v11236_v51, %v11235_v16 }
0x3b3d   :  { %18087 = vmatprep.subr.bf16.mxu1 %v18086_v33 }
0x3b3e   :  { %18089 = vmatpush3.bf16.msra.mxu1 %v18086_v33  ;;  %v15114_v33 = vld [vmem:[%s22442_s25 + $0x1] ss:$0 sm:$0xff] }
0x3bc7   :  { %v11177_v7 = vpop.xlane.xlu0 %11176 }
0x3bc8   :  { %v11179_v25 = vmul.f32 0.032258064, %v11177_v7  ;;  %v11174_v43 = vpop.xlane.xlu1 %11173  ;;  %v15107_v7 = vld [vmem:[%s22440_s5 + $0x38] sm:$0xff] }
0x3bc9   :  { %v11178_v37 = vmul.f32 0.032258064, %v11174_v43 }
0x3bca   :  { %19413 = vrsqrt.f32 %v11179_v25  ;;  %vm11197_vm8 = vcmp.eq.f32.partialorder %v11179_v25, inf  ;;  %v11200_v22 = vand.u32 2147483648, %v11179_v25  ;;  %vm11199_vm9 = vcmp.eq.f32.partialorder %v11179_v25, 0.0 }
0x3bcb   :  { %19415 = vrsqrt.f32 %v11178_v37  ;;  %vm11190_vm10 = vcmp.eq.f32.partialorder %v11178_v37, inf  ;;  %v11193_v1 = vand.u32 2147483648, %v11178_v37  ;;  %vm11192_vm11 = vcmp.eq.f32.partialorder %v11178_v37, 0.0 }
0x3bd4   :  { %v19414_v57 = vpop.eup %19413 }
0x3bd5   :  { %v19416_v34 = vpop.eup %19415  ;;  %v11196_v20 = vmul.f32 %v19414_v57, %v11179_v25 }
0x3bd6   :  { %v11189_v27 = vmul.f32 %v19416_v34, %v11178_v37 }
0x3bd7   :  { %v11198_v52 = vsel %vm11197_vm8, %v11179_v25, %v11196_v20  ;;  %v18094_v25 = vpack.c.bf16 %v15107_v7, %v15106_v60 }
0x3bd8   :  { %v11201_v32 = vsel %vm11199_vm9, %v11200_v22, %v11198_v52  ;;  %v11191_v61 = vsel %vm11190_vm10, %v11178_v37, %v11189_v27 }
0x3bd9   :  { %v11203_v30 = vadd.f32 1e-06, %v11201_v32  ;;  %v11194_v40 = vsel %vm11192_vm11, %v11193_v1, %v11191_v61 }
0x3bda   :  { %v11202_v36 = vadd.f32 1e-06, %v11194_v40 }
0x3bdb   :  { %19417 = vrcp.f32 %v11203_v30 }
0x3bdc   :  { %19419 = vrcp.f32 %v11202_v36 }
0x3be5   :  { %v19418_v13 = vpop.eup %19417 }
0x3be6   :  { %v19420_v9 = vpop.eup %19419  ;;  %v11207_v55 = vmul.f32 %v19418_v13, %v11187_v44  ;;  %v15102_v13 = vld [vmem:[%s19819_s4] ss:$0 sm:$0xff] }
0x3be7   :  { %v11205_v47 = vmul.f32 %v19420_v9, %v11186_v18 }
0x3be8   :  { %v11215_v39 = vadd.f32 %v15097_v14, %v11207_v55 }
0x3be9   :  { %v11214_v49 = vadd.f32 %v15097_v14, %v11205_v47  ;;  %v15103_v47 = vld [vmem:[%s19824_s21] ss:$0 sm:$0xff] }
0x3beb   :  { %17090 = vmatprep.mubr.msk.f32.mxu0 %vm181_vm0, %v11214_v49 }
0x3bec   :  { %17091 = vmatmul.mubr.msk.f32.vlgmr.msra.gmra.mrb[102].mxu0 %vm181_vm0, %v11215_v39 }
0x3bed   :  { %18093 = vmatpush3.bf16.msra.mxu0 %v18090_v5 }
0x3bee   :  { %18095 = vmatprep.subr.bf16.mxu0 %v18094_v25 }
0x3bf1   :  { %18097 = vmatpush3.bf16.msra.mxu0 %v18094_v25 }
0x3cbf   :  { %v17092_v15 = vpop.f32.mrb[102].mxu0 }
0x3cc0   :  { %v11322_v63 = vadd.f32 %v17092_v15, %v15098_v54  ;;  %v11316_v58 = vpop.f32.mrb[103].mxu0 }
0x3cc1   :  { %v11317_v3 = vadd.f32 %v15098_v54, %v11316_v58 }
0x3cc2   :  { %v11326_v8 = vmax.f32 %v11322_v63, 0.0 }
0x3cc3   :  { %v11325_v23 = vmax.f32 %v11317_v3, 0.0 }
0x3cc5   :  { %17125 = vmatprep.mubr.f32.mxu1 %v11325_v23 }
0x3cc6   :  { %17126 = vmatmul.mubr.f32.vlgmr.msra.gmra.mrb[134].mxu1 %v11326_v8 }
0x3d99   :  { %v17127_v62 = vpop.f32.mrb[134].mxu1 }
0x3d9a   :  { %v11405_v12 = vadd.f32 %v17127_v62, %v15101_v46  ;;  %v11399_v59 = vpop.f32.mrb[135].mxu1 }
0x3d9b   :  { %v11400_v42 = vadd.f32 %v15101_v46, %v11399_v59 }
0x3d9c   :  { %v11409_v50 = vadd.f32 %v11405_v12, %v11215_v39 }
0x3d9d   :  { %v11408_v29 = vadd.f32 %v11400_v42, %v11214_v49 }
0x3d9e   :  { %v11415_v41 = vsel %vm181_vm0, %v11409_v50, 0.0 }
0x3d9f   :  { %11416 = vadd.xlane.f32.xlu0 %v11415_v41  ;;  %v11412_v0 = vsel %vm181_vm0, %v11408_v29, 0.0 }
0x3da0   :  { %11413 = vadd.xlane.f32.xlu1 %v11412_v0 }
0x3e2c   :  { %v11417_v2 = vpop.xlane.xlu0 %11416 }
0x3e2d   :  { %v11419_v11 = vmul.f32 0.03125, %v11417_v2  ;;  %v11414_v10 = vpop.xlane.xlu1 %11413 }
0x3e2e   :  { %v11418_v19 = vmul.f32 0.03125, %v11414_v10 }
0x3e2f   :  { %v11421_v4 = vsub.f32 %v11409_v50, %v11419_v11  ;;  %v22065_v11 = vld [vmem:[%s22443_s29] sm:$0xff] }
0x3e30   :  { %v11420_v56 = vsub.f32 %v11408_v29, %v11418_v19  ;;  %v22069_v19 = vld [vmem:[%s22443_s29 + $0x8] sm:$0xff] }
0x3e31   :  { %v11423_v6 = vmul.f32 %v11421_v4, %v11421_v4  ;;  %v11439_v18 = vmul.f32 %v15102_v13, %v11421_v4 }
0x3e32   :  { %v11422_v17 = vmul.f32 %v11420_v56, %v11420_v56  ;;  %v11438_v14 = vmul.f32 %v15102_v13, %v11420_v56 }
0x3e33   :  { %v11427_v35 = vsel %vm181_vm0, %v11423_v6, 0.0 }
0x3e34   :  { %11428 = vadd.xlane.f32.xlu0 %v11427_v35  ;;  %v11424_v31 = vsel %vm181_vm0, %v11422_v17, 0.0 }
0x3e35   :  { %11425 = vadd.xlane.f32.xlu1 %v11424_v31 }
0x3ec1   :  { %v11429_v43 = vpop.xlane.xlu0 %11428 }
0x3ec2   :  { %v11431_v37 = vmul.f32 0.032258064, %v11429_v43  ;;  %v11426_v57 = vpop.xlane.xlu1 %11425 }
0x3ec3   :  { %v11430_v34 = vmul.f32 0.032258064, %v11426_v57 }
0x3ec4   :  { %19421 = vrsqrt.f32 %v11431_v37  ;;  %vm11449_vm13 = vcmp.eq.f32.partialorder %v11431_v37, inf  ;;  %v11452_v52 = vand.u32 2147483648, %v11431_v37  ;;  %vm11451_vm14 = vcmp.eq.f32.partialorder %v11431_v37, 0.0 }
0x3ec5   :  { %19423 = vrsqrt.f32 %v11430_v34  ;;  %vm11442_vm15 = vcmp.eq.f32.partialorder %v11430_v34, inf  ;;  %v11445_v61 = vand.u32 2147483648, %v11430_v34  ;;  %vm11444_vm3 = vcmp.eq.f32.partialorder %v11430_v34, 0.0 }
0x3ece   :  { %v19422_v20 = vpop.eup %19421 }
0x3ecf   :  { %v19424_v22 = vpop.eup %19423  ;;  %v11448_v27 = vmul.f32 %v19422_v20, %v11431_v37 }
0x3ed0   :  { %v11441_v1 = vmul.f32 %v19424_v22, %v11430_v34 }
0x3ed1   :  { %v11450_v32 = vsel %vm11449_vm13, %v11431_v37, %v11448_v27 }
0x3ed2   :  { %v11453_v30 = vsel %vm11451_vm14, %v11452_v52, %v11450_v32  ;;  %v11443_v40 = vsel %vm11442_vm15, %v11430_v34, %v11441_v1 }
0x3ed3   :  { %v11455_v36 = vadd.f32 1e-06, %v11453_v30  ;;  %v11446_v26 = vsel %vm11444_vm3, %v11445_v61, %v11443_v40 }
0x3ed4   :  { %v11454_v44 = vadd.f32 1e-06, %v11446_v26 }
0x3ed5   :  { %19425 = vrcp.f32 %v11455_v36 }
0x3ed6   :  { %19427 = vrcp.f32 %v11454_v44 }
0x3edf   :  { %v19426_v9 = vpop.eup %19425 }
0x3ee0   :  { %v19428_v55 = vpop.eup %19427  ;;  %v11459_v49 = vmul.f32 %v19426_v9, %v11439_v18 }
0x3ee1   :  { %v11457_v39 = vmul.f32 %v19428_v55, %v11438_v14 }
0x3ee2   :  { %v22033_v51 = vadd.f32 %v15103_v47, %v11459_v49 }
0x3ee3   :  { %v22031_v16 = vadd.f32 %v15103_v47, %v11457_v39 }
0x3ee5   :  { %17136 = vmatprep.mubr.msk.f32.mxu0 %vm181_vm0, %v22031_v16 }
0x3ee6   :  { %17137 = vmatmul.mubr.msk.f32.vlgmr.msra.gmra.mrb[104].mxu0 %vm181_vm0, %v22033_v51 }
0x3fb9   :  { %v17138_v54 = vpop.f32.mrb[104].mxu0 }
0x3fba   :  { %v22040_v15 = vadd.f32 %v17138_v54, %v15114_v33  ;;  %v11560_v63 = vpop.f32.mrb[105].mxu0 }
0x3fbb   :  { %v22042_v58 = vadd.f32 %v15114_v33, %v11560_v63 }
0x3fbd   :  { %17143 = vmatprep.mubr.msk.f32.mxu0 %vm291_vm1, %v22042_v58  ;;  %v22048_v3 = vpack.i.bf16 %v22040_v15, %v22042_v58 }
0x3fbf   :  { %18838 = vrot.lane.b32.xlu1 %v22048_v3, %s19632_s28 }
0x3fc3   :  { %18843 = vrot.lane.b32.xlu1 %v22048_v3, %s19634_s2  ;;  %s22459_s2 = smov 48  }
0x3fc7   :  { %11771 = vrot.lane.b32.xlu1 %v22042_v58, %s19633_s1 }
0x3fcb   :  { %11773 = vrot.lane.b32.xlu1 %v22040_v15, %s19633_s1 }
0x4031   :  { %v18839_v23 = vpop.permute.xlu1 %18838 }
0x4032   :  { %v18841_v8 = vunpack.i.h.bf16 %v18839_v23  ;;  %v18840_v46 = vunpack.i.l.bf16 %v18839_v23 }
0x4034   :  { %v18098_v62 = vpack.c.bf16 %v18841_v8, %v18840_v46 }
0x4035   :  { %v18844_v12 = vpop.permute.xlu1 %18843 }
0x4036   :  { %v18846_v59 = vunpack.i.h.bf16 %v18844_v12  ;;  %v18845_v42 = vunpack.i.l.bf16 %v18844_v12  ;;  %18100 = vmatprep.subr.msk.bf16.mxu0 %vm19885_vm2, %v18098_v62 }
0x4037   :  { %18103 = vmatpush3.bf16.xpose.msk.msra.mxu0 %vm19885_vm2, %v18098_v62 }
0x4038   :  { %v18104_v50 = vpack.c.bf16 %v18846_v59, %v18845_v42 }
0x4039   :  { %v11772_v30 = vpop.permute.xlu1 %11771 }
0x403a   :  { %18105 = vmatprep.subr.bf16.mxu0 %v18104_v50 }
0x403d   :  { %v11774_v40 = vpop.permute.xlu1 %11773 }
0x403e   :  { %17144 = vmatmul.mubr.msk.f32.vlgmr.msra.gmra.mrb[106].mxu0 %vm291_vm1, %v22040_v15 }
0x403f   :  { %18107 = vmatpush3.bf16.msra.mxu0 %v18104_v50 }
0x4111   :  { %v17145_v29 = vpop.f32.mrb[106].mxu0 }
0x4112   :  { %v11649_v41 = vpop.f32.mrb[107].mxu0  ;;  %v11659_v0 = vmul.f32 0.35355338, %v17145_v29 }
0x4113   :  { %v11658_v2 = vmul.f32 0.35355338, %v11649_v41 }
0x4114   :  { %v11661_v4 = vadd.f32 %v22069_v19, %v11659_v0 }
0x4115   :  { %v11660_v10 = vadd.f32 %v22065_v11, %v11658_v2 }
0x4116   :  { %v11665_v6 = vsel %vm8623_vm12, %v11661_v4, -inf }
0x4117   :  { %v11662_v56 = vsel %vm8623_vm12, %v11660_v10, -inf }
0x4118   :  { %11663 = vmax.xlane.f32.xlu0 %v11662_v56 }
0x411c   :  { %11666 = vmax.xlane.f32.xlu0 %v11665_v6 }
0x41a5   :  { %v11664_v17 = vpop.xlane.xlu0 %11663 }
0x41a6   :  { %v11668_v35 = vsub.f32 %v11660_v10, %v11664_v17 }
0x41a8   :  { %v11670_v48 = vmul.f32 1.442695, %v11668_v35 }
0x41a9   :  { %v11667_v31 = vpop.xlane.xlu0 %11666 }
0x41aa   :  { %v11669_v21 = vsub.f32 %v11661_v4, %v11667_v31 }
0x41ac   :  { %v11672_v60 = vmul.f32 1.442695, %v11669_v21 }
0x41ae   :  { %19429 = vpow2.f32 %v11672_v60 }
0x41af   :  { %19431 = vpow2.f32 %v11670_v48 }
0x41b8   :  { %v19430_v5 = vpop.eup %19429 }
0x41b9   :  { %v11677_v7 = vsel %vm8623_vm12, %v19430_v5, 0.0  ;;  %v19432_v25 = vpop.eup %19431 }
0x41ba   :  { %11678 = vadd.xlane.f32.xlu0 %v11677_v7  ;;  %v11674_v43 = vsel %vm8623_vm12, %v19432_v25, 0.0 }
0x41be   :  { %11675 = vadd.xlane.f32.xlu0 %v11674_v43 }
0x41d4   :  { %18848 = vrot.lane.b32.xlu0 %v22048_v3, %s19631_s0 }
0x4247   :  { %v11679_v37 = vpop.xlane.xlu0 %11678 }
0x4248   :  { %19433 = vrcp.f32 %v11679_v37  ;;  %v15110_v37 = vld [vmem:[%s22444_s3 + $0x28] sm:$0xff] }
0x424b   :  { %v11676_v57 = vpop.xlane.xlu0 %11675 }
0x424c   :  { %19435 = vrcp.f32 %v11676_v57  ;;  %v15109_v57 = vld [vmem:[%s22444_s3 + $0x20] sm:$0xff] }
0x424f   :  { %v18849_v34 = vpop.permute.xlu0 %18848 }
0x4250   :  { %v18851_v20 = vunpack.i.h.bf16 %v18849_v34  ;;  %v18850_v22 = vunpack.i.l.bf16 %v18849_v34 }
0x4252   :  { %v18108_v27 = vpack.c.bf16 %v18851_v20, %v18850_v22  ;;  %v19434_v52 = vpop.eup %19433 }
0x4253   :  { %v11683_v61 = vmul.f32 %v19434_v52, %v19430_v5 }
0x4254   :  { %18110 = vmatprep.subr.msk.bf16.mxu0 %vm19885_vm2, %v18108_v27 }
0x4256   :  { %v19436_v1 = vpop.eup %19435 }
0x4257   :  { %v11681_v32 = vmul.f32 %v19436_v1, %v19432_v25 }
0x4259   :  { %17150 = vmatprep.mubr.msk.f32.mxu0 %vm8623_vm12, %v11681_v32 }
0x425a   :  { %17151 = vmatmul.mubr.msk.f32.vlgmr.msra.gmra.mrb[108].mxu0 %vm8623_vm12, %v11683_v61 }
0x425b   :  { %18113 = vmatpush3.bf16.xpose.msk.msra.mxu0 %vm19885_vm2, %v18108_v27  ;;  %17157 = vmatprep.mubr.msk.f32.mxu0 %vm291_vm1, %v11772_v30 }
0x425c   :  { %17167 = vmatprep.subr.mxu0 %v15110_v37 }
0x4262   :  { %17158 = vmatmul.mubr.msk.f32.vlgmr.msra.gmra.mrb[110].mxu0 %vm291_vm1, %v11774_v40 }
0x4263   :  { %17168 = vmatpush3.msra.mxu0 %v15110_v37 }
0x4264   :  { %17172 = vmatprep.subr.mxu0 %v15109_v57 }
0x432d   :  { %v22086_v36 = vpop.f32.mrb[108].mxu0 }
0x432e   :  { %v22088_v26 = vpop.f32.mrb[109].mxu0 }
0x4335   :  { %v17159_v44 = vpop.f32.mrb[110].mxu0 }
0x4336   :  { %v11863_v13 = vmul.f32 0.35355338, %v17159_v44  ;;  %v11853_v18 = vpop.f32.mrb[111].mxu0 }
0x4337   :  { %v11862_v9 = vmul.f32 0.35355338, %v11853_v18 }
0x4338   :  { %v11865_v14 = vadd.f32 %v22069_v19, %v11863_v13 }
0x4339   :  { %v11864_v55 = vadd.f32 %v22065_v11, %v11862_v9 }
0x433a   :  { %v11869_v47 = vsel %vm8623_vm12, %v11865_v14, -inf }
0x433b   :  { %11870 = vmax.xlane.f32.xlu0 %v11869_v47  ;;  %v11866_v49 = vsel %vm8623_vm12, %v11864_v55, -inf }
0x433c   :  { %11867 = vmax.xlane.f32.xlu1 %v11866_v49 }
0x434d   :  { %18858 = vrot.lane.b32.xlu1 %v22048_v3, %s19635_s7 }
0x4351   :  { %18853 = vrot.lane.b32.xlu0 %v22048_v3, %s19637_s11  ;;  %s22460_s11 = smov 40  }
0x4355   :  { %12139 = vrot.lane.b32.xlu0 %v22040_v15, %s19636_s10 }
0x4359   :  { %12424 = vrot.lane.b32.xlu0 %v22042_v58, %s19639_s16 }
0x43c8   :  { %v11871_v39 = vpop.xlane.xlu0 %11870 }
0x43c9   :  { %v11873_v33 = vsub.f32 %v11865_v14, %v11871_v39  ;;  %v11868_v54 = vpop.xlane.xlu1 %11867 }
0x43ca   :  { %v11872_v63 = vsub.f32 %v11864_v55, %v11868_v54 }
0x43cb   :  { %v11876_v23 = vmul.f32 1.442695, %v11873_v33 }
0x43cc   :  { %v11874_v8 = vmul.f32 1.442695, %v11872_v63  ;;  %v18854_v46 = vpop.permute.xlu0 %18853 }
0x43cd   :  { %19437 = vpow2.f32 %v11876_v23  ;;  %v18856_v62 = vunpack.i.h.bf16 %v18854_v46  ;;  %v18855_v12 = vunpack.i.l.bf16 %v18854_v46  ;;  %v18859_v59 = vpop.permute.xlu1 %18858 }
0x43ce   :  { %v18861_v42 = vunpack.i.h.bf16 %v18859_v59  ;;  %v18860_v50 = vunpack.i.l.bf16 %v18859_v59  ;;  %19439 = vpow2.f32 %v11874_v8 }
0x43cf   :  { %v18114_v29 = vpack.c.bf16 %v18856_v62, %v18855_v12 }
0x43d0   :  { %v18118_v41 = vpack.c.bf16 %v18861_v42, %v18860_v50  ;;  %v15111_v50 = vld [vmem:[%s22444_s3 + $0x30] sm:$0xff] }
0x43d1   :  { %18115 = vmatprep.subr.bf16.mxu1 %v18114_v29 }
0x43d2   :  { %18117 = vmatpush3.bf16.msra.mxu1 %v18114_v29 }
0x43d3   :  { %18120 = vmatprep.subr.msk.bf16.mxu1 %vm19885_vm2, %v18118_v41 }
0x43d7   :  { %v19438_v0 = vpop.eup %19437 }
0x43d8   :  { %v11881_v2 = vsel %vm8623_vm12, %v19438_v0, 0.0  ;;  %v19440_v10 = vpop.eup %19439 }
0x43d9   :  { %11882 = vadd.xlane.f32.xlu1 %v11881_v2  ;;  %v11878_v4 = vsel %vm8623_vm12, %v19440_v10, 0.0 }
0x43dd   :  { %11879 = vadd.xlane.f32.xlu1 %v11878_v4 }
0x43ee   :  { %12137 = vrot.lane.b32.xlu1 %v22042_v58, %s19636_s10 }
0x43f2   :  { %18863 = vrot.lane.b32.xlu1 %v22048_v3, %s19638_s15 }
0x43f6   :  { %12426 = vrot.lane.b32.xlu1 %v22040_v15, %s19639_s16  ;;  %v12140_v15 = vpop.permute.xlu0 %12139 }
0x43fa   :  { %v12425_v25 = vpop.permute.xlu0 %12424 }
0x4466   :  { %v11883_v56 = vpop.xlane.xlu1 %11882 }
0x4467   :  { %19441 = vrcp.f32 %v11883_v56 }
0x446a   :  { %v11880_v6 = vpop.xlane.xlu1 %11879 }
0x446b   :  { %19443 = vrcp.f32 %v11880_v6 }
0x446e   :  { %v12138_v17 = vpop.permute.xlu1 %12137 }
0x4471   :  { %v19442_v31 = vpop.eup %19441 }
0x4472   :  { %v18864_v35 = vpop.permute.xlu1 %18863  ;;  %v11887_v7 = vmul.f32 %v19442_v31, %v19438_v0 }
0x4473   :  { %v18866_v48 = vunpack.i.h.bf16 %v18864_v35  ;;  %v18865_v60 = vunpack.i.l.bf16 %v18864_v35 }
0x4475   :  { %v19444_v21 = vpop.eup %19443  ;;  %v18128_v58 = vpack.c.bf16 %v18866_v48, %v18865_v60 }
0x4476   :  { %v11885_v5 = vmul.f32 %v19444_v21, %v19440_v10  ;;  %v12427_v43 = vpop.permute.xlu1 %12426 }
0x4478   :  { %17164 = vmatprep.mubr.msk.f32.mxu1 %vm8623_vm12, %v11885_v5 }
0x4479   :  { %17165 = vmatmul.mubr.msk.f32.vlgmr.msra.gmra.mrb[136].mxu1 %vm8623_vm12, %v11887_v7 }
0x447a   :  { %18123 = vmatpush3.bf16.xpose.msk.msra.mxu1 %vm19885_vm2, %v18118_v41  ;;  %17181 = vmatprep.mubr.msk.f32.mxu1 %vm291_vm1, %v12138_v17 }
0x447b   :  { %18130 = vmatprep.subr.msk.bf16.mxu1 %vm19885_vm2, %v18128_v58 }
0x4481   :  { %17182 = vmatmul.mubr.msk.f32.vlgmr.msra.gmra.mrb[138].mxu1 %vm291_vm1, %v12140_v15 }
0x4482   :  { %18133 = vmatpush3.bf16.xpose.msk.msra.mxu1 %vm19885_vm2, %v18128_v58  ;;  %17200 = vmatprep.mubr.msk.f32.mxu1 %vm291_vm1, %v12425_v25 }
0x4489   :  { %17201 = vmatmul.mubr.msk.f32.vlgmr.msra.gmra.mrb[140].mxu1 %vm291_vm1, %v12427_v43 }
0x454c   :  { %v17166_v34 = vpop.f32.mrb[136].mxu1 }
0x454d   :  { %v11966_v20 = vpop.f32.mrb[137].mxu1 }
0x454e   :  { %17169 = vmatprep.mubr.msk.f32.mxu0 %vm291_vm1, %v11966_v20 }
0x454f   :  { %17170 = vmatmul.mubr.msk.f32.vlgmr.msra.gmra.mrb[112].mxu0 %vm291_vm1, %v17166_v34 }
0x4550   :  { %17174 = vmatprep.mubr.msk.f32.mxu0 %vm291_vm1, %v22088_v26  ;;  %17173 = vmatpush3.msra.mxu0 %v15109_v57 }
0x4554   :  { %v17183_v22 = vpop.f32.mrb[138].mxu1 }
0x4555   :  { %v12229_v27 = vmul.f32 0.35355338, %v17183_v22  ;;  %v12219_v52 = vpop.f32.mrb[139].mxu1 }
0x4556   :  { %v12228_v1 = vmul.f32 0.35355338, %v12219_v52 }
0x4557   :  { %v12231_v32 = vadd.f32 %v22069_v19, %v12229_v27  ;;  %17175 = vmatmul.mubr.msk.f32.vlgmr.msra.gmra.mrb[112].mxu0 %vm291_vm1, %v22086_v36  ;;  %v15112_v27 = vld [vmem:[%s22444_s3 + $0x38] sm:$0xff] }
0x4558   :  { %v12230_v61 = vadd.f32 %v22065_v11, %v12228_v1 }
0x4559   :  { %v12235_v30 = vsel %vm8623_vm12, %v12231_v32, -inf }
0x455a   :  { %12236 = vmax.xlane.f32.xlu1 %v12235_v30  ;;  %v12232_v40 = vsel %vm8623_vm12, %v12230_v61, -inf }
0x455b   :  { %12233 = vmax.xlane.f32.xlu0 %v12232_v40 }
0x455c   :  { %v17202_v44 = vpop.f32.mrb[140].mxu1 }
0x455d   :  { %v12506_v26 = vpop.f32.mrb[141].mxu1  ;;  %v12516_v8 = vmul.f32 0.35355338, %v17202_v44 }
0x455e   :  { %v12515_v63 = vmul.f32 0.35355338, %v12506_v26 }
0x455f   :  { %v12518_v12 = vadd.f32 %v22069_v19, %v12516_v8 }
0x4560   :  { %v12517_v46 = vadd.f32 %v22065_v11, %v12515_v63 }
0x4561   :  { %v12522_v42 = vsel %vm8623_vm12, %v12518_v12, -inf }
0x4562   :  { %v12519_v59 = vsel %vm8623_vm12, %v12517_v46, -inf }
0x456b   :  { %18868 = vrot.lane.b32.xlu1 %v22048_v3, %s22459_s2 }
0x456f   :  { %18873 = vrot.lane.b32.xlu1 %v22048_v3, %s22460_s11 }
0x45e7   :  { %v12237_v13 = vpop.xlane.xlu1 %12236 }
0x45e8   :  { %v12239_v18 = vsub.f32 %v12231_v32, %v12237_v13  ;;  %v12234_v9 = vpop.xlane.xlu0 %12233 }
0x45e9   :  { %v12238_v36 = vsub.f32 %v12230_v61, %v12234_v9  ;;  %v15149_v61 = vld [vmem:[%s22445_s8 + $0x1] ss:$0 sm:$0xff] }
0x45ea   :  { %v12242_v14 = vmul.f32 1.442695, %v12239_v18 }
0x45eb   :  { %v12240_v55 = vmul.f32 1.442695, %v12238_v36  ;;  %v18869_v47 = vpop.permute.xlu1 %18868 }
0x45ec   :  { %v18871_v49 = vunpack.i.h.bf16 %v18869_v47  ;;  %v18870_v39 = vunpack.i.l.bf16 %v18869_v47 }
0x45ed   :  { %19445 = vpow2.f32 %v12240_v55  ;;  %v15155_v55 = vld [vmem:[%s22446_s14 + $0x28] sm:$0xff] }
0x45ee   :  { %v18124_v33 = vpack.c.bf16 %v18871_v49, %v18870_v39  ;;  %19447 = vpow2.f32 %v12242_v14  ;;  %v15154_v14 = vld [vmem:[%s22446_s14 + $0x20] sm:$0xff] }
0x45ef   :  { %v18874_v10 = vpop.permute.xlu1 %18873  ;;  %v18877_v47 = vpack.i.bf16 %v15155_v55, %v15154_v14 }
0x45f0   :  { %18125 = vmatprep.subr.bf16.mxu0 %v18124_v33  ;;  %v18876_v17 = vunpack.i.h.bf16 %v18874_v10  ;;  %v18875_v35 = vunpack.i.l.bf16 %v18874_v10 }
0x45f1   :  { %18127 = vmatpush3.bf16.msra.mxu0 %v18124_v33 }
0x45f2   :  { %17191 = vmatprep.subr.mxu0 %v15111_v50  ;;  %v18134_v60 = vpack.c.bf16 %v18876_v17, %v18875_v35 }
0x45f7   :  { %v19446_v54 = vpop.eup %19445 }
0x45f8   :  { %v12244_v23 = vsel %vm8623_vm12, %v19446_v54, 0.0  ;;  %v19448_v3 = vpop.eup %19447 }
0x45f9   :  { %12245 = vadd.xlane.f32.xlu0 %v12244_v23  ;;  %v12247_v62 = vsel %vm8623_vm12, %v19448_v3, 0.0 }
0x45fd   :  { %12248 = vadd.xlane.f32.xlu0 %v12247_v62 }
0x4601   :  { %12520 = vmax.xlane.f32.xlu0 %v12519_v59  ;;  %v15156_v59 = vld [vmem:[%s22446_s14 + $0x30] sm:$0xff] }
0x4605   :  { %12523 = vmax.xlane.f32.xlu0 %v12522_v42  ;;  %v15157_v42 = vld [vmem:[%s22446_s14 + $0x38] sm:$0xff] }
0x4686   :  { %v12246_v29 = vpop.xlane.xlu0 %12245 }
0x4687   :  { %19449 = vrcp.f32 %v12246_v29  ;;  %v18138_v29 = vpack.c.bf16 %v15155_v55, %v15154_v14 }
0x4689   :  { %18139 = vmatprep.subr.bf16.mxu1 %v18138_v29 }
0x468a   :  { %v12249_v41 = vpop.xlane.xlu0 %12248  ;;  %18141 = vmatpush3.bf16.msra.mxu1 %v18138_v29 }
0x468b   :  { %19451 = vrcp.f32 %v12249_v41  ;;  %v18142_v41 = vpack.c.bf16 %v15157_v42, %v15156_v59 }
0x468d   :  { %18143 = vmatprep.subr.bf16.mxu1 %v18142_v41 }
0x468e   :  { %v12521_v0 = vpop.xlane.xlu0 %12520  ;;  %18145 = vmatpush3.bf16.msra.mxu1 %v18142_v41 }
0x468f   :  { %v12525_v2 = vsub.f32 %v12517_v46, %v12521_v0  ;;  %v22174_v0 = vld [vmem:[%s22447_s19 + $0x1] ss:$0 sm:$0xff] }
0x4691   :  { %v19450_v11 = vpop.eup %19449  ;;  %v12527_v4 = vmul.f32 1.442695, %v12525_v2 }
0x4692   :  { %v12524_v56 = vpop.xlane.xlu0 %12523  ;;  %v12251_v6 = vmul.f32 %v19450_v11, %v19446_v54 }
0x4693   :  { %19453 = vpow2.f32 %v12527_v4  ;;  %v12526_v19 = vsub.f32 %v12518_v12, %v12524_v56 }
0x4694   :  { %17188 = vmatprep.mubr.msk.f32.mxu0 %vm8623_vm12, %v12251_v6 }
0x4695   :  { %v19452_v31 = vpop.eup %19451  ;;  %v12529_v21 = vmul.f32 1.442695, %v12526_v19 }
0x4696   :  { %v12253_v48 = vmul.f32 %v19452_v31, %v19448_v3 }
0x4697   :  { %19455 = vpow2.f32 %v12529_v21 }
0x4698   :  { %17189 = vmatmul.mubr.msk.f32.vlgmr.msra.gmra.mrb[114].mxu0 %vm8623_vm12, %v12253_v48 }
0x4699   :  { %17192 = vmatpush3.msra.mxu0 %v15111_v50  ;;  %v18882_v50 = vpack.i.bf16 %v15157_v42, %v15156_v59 }
0x469a   :  { %18135 = vmatprep.subr.bf16.mxu0 %v18134_v60 }
0x469d   :  { %v19454_v5 = vpop.eup %19453 }
0x469e   :  { %v12531_v7 = vsel %vm8623_vm12, %v19454_v5, 0.0 }
0x469f   :  { %12532 = vadd.xlane.f32.xlu0 %v12531_v7 }
0x46a1   :  { %v19456_v58 = vpop.eup %19455 }
0x46a2   :  { %v12534_v15 = vsel %vm8623_vm12, %v19456_v58, 0.0 }
0x46a3   :  { %12535 = vadd.xlane.f32.xlu0 %v12534_v15 }
0x472c   :  { %v12533_v25 = vpop.xlane.xlu0 %12532 }
0x472d   :  { %19457 = vrcp.f32 %v12533_v25 }
0x4730   :  { %v12536_v43 = vpop.xlane.xlu0 %12535 }
0x4731   :  { %19459 = vrcp.f32 %v12536_v43 }
0x4737   :  { %v19458_v37 = vpop.eup %19457 }
0x4738   :  { %v12538_v22 = vmul.f32 %v19458_v37, %v19454_v5 }
0x473b   :  { %v19460_v20 = vpop.eup %19459 }
0x473c   :  { %v12540_v52 = vmul.f32 %v19460_v20, %v19456_v58 }
0x476b   :  { %v17190_v57 = vpop.f32.mrb[114].mxu0 }
0x476c   :  { %v12332_v34 = vpop.f32.mrb[115].mxu0 }
0x476d   :  { %17193 = vmatprep.mubr.msk.f32.mxu0 %vm291_vm1, %v12332_v34 }
0x476e   :  { %17194 = vmatmul.mubr.msk.f32.vlgmr.msra.gmra.mrb[112].mxu0 %vm291_vm1, %v17190_v57  ;;  %v15152_v57 = vld [vmem:[%s22448_s24 + $0x1] ss:$0 sm:$0xff] }
0x476f   :  { %18137 = vmatpush3.bf16.msra.mxu0 %v18134_v60  ;;  %17207 = vmatprep.mubr.msk.f32.mxu0 %vm8623_vm12, %v12538_v22 }
0x4770   :  { %17210 = vmatprep.subr.mxu0 %v15112_v27 }
0x4772   :  { %17208 = vmatmul.mubr.msk.f32.vlgmr.msra.gmra.mrb[116].mxu0 %vm8623_vm12, %v12540_v52  ;;  %v15153_v52 = vld [vmem:[%s22449_s30 + $0x1] ss:$0 sm:$0xff] }
0x4773   :  { %17211 = vmatpush3.msra.mxu0 %v15112_v27 }
0x4845   :  { %v17209_v1 = vpop.f32.mrb[116].mxu0 }
0x4846   :  { %v12619_v32 = vpop.f32.mrb[117].mxu0 }
0x4847   :  { %17212 = vmatprep.mubr.msk.f32.mxu0 %vm291_vm1, %v12619_v32 }
0x4848   :  { %17213 = vmatmul.mubr.msk.f32.vlgmr.msra.gmra.mrb[112].mxu0 %vm291_vm1, %v17209_v1 }
0x4849   :  { %17234 = vmatprep.mubr.msk.f32.mxu0 %vm181_vm0, %v21778_v45 }
0x491b   :  { %v17214_v30 = vpop.f32.mrb[112].mxu0 }
0x491c   :  { %v12718_v40 = vadd.f32 %v17214_v30, %v15149_v61  ;;  %v12700_v44 = vpop.f32.mrb[113].mxu0 }
0x491d   :  { %v12717_v26 = vadd.f32 %v15149_v61, %v12700_v44 }
0x491e   :  { %v12720_v13 = vadd.f32 %v12718_v40, %v22033_v51 }
0x491f   :  { %v12719_v18 = vadd.f32 %v12717_v26, %v22031_v16 }
0x4920   :  { %v12728_v9 = vsel %vm181_vm0, %v12720_v13, 0.0 }
0x4921   :  { %12729 = vadd.xlane.f32.xlu1 %v12728_v9  ;;  %v12725_v36 = vsel %vm181_vm0, %v12719_v18, 0.0 }
0x4922   :  { %12726 = vadd.xlane.f32.xlu0 %v12725_v36 }
0x4938   :  { %18878 = vrot.lane.b32.xlu0 %v18877_v47, %s19632_s28 }
0x49ae   :  { %v12730_v45 = vpop.xlane.xlu1 %12729 }
0x49af   :  { %v12732_v49 = vmul.f32 0.03125, %v12730_v45  ;;  %v12727_v39 = vpop.xlane.xlu0 %12726 }
0x49b0   :  { %v12731_v33 = vmul.f32 0.03125, %v12727_v39 }
0x49b1   :  { %v12734_v51 = vsub.f32 %v12720_v13, %v12732_v49 }
0x49b2   :  { %v12733_v54 = vsub.f32 %v12719_v18, %v12731_v33 }
0x49b3   :  { %v12736_v16 = vmul.f32 %v12734_v51, %v12734_v51  ;;  %v18879_v63 = vpop.permute.xlu0 %18878 }
0x49b4   :  { %v18881_v23 = vunpack.i.h.bf16 %v18879_v63  ;;  %v18880_v3 = vunpack.i.l.bf16 %v18879_v63  ;;  %v12735_v46 = vmul.f32 %v12733_v54, %v12733_v54  ;;  %v12751_v20 = vmul.f32 %v15152_v57, %v12733_v54 }
0x49b5   :  { %v12740_v8 = vsel %vm181_vm0, %v12736_v16, 0.0 }
0x49b6   :  { %12741 = vadd.xlane.f32.xlu0 %v12740_v8  ;;  %v18146_v62 = vpack.c.bf16 %v18881_v23, %v18880_v3  ;;  %v12737_v12 = vsel %vm181_vm0, %v12735_v46, 0.0  ;;  %v22217_v23 = vld [vmem:[%s22450_s6 + $0x8] sm:$0xff]  ;;  %v22221_v8 = vld [vmem:[%s22450_s6] sm:$0xff] }
0x49b8   :  { %18147 = vmatprep.subr.bf16.mxu0 %v18146_v62 }
0x49b9   :  { %18149 = vmatpush3.bf16.msra.mxu0 %v18146_v62 }
0x49ba   :  { %12738 = vadd.xlane.f32.xlu0 %v12737_v12 }
0x49d0   :  { %18883 = vrot.lane.b32.xlu0 %v18882_v50, %s19632_s28 }
0x49d4   :  { %12898 = vrot.lane.b32.xlu0 %v22174_v0, %s19632_s28 }
0x4a43   :  { %v12742_v2 = vpop.xlane.xlu0 %12741 }
0x4a44   :  { %v12744_v11 = vmul.f32 0.032258064, %v12742_v2 }
0x4a46   :  { %19461 = vrsqrt.f32 %v12744_v11  ;;  %vm12762_vm12 = vcmp.eq.f32.partialorder %v12744_v11, inf  ;;  %v12765_v21 = vand.u32 2147483648, %v12744_v11  ;;  %vm12764_vm4 = vcmp.eq.f32.partialorder %v12744_v11, 0.0 }
0x4a47   :  { %v12739_v10 = vpop.xlane.xlu0 %12738 }
0x4a48   :  { %v12743_v4 = vmul.f32 0.032258064, %v12739_v10 }
0x4a4a   :  { %19463 = vrsqrt.f32 %v12743_v4  ;;  %vm12755_vm5 = vcmp.eq.f32.partialorder %v12743_v4, inf  ;;  %v12758_v15 = vand.u32 2147483648, %v12743_v4  ;;  %vm12757_vm6 = vcmp.eq.f32.partialorder %v12743_v4, 0.0 }
0x4a4b   :  { %v18884_v56 = vpop.permute.xlu0 %18883 }
0x4a4c   :  { %v18886_v6 = vunpack.i.h.bf16 %v18884_v56  ;;  %v18885_v19 = vunpack.i.l.bf16 %v18884_v56 }
0x4a4e   :  { %v18150_v17 = vpack.c.bf16 %v18886_v6, %v18885_v19 }
0x4a50   :  { %v19462_v35 = vpop.eup %19461  ;;  %18151 = vmatprep.subr.bf16.mxu0 %v18150_v17 }
0x4a51   :  { %v12761_v31 = vmul.f32 %v19462_v35, %v12744_v11  ;;  %18153 = vmatpush3.bf16.msra.mxu0 %v18150_v17 }
0x4a53   :  { %v12763_v48 = vsel %vm12762_vm12, %v12744_v11, %v12761_v31 }
0x4a54   :  { %v19464_v60 = vpop.eup %19463  ;;  %v12766_v5 = vsel %vm12764_vm4, %v12765_v21, %v12763_v48  ;;  %17235 = vmatmul.mubr.msk.f32.vlgmr.msra.gmra.mrb[118].mxu0 %vm181_vm0, %v21790_v28  ;;  %v12752_v28 = vmul.f32 %v15152_v57, %v12734_v51 }
0x4a55   :  { %v12768_v7 = vadd.f32 1e-06, %v12766_v5  ;;  %v12754_v58 = vmul.f32 %v19464_v60, %v12743_v4  ;;  %17237 = vmatprep.mubr.msk.f32.mxu0 %vm181_vm0, %v21795_v38 }
0x4a57   :  { %v12756_v25 = vsel %vm12755_vm5, %v12743_v4, %v12754_v58  ;;  %19465 = vrcp.f32 %v12768_v7 }
0x4a58   :  { %v12759_v43 = vsel %vm12757_vm6, %v12758_v15, %v12756_v25  ;;  %17238 = vmatmul.mubr.msk.f32.gmra.mrb[120].mxu0 %vm181_vm0, %v21799_v53  ;;  %v12899_v53 = vpop.permute.xlu0 %12898 }
0x4a59   :  { %v12767_v37 = vadd.f32 1e-06, %v12759_v43 }
0x4a5b   :  { %19467 = vrcp.f32 %v12767_v37 }
0x4a61   :  { %v19466_v34 = vpop.eup %19465 }
0x4a62   :  { %v12772_v27 = vmul.f32 %v19466_v34, %v12752_v28 }
0x4a64   :  { %v22188_v32 = vadd.f32 %v15153_v52, %v12772_v27 }
0x4a65   :  { %v19468_v22 = vpop.eup %19467 }
0x4a66   :  { %v12770_v38 = vmul.f32 %v19468_v22, %v12751_v20 }
0x4a68   :  { %v22186_v1 = vadd.f32 %v15153_v52, %v12770_v38 }
0x4a6a   :  { %17223 = vmatprep.mubr.msk.f32.mxu1 %vm181_vm0, %v22186_v1 }
0x4a6b   :  { %17224 = vmatmul.mubr.msk.f32.vlgmr.msra.gmra.mrb[142].mxu1 %vm181_vm0, %v22188_v32 }
0x4b27   :  { %v17236_v61 = vpop.f32.mrb[118].mxu0 }
0x4b28   :  { %v12973_v30 = vadd.f32 %v17236_v61, %v12899_v53  ;;  %v12967_v40 = vpop.f32.mrb[119].mxu0 }
0x4b29   :  { %v12968_v44 = vadd.f32 %v12967_v40, %v12899_v53 }
0x4b2b   :  { %v17239_v26 = vpop.f32.mrb[120].mxu0  ;;  %v18154_v13 = vpack.c.bf16 %v12973_v30, %v12968_v44  ;;  %v22194_v18 = vpack.i.bf16 %v12973_v30, %v12968_v44 }
0x4b2c   :  { %v12983_v9 = vadd.f32 %v17239_v26, %v12899_v53  ;;  %v12977_v36 = vpop.f32.mrb[121].mxu0 }
0x4b2d   :  { %v12978_v14 = vadd.f32 %v12977_v36, %v12899_v53  ;;  %18156 = vmatprep.subr.msk.bf16.mxu1 %vm19885_vm2, %v18154_v13 }
0x4b2e   :  { %18159 = vmatpush3.bf16.xpose.msk.msra.mxu1 %vm19885_vm2, %v18154_v13 }
0x4b2f   :  { %v18160_v55 = vpack.c.bf16 %v12983_v9, %v12978_v14  ;;  %v22200_v47 = vpack.i.bf16 %v12983_v9, %v12978_v14 }
0x4b31   :  { %18162 = vmatprep.subr.msk.bf16.mxu1 %vm19885_vm2, %v18160_v55 }
0x4b36   :  { %18165 = vmatpush3.bf16.xpose.msk.msra.mxu1 %vm19885_vm2, %v18160_v55 }
0x4b3e   :  { %v17225_v45 = vpop.f32.mrb[142].mxu1 }
0x4b3f   :  { %v12873_v49 = vpop.f32.mrb[143].mxu1  ;;  %v22210_v33 = vadd.f32 %v17225_v45, %v22174_v0 }
0x4b40   :  { %v22207_v39 = vadd.f32 %v22174_v0, %v12873_v49 }
0x4b42   :  { %17248 = vmatprep.mubr.msk.f32.mxu1 %vm291_vm1, %v22207_v39 }
0x4b43   :  { %17249 = vmatmul.mubr.msk.f32.vlgmr.msra.gmra.mrb[144].mxu1 %vm291_vm1, %v22210_v33 }
0x4c16   :  { %v17250_v51 = vpop.f32.mrb[144].mxu1 }
0x4c17   :  { %v13080_v54 = vmul.f32 0.35355338, %v17250_v51  ;;  %v13070_v16 = vpop.f32.mrb[145].mxu1 }
0x4c18   :  { %v13079_v63 = vmul.f32 0.35355338, %v13070_v16 }
0x4c19   :  { %v13082_v3 = vadd.f32 %v22217_v23, %v13080_v54 }
0x4c1a   :  { %v13081_v46 = vadd.f32 %v22221_v8, %v13079_v63 }
0x4c1b   :  { %v13086_v62 = vsel %vm181_vm0, %v13082_v3, -inf }
0x4c1c   :  { %13087 = vmax.xlane.f32.xlu0 %v13086_v62  ;;  %v13083_v12 = vsel %vm181_vm0, %v13081_v46, -inf }
0x4c1d   :  { %13084 = vmax.xlane.f32.xlu1 %v13083_v12 }
0x4c2e   :  { %18888 = vrot.lane.b32.xlu1 %v22194_v18, %s19632_s28 }
0x4c32   :  { %18903 = vrot.lane.b32.xlu0 %v22200_v47, %s19633_s1  ;;  %18893 = vrot.lane.b32.xlu1 %v22200_v47, %s19632_s28 }
0x4c36   :  { %13580 = vrot.lane.b32.xlu0 %v22210_v33, %s19636_s10 }
0x4ca9   :  { %v13088_v59 = vpop.xlane.xlu0 %13087 }
0x4caa   :  { %v13090_v42 = vsub.f32 %v13082_v3, %v13088_v59  ;;  %v13085_v50 = vpop.xlane.xlu1 %13084 }
0x4cab   :  { %v13089_v29 = vsub.f32 %v13081_v46, %v13085_v50 }
0x4cac   :  { %v13093_v41 = vmul.f32 1.442695, %v13090_v42 }
0x4cad   :  { %v13091_v0 = vmul.f32 1.442695, %v13089_v29  ;;  %v18904_v43 = vpop.permute.xlu0 %18903 }
0x4cae   :  { %19469 = vpow2.f32 %v13093_v41  ;;  %v18889_v2 = vpop.permute.xlu1 %18888  ;;  %v18906_v28 = vunpack.i.h.bf16 %v18904_v43  ;;  %v18905_v20 = vunpack.i.l.bf16 %v18904_v43 }
0x4caf   :  { %v18891_v11 = vunpack.i.h.bf16 %v18889_v2  ;;  %v18890_v10 = vunpack.i.l.bf16 %v18889_v2  ;;  %19471 = vpow2.f32 %v13091_v0 }
0x4cb0   :  { %v18180_v38 = vpack.c.bf16 %v18906_v28, %v18905_v20 }
0x4cb1   :  { %v18166_v4 = vpack.c.bf16 %v18891_v11, %v18890_v10  ;;  %v13581_v14 = vpop.permute.xlu0 %13580 }
0x4cb2   :  { %v18894_v56 = vpop.permute.xlu1 %18893 }
0x4cb3   :  { %v18896_v6 = vunpack.i.h.bf16 %v18894_v56  ;;  %v18895_v19 = vunpack.i.l.bf16 %v18894_v56  ;;  %18167 = vmatprep.subr.bf16.mxu0 %v18166_v4 }
0x4cb4   :  { %18169 = vmatpush3.bf16.msra.mxu0 %v18166_v4 }
0x4cb5   :  { %v18170_v17 = vpack.c.bf16 %v18896_v6, %v18895_v19 }
0x4cb7   :  { %18171 = vmatprep.subr.bf16.mxu0 %v18170_v17 }
0x4cb8   :  { %v19470_v35 = vpop.eup %19469  ;;  %18173 = vmatpush3.bf16.msra.mxu0 %v18170_v17 }
0x4cb9   :  { %v13098_v31 = vsel %vm181_vm0, %v19470_v35, 0.0  ;;  %v19472_v21 = vpop.eup %19471 }
0x4cba   :  { %13099 = vadd.xlane.f32.xlu1 %v13098_v31  ;;  %v13095_v48 = vsel %vm181_vm0, %v19472_v21, 0.0 }
0x4cbe   :  { %13096 = vadd.xlane.f32.xlu1 %v13095_v48 }
0x4ccf   :  { %18898 = vrot.lane.b32.xlu1 %v22194_v18, %s19633_s1 }
0x4cd3   :  { %13198 = vrot.lane.b32.xlu1 %v22207_v39, %s19633_s1 }
0x4cd7   :  { %13200 = vrot.lane.b32.xlu1 %v22210_v33, %s19633_s1 }
0x4cdb   :  { %18908 = vrot.lane.b32.xlu1 %v22194_v18, %s19636_s10 }
0x4cdf   :  { %18913 = vrot.lane.b32.xlu1 %v22200_v47, %s19636_s10 }
0x4ce3   :  { %13578 = vrot.lane.b32.xlu1 %v22207_v39, %s19636_s10 }
0x4d47   :  { %v13100_v60 = vpop.xlane.xlu1 %13099 }
0x4d48   :  { %19473 = vrcp.f32 %v13100_v60 }
0x4d4b   :  { %v13097_v5 = vpop.xlane.xlu1 %13096 }
0x4d4c   :  { %19475 = vrcp.f32 %v13097_v5 }
0x4d4f   :  { %v18899_v7 = vpop.permute.xlu1 %18898 }
0x4d50   :  { %v18901_v58 = vunpack.i.h.bf16 %v18899_v7  ;;  %v18900_v15 = vunpack.i.l.bf16 %v18899_v7 }
0x4d52   :  { %v18174_v25 = vpack.c.bf16 %v18901_v58, %v18900_v15  ;;  %v19474_v57 = vpop.eup %19473 }
0x4d53   :  { %v13199_v37 = vpop.permute.xlu1 %13198  ;;  %v13104_v52 = vmul.f32 %v19474_v57, %v19470_v35 }
0x4d54   :  { %18176 = vmatprep.subr.msk.bf16.mxu0 %vm19885_vm2, %v18174_v25 }
0x4d56   :  { %v19476_v34 = vpop.eup %19475 }
0x4d57   :  { %v13201_v22 = vpop.permute.xlu1 %13200  ;;  %v13102_v27 = vmul.f32 %v19476_v34, %v19472_v21 }
0x4d59   :  { %17259 = vmatprep.mubr.msk.f32.mxu0 %vm181_vm0, %v13102_v27 }
0x4d5a   :  { %17260 = vmatmul.mubr.msk.f32.vlgmr.msra.gmra.mrb[122].mxu0 %vm181_vm0, %v13104_v52 }
0x4d5b   :  { %18179 = vmatpush3.bf16.xpose.msk.msra.mxu0 %vm19885_vm2, %v18174_v25  ;;  %v18909_v53 = vpop.permute.xlu1 %18908  ;;  %17270 = vmatprep.mubr.msk.f32.mxu0 %vm291_vm1, %v13199_v37 }
0x4d5c   :  { %18182 = vmatprep.subr.msk.bf16.mxu0 %vm19885_vm2, %v18180_v38  ;;  %v18911_v61 = vunpack.i.h.bf16 %v18909_v53  ;;  %v18910_v30 = vunpack.i.l.bf16 %v18909_v53 }
0x4d5e   :  { %v18194_v40 = vpack.c.bf16 %v18911_v61, %v18910_v30 }
0x4d5f   :  { %v18914_v44 = vpop.permute.xlu1 %18913 }
0x4d60   :  { %v18916_v26 = vunpack.i.h.bf16 %v18914_v44  ;;  %v18915_v13 = vunpack.i.l.bf16 %v18914_v44 }
0x4d62   :  { %v18200_v9 = vpack.c.bf16 %v18916_v26, %v18915_v13 }
0x4d63   :  { %18185 = vmatpush3.bf16.xpose.msk.msra.mxu0 %vm19885_vm2, %v18180_v38  ;;  %v13579_v36 = vpop.permute.xlu1 %13578 }
0x4d64   :  { %18196 = vmatprep.subr.msk.bf16.mxu0 %vm19885_vm2, %v18194_v40 }
0x4d6a   :  { %17271 = vmatmul.mubr.msk.f32.vlgmr.msra.gmra.mrb[124].mxu0 %vm291_vm1, %v13201_v22 }
0x4d6b   :  { %18199 = vmatpush3.bf16.xpose.msk.msra.mxu0 %vm19885_vm2, %v18194_v40  ;;  %17302 = vmatprep.mubr.msk.f32.mxu0 %vm291_vm1, %v13579_v36  ;;  %v15159_v36 = vld [vmem:[%s22451_s12 + $0x20] sm:$0xff] }
0x4d6c   :  { %18202 = vmatprep.subr.msk.bf16.mxu0 %vm19885_vm2, %v18200_v9 }
0x4d73   :  { %18205 = vmatpush3.bf16.xpose.msk.msra.mxu0 %vm19885_vm2, %v18200_v9  ;;  %v15160_v9 = vld [vmem:[%s22451_s12 + $0x28] sm:$0xff] }
0x4d7a   :  { %17303 = vmatmul.mubr.msk.f32.vlgmr.msra.gmra.mrb[126].mxu0 %vm291_vm1, %v13581_v14 }
0x4e2d   :  { %v22270_v55 = vpop.f32.mrb[122].mxu0 }
0x4e2e   :  { %v22272_v45 = vpop.f32.mrb[123].mxu0 }
0x4e3d   :  { %v17272_v49 = vpop.f32.mrb[124].mxu0 }
0x4e3e   :  { %v13298_v51 = vmul.f32 0.35355338, %v17272_v49  ;;  %v13288_v54 = vpop.f32.mrb[125].mxu0 }
0x4e3f   :  { %v13297_v16 = vmul.f32 0.35355338, %v13288_v54 }
0x4e40   :  { %v13300_v63 = vadd.f32 %v22217_v23, %v13298_v51 }
0x4e41   :  { %v13299_v3 = vadd.f32 %v22221_v8, %v13297_v16 }
0x4e42   :  { %v13304_v46 = vsel %vm181_vm0, %v13300_v63, -inf }
0x4e43   :  { %13305 = vmax.xlane.f32.xlu0 %v13304_v46  ;;  %v13301_v62 = vsel %vm181_vm0, %v13299_v3, -inf }
0x4e44   :  { %13302 = vmax.xlane.f32.xlu1 %v13301_v62 }
0x4e4d   :  { %v17304_v12 = vpop.f32.mrb[126].mxu0 }
0x4e4e   :  { %v13668_v59 = vpop.f32.mrb[127].mxu0  ;;  %v13678_v19 = vmul.f32 0.35355338, %v17304_v12 }
0x4e4f   :  { %v13677_v6 = vmul.f32 0.35355338, %v13668_v59 }
0x4e50   :  { %v13680_v35 = vadd.f32 %v22217_v23, %v13678_v19 }
0x4e51   :  { %v13679_v17 = vadd.f32 %v22221_v8, %v13677_v6 }
0x4e52   :  { %v13684_v21 = vsel %vm181_vm0, %v13680_v35, -inf }
0x4e53   :  { %v13681_v31 = vsel %vm181_vm0, %v13679_v17, -inf }
0x4ed0   :  { %v13306_v42 = vpop.xlane.xlu0 %13305 }
0x4ed1   :  { %v13308_v50 = vsub.f32 %v13300_v63, %v13306_v42  ;;  %v13303_v29 = vpop.xlane.xlu1 %13302 }
0x4ed2   :  { %v13307_v41 = vsub.f32 %v13299_v3, %v13303_v29 }
0x4ed3   :  { %v13311_v0 = vmul.f32 1.442695, %v13308_v50 }
0x4ed4   :  { %v13309_v2 = vmul.f32 1.442695, %v13307_v41  ;;  %v15161_v41 = vld [vmem:[%s22451_s12 + $0x30] sm:$0xff] }
0x4ed5   :  { %19477 = vpow2.f32 %v13311_v0 }
0x4ed6   :  { %19479 = vpow2.f32 %v13309_v2 }
0x4edf   :  { %v19478_v11 = vpop.eup %19477 }
0x4ee0   :  { %v19480_v10 = vpop.eup %19479  ;;  %v13316_v4 = vsel %vm181_vm0, %v19478_v11, 0.0 }
0x4ee1   :  { %13317 = vadd.xlane.f32.xlu1 %v13316_v4  ;;  %v13313_v56 = vsel %vm181_vm0, %v19480_v10, 0.0 }
0x4ee2   :  { %13314 = vadd.xlane.f32.xlu0 %v13313_v56 }
0x4ef2   :  { %18923 = vrot.lane.b32.xlu1 %v22200_v47, %s19631_s0 }
0x4ef8   :  { %18918 = vrot.lane.b32.xlu0 %v22194_v18, %s19631_s0  ;;  %s19642_s0 = smov [#allocation2]  }
0x4ef9   :  { %s14519_s28 = sshll.u32 %s19642_s0, 4  ;;  %s14520_s28 = int_to_ptr.vmem [resolvable:$true] %s14519_s28 }
0x4efa   :  { %s19547_s1 = scalar_lea.vmem %s14520_s28, 512  ;;  %p19552_p1 = scmp.lt.s32.totalorder %s14520_s28, %s14520_s28 }
0x4efb   :  { %p19548_p0 = scmp.ne.s32.totalorder %s14520_s28, %s19547_s1  ;;  %p19553_p2 = scmp.lt.s32.totalorder %s19547_s1, %s19547_s1 }
0x4efd   :  { %p19554_p3 = por %p19553_p2, %p19552_p1 }
0x4eff   :  { %p19555_p4 = pnand %p19554_p3, %p19548_p0 }
0x4f16   :  { %13682 = vmax.xlane.f32.xlu1 %v13681_v31 }
0x4f17   :  { %13685 = vmax.xlane.f32.xlu0 %v13684_v21 }
0x4f6e   :  { %v13318_v48 = vpop.xlane.xlu1 %13317 }
0x4f6f   :  { %v13315_v60 = vpop.xlane.xlu0 %13314 }
0x4f70   :  { %19481 = vrcp.f32 %v13315_v60 }
0x4f71   :  { %19483 = vrcp.f32 %v13318_v48 }
0x4f72   :  { %v18924_v5 = vpop.permute.xlu1 %18923 }
0x4f73   :  { %v18919_v7 = vpop.permute.xlu0 %18918  ;;  %v18926_v58 = vunpack.i.h.bf16 %v18924_v5  ;;  %v18925_v15 = vunpack.i.l.bf16 %v18924_v5 }
0x4f74   :  { %v18921_v25 = vunpack.i.h.bf16 %v18919_v7  ;;  %v18920_v43 = vunpack.i.l.bf16 %v18919_v7 }
0x4f75   :  { %v18190_v57 = vpack.c.bf16 %v18926_v58, %v18925_v15 }
0x4f76   :  { %v18186_v37 = vpack.c.bf16 %v18921_v25, %v18920_v43 }
0x4f78   :  { %18187 = vmatprep.subr.bf16.mxu1 %v18186_v37 }
0x4f79   :  { %18189 = vmatpush3.bf16.msra.mxu1 %v18186_v37 }
0x4f7a   :  { %v19482_v34 = vpop.eup %19481  ;;  %18191 = vmatprep.subr.bf16.mxu1 %v18190_v57 }
0x4f7b   :  { %v19484_v28 = vpop.eup %19483  ;;  %v13320_v20 = vmul.f32 %v19482_v34, %v19480_v10 }
0x4f7c   :  { %v13322_v22 = vmul.f32 %v19484_v28, %v19478_v11 }
0x4f7d   :  { %18193 = vmatpush3.bf16.msra.mxu1 %v18190_v57  ;;  %17281 = vmatprep.mubr.msk.f32.mxu1 %vm181_vm0, %v13320_v20 }
0x4f7e   :  { %17284 = vmatprep.subr.mxu1 %v15160_v9 }
0x4f80   :  { %17282 = vmatmul.mubr.msk.f32.vlgmr.msra.gmra.mrb[146].mxu1 %vm181_vm0, %v13322_v22  ;;  %v15162_v22 = vld [vmem:[%s22451_s12 + $0x38] sm:$0xff] }
0x4f81   :  { %17285 = vmatpush3.msra.mxu1 %v15160_v9 }
0x4f82   :  { %17289 = vmatprep.subr.mxu1 %v15159_v36 }
0x4fa3   :  { %v13683_v27 = vpop.xlane.xlu1 %13682 }
0x4fa4   :  { %v13687_v52 = vsub.f32 %v13679_v17, %v13683_v27  ;;  %v13686_v38 = vpop.xlane.xlu0 %13685 }
0x4fa5   :  { %v13688_v53 = vsub.f32 %v13680_v35, %v13686_v38 }
0x4fa6   :  { %v13689_v61 = vmul.f32 1.442695, %v13687_v52 }
0x4fa7   :  { %v13691_v30 = vmul.f32 1.442695, %v13688_v53 }
0x4fa8   :  { %19485 = vpow2.f32 %v13689_v61 }
0x4fa9   :  { %19487 = vpow2.f32 %v13691_v30 }
0x4fb2   :  { %v19486_v40 = vpop.eup %19485 }
0x4fb3   :  { %v19488_v44 = vpop.eup %19487  ;;  %v13693_v26 = vsel %vm181_vm0, %v19486_v40, 0.0 }
0x4fb4   :  { %13694 = vadd.xlane.f32.xlu0 %v13693_v26  ;;  %v13696_v13 = vsel %vm181_vm0, %v19488_v44, 0.0 }
0x4fb5   :  { %13697 = vadd.xlane.f32.xlu1 %v13696_v13 }
0x4fc6   :  { %18933 = vrot.lane.b32.xlu1 %v22200_v47, %s19635_s7 }
0x4fca   :  { %18938 = vrot.lane.b32.xlu1 %v22194_v18, %s19639_s16  ;;  %18928 = vrot.lane.b32.xlu0 %v22194_v18, %s19635_s7 }
0x4fce   :  { %13879 = vrot.lane.b32.xlu1 %v22207_v39, %s19639_s16  ;;  %18943 = vrot.lane.b32.xlu0 %v22200_v47, %s19639_s16 }
0x4fd2   :  { %13881 = vrot.lane.b32.xlu0 %v22210_v33, %s19639_s16 }
0x5041   :  { %v13695_v14 = vpop.xlane.xlu0 %13694 }
0x5042   :  { %19489 = vrcp.f32 %v13695_v14  ;;  %v13698_v51 = vpop.xlane.xlu1 %13697 }
0x5043   :  { %19491 = vrcp.f32 %v13698_v51  ;;  %v15211_v51 = vld [vmem:[%s22452_s20 + $0x1] ss:$0 sm:$0xff] }
0x5045   :  { %v18929_v49 = vpop.permute.xlu0 %18928 }
0x5046   :  { %v18931_v54 = vunpack.i.h.bf16 %v18929_v49  ;;  %v18930_v16 = vunpack.i.l.bf16 %v18929_v49  ;;  %v18934_v46 = vpop.permute.xlu1 %18933 }
0x5047   :  { %v18936_v62 = vunpack.i.h.bf16 %v18934_v46  ;;  %v18935_v12 = vunpack.i.l.bf16 %v18934_v46 }
0x5048   :  { %v18206_v39 = vpack.c.bf16 %v18931_v54, %v18930_v16 }
0x5049   :  { %v18210_v42 = vpack.c.bf16 %v18936_v62, %v18935_v12 }
0x504a   :  { %v18939_v50 = vpop.permute.xlu1 %18938 }
0x504b   :  { %v18941_v0 = vunpack.i.h.bf16 %v18939_v50  ;;  %v18940_v2 = vunpack.i.l.bf16 %v18939_v50 }
0x504c   :  { %v19490_v33 = vpop.eup %19489 }
0x504d   :  { %v13700_v59 = vmul.f32 %v19490_v33, %v19486_v40  ;;  %v19492_v29 = vpop.eup %19491  ;;  %v18214_v11 = vpack.c.bf16 %v18941_v0, %v18940_v2 }
0x504e   :  { %v13880_v17 = vpop.permute.xlu1 %13879 }
0x5053   :  { %v17283_v63 = vpop.f32.mrb[146].mxu1 }
0x5054   :  { %v13407_v3 = vpop.f32.mrb[147].mxu1 }
0x5055   :  { %17286 = vmatprep.mubr.msk.f32.mxu1 %vm291_vm1, %v13407_v3 }
0x5056   :  { %17287 = vmatmul.mubr.msk.f32.vlgmr.msra.gmra.mrb[148].mxu1 %vm291_vm1, %v17283_v63 }
0x5057   :  { %17290 = vmatpush3.msra.mxu1 %v15159_v36  ;;  %17291 = vmatprep.mubr.msk.f32.mxu1 %vm291_vm1, %v22272_v45  ;;  %v13702_v45 = vmul.f32 %v19492_v29, %v19488_v44 }
0x5058   :  { %18207 = vmatprep.subr.bf16.mxu1 %v18206_v39 }
0x505e   :  { %17292 = vmatmul.mubr.msk.f32.vlgmr.msra.gmra.mrb[148].mxu1 %vm291_vm1, %v22270_v55  ;;  %v18944_v55 = vpop.permute.xlu0 %18943 }
0x505f   :  { %18209 = vmatpush3.bf16.msra.mxu1 %v18206_v39  ;;  %17313 = vmatprep.mubr.msk.f32.mxu1 %vm181_vm0, %v13700_v59  ;;  %v18946_v10 = vunpack.i.h.bf16 %v18944_v55  ;;  %v18945_v4 = vunpack.i.l.bf16 %v18944_v55  ;;  %v15218_v55 = vld [vmem:[%s22453_s27 + $0x30] sm:$0xff] }
0x5060   :  { %18211 = vmatprep.subr.bf16.mxu1 %v18210_v42 }
0x5061   :  { %v18220_v19 = vpack.c.bf16 %v18946_v10, %v18945_v4  ;;  %v15219_v4 = vld [vmem:[%s22453_s27 + $0x38] sm:$0xff] }
0x5062   :  { %v13882_v35 = vpop.permute.xlu0 %13881 }
0x5063   :  { %18213 = vmatpush3.bf16.msra.mxu1 %v18210_v42 }
0x5064   :  { %17316 = vmatprep.subr.mxu1 %v15161_v41 }
0x5066   :  { %17314 = vmatmul.mubr.msk.f32.vlgmr.msra.gmra.mrb[150].mxu1 %vm181_vm0, %v13702_v45  ;;  %v15216_v45 = vld [vmem:[%s22453_s27 + $0x20] sm:$0xff] }
0x5067   :  { %17317 = vmatpush3.msra.mxu1 %v15161_v41 }
0x5068   :  { %18216 = vmatprep.subr.msk.bf16.mxu1 %vm19885_vm2, %v18214_v11 }
0x5139   :  { %v17315_v56 = vpop.f32.mrb[150].mxu1 }
0x513a   :  { %v13787_v6 = vpop.f32.mrb[151].mxu1 }
0x513b   :  { %17318 = vmatprep.mubr.msk.f32.mxu1 %vm291_vm1, %v13787_v6  ;;  %v15221_v6 = vld [vmem:[%s22454_s23 + $0x80] sm:$0xff] }
0x513c   :  { %17319 = vmatmul.mubr.msk.f32.vlgmr.msra.gmra.mrb[148].mxu1 %vm291_vm1, %v17315_v56  ;;  %v18238_v56 = vpack.c.bf16 %v15219_v4, %v15218_v55 }
0x513d   :  { %18219 = vmatpush3.bf16.xpose.msk.msra.mxu1 %vm19885_vm2, %v18214_v11  ;;  %17329 = vmatprep.mubr.msk.f32.mxu1 %vm291_vm1, %v13880_v17  ;;  %v15217_v11 = vld [vmem:[%s22453_s27 + $0x28] sm:$0xff] }
0x513e   :  { %18222 = vmatprep.subr.msk.bf16.mxu1 %vm19885_vm2, %v18220_v19  ;;  %v18234_v10 = vpack.c.bf16 %v15217_v11, %v15216_v45 }
0x5145   :  { %18225 = vmatpush3.bf16.xpose.msk.msra.mxu1 %vm19885_vm2, %v18220_v19  ;;  %v15222_v19 = vld [vmem:[%s22454_s23 + $0x88] sm:$0xff] }
0x5146   :  { %17343 = vmatprep.subr.mxu1 %v15162_v22  ;;  %v18242_v17 = vpack.c.bf16 %v15222_v19, %v15221_v6 }
0x514c   :  { %17330 = vmatmul.mubr.msk.f32.vlgmr.msra.gmra.mrb[152].mxu1 %vm291_vm1, %v13882_v35 }
0x514d   :  { %17344 = vmatpush3.msra.mxu1 %v15162_v22 }
0x521f   :  { %v17331_v31 = vpop.f32.mrb[152].mxu1 }
0x5220   :  { %v13979_v21 = vmul.f32 0.35355338, %v17331_v31  ;;  %v13969_v48 = vpop.f32.mrb[153].mxu1 }
0x5221   :  { %v13978_v60 = vmul.f32 0.35355338, %v13969_v48 }
0x5222   :  { %v13981_v5 = vadd.f32 %v22217_v23, %v13979_v21 }
0x5223   :  { %v13980_v7 = vadd.f32 %v22221_v8, %v13978_v60 }
0x5224   :  { %v13985_v58 = vsel %vm181_vm0, %v13981_v5, -inf }
0x5225   :  { %13986 = vmax.xlane.f32.xlu0 %v13985_v58  ;;  %v13982_v15 = vsel %vm181_vm0, %v13980_v7, -inf }
0x5226   :  { %13983 = vmax.xlane.f32.xlu1 %v13982_v15 }
0x52b2   :  { %v13987_v25 = vpop.xlane.xlu0 %13986 }
0x52b3   :  { %v13989_v24 = vsub.f32 %v13981_v5, %v13987_v25  ;;  %v13984_v43 = vpop.xlane.xlu1 %13983 }
0x52b4   :  { %v13988_v37 = vsub.f32 %v13980_v7, %v13984_v43 }
0x52b5   :  { %v13992_v57 = vmul.f32 1.442695, %v13989_v24 }
0x52b6   :  { %v13990_v34 = vmul.f32 1.442695, %v13988_v37 }
0x52b7   :  { %19493 = vpow2.f32 %v13992_v57 }
0x52b8   :  { %19495 = vpow2.f32 %v13990_v34 }
0x52c1   :  { %v19494_v28 = vpop.eup %19493 }
0x52c2   :  { %v19496_v20 = vpop.eup %19495  ;;  %v13997_v23 = vsel %vm181_vm0, %v19494_v28, 0.0 }
0x52c3   :  { %13998 = vadd.xlane.f32.xlu1 %v13997_v23  ;;  %v13994_v8 = vsel %vm181_vm0, %v19496_v20, 0.0 }
0x52c4   :  { %13995 = vadd.xlane.f32.xlu0 %v13994_v8 }
0x52d4   :  { %18953 = vrot.lane.b32.xlu1 %v22200_v47, %s19638_s15 }
0x52da   :  { %18948 = vrot.lane.b32.xlu0 %v22194_v18, %s19638_s15 }
0x5350   :  { %v13999_v27 = vpop.xlane.xlu1 %13998 }
0x5351   :  { %v13996_v52 = vpop.xlane.xlu0 %13995 }
0x5352   :  { %19497 = vrcp.f32 %v13996_v52  ;;  %v15215_v52 = vld [vmem:[%s22456_s13 + $0x1] ss:$0 sm:$0xff] }
0x5353   :  { %19499 = vrcp.f32 %v13999_v27 }
0x5354   :  { %v18954_v38 = vpop.permute.xlu1 %18953 }
0x5355   :  { %v18949_v53 = vpop.permute.xlu0 %18948  ;;  %v18956_v61 = vunpack.i.h.bf16 %v18954_v38  ;;  %v18955_v30 = vunpack.i.l.bf16 %v18954_v38 }
0x5356   :  { %v18951_v40 = vunpack.i.h.bf16 %v18949_v53  ;;  %v18950_v44 = vunpack.i.l.bf16 %v18949_v53 }
0x5357   :  { %v18230_v13 = vpack.c.bf16 %v18956_v61, %v18955_v30  ;;  %v15223_v61 = vld [vmem:[%s22454_s23 + $0x90] sm:$0xff]  ;;  %v15224_v30 = vld [vmem:[%s22454_s23 + $0x98] sm:$0xff] }
0x5358   :  { %v18226_v26 = vpack.c.bf16 %v18951_v40, %v18950_v44 }
0x535a   :  { %18227 = vmatprep.subr.bf16.mxu0 %v18226_v26 }
0x535b   :  { %18229 = vmatpush3.bf16.msra.mxu0 %v18226_v26  ;;  %v18246_v26 = vpack.c.bf16 %v15224_v30, %v15223_v61 }
0x535c   :  { %v19498_v47 = vpop.eup %19497  ;;  %18231 = vmatprep.subr.bf16.mxu0 %v18230_v13 }
0x535d   :  { %v19500_v18 = vpop.eup %19499  ;;  %v14001_v9 = vmul.f32 %v19498_v47, %v19496_v20  ;;  %v15214_v20 = vld [vmem:[%s22455_s26 + $0x1] ss:$0 sm:$0xff]  ;;  %v15226_v47 = vld [vmem:[%s22454_s23 + $0xa8] sm:$0xff] }
0x535e   :  { %v14003_v36 = vmul.f32 %v19500_v18, %v19494_v28 }
0x535f   :  { %18233 = vmatpush3.bf16.msra.mxu0 %v18230_v13  ;;  %17340 = vmatprep.mubr.msk.f32.mxu0 %vm181_vm0, %v14001_v9  ;;  %v15225_v13 = vld [vmem:[%s22454_s23 + $0xa0] sm:$0xff]  ;;  %v15227_v9 = vld [vmem:[%s22454_s23 + $0xb0] sm:$0xff] }
0x5360   :  { %18235 = vmatprep.subr.bf16.mxu0 %v18234_v10  ;;  %v18250_v18 = vpack.c.bf16 %v15226_v47, %v15225_v13 }
0x5362   :  { %17341 = vmatmul.mubr.msk.f32.vlgmr.msra.gmra.mrb[128].mxu0 %vm181_vm0, %v14003_v36  ;;  %v15228_v36 = vld [vmem:[%s22454_s23 + $0xb8] sm:$0xff] }
0x5363   :  { %18237 = vmatpush3.bf16.msra.mxu0 %v18234_v10 }
0x5364   :  { %18239 = vmatprep.subr.bf16.mxu0 %v18238_v56 }
0x5367   :  { %18241 = vmatpush3.bf16.msra.mxu0 %v18238_v56 }
0x5368   :  { %18243 = vmatprep.subr.bf16.mxu0 %v18242_v17 }
0x5435   :  { %v17342_v14 = vpop.f32.mrb[128].mxu0 }
0x5436   :  { %v14088_v49 = vpop.f32.mrb[129].mxu0 }
0x5437   :  { %17345 = vmatprep.mubr.msk.f32.mxu1 %vm291_vm1, %v14088_v49  ;;  %v15229_v49 = vld [vmem:[%s22454_s23 + $0xc0] sm:$0xff] }
0x5438   :  { %17346 = vmatmul.mubr.msk.f32.vlgmr.msra.gmra.mrb[148].mxu1 %vm291_vm1, %v17342_v14  ;;  %v18254_v14 = vpack.c.bf16 %v15228_v36, %v15227_v9 }
0x550b   :  { %v17347_v54 = vpop.f32.mrb[148].mxu1 }
0x550c   :  { %v14187_v16 = vadd.f32 %v17347_v54, %v15211_v51  ;;  %v14169_v63 = vpop.f32.mrb[149].mxu1 }
0x550d   :  { %v14186_v3 = vadd.f32 %v15211_v51, %v14169_v63  ;;  %v15230_v51 = vld [vmem:[%s22454_s23 + $0xc8] sm:$0xff]  ;;  %v15232_v63 = vld [vmem:[%s22454_s23 + $0xd8] sm:$0xff] }
0x550e   :  { %v14189_v39 = vadd.f32 %v14187_v16, %v22188_v32  ;;  %v18258_v54 = vpack.c.bf16 %v15230_v51, %v15229_v49  ;;  %v15231_v16 = vld [vmem:[%s22454_s23 + $0xd0] sm:$0xff] }
0x550f   :  { %v14188_v46 = vadd.f32 %v14186_v3, %v22186_v1  ;;  %v18262_v3 = vpack.c.bf16 %v15232_v63, %v15231_v16 }
0x5510   :  { %v14197_v33 = vsel %vm181_vm0, %v14189_v39, 0.0 }
0x5511   :  { %14198 = vadd.xlane.f32.xlu0 %v14197_v33  ;;  %v14194_v62 = vsel %vm181_vm0, %v14188_v46, 0.0 }
0x5512   :  { %14195 = vadd.xlane.f32.xlu1 %v14194_v62  ;;  %v15235_v62 = vld [vmem:[%s22454_s23 + $0xf0] sm:$0xff] }
0x559e   :  { %v14199_v12 = vpop.xlane.xlu0 %14198 }
0x559f   :  { %v14201_v59 = vmul.f32 0.03125, %v14199_v12  ;;  %v14196_v42 = vpop.xlane.xlu1 %14195  ;;  %v15236_v12 = vld [vmem:[%s22454_s23 + $0xf8] sm:$0xff] }
0x55a0   :  { %v14200_v50 = vmul.f32 0.03125, %v14196_v42  ;;  %v15238_v42 = vld [vmem:[%s22457_s22 + $0x1] ss:$0 sm:$0xff] }
0x55a1   :  { %v14203_v29 = vsub.f32 %v14189_v39, %v14201_v59  ;;  %v15233_v39 = vld [vmem:[%s22454_s23 + $0xe0] sm:$0xff]  ;;  %v18270_v59 = vpack.c.bf16 %v15236_v12, %v15235_v62 }
0x55a2   :  { %v14202_v41 = vsub.f32 %v14188_v46, %v14200_v50  ;;  %v15234_v46 = vld [vmem:[%s22454_s23 + $0xe8] sm:$0xff] }
0x55a3   :  { %v14205_v0 = vmul.f32 %v14203_v29, %v14203_v29  ;;  %v14221_v23 = vmul.f32 %v15214_v20, %v14203_v29  ;;  %v18266_v33 = vpack.c.bf16 %v15234_v46, %v15233_v39 }
0x55a4   :  { %v14204_v32 = vmul.f32 %v14202_v41, %v14202_v41  ;;  %v14220_v22 = vmul.f32 %v15214_v20, %v14202_v41 }
0x55a5   :  { %v14209_v1 = vsel %vm181_vm0, %v14205_v0, 0.0 }
0x55a6   :  { %14210 = vadd.xlane.f32.xlu1 %v14209_v1  ;;  %v14206_v2 = vsel %vm181_vm0, %v14204_v32, 0.0 }
0x55a7   :  { %14207 = vadd.xlane.f32.xlu0 %v14206_v2  ;;  %v15241_v2 = vld [vmem:[%s22458_s18 + $0x1] ss:$0 sm:$0xff] }
0x5633   :  { %v14211_v35 = vpop.xlane.xlu1 %14210 }
0x5634   :  { %v14213_v31 = vmul.f32 0.032258064, %v14211_v35  ;;  %v14208_v21 = vpop.xlane.xlu0 %14207 }
0x5635   :  { %v14212_v48 = vmul.f32 0.032258064, %v14208_v21 }
0x5636   :  { %19501 = vrsqrt.f32 %v14213_v31  ;;  %vm14231_vm1 = vcmp.eq.f32.partialorder %v14213_v31, inf  ;;  %v14234_v58 = vand.u32 2147483648, %v14213_v31  ;;  %vm14233_vm2 = vcmp.eq.f32.partialorder %v14213_v31, 0.0 }
0x5637   :  { %19503 = vrsqrt.f32 %v14212_v48  ;;  %vm14224_vm7 = vcmp.eq.f32.partialorder %v14212_v48, inf  ;;  %v14227_v24 = vand.u32 2147483648, %v14212_v48  ;;  %vm14226_vm8 = vcmp.eq.f32.partialorder %v14212_v48, 0.0 }
0x5640   :  { %v19502_v60 = vpop.eup %19501 }
0x5641   :  { %v19504_v5 = vpop.eup %19503  ;;  %v14230_v7 = vmul.f32 %v19502_v60, %v14213_v31 }
0x5642   :  { %v14223_v15 = vmul.f32 %v19504_v5, %v14212_v48 }
0x5643   :  { %v14232_v25 = vsel %vm14231_vm1, %v14213_v31, %v14230_v7 }
0x5644   :  { %v14235_v43 = vsel %vm14233_vm2, %v14234_v58, %v14232_v25  ;;  %v14225_v37 = vsel %vm14224_vm7, %v14212_v48, %v14223_v15 }
0x5645   :  { %v14237_v57 = vadd.f32 1e-06, %v14235_v43  ;;  %v14228_v34 = vsel %vm14226_vm8, %v14227_v24, %v14225_v37 }
0x5646   :  { %v14236_v28 = vadd.f32 1e-06, %v14228_v34 }
0x5647   :  { %19505 = vrcp.f32 %v14237_v57 }
0x5648   :  { %19507 = vrcp.f32 %v14236_v28 }
0x5651   :  { %v19506_v8 = vpop.eup %19505 }
0x5652   :  { %v19508_v27 = vpop.eup %19507  ;;  %v14241_v38 = vmul.f32 %v19506_v8, %v14221_v23 }
0x5653   :  { %v14239_v53 = vmul.f32 %v19508_v27, %v14220_v22 }
0x5654   :  { %v14249_v44 = vadd.f32 %v15215_v52, %v14241_v38 }
0x5655   :  { %v14248_v40 = vadd.f32 %v15215_v52, %v14239_v53 }
0x5657   :  { %17356 = vmatprep.mubr.msk.f32.mxu0 %vm181_vm0, %v14248_v40 }
0x5658   :  { %17357 = vmatmul.mubr.msk.f32.vlgmr.msra.gmra.mrb[130].mxu0 %vm181_vm0, %v14249_v44 }
0x5659   :  { %18245 = vmatpush3.bf16.msra.mxu0 %v18242_v17 }
0x565a   :  { %18247 = vmatprep.subr.bf16.mxu0 %v18246_v26 }
0x565d   :  { %18249 = vmatpush3.bf16.msra.mxu0 %v18246_v26 }
0x565e   :  { %18251 = vmatprep.subr.bf16.mxu0 %v18250_v18 }
0x5661   :  { %18253 = vmatpush3.bf16.msra.mxu0 %v18250_v18 }
0x5662   :  { %18255 = vmatprep.subr.bf16.mxu0 %v18254_v14 }
0x5665   :  { %18257 = vmatpush3.bf16.msra.mxu0 %v18254_v14 }
0x5666   :  { %18259 = vmatprep.subr.bf16.mxu0 %v18258_v54 }
0x5669   :  { %18261 = vmatpush3.bf16.msra.mxu0 %v18258_v54 }
0x566a   :  { %18263 = vmatprep.subr.bf16.mxu0 %v18262_v3 }
0x566d   :  { %18265 = vmatpush3.bf16.msra.mxu0 %v18262_v3 }
0x566e   :  { %18267 = vmatprep.subr.bf16.mxu0 %v18266_v33 }
0x5671   :  { %18269 = vmatpush3.bf16.msra.mxu0 %v18266_v33 }
0x5672   :  { %18271 = vmatprep.subr.bf16.mxu0 %v18270_v59 }
0x5675   :  { %18273 = vmatpush3.bf16.msra.mxu0 %v18270_v59 }
0x572b   :  { %v17358_v50 = vpop.f32.mrb[130].mxu0 }
0x572c   :  { %v14360_v29 = vadd.f32 %v17358_v50, %v15238_v42  ;;  %v14354_v41 = vpop.f32.mrb[131].mxu0 }
0x572d   :  { %v14355_v0 = vadd.f32 %v15238_v42, %v14354_v41 }
0x572e   :  { %v14364_v1 = vmax.f32 %v14360_v29, 0.0 }
0x572f   :  { %v14363_v32 = vmax.f32 %v14355_v0, 0.0 }
0x5731   :  { %17391 = vmatprep.mubr.f32.mxu0 %v14363_v32 }
0x5732   :  { %17392 = vmatmul.mubr.f32.vlgmr.msra.gmra.mrb[132].mxu0 %v14364_v1 }
0x5805   :  { %v17393_v45 = vpop.f32.mrb[132].mxu0 }
0x5806   :  { %v14443_v11 = vadd.f32 %v17393_v45, %v15241_v2  ;;  %v14437_v55 = vpop.f32.mrb[133].mxu0 }
0x5807   :  { %v14438_v10 = vadd.f32 %v15241_v2, %v14437_v55 }
0x5808   :  { %v14447_v4 = vadd.f32 %v14443_v11, %v14249_v44 }
0x5809   :  { %v14446_v56 = vadd.f32 %v14438_v10, %v14248_v40 }
0x580a   :  { %v14455_v6 = vsel %vm181_vm0, %v14447_v4, 0.0 }
0x580b   :  { %14456 = vadd.xlane.f32.xlu1 %v14455_v6  ;;  %v14452_v19 = vsel %vm181_vm0, %v14446_v56, 0.0 }
0x580c   :  { %14453 = vadd.xlane.f32.xlu0 %v14452_v19 }
0x5898   :  { %v14457_v17 = vpop.xlane.xlu1 %14456 }
0x5899   :  { %v14459_v35 = vmul.f32 0.03125, %v14457_v17  ;;  %v14454_v31 = vpop.xlane.xlu0 %14453 }
0x589a   :  { %v14458_v21 = vmul.f32 0.03125, %v14454_v31 }
0x589b   :  { %v14461_v48 = vsub.f32 %v14447_v4, %v14459_v35 }
0x589c   :  { %v14460_v60 = vsub.f32 %v14446_v56, %v14458_v21 }
0x589d   :  { %v14463_v5 = vmul.f32 %v14461_v48, %v14461_v48 }
0x589e   :  { %v14462_v7 = vmul.f32 %v14460_v60, %v14460_v60 }
0x589f   :  { %v14467_v58 = vsel %vm181_vm0, %v14463_v5, 0.0 }
0x58a0   :  { %14468 = vadd.xlane.f32.xlu1 %v14467_v58  ;;  %v14464_v15 = vsel %vm181_vm0, %v14462_v7, 0.0 }
0x58a1   :  { %14465 = vadd.xlane.f32.xlu0 %v14464_v15 }
0x58a2   :  { %19558 = shalt.err (!%p19555_p4)
}
0x58a3   :  { %s19559_s7 = scalar_lea.hbm %s19829_s17, 512 }
0x58a4   :  { %p19560_p5 = scmp.ne.s32.totalorder %s19829_s17, %s19559_s7  ;;  %p19563_p6 = scmp.lt.u32.totalorder %s19559_s7, %s19829_s17 }
0x58a6   :  { %p19565_p7 = pnand %p19563_p6, %p19560_p5 }
0x58a8   :  { %19568 = shalt.err (!%p19565_p7)
}
0x58a9   :  { %s19643_s10 = smov 128   ;;  %s19644_s15 = smov 8   ;;  %v15244_v30 = vld [vmem:[%s19819_s4 + $0x1] ss:$0 sm:$0xff] }
0x58aa   :  { %14525 = dma.vmem_to_hbm [thread:$0]  %s14520_s28, 512, %s19829_s17, [#allocation3], %s19643_s10, %s19643_s10, %s19644_s15   ;;  %v14479_v40 = vmul.f32 %v15244_v30, %v14461_v48  ;;  %v14478_v26 = vmul.f32 %v15244_v30, %v14460_v60 }
0x58ab   :  { %v15245_v13 = vld [vmem:[%s19824_s21 + $0x1] ss:$0 sm:$0xff]  ;;  %s19645_s17 = smov [#allocation4]  }
0x58ac   :  { %s14531_s16 = sshll.u32 %s19645_s17, 4  ;;  %s14532_s16 = int_to_ptr.vmem [resolvable:$true] %s14531_s16 }
0x58ad   :  { %s19569_s18 = scalar_lea.vmem %s14532_s16, 256  ;;  %p19574_p9 = scmp.lt.s32.totalorder %s14532_s16, %s14532_s16 }
0x58ae   :  { %p19570_p8 = scmp.ne.s32.totalorder %s14532_s16, %s19569_s18  ;;  %p19575_p10 = scmp.lt.s32.totalorder %s19569_s18, %s19569_s18 }
0x58b0   :  { %p19576_p11 = por %p19575_p10, %p19574_p9 }
0x58b2   :  { %p19577_p12 = pnand %p19576_p11, %p19570_p8 }
0x592d   :  { %v14469_v25 = vpop.xlane.xlu1 %14468 }
0x592e   :  { %v14471_v24 = vmul.f32 0.032258064, %v14469_v25  ;;  %v14466_v43 = vpop.xlane.xlu0 %14465 }
0x592f   :  { %v14470_v37 = vmul.f32 0.032258064, %v14466_v43 }
0x5930   :  { %19509 = vrsqrt.f32 %v14471_v24  ;;  %vm14489_vm9 = vcmp.eq.f32.partialorder %v14471_v24, inf  ;;  %v14492_v20 = vand.u32 2147483648, %v14471_v24  ;;  %vm14491_vm10 = vcmp.eq.f32.partialorder %v14471_v24, 0.0 }
0x5931   :  { %19511 = vrsqrt.f32 %v14470_v37  ;;  %vm14482_vm11 = vcmp.eq.f32.partialorder %v14470_v37, inf  ;;  %v14485_v22 = vand.u32 2147483648, %v14470_v37  ;;  %vm14484_vm13 = vcmp.eq.f32.partialorder %v14470_v37, 0.0 }
0x593a   :  { %v19510_v57 = vpop.eup %19509 }
0x593b   :  { %v19512_v34 = vpop.eup %19511  ;;  %v14488_v28 = vmul.f32 %v19510_v57, %v14471_v24 }
0x593c   :  { %v14481_v23 = vmul.f32 %v19512_v34, %v14470_v37 }
0x593d   :  { %v14490_v8 = vsel %vm14489_vm9, %v14471_v24, %v14488_v28 }
0x593e   :  { %v14493_v27 = vsel %vm14491_vm10, %v14492_v20, %v14490_v8  ;;  %v14483_v52 = vsel %vm14482_vm11, %v14470_v37, %v14481_v23 }
0x593f   :  { %v14495_v38 = vadd.f32 1e-06, %v14493_v27  ;;  %v14486_v53 = vsel %vm14484_vm13, %v14485_v22, %v14483_v52 }
0x5940   :  { %v14494_v61 = vadd.f32 1e-06, %v14486_v53 }
0x5941   :  { %19513 = vrcp.f32 %v14495_v38 }
0x5942   :  { %19515 = vrcp.f32 %v14494_v61 }
0x594b   :  { %v19514_v44 = vpop.eup %19513 }
0x594c   :  { %v19516_v47 = vpop.eup %19515  ;;  %v14499_v18 = vmul.f32 %v19514_v44, %v14479_v40 }
0x594d   :  { %v14497_v9 = vmul.f32 %v19516_v47, %v14478_v26 }
0x594e   :  { %v14507_v36 = vadd.f32 %v15245_v13, %v14499_v18 }
0x594f   :  { %v14506_v14 = vadd.f32 %v15245_v13, %v14497_v9 }
0x5950   :  { %14513 = vst.msk [vmem:[#allocation4 + $0x8] sm:$0xff] %vm181_vm0, %v14507_v36 }
0x5951   :  { %14512 = vst.msk [vmem:[#allocation4] sm:$0xff] %vm181_vm0, %v14506_v14 }
0x5952   :  { %19580 = shalt.err (!%p19577_p12)
}
0x5953   :  { %s19581_s21 = scalar_lea.hbm %s19834_s9, 256 }
0x5954   :  { %p19582_p13 = scmp.ne.s32.totalorder %s19834_s9, %s19581_s21  ;;  %p19585_p0 = scmp.lt.u32.totalorder %s19581_s21, %s19834_s9 }
0x5956   :  { %p19587_p1 = pnand %p19585_p0, %p19582_p13 }
0x5958   :  { %19590 = shalt.err (!%p19587_p1)
}
0x5959   :  { %14537 = dma.vmem_to_hbm [thread:$0]  %s14532_s16, 256, %s19834_s9, [#allocation5], %s19643_s10, %s19643_s10, %s19644_s15  }
0x595a   :  { %19591 = dma.done.wait [#allocation3], 512  }
0x595b   :  { %19592 = vsyncadd [#allocation3], 4294966784 }
0x595c   :  { %19593 = dma.done.wait [#allocation5], 256  }
0x595d   :  { %19594 = vsyncadd [#allocation5], 4294967040 }
0x595e   :  { %14544 = vsyncpa [#allocation3], 1 }
0x595f   :  { %14545 = vsyncpa [#allocation5], 1 }

</bundles_post_ra>
